<compile_context>
chip_gen: v7x
topology: tpu7x:2x2x1
jax: 0.10.0
libtpu: 0.0.40
codegen_flags: <defaults>
</compile_context>

<pallas_src>
import functools

import jax
import jax.numpy as jnp
from jax.experimental import pallas as pl
from jax.experimental.pallas import tpu as pltpu

EPS = 1e-5
LANE = 128
SUBLANE = 8


def _round_up(v, m):
    return ((v + m - 1) // m) * m


def _vmem_limit_bytes():
    """Scoped-VMEM cap: ~3/4 of physical capacity, capped at 96 MiB."""
    cap = 64 * 1024 * 1024
    try:
        cap = int(getattr(pltpu.get_tpu_info(), "vmem_capacity_bytes", cap))
    except Exception:
        pass
    return max(32 * 1024 * 1024, min((cap * 3) // 4, 96 * 1024 * 1024))


# ----------------------------- kernel helpers --------------------------------
def _conv3x3_banded(pad_ref, w_ref, h, w):
    """3x3 'same' conv (stride 1) as 3 accumulating MXU matmuls (K = 3*cp).

    pad_ref: (n, h+2, >=w+2, cp) zero-halo staging buffer (interior filled)
    w_ref:   (3, 3*cp, cout) kh-banded im2col weights (kw-major, ci-minor)
    returns: (n*h*w, cout) f32 accumulator
    """
    n, cp = pad_ref.shape[0], pad_ref.shape[-1]
    cout = w_ref.shape[-1]
    acc = jnp.zeros((n * h * w, cout), jnp.float32)
    for kh in range(3):                                   # unrolled at trace time
        band = jnp.concatenate(
            [pad_ref[:, kh:kh + h, kw:kw + w, :] for kw in range(3)],
            axis=-1).reshape(n * h * w, 3 * cp)           # K = 3*cp per push
        acc = acc + jnp.dot(band, w_ref[kh], preferred_element_type=jnp.float32)
    return acc


def _fill_padded(pad_ref, tile, h, w):
    """Write interior tile + thin zero halo strips into pad_ref (1,h+2,wp2,cp).

    Only the four 1-wide halo strips are rewritten each step (no interior
    concat, no full-buffer zeroing).  Columns >= w+2 are never read.
    """
    wp2, cp = pad_ref.shape[2], pad_ref.shape[3]
    pad_ref[:, 1:h + 1, 1:w + 1, :] = tile
    zrow = jnp.zeros((1, 1, wp2, cp), pad_ref.dtype)
    pad_ref[:, 0:1, :, :] = zrow
    pad_ref[:, h + 1:h + 2, :, :] = zrow
    zcol = jnp.zeros((1, h, 1, cp), pad_ref.dtype)
    pad_ref[:, 1:h + 1, 0:1, :] = zcol
    pad_ref[:, 1:h + 1, w + 1:w + 2, :] = zcol


def _partial_stats(y_f32):
    """Per-grid-step (sum, sum_sq) over rows of y=(M,cp), packed (1,8,cp) f32."""
    cp = y_f32.shape[-1]
    s = jnp.sum(y_f32, axis=0, keepdims=True)
    sq = jnp.sum(y_f32 * y_f32, axis=0, keepdims=True)
    return jnp.concatenate([s, sq, jnp.zeros((6, cp), jnp.float32)], axis=0)[None]


# ----------------------- fused single-launch kernel ---------------------------
def fused_block_kernel(x_ref, w1_ref, w2_ref, g1_ref, b1_ref, g2_ref, b2_ref,
                       o_ref, pad_ref):
    """Whole BasicBlock in one launch: everything stays resident in VMEM.

    x_ref/o_ref keep the true channel count C (no channel-padded HBM traffic);
    the conv runs at cp = round_up(C, 128) purely in VMEM.  BN statistics are
    exact two-pass batch statistics (training mode).
    """
    n, h, w, c = x_ref.shape
    cp = pad_ref.shape[-1]
    tot = n * h * w

    pad_ref[...] = jnp.zeros_like(pad_ref)                # halo + padded lanes
    pad_ref[:, 1:h + 1, 1:w + 1, :c] = x_ref[...]         # interior, true C

    # conv1 -> bn1 (exact batch stats) -> relu
    y1 = _conv3x3_banded(pad_ref, w1_ref, h, w)           # (tot, cp) f32
    m1 = jnp.sum(y1, axis=0, keepdims=True) / tot
    v1 = jnp.sum((y1 - m1) ** 2, axis=0, keepdims=True) / tot
    a1 = jnp.maximum((y1 - m1) * jax.lax.rsqrt(v1 + EPS) * g1_ref[...]
                     + b1_ref[...], 0.0)

    # conv2 (padded lanes of a1 are exactly 0: gamma/beta were zero-padded)
    pad_ref[:, 1:h + 1, 1:w + 1, :] = a1.reshape(n, h, w, cp)
    y2 = _conv3x3_banded(pad_ref, w2_ref, h, w)
    m2 = jnp.sum(y2, axis=0, keepdims=True) / tot
    v2 = jnp.sum((y2 - m2) ** 2, axis=0, keepdims=True) / tot
    out = (y2 - m2) * jax.lax.rsqrt(v2 + EPS) * g2_ref[...] + b2_ref[...]

    # residual add + relu on the true channels only
    out = jnp.maximum(out[:, :c] + x_ref[...].reshape(tot, c), 0.0)
    o_ref[...] = out.reshape(n, h, w, c)


# ------------------------ tiled 3-call path kernels ---------------------------
def conv1_kernel(x_ref, w1_ref, y1_ref, st1_ref, pad_ref):
    """conv1 on one batch image + BN1 partial stats (from the f32 accumulator)."""
    _, h, w, cp = x_ref.shape
    _fill_padded(pad_ref, x_ref[...].astype(pad_ref.dtype), h, w)   # bf16 staging
    y = _conv3x3_banded(pad_ref, w1_ref, h, w)                      # (h*w, cp) f32
    st1_ref[...] = _partial_stats(y)
    y1_ref[...] = y.astype(y1_ref.dtype).reshape(1, h, w, cp)       # bf16 to HBM


def bn1_conv2_kernel(y1_ref, a1_ref, c1_ref, w2_ref, y2_ref, st2_ref, pad_ref):
    """bn1 (fused affine, f32 VPU math) + relu + conv2 + BN2 partial stats."""
    _, h, w, cp = y1_ref.shape
    y1 = y1_ref[...].astype(jnp.float32).reshape(h * w, cp)
    act = jnp.maximum(y1 * a1_ref[...] + c1_ref[...], 0.0)
    _fill_padded(pad_ref, act.reshape(1, h, w, cp).astype(pad_ref.dtype), h, w)
    y2 = _conv3x3_banded(pad_ref, w2_ref, h, w)
    st2_ref[...] = _partial_stats(y2)
    y2_ref[...] = y2.astype(y2_ref.dtype).reshape(1, h, w, cp)


def bn2_residual_kernel(y2_ref, a2_ref, c2_ref, x_ref, o_ref):
    """bn2 (fused affine) + residual add + relu, all in f32."""
    _, h, w, cp = y2_ref.shape
    y2 = y2_ref[...].astype(jnp.float32).reshape(h * w, cp)
    x = x_ref[...].reshape(h * w, cp)
    out = jnp.maximum(y2 * a2_ref[...] + c2_ref[...] + x, 0.0)
    o_ref[...] = out.reshape(1, h, w, cp)


# --------------------------------- wrappers ------------------------------------
def _banded_weights(wgt, cp, dtype):
    """HWIO (3,3,ci,co) -> (3, 3*cp, cp) kh-banded im2col layout (zero padded)."""
    _, _, ci, co = wgt.shape
    wp = jnp.zeros((3, 3, cp, cp), jnp.float32)
    wp = wp.at[:, :, :ci, :co].set(wgt.astype(jnp.float32))
    return wp.reshape(3, 3 * cp, cp).astype(dtype)


def _pad_vec(v, cp):
    return jnp.zeros((cp,), jnp.float32).at[:v.shape[0]].set(v.astype(jnp.float32))


def _forward_fused(x, w1, g1, b1, w2, g2, b2):
    """Single-launch path for small problems (NHWC f32 in / NHWC f32 out)."""
    n, h, w, c = x.shape
    cp = _round_up(c, LANE)
    wp2 = _round_up(w + 2, SUBLANE)

    w1p = _banded_weights(w1, cp, jnp.float32)
    w2p = _banded_weights(w2, cp, jnp.float32)
    g1p = _pad_vec(g1, cp).reshape(1, cp)
    b1p = _pad_vec(b1, cp).reshape(1, cp)
    g2p = _pad_vec(g2, cp).reshape(1, cp)
    b2p = _pad_vec(b2, cp).reshape(1, cp)

    act_spec = pl.BlockSpec((n, h, w, c), lambda i: (0, 0, 0, 0))
    wgt_spec = pl.BlockSpec((3, 3 * cp, cp), lambda i: (0, 0, 0))
    vec_spec = pl.BlockSpec((1, cp), lambda i: (0, 0))

    return pl.pallas_call(
        fused_block_kernel,
        out_shape=jax.ShapeDtypeStruct((n, h, w, c), jnp.float32),
        grid=(1,),
        in_specs=[act_spec, wgt_spec, wgt_spec,
                  vec_spec, vec_spec, vec_spec, vec_spec],
        out_specs=act_spec,
        scratch_shapes=[pltpu.VMEM((n, h + 2, wp2, cp), jnp.float32)],
        compiler_params=pltpu.CompilerParams(
            dimension_semantics=("arbitrary",),
            vmem_limit_bytes=_vmem_limit_bytes()),
    )(x, w1p, w2p, g1p, b1p, g2p, b2p)


def _forward_tiled(x, w1, g1, b1, w2, g2, b2):
    """Three pipelined launches for ResNet-sized problems (NHWC f32 in/out)."""
    n, h, w, c = x.shape
    cp = _round_up(c, LANE)
    wp2 = _round_up(w + 2, SUBLANE)

    xp = x if cp == c else jnp.zeros((n, h, w, cp), jnp.float32).at[..., :c].set(x)
    w1p = _banded_weights(w1, cp, jnp.bfloat16)           # bf16 MXU operands
    w2p = _banded_weights(w2, cp, jnp.bfloat16)
    g1p, b1p = _pad_vec(g1, cp), _pad_vec(b1, cp)
    g2p, b2p = _pad_vec(g2, cp), _pad_vec(b2, cp)

    act_spec = pl.BlockSpec((1, h, w, cp), lambda b: (b, 0, 0, 0))
    wgt_spec = pl.BlockSpec((3, 3 * cp, cp), lambda b: (0, 0, 0))
    vec_spec = pl.BlockSpec((1, cp), lambda b: (0, 0))
    st_spec = pl.BlockSpec((1, 8, cp), lambda b: (b, 0, 0))
    cparams = pltpu.CompilerParams(dimension_semantics=("parallel",),
                                   vmem_limit_bytes=_vmem_limit_bytes())
    act_f32 = jax.ShapeDtypeStruct((n, h, w, cp), jnp.float32)
    act_bf16 = jax.ShapeDtypeStruct((n, h, w, cp), jnp.bfloat16)   # half HBM traffic
    st_shape = jax.ShapeDtypeStruct((n, 8, cp), jnp.float32)
    pad_scratch = pltpu.VMEM((1, h + 2, wp2, cp), jnp.bfloat16)
    total = float(n * h * w)

    def bn_affine(st, gamma, beta):
        """Reduce tiny per-step partials -> fused BN scale/shift (f32)."""
        s = jnp.sum(st[:, 0, :], axis=0)
        sq = jnp.sum(st[:, 1, :], axis=0)
        mean = s / total
        var = jnp.maximum(sq / total - mean * mean, 0.0)   # biased (training BN)
        inv = jax.lax.rsqrt(var + EPS)
        scale = gamma * inv
        shift = beta - mean * scale
        return scale.reshape(1, cp), shift.reshape(1, cp)

    # ---- call 1: conv1 + bn1 partial stats -----------------------------------
    y1, st1 = pl.pallas_call(
        conv1_kernel,
        out_shape=(act_bf16, st_shape),
        grid=(n,),
        in_specs=[act_spec, wgt_spec],
        out_specs=(act_spec, st_spec),
        scratch_shapes=[pad_scratch],
        compiler_params=cparams,
    )(xp, w1p)
    a1, c1 = bn_affine(st1, g1p, b1p)

    # ---- call 2: bn1 + relu + conv2 + bn2 partial stats -----------------------
    y2, st2 = pl.pallas_call(
        bn1_conv2_kernel,
        out_shape=(act_bf16, st_shape),
        grid=(n,),
        in_specs=[act_spec, vec_spec, vec_spec, wgt_spec],
        out_specs=(act_spec, st_spec),
        scratch_shapes=[pad_scratch],
        compiler_params=cparams,
    )(y1, a1, c1, w2p)
    a2, c2 = bn_affine(st2, g2p, b2p)

    # ---- call 3: bn2 + residual + relu ----------------------------------------
    outp = pl.pallas_call(
        bn2_residual_kernel,
        out_shape=act_f32,
        grid=(n,),
        in_specs=[act_spec, vec_spec, vec_spec, act_spec],
        out_specs=act_spec,
        compiler_params=cparams,
    )(y2, a2, c2, xp)

    return outp if cp == c else outp[..., :c]


@functools.partial(jax.jit, static_argnames=("force_path",))
def basic_block_forward(x_nchw, w1, g1, b1, w2, g2, b2, *, force_path=None):
    """BasicBlock forward: NCHW in / NCHW out (conv weights in HWIO).

    force_path: None (size heuristic) | "fused" | "tiled".
    """
    x = jnp.transpose(x_nchw, (0, 2, 3, 1)).astype(jnp.float32)     # NHWC
    n, h, w, c = x.shape
    cout = w1.shape[-1]
    assert c == cout and w2.shape[-1] == cout, \
        "BasicBlock with downsample=None requires inplanes == planes"

    cp = _round_up(c, LANE)
    fused_scratch = n * (h + 2) * _round_up(w + 2, SUBLANE) * cp * 4
    path = force_path
    if path is None:
        path = "fused" if fused_scratch <= 4 * 1024 * 1024 else "tiled"
    if path == "fused":
        out = _forward_fused(x, w1, g1, b1, w2, g2, b2)
    elif path == "tiled":
        out = _forward_tiled(x, w1, g1, b1, w2, g2, b2)
    else:
        raise ValueError(f"unknown path {path!r}")
    return jnp.transpose(out, (0, 3, 1, 2))                         # -> NCHW


# ---------------- pure-JAX reference (for correctness check) ----------------
def ref_basic_block(x_nchw, w1, g1, b1, w2, g2, b2):
    x = jnp.transpose(x_nchw, (0, 2, 3, 1)).astype(jnp.float32)

    def conv(y, wgt):
        return jax.lax.conv_general_dilated(
            y, wgt, window_strides=(1, 1), padding="SAME",
            dimension_numbers=("NHWC", "HWIO", "NHWC"))

    def bn(y, g, b):
        mean = jnp.mean(y, axis=(0, 1, 2), keepdims=True)
        var = jnp.mean((y - mean) ** 2, axis=(0, 1, 2), keepdims=True)
        return (y - mean) * jax.lax.rsqrt(var + EPS) * g.reshape(1, 1, 1, -1) \
            + b.reshape(1, 1, 1, -1)

    out = jax.nn.relu(bn(conv(x, w1), g1, b1))
    out = bn(conv(out, w2), g2, b2)
    out = jax.nn.relu(out + x)
    return jnp.transpose(out, (0, 3, 1, 2))


def _make_params(key, c):
    kw1, kw2, kg1, kb1, kg2, kb2 = jax.random.split(key, 6)
    w1 = 0.1 * jax.random.normal(kw1, (3, 3, c, c), jnp.float32)   # HWIO
    w2 = 0.1 * jax.random.normal(kw2, (3, 3, c, c), jnp.float32)   # HWIO
    g1 = 1.0 + 0.1 * jax.random.normal(kg1, (c,), jnp.float32)
    b1 = 0.1 * jax.random.normal(kb1, (c,), jnp.float32)
    g2 = 1.0 + 0.1 * jax.random.normal(kg2, (c,), jnp.float32)
    b2 = 0.1 * jax.random.normal(kb2, (c,), jnp.float32)
    return w1, g1, b1, w2, g2, b2


if __name__ == "__main__":
    key = jax.random.PRNGKey(0)
    k1, k2, k3, k4 = jax.random.split(key, 4)

    # --- the module's shape: BasicBlock(4, 4), x = (2,4,16,16) -> fused path --
    N, C, H, W = 2, 4, 16, 16
    x = jax.random.normal(k1, (N, C, H, W), jnp.float32)
    params = _make_params(k2, C)
    out = jax.block_until_ready(basic_block_forward(x, *params))
    ref = jax.block_until_ready(ref_basic_block(x, *params))
    assert out.shape == (N, C, H, W), out.shape
    err = float(jnp.max(jnp.abs(out - ref)))
    assert jnp.allclose(out, ref, atol=5e-3, rtol=5e-3), \
        f"fused path max diff {err}"

    # --- ResNet-like channels -> tiled bf16 path (forced so both paths run) ---
    N2, C2, H2, W2 = 2, 128, 16, 16
    x2 = jax.random.normal(k3, (N2, C2, H2, W2), jnp.float32)
    params2 = _make_params(k4, C2)
    out2 = jax.block_until_ready(
        basic_block_forward(x2, *params2, force_path="tiled"))
    ref2 = jax.block_until_ready(ref_basic_block(x2, *params2))
    assert out2.shape == (N2, C2, H2, W2), out2.shape
    err2 = float(jnp.max(jnp.abs(out2 - ref2)))
    # bf16 MXU operands + bf16 y1/y2 HBM intermediates -> looser tolerance.
    assert jnp.allclose(out2, ref2, atol=5e-2, rtol=5e-2), \
        f"tiled path max diff {err2}"

    print("KERNEL_OK")
</pallas_src>

<mosaic_0001>
module attributes {stable_mosaic.version = 11 : i64} {
  func.func @fused_block_kernel(%arg0: i32, %arg1: memref<2x16x16x4xf32, #tpu.memory_space<vmem>>, %arg2: memref<3x384x128xf32, #tpu.memory_space<vmem>>, %arg3: memref<3x384x128xf32, #tpu.memory_space<vmem>>, %arg4: memref<1x128xf32, #tpu.memory_space<vmem>>, %arg5: memref<1x128xf32, #tpu.memory_space<vmem>>, %arg6: memref<1x128xf32, #tpu.memory_space<vmem>>, %arg7: memref<1x128xf32, #tpu.memory_space<vmem>>, %arg8: memref<2x16x16x4xf32, #tpu.memory_space<vmem>>, %arg9: memref<2x18x24x128xf32, #tpu.memory_space<vmem>>) attributes {dimension_semantics = [#tpu.dimension_semantics<arbitrary>], iteration_bounds = array<i64: 1>, scalar_prefetch = 0 : i64, scratch_operands = 1 : i64, tpu.core_type = #tpu.core_type<tc>, window_params = [{pipeline_mode = #tpu.pipeline_mode<synchronous>, transform_indices = @transform_0, window_bounds = array<i64: 2, 16, 16, 4>}, {pipeline_mode = #tpu.pipeline_mode<synchronous>, transform_indices = @transform_1, window_bounds = array<i64: 3, 384, 128>}, {pipeline_mode = #tpu.pipeline_mode<synchronous>, transform_indices = @transform_2, window_bounds = array<i64: 3, 384, 128>}, {pipeline_mode = #tpu.pipeline_mode<synchronous>, transform_indices = @transform_3, window_bounds = array<i64: 1, 128>}, {pipeline_mode = #tpu.pipeline_mode<synchronous>, transform_indices = @transform_4, window_bounds = array<i64: 1, 128>}, {pipeline_mode = #tpu.pipeline_mode<synchronous>, transform_indices = @transform_5, window_bounds = array<i64: 1, 128>}, {pipeline_mode = #tpu.pipeline_mode<synchronous>, transform_indices = @transform_6, window_bounds = array<i64: 1, 128>}, {pipeline_mode = #tpu.pipeline_mode<synchronous>, transform_indices = @transform_7, window_bounds = array<i64: 2, 16, 16, 4>}]} {
    %cst = arith.constant 0.000000e+00 : f32
    %0 = vector.broadcast %cst : f32 to vector<2x18x24x128xf32>
    %c0 = arith.constant 0 : index
    %c0_0 = arith.constant 0 : index
    %c0_1 = arith.constant 0 : index
    %c0_2 = arith.constant 0 : index
    %1 = vector.load %arg9[%c0, %c0_0, %c0_1, %c0_2] : memref<2x18x24x128xf32, #tpu.memory_space<vmem>>, vector<2x18x24x128xf32>
    tpu.vector_store %arg9[%c0, %c0_0, %c0_1, %c0_2], %0 {strides = array<i32>} : memref<2x18x24x128xf32, #tpu.memory_space<vmem>>, vector<2x18x24x128xf32>,
    %c0_3 = arith.constant 0 : index
    %c0_4 = arith.constant 0 : index
    %c0_5 = arith.constant 0 : index
    %c0_6 = arith.constant 0 : index
    %2 = vector.load %arg1[%c0_3, %c0_4, %c0_5, %c0_6] : memref<2x16x16x4xf32, #tpu.memory_space<vmem>>, vector<2x16x16x4xf32>
    %c0_7 = arith.constant 0 : index
    %c1 = arith.constant 1 : index
    %c1_8 = arith.constant 1 : index
    %c0_9 = arith.constant 0 : index
    %3 = vector.load %arg9[%c0_7, %c1, %c1_8, %c0_9] : memref<2x18x24x128xf32, #tpu.memory_space<vmem>>, vector<2x16x16x4xf32>
    tpu.vector_store %arg9[%c0_7, %c1, %c1_8, %c0_9], %2 {strides = array<i32>} : memref<2x18x24x128xf32, #tpu.memory_space<vmem>>, vector<2x16x16x4xf32>,
    %cst_10 = arith.constant 0.000000e+00 : f32
    %4 = vector.broadcast %cst_10 : f32 to vector<512x128xf32>
    %c0_11 = arith.constant 0 : index
    %c0_12 = arith.constant 0 : index
    %c0_13 = arith.constant 0 : index
    %c0_14 = arith.constant 0 : index
    %5 = vector.load %arg9[%c0_11, %c0_12, %c0_13, %c0_14] : memref<2x18x24x128xf32, #tpu.memory_space<vmem>>, vector<2x16x16x128xf32>
    %c0_15 = arith.constant 0 : index
    %c0_16 = arith.constant 0 : index
    %c1_17 = arith.constant 1 : index
    %c0_18 = arith.constant 0 : index
    %6 = vector.load %arg9[%c0_15, %c0_16, %c1_17, %c0_18] : memref<2x18x24x128xf32, #tpu.memory_space<vmem>>, vector<2x16x16x128xf32>
    %c0_19 = arith.constant 0 : index
    %c0_20 = arith.constant 0 : index
    %c2 = arith.constant 2 : index
    %c0_21 = arith.constant 0 : index
    %7 = vector.load %arg9[%c0_19, %c0_20, %c2, %c0_21] : memref<2x18x24x128xf32, #tpu.memory_space<vmem>>, vector<2x16x16x128xf32>
    %8 = tpu.concatenate %5, %6, %7 in 3 : vector<2x16x16x128xf32>, vector<2x16x16x128xf32>, vector<2x16x16x128xf32> -> vector<2x16x16x384xf32>
    %9 = vector.shape_cast %8 : vector<2x16x16x384xf32> to vector<512x384xf32>
    %c0_22 = arith.constant 0 : index
    %c0_23 = arith.constant 0 : index
    %c0_24 = arith.constant 0 : index
    %10 = vector.load %arg2[%c0_22, %c0_23, %c0_24] : memref<3x384x128xf32, #tpu.memory_space<vmem>>, vector<1x384x128xf32>
    %11 = vector.shape_cast %10 : vector<1x384x128xf32> to vector<384x128xf32>
    %cst_25 = arith.constant dense<0.000000e+00> : vector<512x128xf32>
    %12 = tpu.matmul %9, %11, %cst_25 {dimension_numbers = #tpu.dot_dimension_numbers<[1], [0], [0], [1], [0, 0, 1, 1], [], []>} : vector<512x384xf32>, vector<384x128xf32>, vector<512x128xf32> -> vector<512x128xf32>
    %13 = arith.addf %4, %12 : vector<512x128xf32>
    %c0_26 = arith.constant 0 : index
    %c1_27 = arith.constant 1 : index
    %c0_28 = arith.constant 0 : index
    %c0_29 = arith.constant 0 : index
    %14 = vector.load %arg9[%c0_26, %c1_27, %c0_28, %c0_29] : memref<2x18x24x128xf32, #tpu.memory_space<vmem>>, vector<2x16x16x128xf32>
    %c0_30 = arith.constant 0 : index
    %c1_31 = arith.constant 1 : index
    %c1_32 = arith.constant 1 : index
    %c0_33 = arith.constant 0 : index
    %15 = vector.load %arg9[%c0_30, %c1_31, %c1_32, %c0_33] : memref<2x18x24x128xf32, #tpu.memory_space<vmem>>, vector<2x16x16x128xf32>
    %c0_34 = arith.constant 0 : index
    %c1_35 = arith.constant 1 : index
    %c2_36 = arith.constant 2 : index
    %c0_37 = arith.constant 0 : index
    %16 = vector.load %arg9[%c0_34, %c1_35, %c2_36, %c0_37] : memref<2x18x24x128xf32, #tpu.memory_space<vmem>>, vector<2x16x16x128xf32>
    %17 = tpu.concatenate %14, %15, %16 in 3 : vector<2x16x16x128xf32>, vector<2x16x16x128xf32>, vector<2x16x16x128xf32> -> vector<2x16x16x384xf32>
    %18 = vector.shape_cast %17 : vector<2x16x16x384xf32> to vector<512x384xf32>
    %c1_38 = arith.constant 1 : index
    %c0_39 = arith.constant 0 : index
    %c0_40 = arith.constant 0 : index
    %19 = vector.load %arg2[%c1_38, %c0_39, %c0_40] : memref<3x384x128xf32, #tpu.memory_space<vmem>>, vector<1x384x128xf32>
    %20 = vector.shape_cast %19 : vector<1x384x128xf32> to vector<384x128xf32>
    %cst_41 = arith.constant dense<0.000000e+00> : vector<512x128xf32>
    %21 = tpu.matmul %18, %20, %cst_41 {dimension_numbers = #tpu.dot_dimension_numbers<[1], [0], [0], [1], [0, 0, 1, 1], [], []>} : vector<512x384xf32>, vector<384x128xf32>, vector<512x128xf32> -> vector<512x128xf32>
    %22 = arith.addf %13, %21 : vector<512x128xf32>
    %c0_42 = arith.constant 0 : index
    %c2_43 = arith.constant 2 : index
    %c0_44 = arith.constant 0 : index
    %c0_45 = arith.constant 0 : index
    %23 = vector.load %arg9[%c0_42, %c2_43, %c0_44, %c0_45] : memref<2x18x24x128xf32, #tpu.memory_space<vmem>>, vector<2x16x16x128xf32>
    %c0_46 = arith.constant 0 : index
    %c2_47 = arith.constant 2 : index
    %c1_48 = arith.constant 1 : index
    %c0_49 = arith.constant 0 : index
    %24 = vector.load %arg9[%c0_46, %c2_47, %c1_48, %c0_49] : memref<2x18x24x128xf32, #tpu.memory_space<vmem>>, vector<2x16x16x128xf32>
    %c0_50 = arith.constant 0 : index
    %c2_51 = arith.constant 2 : index
    %c2_52 = arith.constant 2 : index
    %c0_53 = arith.constant 0 : index
    %25 = vector.load %arg9[%c0_50, %c2_51, %c2_52, %c0_53] : memref<2x18x24x128xf32, #tpu.memory_space<vmem>>, vector<2x16x16x128xf32>
    %26 = tpu.concatenate %23, %24, %25 in 3 : vector<2x16x16x128xf32>, vector<2x16x16x128xf32>, vector<2x16x16x128xf32> -> vector<2x16x16x384xf32>
    %27 = vector.shape_cast %26 : vector<2x16x16x384xf32> to vector<512x384xf32>
    %c2_54 = arith.constant 2 : index
    %c0_55 = arith.constant 0 : index
    %c0_56 = arith.constant 0 : index
    %28 = vector.load %arg2[%c2_54, %c0_55, %c0_56] : memref<3x384x128xf32, #tpu.memory_space<vmem>>, vector<1x384x128xf32>
    %29 = vector.shape_cast %28 : vector<1x384x128xf32> to vector<384x128xf32>
    %cst_57 = arith.constant dense<0.000000e+00> : vector<512x128xf32>
    %30 = tpu.matmul %27, %29, %cst_57 {dimension_numbers = #tpu.dot_dimension_numbers<[1], [0], [0], [1], [0, 0, 1, 1], [], []>} : vector<512x384xf32>, vector<384x128xf32>, vector<512x128xf32> -> vector<512x128xf32>
    %31 = arith.addf %22, %30 : vector<512x128xf32>
    %cst_58 = arith.constant dense<0.000000e+00> : vector<128xf32>
    %32 = vector.multi_reduction <add>, %31, %cst_58 [0] : vector<512x128xf32> to vector<128xf32>
    %33 = vector.shape_cast %32 : vector<128xf32> to vector<1x128xf32>
    %cst_59 = arith.constant 5.120000e+02 : f32
    %34 = vector.broadcast %cst_59 : f32 to vector<1x128xf32>
    %35 = arith.divf %33, %34 : vector<1x128xf32>
    %36 = vector.broadcast %35 : vector<1x128xf32> to vector<512x128xf32>
    %37 = arith.subf %31, %36 : vector<512x128xf32>
    %38 = arith.mulf %37, %37 : vector<512x128xf32>
    %cst_60 = arith.constant dense<0.000000e+00> : vector<128xf32>
    %39 = vector.multi_reduction <add>, %38, %cst_60 [0] : vector<512x128xf32> to vector<128xf32>
    %40 = vector.shape_cast %39 : vector<128xf32> to vector<1x128xf32>
    %cst_61 = arith.constant 5.120000e+02 : f32
    %41 = vector.broadcast %cst_61 : f32 to vector<1x128xf32>
    %42 = arith.divf %40, %41 : vector<1x128xf32>
    %43 = vector.broadcast %35 : vector<1x128xf32> to vector<512x128xf32>
    %44 = arith.subf %31, %43 : vector<512x128xf32>
    %cst_62 = arith.constant 9.99999974E-6 : f32
    %45 = vector.broadcast %cst_62 : f32 to vector<1x128xf32>
    %46 = arith.addf %42, %45 : vector<1x128xf32>
    %47 = math.rsqrt %46 : vector<1x128xf32>
    %48 = vector.broadcast %47 : vector<1x128xf32> to vector<512x128xf32>
    %49 = arith.mulf %44, %48 : vector<512x128xf32>
    %c0_63 = arith.constant 0 : index
    %c0_64 = arith.constant 0 : index
    %50 = vector.load %arg4[%c0_63, %c0_64] : memref<1x128xf32, #tpu.memory_space<vmem>>, vector<1x128xf32>
    %51 = vector.broadcast %50 : vector<1x128xf32> to vector<512x128xf32>
    %52 = arith.mulf %49, %51 : vector<512x128xf32>
    %c0_65 = arith.constant 0 : index
    %c0_66 = arith.constant 0 : index
    %53 = vector.load %arg5[%c0_65, %c0_66] : memref<1x128xf32, #tpu.memory_space<vmem>>, vector<1x128xf32>
    %54 = vector.broadcast %53 : vector<1x128xf32> to vector<512x128xf32>
    %55 = arith.addf %52, %54 : vector<512x128xf32>
    %cst_67 = arith.constant 0.000000e+00 : f32
    %56 = vector.broadcast %cst_67 : f32 to vector<512x128xf32>
    %57 = arith.maximumf %55, %56 : vector<512x128xf32>
    %58 = vector.shape_cast %57 : vector<512x128xf32> to vector<2x16x16x128xf32>
    %c0_68 = arith.constant 0 : index
    %c1_69 = arith.constant 1 : index
    %c1_70 = arith.constant 1 : index
    %c0_71 = arith.constant 0 : index
    %59 = vector.load %arg9[%c0_68, %c1_69, %c1_70, %c0_71] : memref<2x18x24x128xf32, #tpu.memory_space<vmem>>, vector<2x16x16x128xf32>
    tpu.vector_store %arg9[%c0_68, %c1_69, %c1_70, %c0_71], %58 {strides = array<i32>} : memref<2x18x24x128xf32, #tpu.memory_space<vmem>>, vector<2x16x16x128xf32>,
    %cst_72 = arith.constant 0.000000e+00 : f32
    %60 = vector.broadcast %cst_72 : f32 to vector<512x128xf32>
    %c0_73 = arith.constant 0 : index
    %c0_74 = arith.constant 0 : index
    %c0_75 = arith.constant 0 : index
    %c0_76 = arith.constant 0 : index
    %61 = vector.load %arg9[%c0_73, %c0_74, %c0_75, %c0_76] : memref<2x18x24x128xf32, #tpu.memory_space<vmem>>, vector<2x16x16x128xf32>
    %c0_77 = arith.constant 0 : index
    %c0_78 = arith.constant 0 : index
    %c1_79 = arith.constant 1 : index
    %c0_80 = arith.constant 0 : index
    %62 = vector.load %arg9[%c0_77, %c0_78, %c1_79, %c0_80] : memref<2x18x24x128xf32, #tpu.memory_space<vmem>>, vector<2x16x16x128xf32>
    %c0_81 = arith.constant 0 : index
    %c0_82 = arith.constant 0 : index
    %c2_83 = arith.constant 2 : index
    %c0_84 = arith.constant 0 : index
    %63 = vector.load %arg9[%c0_81, %c0_82, %c2_83, %c0_84] : memref<2x18x24x128xf32, #tpu.memory_space<vmem>>, vector<2x16x16x128xf32>
    %64 = tpu.concatenate %61, %62, %63 in 3 : vector<2x16x16x128xf32>, vector<2x16x16x128xf32>, vector<2x16x16x128xf32> -> vector<2x16x16x384xf32>
    %65 = vector.shape_cast %64 : vector<2x16x16x384xf32> to vector<512x384xf32>
    %c0_85 = arith.constant 0 : index
    %c0_86 = arith.constant 0 : index
    %c0_87 = arith.constant 0 : index
    %66 = vector.load %arg3[%c0_85, %c0_86, %c0_87] : memref<3x384x128xf32, #tpu.memory_space<vmem>>, vector<1x384x128xf32>
    %67 = vector.shape_cast %66 : vector<1x384x128xf32> to vector<384x128xf32>
    %cst_88 = arith.constant dense<0.000000e+00> : vector<512x128xf32>
    %68 = tpu.matmul %65, %67, %cst_88 {dimension_numbers = #tpu.dot_dimension_numbers<[1], [0], [0], [1], [0, 0, 1, 1], [], []>} : vector<512x384xf32>, vector<384x128xf32>, vector<512x128xf32> -> vector<512x128xf32>
    %69 = arith.addf %60, %68 : vector<512x128xf32>
    %c0_89 = arith.constant 0 : index
    %c1_90 = arith.constant 1 : index
    %c0_91 = arith.constant 0 : index
    %c0_92 = arith.constant 0 : index
    %70 = vector.load %arg9[%c0_89, %c1_90, %c0_91, %c0_92] : memref<2x18x24x128xf32, #tpu.memory_space<vmem>>, vector<2x16x16x128xf32>
    %c0_93 = arith.constant 0 : index
    %c1_94 = arith.constant 1 : index
    %c1_95 = arith.constant 1 : index
    %c0_96 = arith.constant 0 : index
    %71 = vector.load %arg9[%c0_93, %c1_94, %c1_95, %c0_96] : memref<2x18x24x128xf32, #tpu.memory_space<vmem>>, vector<2x16x16x128xf32>
    %c0_97 = arith.constant 0 : index
    %c1_98 = arith.constant 1 : index
    %c2_99 = arith.constant 2 : index
    %c0_100 = arith.constant 0 : index
    %72 = vector.load %arg9[%c0_97, %c1_98, %c2_99, %c0_100] : memref<2x18x24x128xf32, #tpu.memory_space<vmem>>, vector<2x16x16x128xf32>
    %73 = tpu.concatenate %70, %71, %72 in 3 : vector<2x16x16x128xf32>, vector<2x16x16x128xf32>, vector<2x16x16x128xf32> -> vector<2x16x16x384xf32>
    %74 = vector.shape_cast %73 : vector<2x16x16x384xf32> to vector<512x384xf32>
    %c1_101 = arith.constant 1 : index
    %c0_102 = arith.constant 0 : index
    %c0_103 = arith.constant 0 : index
    %75 = vector.load %arg3[%c1_101, %c0_102, %c0_103] : memref<3x384x128xf32, #tpu.memory_space<vmem>>, vector<1x384x128xf32>
    %76 = vector.shape_cast %75 : vector<1x384x128xf32> to vector<384x128xf32>
    %cst_104 = arith.constant dense<0.000000e+00> : vector<512x128xf32>
    %77 = tpu.matmul %74, %76, %cst_104 {dimension_numbers = #tpu.dot_dimension_numbers<[1], [0], [0], [1], [0, 0, 1, 1], [], []>} : vector<512x384xf32>, vector<384x128xf32>, vector<512x128xf32> -> vector<512x128xf32>
    %78 = arith.addf %69, %77 : vector<512x128xf32>
    %c0_105 = arith.constant 0 : index
    %c2_106 = arith.constant 2 : index
    %c0_107 = arith.constant 0 : index
    %c0_108 = arith.constant 0 : index
    %79 = vector.load %arg9[%c0_105, %c2_106, %c0_107, %c0_108] : memref<2x18x24x128xf32, #tpu.memory_space<vmem>>, vector<2x16x16x128xf32>
    %c0_109 = arith.constant 0 : index
    %c2_110 = arith.constant 2 : index
    %c1_111 = arith.constant 1 : index
    %c0_112 = arith.constant 0 : index
    %80 = vector.load %arg9[%c0_109, %c2_110, %c1_111, %c0_112] : memref<2x18x24x128xf32, #tpu.memory_space<vmem>>, vector<2x16x16x128xf32>
    %c0_113 = arith.constant 0 : index
    %c2_114 = arith.constant 2 : index
    %c2_115 = arith.constant 2 : index
    %c0_116 = arith.constant 0 : index
    %81 = vector.load %arg9[%c0_113, %c2_114, %c2_115, %c0_116] : memref<2x18x24x128xf32, #tpu.memory_space<vmem>>, vector<2x16x16x128xf32>
    %82 = tpu.concatenate %79, %80, %81 in 3 : vector<2x16x16x128xf32>, vector<2x16x16x128xf32>, vector<2x16x16x128xf32> -> vector<2x16x16x384xf32>
    %83 = vector.shape_cast %82 : vector<2x16x16x384xf32> to vector<512x384xf32>
    %c2_117 = arith.constant 2 : index
    %c0_118 = arith.constant 0 : index
    %c0_119 = arith.constant 0 : index
    %84 = vector.load %arg3[%c2_117, %c0_118, %c0_119] : memref<3x384x128xf32, #tpu.memory_space<vmem>>, vector<1x384x128xf32>
    %85 = vector.shape_cast %84 : vector<1x384x128xf32> to vector<384x128xf32>
    %cst_120 = arith.constant dense<0.000000e+00> : vector<512x128xf32>
    %86 = tpu.matmul %83, %85, %cst_120 {dimension_numbers = #tpu.dot_dimension_numbers<[1], [0], [0], [1], [0, 0, 1, 1], [], []>} : vector<512x384xf32>, vector<384x128xf32>, vector<512x128xf32> -> vector<512x128xf32>
    %87 = arith.addf %78, %86 : vector<512x128xf32>
    %cst_121 = arith.constant dense<0.000000e+00> : vector<128xf32>
    %88 = vector.multi_reduction <add>, %87, %cst_121 [0] : vector<512x128xf32> to vector<128xf32>
    %89 = vector.shape_cast %88 : vector<128xf32> to vector<1x128xf32>
    %cst_122 = arith.constant 5.120000e+02 : f32
    %90 = vector.broadcast %cst_122 : f32 to vector<1x128xf32>
    %91 = arith.divf %89, %90 : vector<1x128xf32>
    %92 = vector.broadcast %91 : vector<1x128xf32> to vector<512x128xf32>
    %93 = arith.subf %87, %92 : vector<512x128xf32>
    %94 = arith.mulf %93, %93 : vector<512x128xf32>
    %cst_123 = arith.constant dense<0.000000e+00> : vector<128xf32>
    %95 = vector.multi_reduction <add>, %94, %cst_123 [0] : vector<512x128xf32> to vector<128xf32>
    %96 = vector.shape_cast %95 : vector<128xf32> to vector<1x128xf32>
    %cst_124 = arith.constant 5.120000e+02 : f32
    %97 = vector.broadcast %cst_124 : f32 to vector<1x128xf32>
    %98 = arith.divf %96, %97 : vector<1x128xf32>
    %99 = vector.broadcast %91 : vector<1x128xf32> to vector<512x128xf32>
    %100 = arith.subf %87, %99 : vector<512x128xf32>
    %cst_125 = arith.constant 9.99999974E-6 : f32
    %101 = vector.broadcast %cst_125 : f32 to vector<1x128xf32>
    %102 = arith.addf %98, %101 : vector<1x128xf32>
    %103 = math.rsqrt %102 : vector<1x128xf32>
    %104 = vector.broadcast %103 : vector<1x128xf32> to vector<512x128xf32>
    %105 = arith.mulf %100, %104 : vector<512x128xf32>
    %c0_126 = arith.constant 0 : index
    %c0_127 = arith.constant 0 : index
    %106 = vector.load %arg6[%c0_126, %c0_127] : memref<1x128xf32, #tpu.memory_space<vmem>>, vector<1x128xf32>
    %107 = vector.broadcast %106 : vector<1x128xf32> to vector<512x128xf32>
    %108 = arith.mulf %105, %107 : vector<512x128xf32>
    %c0_128 = arith.constant 0 : index
    %c0_129 = arith.constant 0 : index
    %109 = vector.load %arg7[%c0_128, %c0_129] : memref<1x128xf32, #tpu.memory_space<vmem>>, vector<1x128xf32>
    %110 = vector.broadcast %109 : vector<1x128xf32> to vector<512x128xf32>
    %111 = arith.addf %108, %110 : vector<512x128xf32>
    %112 = vector.extract_strided_slice %111 {offsets = [0, 0], sizes = [512, 4], strides = [1, 1]} : vector<512x128xf32> to vector<512x4xf32>
    %c0_130 = arith.constant 0 : index
    %c0_131 = arith.constant 0 : index
    %c0_132 = arith.constant 0 : index
    %c0_133 = arith.constant 0 : index
    %113 = vector.load %arg1[%c0_130, %c0_131, %c0_132, %c0_133] : memref<2x16x16x4xf32, #tpu.memory_space<vmem>>, vector<2x16x16x4xf32>
    %114 = vector.shape_cast %113 : vector<2x16x16x4xf32> to vector<512x4xf32>
    %115 = arith.addf %112, %114 : vector<512x4xf32>
    %cst_134 = arith.constant 0.000000e+00 : f32
    %116 = vector.broadcast %cst_134 : f32 to vector<512x4xf32>
    %117 = arith.maximumf %115, %116 : vector<512x4xf32>
    %118 = vector.shape_cast %117 : vector<512x4xf32> to vector<2x16x16x4xf32>
    %c0_135 = arith.constant 0 : index
    %c0_136 = arith.constant 0 : index
    %c0_137 = arith.constant 0 : index
    %c0_138 = arith.constant 0 : index
    %119 = vector.load %arg8[%c0_135, %c0_136, %c0_137, %c0_138] : memref<2x16x16x4xf32, #tpu.memory_space<vmem>>, vector<2x16x16x4xf32>
    tpu.vector_store %arg8[%c0_135, %c0_136, %c0_137, %c0_138], %118 {strides = array<i32>} : memref<2x16x16x4xf32, #tpu.memory_space<vmem>>, vector<2x16x16x4xf32>,
    return
  }
  func.func @transform_0(%arg0: i32) -> (i32, i32, i32, i32) {
    %c0_i32 = arith.constant 0 : i32
    %c0_i32_0 = arith.constant 0 : i32
    %c0_i32_1 = arith.constant 0 : i32
    %c0_i32_2 = arith.constant 0 : i32
    %c0_i32_3 = arith.constant 0 : i32
    return %c0_i32, %c0_i32_0, %c0_i32_1, %c0_i32_2 : i32, i32, i32, i32
  }
  func.func @transform_1(%arg0: i32) -> (i32, i32, i32) {
    %c0_i32 = arith.constant 0 : i32
    %c0_i32_0 = arith.constant 0 : i32
    %c0_i32_1 = arith.constant 0 : i32
    %c0_i32_2 = arith.constant 0 : i32
    return %c0_i32, %c0_i32_0, %c0_i32_1 : i32, i32, i32
  }
  func.func @transform_2(%arg0: i32) -> (i32, i32, i32) {
    %c0_i32 = arith.constant 0 : i32
    %c0_i32_0 = arith.constant 0 : i32
    %c0_i32_1 = arith.constant 0 : i32
    %c0_i32_2 = arith.constant 0 : i32
    return %c0_i32, %c0_i32_0, %c0_i32_1 : i32, i32, i32
  }
  func.func @transform_3(%arg0: i32) -> (i32, i32) {
    %c0_i32 = arith.constant 0 : i32
    %c0_i32_0 = arith.constant 0 : i32
    %c0_i32_1 = arith.constant 0 : i32
    return %c0_i32, %c0_i32_0 : i32, i32
  }
  func.func @transform_4(%arg0: i32) -> (i32, i32) {
    %c0_i32 = arith.constant 0 : i32
    %c0_i32_0 = arith.constant 0 : i32
    %c0_i32_1 = arith.constant 0 : i32
    return %c0_i32, %c0_i32_0 : i32, i32
  }
  func.func @transform_5(%arg0: i32) -> (i32, i32) {
    %c0_i32 = arith.constant 0 : i32
    %c0_i32_0 = arith.constant 0 : i32
    %c0_i32_1 = arith.constant 0 : i32
    return %c0_i32, %c0_i32_0 : i32, i32
  }
  func.func @transform_6(%arg0: i32) -> (i32, i32) {
    %c0_i32 = arith.constant 0 : i32
    %c0_i32_0 = arith.constant 0 : i32
    %c0_i32_1 = arith.constant 0 : i32
    return %c0_i32, %c0_i32_0 : i32, i32
  }
  func.func @transform_7(%arg0: i32) -> (i32, i32, i32, i32) {
    %c0_i32 = arith.constant 0 : i32
    %c0_i32_0 = arith.constant 0 : i32
    %c0_i32_1 = arith.constant 0 : i32
    %c0_i32_2 = arith.constant 0 : i32
    %c0_i32_3 = arith.constant 0 : i32
    return %c0_i32, %c0_i32_0, %c0_i32_1, %c0_i32_2 : i32, i32, i32, i32
  }
}

</mosaic_0001>

<bundles_post_ra>
// kernel: basic_block_forward.1
= control target key start
LH: loop header
LB: loop body
LE: loop exit
PB: predicated region body
PF: predicated region fallthrough
CT: control target
= control target key end

     0   :  { %v17522_v0 = vmov 0.0|0.0   ;;  %v9733_v4 = vmov 0.0   ;;  %vm199_vm0 = vcmask 31744   ;;  %s17511_s1 = inlined_call_operand.vmem [shape: f32[3,384,128], index: 1, kind: input, shape index: {}]   ;;  %s17512_s0 = inlined_call_operand.vmem [shape: f32[2,16,16,4], index: 0, kind: input, shape index: {}]   ;;  %s17513_s2 = inlined_call_operand.vmem [shape: f32[3,384,128], index: 2, kind: input, shape index: {}]   ;;  %s17514_s3 = inlined_call_operand.vmem [shape: f32[1,128], index: 3, kind: input, shape index: {}]   ;;  %s17515_s4 = inlined_call_operand.vmem [shape: f32[1,128], index: 4, kind: input, shape index: {}]   ;;  %s17516_s5 = inlined_call_operand.vmem [shape: f32[1,128], index: 5, kind: input, shape index: {}]   ;;  %s17517_s6 = inlined_call_operand.vmem [shape: f32[1,128], index: 6, kind: input, shape index: {}]   ;;  %s17518_s7 = inlined_call_operand.vmem [shape: f32[2,16,16,4], index: 7, kind: output, shape index: {}]  }
   0x1   :  { %9242 = vmatprep.subr.bf16.mxu0 %v17522_v0  ;;  %v9778_v1 = vld [vmem:[%s17511_s1 + $0x180] sm:$0xff]  ;;  %v9783_v2 = vld [vmem:[%s17511_s1 + $0x188] sm:$0xff]  ;;  %29 = vst [vmem:[#allocation2 + $0x18] sm:$0xff] %v9733_v4  ;;  %30 = vst [vmem:[#allocation2 + $0x20] sm:$0xff] %v9733_v4 }
   0x2   :  { %v9788_v3 = vld [vmem:[%s17511_s1 + $0x280] sm:$0xff]  ;;  %31 = vst [vmem:[#allocation2 + $0x28] sm:$0xff] %v9733_v4  ;;  %26 = vst [vmem:[#allocation2] sm:$0xff] %v9733_v4  ;;  %v9243_v5 = vpack.c.bf16 %v9783_v2, %v9778_v1  ;;  %v7831_v6 = vld [vmem:[%s17511_s1 + $0x288] sm:$0xff] }
   0x3   :  { %27 = vst [vmem:[#allocation2 + $0x8] sm:$0xff] %v9733_v4  ;;  %28 = vst [vmem:[#allocation2 + $0x10] sm:$0xff] %v9733_v4  ;;  %v7800_v7 = vld [vmem:[%s17511_s1 + $0x190] sm:$0xff]  ;;  %v7801_v8 = vld [vmem:[%s17511_s1 + $0x198] sm:$0xff]  ;;  %v9290_v9 = vpack.c.bf16 %v7831_v6, %v9788_v3 }
   0x4   :  { %32 = vst [vmem:[#allocation2 + $0x30] sm:$0xff] %v9733_v4  ;;  %33 = vst [vmem:[#allocation2 + $0x38] sm:$0xff] %v9733_v4  ;;  %v7832_v10 = vld [vmem:[%s17511_s1 + $0x290] sm:$0xff]  ;;  %v7833_v11 = vld [vmem:[%s17511_s1 + $0x298] sm:$0xff]  ;;  %9244 = vmatpush1.bf16.msra.mxu0 %v9243_v5  ;;  %v9246_v12 = vpack.c.bf16 %v7801_v8, %v7800_v7 }
   0x5   :  { %34 = vst [vmem:[#allocation2 + $0x40] sm:$0xff] %v9733_v4  ;;  %35 = vst [vmem:[#allocation2 + $0x48] sm:$0xff] %v9733_v4  ;;  %v9294_v13 = vpack.c.bf16 %v7833_v11, %v7832_v10  ;;  %v7834_v14 = vld [vmem:[%s17511_s1 + $0x2a0] sm:$0xff]  ;;  %v7835_v15 = vld [vmem:[%s17511_s1 + $0x2a8] sm:$0xff]  ;;  %9291 = vmatprep.subr.bf16.mxu1 %v9290_v9  ;;  %9245 = vmatprep.subr.bf16.mxu0 %v17522_v0 }
   0x6   :  { %36 = vst [vmem:[#allocation2 + $0x50] sm:$0xff] %v9733_v4  ;;  %37 = vst [vmem:[#allocation2 + $0x58] sm:$0xff] %v9733_v4  ;;  %v7802_v16 = vld [vmem:[%s17511_s1 + $0x1a0] sm:$0xff]  ;;  %v7803_v17 = vld [vmem:[%s17511_s1 + $0x1a8] sm:$0xff]  ;;  %9293 = vmatpush3.bf16.msra.mxu1 %v9290_v9  ;;  %v9298_v18 = vpack.c.bf16 %v7835_v15, %v7834_v14 }
   0x7   :  { %38 = vst [vmem:[#allocation2 + $0x60] sm:$0xff] %v9733_v4  ;;  %39 = vst [vmem:[#allocation2 + $0x68] sm:$0xff] %v9733_v4  ;;  %9295 = vmatprep.subr.bf16.mxu1 %v9294_v13  ;;  %v9249_v19 = vpack.c.bf16 %v7803_v17, %v7802_v16  ;;  %v7836_v20 = vld [vmem:[%s17511_s1 + $0x2b0] sm:$0xff]  ;;  %v7837_v21 = vld [vmem:[%s17511_s1 + $0x2b8] sm:$0xff] }
   0x8   :  { %40 = vst [vmem:[#allocation2 + $0x70] sm:$0xff] %v9733_v4  ;;  %41 = vst [vmem:[#allocation2 + $0x78] sm:$0xff] %v9733_v4  ;;  %9247 = vmatpush1.bf16.msra.mxu0 %v9246_v12  ;;  %v7804_v22 = vld [vmem:[%s17511_s1 + $0x1b0] sm:$0xff]  ;;  %v7805_v23 = vld [vmem:[%s17511_s1 + $0x1b8] sm:$0xff]  ;;  %v9302_v24 = vpack.c.bf16 %v7837_v21, %v7836_v20 }
   0x9   :  { %42 = vst [vmem:[#allocation2 + $0x80] sm:$0xff] %v9733_v4  ;;  %43 = vst [vmem:[#allocation2 + $0x88] sm:$0xff] %v9733_v4  ;;  %9248 = vmatprep.subr.bf16.mxu0 %v17522_v0  ;;  %v134_v25 = vld [vmem:[%s17512_s0] sm:$0xff]  ;;  %v9252_v26 = vpack.c.bf16 %v7805_v23, %v7804_v22  ;;  %v7839_v28 = vld [vmem:[%s17511_s1 + $0x2c8] sm:$0xff] }
   0xa   :  { %44 = vst [vmem:[#allocation2 + $0x90] sm:$0xff] %v9733_v4  ;;  %45 = vst [vmem:[#allocation2 + $0x98] sm:$0xff] %v9733_v4  ;;  %9297 = vmatpush3.bf16.msra.mxu1 %v9294_v13  ;;  %v7838_v27 = vld [vmem:[%s17511_s1 + $0x2c0] sm:$0xff]  ;;  %v135_v29 = vld [vmem:[%s17512_s0 + $0x8] sm:$0xff] }
   0xb   :  { %46 = vst [vmem:[#allocation2 + $0xa0] sm:$0xff] %v9733_v4  ;;  %47 = vst [vmem:[#allocation2 + $0xa8] sm:$0xff] %v9733_v4  ;;  %9299 = vmatprep.subr.bf16.mxu1 %v9298_v18  ;;  %v7806_v30 = vld [vmem:[%s17511_s1 + $0x1c0] sm:$0xff]  ;;  %v7807_v31 = vld [vmem:[%s17511_s1 + $0x1c8] sm:$0xff]  ;;  %v9306_v34 = vpack.c.bf16 %v7839_v28, %v7838_v27 }
   0xc   :  { %48 = vst [vmem:[#allocation2 + $0xb0] sm:$0xff] %v9733_v4  ;;  %49 = vst [vmem:[#allocation2 + $0xb8] sm:$0xff] %v9733_v4  ;;  %9250 = vmatpush1.bf16.msra.mxu0 %v9249_v19  ;;  %v136_v32 = vld [vmem:[%s17512_s0 + $0x10] sm:$0xff]  ;;  %v137_v33 = vld [vmem:[%s17512_s0 + $0x18] sm:$0xff]  ;;  %v9255_v37 = vpack.c.bf16 %v7807_v31, %v7806_v30 }
   0xd   :  { %50 = vst [vmem:[#allocation2 + $0xc0] sm:$0xff] %v9733_v4  ;;  %51 = vst [vmem:[#allocation2 + $0xc8] sm:$0xff] %v9733_v4  ;;  %9251 = vmatprep.subr.bf16.mxu0 %v17522_v0  ;;  %v138_v35 = vld [vmem:[%s17512_s0 + $0x20] sm:$0xff]  ;;  %v139_v36 = vld [vmem:[%s17512_s0 + $0x28] sm:$0xff] }
   0xe   :  { %52 = vst [vmem:[#allocation2 + $0xd0] sm:$0xff] %v9733_v4  ;;  %53 = vst [vmem:[#allocation2 + $0xd8] sm:$0xff] %v9733_v4  ;;  %9301 = vmatpush3.bf16.msra.mxu1 %v9298_v18  ;;  %v7808_v38 = vld [vmem:[%s17511_s1 + $0x1d0] sm:$0xff]  ;;  %v7841_v40 = vld [vmem:[%s17511_s1 + $0x2d8] sm:$0xff] }
   0xf   :  { %54 = vst [vmem:[#allocation2 + $0xe0] sm:$0xff] %v9733_v4  ;;  %55 = vst [vmem:[#allocation2 + $0xe8] sm:$0xff] %v9733_v4  ;;  %9303 = vmatprep.subr.bf16.mxu1 %v9302_v24  ;;  %v7840_v39 = vld [vmem:[%s17511_s1 + $0x2d0] sm:$0xff]  ;;  %v7809_v41 = vld [vmem:[%s17511_s1 + $0x1d8] sm:$0xff] }
  0x10   :  { %56 = vst [vmem:[#allocation2 + $0xf0] sm:$0xff] %v9733_v4  ;;  %57 = vst [vmem:[#allocation2 + $0xf8] sm:$0xff] %v9733_v4  ;;  %9253 = vmatpush1.bf16.msra.mxu0 %v9252_v26  ;;  %v140_v42 = vld [vmem:[%s17512_s0 + $0x30] sm:$0xff]  ;;  %v141_v43 = vld [vmem:[%s17512_s0 + $0x38] sm:$0xff]  ;;  %v9310_v46 = vpack.c.bf16 %v7841_v40, %v7840_v39  ;;  %v9258_v48 = vpack.c.bf16 %v7809_v41, %v7808_v38 }
  0x11   :  { %58 = vst [vmem:[#allocation2 + $0x100] sm:$0xff] %v9733_v4  ;;  %59 = vst [vmem:[#allocation2 + $0x108] sm:$0xff] %v9733_v4  ;;  %9254 = vmatprep.subr.bf16.mxu0 %v17522_v0  ;;  %v142_v44 = vld [vmem:[%s17512_s0 + $0x40] sm:$0xff]  ;;  %v143_v45 = vld [vmem:[%s17512_s0 + $0x48] sm:$0xff] }
  0x12   :  { %60 = vst [vmem:[#allocation2 + $0x110] sm:$0xff] %v9733_v4  ;;  %61 = vst [vmem:[#allocation2 + $0x118] sm:$0xff] %v9733_v4  ;;  %9305 = vmatpush3.bf16.msra.mxu1 %v9302_v24  ;;  %v7810_v47 = vld [vmem:[%s17511_s1 + $0x1e0] sm:$0xff]  ;;  %v7843_v50 = vld [vmem:[%s17511_s1 + $0x2e8] sm:$0xff] }
  0x13   :  { %62 = vst [vmem:[#allocation2 + $0x120] sm:$0xff] %v9733_v4  ;;  %63 = vst [vmem:[#allocation2 + $0x128] sm:$0xff] %v9733_v4  ;;  %9307 = vmatprep.subr.bf16.mxu1 %v9306_v34  ;;  %v7842_v49 = vld [vmem:[%s17511_s1 + $0x2e0] sm:$0xff]  ;;  %v7811_v52 = vld [vmem:[%s17511_s1 + $0x1e8] sm:$0xff] }
  0x14   :  { %64 = vst [vmem:[#allocation2 + $0x130] sm:$0xff] %v9733_v4  ;;  %65 = vst [vmem:[#allocation2 + $0x138] sm:$0xff] %v9733_v4  ;;  %9256 = vmatpush1.bf16.msra.mxu0 %v9255_v37  ;;  %v144_v53 = vld [vmem:[%s17512_s0 + $0x50] sm:$0xff]  ;;  %v145_v54 = vld [vmem:[%s17512_s0 + $0x58] sm:$0xff]  ;;  %v9314_v55 = vpack.c.bf16 %v7843_v50, %v7842_v49  ;;  %v9261_v57 = vpack.c.bf16 %v7811_v52, %v7810_v47 }
  0x15   :  { %66 = vst [vmem:[#allocation2 + $0x140] sm:$0xff] %v9733_v4  ;;  %67 = vst [vmem:[#allocation2 + $0x148] sm:$0xff] %v9733_v4  ;;  %9257 = vmatprep.subr.bf16.mxu0 %v17522_v0  ;;  %v146_v56 = vld [vmem:[%s17512_s0 + $0x60] sm:$0xff]  ;;  %v7844_v58 = vld [vmem:[%s17511_s1 + $0x2f0] sm:$0xff] }
  0x16   :  { %68 = vst [vmem:[#allocation2 + $0x150] sm:$0xff] %v9733_v4  ;;  %69 = vst [vmem:[#allocation2 + $0x158] sm:$0xff] %v9733_v4  ;;  %9309 = vmatpush3.bf16.msra.mxu1 %v9306_v34  ;;  %v7845_v59 = vld [vmem:[%s17511_s1 + $0x2f8] sm:$0xff]  ;;  %v147_v60 = vld [vmem:[%s17512_s0 + $0x68] sm:$0xff] }
  0x17   :  { %70 = vst [vmem:[#allocation2 + $0x160] sm:$0xff] %v9733_v4  ;;  %71 = vst [vmem:[#allocation2 + $0x168] sm:$0xff] %v9733_v4  ;;  %9311 = vmatprep.subr.bf16.mxu1 %v9310_v46  ;;  %v7812_v61 = vld [vmem:[%s17511_s1 + $0x1f0] sm:$0xff]  ;;  %v7813_v62 = vld [vmem:[%s17511_s1 + $0x1f8] sm:$0xff]  ;;  %v9318_v63 = vpack.c.bf16 %v7845_v59, %v7844_v58 }
  0x18   :  { %72 = vst [vmem:[#allocation2 + $0x170] sm:$0xff] %v9733_v4  ;;  %73 = vst [vmem:[#allocation2 + $0x178] sm:$0xff] %v9733_v4  ;;  %9259 = vmatpush1.bf16.msra.mxu0 %v9258_v48  ;;  %v148_v1 = vld [vmem:[%s17512_s0 + $0x70] sm:$0xff]  ;;  %v149_v2 = vld [vmem:[%s17512_s0 + $0x78] sm:$0xff]  ;;  %v9264_v3 = vpack.c.bf16 %v7813_v62, %v7812_v61 }
  0x19   :  { %74 = vst [vmem:[#allocation2 + $0x180] sm:$0xff] %v9733_v4  ;;  %75 = vst [vmem:[#allocation2 + $0x188] sm:$0xff] %v9733_v4  ;;  %9260 = vmatprep.subr.bf16.mxu0 %v17522_v0  ;;  %v7814_v5 = vld [vmem:[%s17511_s1 + $0x200] sm:$0xff]  ;;  %v7815_v6 = vld [vmem:[%s17511_s1 + $0x208] sm:$0xff] }
  0x1a   :  { %76 = vst [vmem:[#allocation2 + $0x190] sm:$0xff] %v9733_v4  ;;  %77 = vst [vmem:[#allocation2 + $0x198] sm:$0xff] %v9733_v4  ;;  %9313 = vmatpush3.bf16.msra.mxu1 %v9310_v46  ;;  %v150_v7 = vld [vmem:[%s17512_s0 + $0x80] sm:$0xff]  ;;  %v151_v8 = vld [vmem:[%s17512_s0 + $0x88] sm:$0xff]  ;;  %v9267_v12 = vpack.c.bf16 %v7815_v6, %v7814_v5 }
  0x1b   :  { %78 = vst [vmem:[#allocation2 + $0x1a0] sm:$0xff] %v9733_v4  ;;  %79 = vst [vmem:[#allocation2 + $0x1a8] sm:$0xff] %v9733_v4  ;;  %9315 = vmatprep.subr.bf16.mxu1 %v9314_v55  ;;  %v456_v9 = vld [vmem:[%s17511_s1] sm:$0xff]  ;;  %v457_v10 = vld [vmem:[%s17511_s1 + $0x8] sm:$0xff] }
  0x1c   :  { %80 = vst [vmem:[#allocation2 + $0x1b0] sm:$0xff] %v9733_v4  ;;  %81 = vst [vmem:[#allocation2 + $0x1b8] sm:$0xff] %v9733_v4  ;;  %9262 = vmatpush1.bf16.msra.mxu0 %v9261_v57  ;;  %v152_v11 = vld [vmem:[%s17512_s0 + $0x90] sm:$0xff]  ;;  %v153_v13 = vld [vmem:[%s17512_s0 + $0x98] sm:$0xff]  ;;  %v9323_v18 = vpack.c.bf16 %v457_v10, %v456_v9 }
  0x1d   :  { %82 = vst [vmem:[#allocation2 + $0x1c0] sm:$0xff] %v9733_v4  ;;  %83 = vst [vmem:[#allocation2 + $0x1c8] sm:$0xff] %v9733_v4  ;;  %9263 = vmatprep.subr.bf16.mxu0 %v17522_v0  ;;  %v7816_v14 = vld [vmem:[%s17511_s1 + $0x210] sm:$0xff]  ;;  %v7817_v15 = vld [vmem:[%s17511_s1 + $0x218] sm:$0xff] }
  0x1e   :  { %84 = vst [vmem:[#allocation2 + $0x1d0] sm:$0xff] %v9733_v4  ;;  %85 = vst [vmem:[#allocation2 + $0x1d8] sm:$0xff] %v9733_v4  ;;  %9317 = vmatpush3.bf16.msra.mxu1 %v9314_v55  ;;  %v154_v16 = vld [vmem:[%s17512_s0 + $0xa0] sm:$0xff]  ;;  %v155_v19 = vld [vmem:[%s17512_s0 + $0xa8] sm:$0xff]  ;;  %v9270_v23 = vpack.c.bf16 %v7817_v15, %v7816_v14 }
  0x1f   :  { %86 = vst [vmem:[#allocation2 + $0x1e0] sm:$0xff] %v9733_v4  ;;  %87 = vst [vmem:[#allocation2 + $0x1e8] sm:$0xff] %v9733_v4  ;;  %9319 = vmatprep.subr.bf16.mxu1 %v9318_v63  ;;  %v458_v21 = vld [vmem:[%s17511_s1 + $0x10] sm:$0xff]  ;;  %v459_v22 = vld [vmem:[%s17511_s1 + $0x18] sm:$0xff] }
  0x20   :  { %88 = vst [vmem:[#allocation2 + $0x1f0] sm:$0xff] %v9733_v4  ;;  %89 = vst [vmem:[#allocation2 + $0x1f8] sm:$0xff] %v9733_v4  ;;  %9265 = vmatpush1.bf16.msra.mxu0 %v9264_v3  ;;  %v156_v24 = vld [vmem:[%s17512_s0 + $0xb0] sm:$0xff]  ;;  %v7818_v26 = vld [vmem:[%s17511_s1 + $0x220] sm:$0xff]  ;;  %v9326_v30 = vpack.c.bf16 %v459_v22, %v458_v21 }
  0x21   :  { %90 = vst [vmem:[#allocation2 + $0x200] sm:$0xff] %v9733_v4  ;;  %91 = vst [vmem:[#allocation2 + $0x208] sm:$0xff] %v9733_v4  ;;  %9266 = vmatprep.subr.bf16.mxu0 %v17522_v0  ;;  %v7819_v27 = vld [vmem:[%s17511_s1 + $0x228] sm:$0xff]  ;;  %v158_v28 = vld [vmem:[%s17512_s0 + $0xc0] sm:$0xff] }
  0x22   :  { %92 = vst [vmem:[#allocation2 + $0x210] sm:$0xff] %v9733_v4  ;;  %93 = vst [vmem:[#allocation2 + $0x218] sm:$0xff] %v9733_v4  ;;  %9321 = vmatpush3.bf16.msra.mxu1 %v9318_v63  ;;  %v159_v31 = vld [vmem:[%s17512_s0 + $0xc8] sm:$0xff]  ;;  %v7821_v37 = vld [vmem:[%s17511_s1 + $0x238] sm:$0xff] }
  0x23   :  { %94 = vst [vmem:[#allocation2 + $0x220] sm:$0xff] %v9733_v4  ;;  %95 = vst [vmem:[#allocation2 + $0x228] sm:$0xff] %v9733_v4  ;;  %9322 = vmatprep.subr.bf16.mxu1 %v17522_v0  ;;  %v461_v34 = vld [vmem:[%s17511_s1 + $0x28] sm:$0xff]  ;;  %v160_v38 = vld [vmem:[%s17512_s0 + $0xd0] sm:$0xff] }
  0x24   :  { %96 = vst [vmem:[#allocation2 + $0x230] sm:$0xff] %v9733_v4  ;;  %97 = vst [vmem:[#allocation2 + $0x238] sm:$0xff] %v9733_v4  ;;  %9268 = vmatpush1.bf16.msra.mxu0 %v9267_v12  ;;  %v161_v39 = vld [vmem:[%s17512_s0 + $0xd8] sm:$0xff]  ;;  %v163_v46 = vld [vmem:[%s17512_s0 + $0xe8] sm:$0xff] }
  0x25   :  { %98 = vst [vmem:[#allocation2 + $0x240] sm:$0xff] %v9733_v4  ;;  %99 = vst [vmem:[#allocation2 + $0x248] sm:$0xff] %v9733_v4  ;;  %9269 = vmatprep.subr.bf16.mxu0 %v17522_v0  ;;  %v7822_v48 = vld [vmem:[%s17511_s1 + $0x240] sm:$0xff]  ;;  %v7823_v49 = vld [vmem:[%s17511_s1 + $0x248] sm:$0xff] }
  0x26   :  { %100 = vst [vmem:[#allocation2 + $0x250] sm:$0xff] %v9733_v4  ;;  %101 = vst [vmem:[#allocation2 + $0x258] sm:$0xff] %v9733_v4  ;;  %v164_v50 = vld [vmem:[%s17512_s0 + $0xf0] sm:$0xff]  ;;  %v464_v55 = vld [vmem:[%s17511_s1 + $0x40] sm:$0xff]  ;;  %v9279_v58 = vpack.c.bf16 %v7823_v49, %v7822_v48 }
  0x27   :  { %102 = vst [vmem:[#allocation2 + $0x260] sm:$0xff] %v9733_v4  ;;  %103 = vst [vmem:[#allocation2 + $0x268] sm:$0xff] %v9733_v4  ;;  %v166_v57 = vld [vmem:[%s17512_s0 + $0x100] sm:$0xff]  ;;  %v167_v59 = vld [vmem:[%s17512_s0 + $0x108] sm:$0xff] }
  0x28   :  { %104 = vst [vmem:[#allocation2 + $0x270] sm:$0xff] %v9733_v4  ;;  %105 = vst [vmem:[#allocation2 + $0x278] sm:$0xff] %v9733_v4  ;;  %9271 = vmatpush1.bf16.msra.mxu0 %v9270_v23  ;;  %v7825_v61 = vld [vmem:[%s17511_s1 + $0x258] sm:$0xff]  ;;  %v466_v5 = vld [vmem:[%s17511_s1 + $0x50] sm:$0xff] }
  0x29   :  { %106 = vst [vmem:[#allocation2 + $0x280] sm:$0xff] %v9733_v4  ;;  %107 = vst [vmem:[#allocation2 + $0x288] sm:$0xff] %v9733_v4  ;;  %9272 = vmatprep.subr.bf16.mxu0 %v17522_v0  ;;  %v467_v6 = vld [vmem:[%s17511_s1 + $0x58] sm:$0xff]  ;;  %v171_v9 = vld [vmem:[%s17512_s0 + $0x128] sm:$0xff] }
  0x2a   :  { %108 = vst [vmem:[#allocation2 + $0x290] sm:$0xff] %v9733_v4  ;;  %109 = vst [vmem:[#allocation2 + $0x298] sm:$0xff] %v9733_v4  ;;  %v7826_v10 = vld [vmem:[%s17511_s1 + $0x260] sm:$0xff]  ;;  %v9338_v14 = vpack.c.bf16 %v467_v6, %v466_v5  ;;  %v7829_v21 = vld [vmem:[%s17511_s1 + $0x278] sm:$0xff] }
  0x2b   :  { %110 = vst [vmem:[#allocation2 + $0x2a0] sm:$0xff] %v9733_v4  ;;  %111 = vst [vmem:[#allocation2 + $0x2a8] sm:$0xff] %v9733_v4  ;;  %v468_v15 = vld [vmem:[%s17511_s1 + $0x60] sm:$0xff]  ;;  %v175_v23 = vld [vmem:[%s17512_s0 + $0x148] sm:$0xff] }
  0x2c   :  { %112 = vst [vmem:[#allocation2 + $0x2b0] sm:$0xff] %v9733_v4  ;;  %113 = vst [vmem:[#allocation2 + $0x2b8] sm:$0xff] %v9733_v4  ;;  %v174_v22 = vld [vmem:[%s17512_s0 + $0x140] sm:$0xff]  ;;  %v474_v48 = vld [vmem:[%s17511_s1 + $0x90] sm:$0xff] }
  0x2d   :  { %114 = vst [vmem:[#allocation2 + $0x2c0] sm:$0xff] %v9733_v4  ;;  %115 = vst [vmem:[#allocation2 + $0x2c8] sm:$0xff] %v9733_v4  ;;  %v475_v49 = vld [vmem:[%s17511_s1 + $0x98] sm:$0xff]  ;;  %v478_v6 = vld [vmem:[%s17511_s1 + $0xb0] sm:$0xff] }
  0x2e   :  { %116 = vst [vmem:[#allocation2 + $0x2d0] sm:$0xff] %v9733_v4  ;;  %117 = vst [vmem:[#allocation2 + $0x2d8] sm:$0xff] %v9733_v4  ;;  %v189_v5 = vld [vmem:[%s17512_s0 + $0x1b8] sm:$0xff] }
  0x2f   :  { %118 = vst [vmem:[#allocation2 + $0x2e0] sm:$0xff] %v9733_v4  ;;  %119 = vst [vmem:[#allocation2 + $0x2e8] sm:$0xff] %v9733_v4 }
  0x30   :  { %120 = vst [vmem:[#allocation2 + $0x2f0] sm:$0xff] %v9733_v4  ;;  %121 = vst [vmem:[#allocation2 + $0x2f8] sm:$0xff] %v9733_v4 }
  0x31   :  { %122 = vst [vmem:[#allocation2 + $0x300] sm:$0xff] %v9733_v4  ;;  %123 = vst [vmem:[#allocation2 + $0x308] sm:$0xff] %v9733_v4 }
  0x32   :  { %124 = vst [vmem:[#allocation2 + $0x310] sm:$0xff] %v9733_v4  ;;  %125 = vst [vmem:[#allocation2 + $0x318] sm:$0xff] %v9733_v4 }
  0x33   :  { %126 = vst [vmem:[#allocation2 + $0x320] sm:$0xff] %v9733_v4  ;;  %127 = vst [vmem:[#allocation2 + $0x328] sm:$0xff] %v9733_v4 }
  0x34   :  { %128 = vst [vmem:[#allocation2 + $0x330] sm:$0xff] %v9733_v4  ;;  %129 = vst [vmem:[#allocation2 + $0x338] sm:$0xff] %v9733_v4 }
  0x35   :  { %130 = vst [vmem:[#allocation2 + $0x340] sm:$0xff] %v9733_v4  ;;  %131 = vst [vmem:[#allocation2 + $0x348] sm:$0xff] %v9733_v4 }
  0x36   :  { %132 = vst [vmem:[#allocation2 + $0x350] sm:$0xff] %v9733_v4  ;;  %133 = vst [vmem:[#allocation2 + $0x358] sm:$0xff] %v9733_v4 }
  0x37   :  { %200 = vst.msk [vmem:[#allocation2 + $0x19] sm:$0xff] %vm199_vm0, %v134_v25  ;;  %201 = vst.msk [vmem:[#allocation2 + $0x21] sm:$0xff] %vm199_vm0, %v135_v29  ;;  %v157_v25 = vld [vmem:[%s17512_s0 + $0xb8] sm:$0xff] }
  0x38   :  { %202 = vst.msk [vmem:[#allocation2 + $0x31] sm:$0xff] %vm199_vm0, %v136_v32  ;;  %203 = vst.msk [vmem:[#allocation2 + $0x39] sm:$0xff] %vm199_vm0, %v137_v33  ;;  %v460_v33 = vld [vmem:[%s17511_s1 + $0x20] sm:$0xff] }
  0x39   :  { %204 = vst.msk [vmem:[#allocation2 + $0x49] sm:$0xff] %vm199_vm0, %v138_v35  ;;  %205 = vst.msk [vmem:[#allocation2 + $0x51] sm:$0xff] %vm199_vm0, %v139_v36  ;;  %v9273_v35 = vpack.c.bf16 %v7819_v27, %v7818_v26  ;;  %v7820_v36 = vld [vmem:[%s17511_s1 + $0x230] sm:$0xff] }
  0x3a   :  { %206 = vst.msk [vmem:[#allocation2 + $0x61] sm:$0xff] %vm199_vm0, %v140_v42  ;;  %207 = vst.msk [vmem:[#allocation2 + $0x69] sm:$0xff] %vm199_vm0, %v141_v43  ;;  %v9329_v42 = vpack.c.bf16 %v461_v34, %v460_v33  ;;  %v462_v43 = vld [vmem:[%s17511_s1 + $0x30] sm:$0xff]  ;;  %v9276_v47 = vpack.c.bf16 %v7821_v37, %v7820_v36  ;;  %v472_v37 = vld [vmem:[%s17511_s1 + $0x80] sm:$0xff] }
  0x3b   :  { %208 = vst.msk [vmem:[#allocation2 + $0x79] sm:$0xff] %vm199_vm0, %v142_v44  ;;  %209 = vst.msk [vmem:[#allocation2 + $0x81] sm:$0xff] %vm199_vm0, %v143_v45  ;;  %v463_v44 = vld [vmem:[%s17511_s1 + $0x38] sm:$0xff]  ;;  %v162_v45 = vld [vmem:[%s17512_s0 + $0xe0] sm:$0xff]  ;;  %9274 = vmatpush1.bf16.msra.mxu0 %v9273_v35 }
  0x3c   :  { %210 = vst.msk [vmem:[#allocation2 + $0x91] sm:$0xff] %vm199_vm0, %v144_v53  ;;  %211 = vst.msk [vmem:[#allocation2 + $0x99] sm:$0xff] %vm199_vm0, %v145_v54  ;;  %9275 = vmatprep.subr.bf16.mxu0 %v17522_v0  ;;  %v9332_v53 = vpack.c.bf16 %v463_v44, %v462_v43  ;;  %v165_v54 = vld [vmem:[%s17512_s0 + $0xf8] sm:$0xff]  ;;  %v470_v27 = vld [vmem:[%s17511_s1 + $0x70] sm:$0xff] }
  0x3d   :  { %212 = vst.msk [vmem:[#allocation2 + $0xa9] sm:$0xff] %vm199_vm0, %v146_v56  ;;  %213 = vst.msk [vmem:[#allocation2 + $0xb1] sm:$0xff] %vm199_vm0, %v147_v60  ;;  %v465_v56 = vld [vmem:[%s17511_s1 + $0x48] sm:$0xff]  ;;  %v7824_v60 = vld [vmem:[%s17511_s1 + $0x250] sm:$0xff] }
  0x3e   :  { %v632_v51 = vld [vmem:[#allocation2 + $0x1a] sm:$0xff]  ;;  %214 = vst.msk [vmem:[#allocation2 + $0xc1] sm:$0xff] %vm199_vm0, %v148_v1  ;;  %215 = vst.msk [vmem:[#allocation2 + $0xc9] sm:$0xff] %vm199_vm0, %v149_v2  ;;  %v633_v17 = vld [vmem:[#allocation2 + $0x22] sm:$0xff]  ;;  %v9335_v63 = vpack.c.bf16 %v465_v56, %v464_v55  ;;  %v9350_v56 = vpack.c.bf16 %v475_v49, %v474_v48 }
  0x3f   :  { %8506 = vmatprep.mubr.f32.mxu1 %v632_v51  ;;  %v10058_v4 = vld [vmem:[#allocation2 + $0x19] sm:$0xff]  ;;  %216 = vst.msk [vmem:[#allocation2 + $0xd9] sm:$0xff] %vm199_vm0, %v150_v7  ;;  %217 = vst.msk [vmem:[#allocation2 + $0xe1] sm:$0xff] %vm199_vm0, %v151_v8  ;;  %9277 = vmatpush1.bf16.msra.mxu0 %v9276_v47  ;;  %v168_v1 = vld [vmem:[%s17512_s0 + $0x110] sm:$0xff]  ;;  %v9282_v7 = vpack.c.bf16 %v7825_v61, %v7824_v60 }
  0x40   :  { %809 = vmatprep.mubr.f32.mxu0 %v10058_v4  ;;  %218 = vst.msk [vmem:[#allocation2 + $0xf1] sm:$0xff] %vm199_vm0, %v152_v11  ;;  %219 = vst.msk [vmem:[#allocation2 + $0xf9] sm:$0xff] %vm199_vm0, %v153_v13  ;;  %v634_v20 = vld [vmem:[#allocation2 + $0x32] sm:$0xff]  ;;  %8507 = vmatmul.mubr.f32.vlgmr.msra.gmra.mrb[0].mxu1 %v633_v17  ;;  %v635_v29 = vld [vmem:[#allocation2 + $0x3a] sm:$0xff] }
  0x41   :  { %220 = vst.msk [vmem:[#allocation2 + $0x109] sm:$0xff] %vm199_vm0, %v154_v16  ;;  %221 = vst.msk [vmem:[#allocation2 + $0x111] sm:$0xff] %vm199_vm0, %v155_v19  ;;  %9324 = vmatpush1.bf16.msra.mxu1 %v9323_v18  ;;  %8509 = vmatprep.mubr.f32.mxu1 %v634_v20  ;;  %v636_v32 = vld [vmem:[#allocation2 + $0x4a] sm:$0xff]  ;;  %v637_v40 = vld [vmem:[#allocation2 + $0x52] sm:$0xff] }
  0x42   :  { %222 = vst.msk [vmem:[#allocation2 + $0x121] sm:$0xff] %vm199_vm0, %v156_v24  ;;  %223 = vst.msk [vmem:[#allocation2 + $0x129] sm:$0xff] %vm199_vm0, %v157_v25  ;;  %9325 = vmatprep.subr.bf16.mxu1 %v17522_v0  ;;  %v638_v41 = vld [vmem:[#allocation2 + $0x62] sm:$0xff]  ;;  %v639_v51 = vld [vmem:[#allocation2 + $0x6a] sm:$0xff]  ;;  %9278 = vmatprep.subr.bf16.mxu0 %v17522_v0 }
  0x43   :  { %224 = vst.msk [vmem:[#allocation2 + $0x139] sm:$0xff] %vm199_vm0, %v158_v28  ;;  %225 = vst.msk [vmem:[#allocation2 + $0x141] sm:$0xff] %vm199_vm0, %v159_v31  ;;  %v640_v52 = vld [vmem:[#allocation2 + $0x7a] sm:$0xff]  ;;  %v641_v62 = vld [vmem:[#allocation2 + $0x82] sm:$0xff]  ;;  %9280 = vmatpush1.bf16.msra.mxu0 %v9279_v58 }
  0x44   :  { %8510 = vmatmul.mubr.f32.gmra.mrb[2].mxu1 %v635_v29  ;;  %226 = vst.msk [vmem:[#allocation2 + $0x151] sm:$0xff] %vm199_vm0, %v160_v38  ;;  %227 = vst.msk [vmem:[#allocation2 + $0x159] sm:$0xff] %vm199_vm0, %v161_v39  ;;  %v169_v2 = vld [vmem:[%s17512_s0 + $0x118] sm:$0xff]  ;;  %v170_v8 = vld [vmem:[%s17512_s0 + $0x120] sm:$0xff]  ;;  %9281 = vmatprep.subr.bf16.mxu0 %v17522_v0 }
  0x45   :  { %8512 = vmatprep.mubr.f32.mxu1 %v636_v32  ;;  %9327 = vmatpush1.bf16.msra.mxu1 %v9326_v30  ;;  %228 = vst.msk [vmem:[#allocation2 + $0x169] sm:$0xff] %vm199_vm0, %v162_v45  ;;  %229 = vst.msk [vmem:[#allocation2 + $0x171] sm:$0xff] %vm199_vm0, %v163_v46  ;;  %v642_v3 = vld [vmem:[#allocation2 + $0x92] sm:$0xff]  ;;  %v7827_v11 = vld [vmem:[%s17511_s1 + $0x268] sm:$0xff] }
  0x46   :  { %9328 = vmatprep.subr.bf16.mxu1 %v17522_v0  ;;  %230 = vst.msk [vmem:[#allocation2 + $0x181] sm:$0xff] %vm199_vm0, %v164_v50  ;;  %231 = vst.msk [vmem:[#allocation2 + $0x189] sm:$0xff] %vm199_vm0, %v165_v54  ;;  %v643_v12 = vld [vmem:[#allocation2 + $0x9a] sm:$0xff]  ;;  %v644_v13 = vld [vmem:[#allocation2 + $0xaa] sm:$0xff]  ;;  %v9285_v19 = vpack.c.bf16 %v7827_v11, %v7826_v10 }
  0x47   :  { %232 = vst.msk [vmem:[#allocation2 + $0x1c9] sm:$0xff] %vm199_vm0, %v166_v57  ;;  %233 = vst.msk [vmem:[#allocation2 + $0x1d1] sm:$0xff] %vm199_vm0, %v167_v59  ;;  %v469_v16 = vld [vmem:[%s17511_s1 + $0x68] sm:$0xff]  ;;  %v172_v17 = vld [vmem:[%s17512_s0 + $0x130] sm:$0xff]  ;;  %9283 = vmatpush1.bf16.msra.mxu0 %v9282_v7 }
  0x48   :  { %8513 = vmatmul.mubr.f32.gmra.mrb[4].mxu1 %v637_v40  ;;  %234 = vst.msk [vmem:[#allocation2 + $0x1e1] sm:$0xff] %vm199_vm0, %v168_v1  ;;  %235 = vst.msk [vmem:[#allocation2 + $0x1e9] sm:$0xff] %vm199_vm0, %v169_v2  ;;  %v173_v18 = vld [vmem:[%s17512_s0 + $0x138] sm:$0xff]  ;;  %v7828_v20 = vld [vmem:[%s17511_s1 + $0x270] sm:$0xff]  ;;  %9284 = vmatprep.subr.bf16.mxu0 %v17522_v0  ;;  %v9341_v26 = vpack.c.bf16 %v469_v16, %v468_v15 }
  0x49   :  { %8515 = vmatprep.mubr.f32.mxu1 %v638_v41  ;;  %9330 = vmatpush1.bf16.msra.mxu1 %v9329_v42  ;;  %236 = vst.msk [vmem:[#allocation2 + $0x1f9] sm:$0xff] %vm199_vm0, %v170_v8  ;;  %237 = vst.msk [vmem:[#allocation2 + $0x201] sm:$0xff] %vm199_vm0, %v171_v9  ;;  %v645_v24 = vld [vmem:[#allocation2 + $0xb2] sm:$0xff]  ;;  %v646_v25 = vld [vmem:[#allocation2 + $0xc2] sm:$0xff]  ;;  %v9288_v30 = vpack.c.bf16 %v7829_v21, %v7828_v20 }
  0x4a   :  { %9331 = vmatprep.subr.bf16.mxu1 %v17522_v0  ;;  %238 = vst.msk [vmem:[#allocation2 + $0x211] sm:$0xff] %vm199_vm0, %v172_v17  ;;  %239 = vst.msk [vmem:[#allocation2 + $0x219] sm:$0xff] %vm199_vm0, %v173_v18  ;;  %v471_v28 = vld [vmem:[%s17511_s1 + $0x78] sm:$0xff]  ;;  %v176_v29 = vld [vmem:[%s17512_s0 + $0x150] sm:$0xff] }
  0x4b   :  { %240 = vst.msk [vmem:[#allocation2 + $0x229] sm:$0xff] %vm199_vm0, %v174_v22  ;;  %241 = vst.msk [vmem:[#allocation2 + $0x231] sm:$0xff] %vm199_vm0, %v175_v23  ;;  %9286 = vmatpush1.bf16.msra.mxu0 %v9285_v19  ;;  %v177_v31 = vld [vmem:[%s17512_s0 + $0x158] sm:$0xff]  ;;  %v178_v32 = vld [vmem:[%s17512_s0 + $0x160] sm:$0xff]  ;;  %v9344_v34 = vpack.c.bf16 %v471_v28, %v470_v27 }
  0x4c   :  { %8516 = vmatmul.mubr.f32.gmra.mrb[6].mxu1 %v639_v51  ;;  %242 = vst.msk [vmem:[#allocation2 + $0x241] sm:$0xff] %vm199_vm0, %v176_v29  ;;  %9287 = vmatprep.subr.bf16.mxu0 %v17522_v0  ;;  %243 = vst.msk [vmem:[#allocation2 + $0x249] sm:$0xff] %vm199_vm0, %v177_v31  ;;  %v647_v33 = vld [vmem:[#allocation2 + $0xca] sm:$0xff]  ;;  %v648_v36 = vld [vmem:[#allocation2 + $0xda] sm:$0xff] }
  0x4d   :  { %8518 = vmatprep.mubr.f32.mxu1 %v640_v52  ;;  %9333 = vmatpush1.bf16.msra.mxu1 %v9332_v53  ;;  %v179_v35 = vld [vmem:[%s17512_s0 + $0x168] sm:$0xff]  ;;  %244 = vst.msk [vmem:[#allocation2 + $0x259] sm:$0xff] %vm199_vm0, %v178_v32  ;;  %v10300_v39 = vld [vmem:[#allocation2 + $0x18] sm:$0xff]  ;;  %v180_v40 = vld [vmem:[%s17512_s0 + $0x170] sm:$0xff] }
  0x4e   :  { %9334 = vmatprep.subr.bf16.mxu1 %v17522_v0  ;;  %v473_v38 = vld [vmem:[%s17511_s1 + $0x88] sm:$0xff]  ;;  %245 = vst.msk [vmem:[#allocation2 + $0x261] sm:$0xff] %vm199_vm0, %v179_v35  ;;  %v181_v41 = vld [vmem:[%s17512_s0 + $0x178] sm:$0xff]  ;;  %246 = vst.msk [vmem:[#allocation2 + $0x271] sm:$0xff] %vm199_vm0, %v180_v40 }
  0x4f   :  { %9289 = vmatpush1.bf16.msra.mxu0 %v9288_v30  ;;  %v10308_v42 = vld [vmem:[#allocation2 + $0x21] sm:$0xff]  ;;  %247 = vst.msk [vmem:[#allocation2 + $0x279] sm:$0xff] %vm199_vm0, %v181_v41  ;;  %v9347_v44 = vpack.c.bf16 %v473_v38, %v472_v37  ;;  %v650_v47 = vld [vmem:[#allocation2 + $0xf2] sm:$0xff]  ;;  %v652_v55 = vld [vmem:[#allocation2 + $0x10a] sm:$0xff] }
  0x50   :  { %8519 = vmatmul.mubr.f32.gmra.mrb[8].mxu1 %v641_v62  ;;  %v649_v43 = vld [vmem:[#allocation2 + $0xe2] sm:$0xff]  ;;  %v10331_v51 = vld [vmem:[#allocation2 + $0x31] sm:$0xff]  ;;  %v651_v54 = vld [vmem:[#allocation2 + $0xfa] sm:$0xff]  ;;  %255 = vst.msk [vmem:[#allocation2 + $0x2d9] sm:$0xff] %vm199_vm0, %v189_v5 }
  0x51   :  { %8521 = vmatprep.mubr.f32.mxu1 %v642_v3  ;;  %9336 = vmatpush1.bf16.msra.mxu1 %v9335_v63  ;;  %v182_v45 = vld [vmem:[%s17512_s0 + $0x180] sm:$0xff]  ;;  %v183_v46 = vld [vmem:[%s17512_s0 + $0x188] sm:$0xff]  ;;  %v184_v52 = vld [vmem:[%s17512_s0 + $0x190] sm:$0xff] }
  0x52   :  { %9337 = vmatprep.subr.bf16.mxu1 %v17522_v0  ;;  %810 = vmatmul.mubr.f32.vlgmr.msra.gmra.mrb[0].mxu0 %v10300_v39  ;;  %248 = vst.msk [vmem:[#allocation2 + $0x289] sm:$0xff] %vm199_vm0, %v182_v45  ;;  %249 = vst.msk [vmem:[#allocation2 + $0x291] sm:$0xff] %vm199_vm0, %v183_v46  ;;  %v10329_v50 = vld [vmem:[#allocation2 + $0x20] sm:$0xff]  ;;  %v185_v53 = vld [vmem:[%s17512_s0 + $0x198] sm:$0xff] }
  0x53   :  { %814 = vmatprep.mubr.f32.mxu0 %v10308_v42  ;;  %v476_v57 = vld [vmem:[%s17511_s1 + $0xa0] sm:$0xff]  ;;  %250 = vst.msk [vmem:[#allocation2 + $0x2a1] sm:$0xff] %vm199_vm0, %v184_v52  ;;  %251 = vst.msk [vmem:[#allocation2 + $0x2a9] sm:$0xff] %vm199_vm0, %v185_v53  ;;  %v477_v58 = vld [vmem:[%s17511_s1 + $0xa8] sm:$0xff] }
  0x54   :  { %8522 = vmatmul.mubr.f32.gmra.mrb[10].mxu1 %v643_v12  ;;  %v186_v59 = vld [vmem:[%s17512_s0 + $0x1a0] sm:$0xff]  ;;  %v187_v60 = vld [vmem:[%s17512_s0 + $0x1a8] sm:$0xff]  ;;  %v10356_v61 = vld [vmem:[#allocation2 + $0x30] sm:$0xff]  ;;  %v9353_v3 = vpack.c.bf16 %v477_v58, %v476_v57 }
  0x55   :  { %8524 = vmatprep.mubr.f32.mxu1 %v644_v13  ;;  %9339 = vmatpush1.bf16.msra.mxu1 %v9338_v14  ;;  %252 = vst.msk [vmem:[#allocation2 + $0x2b9] sm:$0xff] %vm199_vm0, %v186_v59  ;;  %253 = vst.msk [vmem:[#allocation2 + $0x2c1] sm:$0xff] %vm199_vm0, %v187_v60  ;;  %v10360_v62 = vld [vmem:[#allocation2 + $0x39] sm:$0xff]  ;;  %v188_v63 = vld [vmem:[%s17512_s0 + $0x1b0] sm:$0xff] }
  0x56   :  { %9340 = vmatprep.subr.bf16.mxu1 %v17522_v0  ;;  %815 = vmatmul.mubr.f32.gmra.mrb[2].mxu0 %v10329_v50  ;;  %v653_v1 = vld [vmem:[#allocation2 + $0x112] sm:$0xff]  ;;  %v654_v2 = vld [vmem:[#allocation2 + $0x122] sm:$0xff]  ;;  %254 = vst.msk [vmem:[#allocation2 + $0x2d1] sm:$0xff] %vm199_vm0, %v188_v63  ;;  %v655_v12 = vld [vmem:[#allocation2 + $0x12a] sm:$0xff] }
  0x57   :  { %819 = vmatprep.mubr.f32.mxu0 %v10331_v51  ;;  %v479_v7 = vld [vmem:[%s17511_s1 + $0xb8] sm:$0xff]  ;;  %v190_v8 = vld [vmem:[%s17512_s0 + $0x1c0] sm:$0xff]  ;;  %v191_v10 = vld [vmem:[%s17512_s0 + $0x1c8] sm:$0xff] }
  0x58   :  { %8525 = vmatmul.mubr.f32.gmra.mrb[12].mxu1 %v645_v24  ;;  %v10382_v9 = vld [vmem:[#allocation2 + $0x38] sm:$0xff]  ;;  %256 = vst.msk [vmem:[#allocation2 + $0x2e9] sm:$0xff] %vm199_vm0, %v190_v8  ;;  %v10388_v11 = vld [vmem:[#allocation2 + $0x49] sm:$0xff]  ;;  %257 = vst.msk [vmem:[#allocation2 + $0x2f1] sm:$0xff] %vm199_vm0, %v191_v10  ;;  %v9356_v13 = vpack.c.bf16 %v479_v7, %v478_v6 }
  0x59   :  { %8527 = vmatprep.mubr.f32.mxu1 %v646_v25  ;;  %9342 = vmatpush1.bf16.msra.mxu1 %v9341_v26  ;;  %v192_v14 = vld [vmem:[%s17512_s0 + $0x1d0] sm:$0xff]  ;;  %v193_v15 = vld [vmem:[%s17512_s0 + $0x1d8] sm:$0xff]  ;;  %v480_v17 = vld [vmem:[%s17511_s1 + $0xc0] sm:$0xff] }
  0x5a   :  { %9343 = vmatprep.subr.bf16.mxu1 %v17522_v0  ;;  %820 = vmatmul.mubr.f32.gmra.mrb[4].mxu0 %v10356_v61  ;;  %v656_v16 = vld [vmem:[#allocation2 + $0x13a] sm:$0xff]  ;;  %v481_v18 = vld [vmem:[%s17511_s1 + $0xc8] sm:$0xff]  ;;  %258 = vst.msk [vmem:[#allocation2 + $0x301] sm:$0xff] %vm199_vm0, %v192_v14  ;;  %259 = vst.msk [vmem:[#allocation2 + $0x309] sm:$0xff] %vm199_vm0, %v193_v15 }
  0x5b   :  { %824 = vmatprep.mubr.f32.mxu0 %v10360_v62  ;;  %v10408_v19 = vld [vmem:[#allocation2 + $0x48] sm:$0xff]  ;;  %v194_v20 = vld [vmem:[%s17512_s0 + $0x1e0] sm:$0xff]  ;;  %v10416_v23 = vld [vmem:[#allocation2 + $0x51] sm:$0xff]  ;;  %v9359_v25 = vpack.c.bf16 %v481_v18, %v480_v17 }
  0x5c   :  { %8528 = vmatmul.mubr.f32.gmra.mrb[14].mxu1 %v647_v33  ;;  %v195_v21 = vld [vmem:[%s17512_s0 + $0x1e8] sm:$0xff]  ;;  %260 = vst.msk [vmem:[#allocation2 + $0x319] sm:$0xff] %vm199_vm0, %v194_v20  ;;  %v658_v24 = vld [vmem:[#allocation2 + $0x152] sm:$0xff]  ;;  %v488_v30 = vld [vmem:[%s17511_s1 + $0x100] sm:$0xff] }
  0x5d   :  { %8530 = vmatprep.mubr.f32.mxu1 %v648_v36  ;;  %9345 = vmatpush1.bf16.msra.mxu1 %v9344_v34  ;;  %v657_v22 = vld [vmem:[#allocation2 + $0x142] sm:$0xff]  ;;  %261 = vst.msk [vmem:[#allocation2 + $0x321] sm:$0xff] %vm199_vm0, %v195_v21  ;;  %v482_v26 = vld [vmem:[%s17511_s1 + $0xd0] sm:$0xff]  ;;  %v483_v27 = vld [vmem:[%s17511_s1 + $0xd8] sm:$0xff] }
  0x5e   :  { %9346 = vmatprep.subr.bf16.mxu1 %v17522_v0  ;;  %825 = vmatmul.mubr.f32.gmra.mrb[6].mxu0 %v10382_v9  ;;  %v196_v28 = vld [vmem:[%s17512_s0 + $0x1f0] sm:$0xff]  ;;  %v197_v29 = vld [vmem:[%s17512_s0 + $0x1f8] sm:$0xff]  ;;  %v489_v32 = vld [vmem:[%s17511_s1 + $0x108] sm:$0xff]  ;;  %v9362_v36 = vpack.c.bf16 %v483_v27, %v482_v26 }
  0x5f   :  { %829 = vmatprep.mubr.f32.mxu0 %v10388_v11  ;;  %v10438_v31 = vld [vmem:[#allocation2 + $0x50] sm:$0xff]  ;;  %262 = vst.msk [vmem:[#allocation2 + $0x331] sm:$0xff] %vm199_vm0, %v196_v28  ;;  %263 = vst.msk [vmem:[#allocation2 + $0x339] sm:$0xff] %vm199_vm0, %v197_v29  ;;  %v10445_v33 = vld [vmem:[#allocation2 + $0x61] sm:$0xff]  ;;  %v9370_v34 = vpack.c.bf16 %v489_v32, %v488_v30 }
  0x60   :  { %8531 = vmatmul.mubr.f32.gmra.mrb[16].mxu1 %v649_v43  ;;  %v659_v35 = vld [vmem:[#allocation2 + $0x15a] sm:$0xff]  ;;  %v660_v37 = vld [vmem:[#allocation2 + $0x16a] sm:$0xff]  ;;  %v662_v46 = vld [vmem:[#allocation2 + $0x182] sm:$0xff] }
  0x61   :  { %8533 = vmatprep.mubr.f32.mxu1 %v650_v47  ;;  %9348 = vmatpush1.bf16.msra.mxu1 %v9347_v44  ;;  %v484_v38 = vld [vmem:[%s17511_s1 + $0xe0] sm:$0xff]  ;;  %v485_v40 = vld [vmem:[%s17511_s1 + $0xe8] sm:$0xff]  ;;  %v661_v44 = vld [vmem:[#allocation2 + $0x172] sm:$0xff] }
  0x62   :  { %9349 = vmatprep.subr.bf16.mxu1 %v17522_v0  ;;  %830 = vmatmul.mubr.f32.gmra.mrb[8].mxu0 %v10408_v19  ;;  %v10456_v41 = vld [vmem:[#allocation2 + $0x60] sm:$0xff]  ;;  %v10458_v43 = vld [vmem:[#allocation2 + $0x69] sm:$0xff]  ;;  %v9365_v45 = vpack.c.bf16 %v485_v40, %v484_v38  ;;  %v487_v48 = vld [vmem:[%s17511_s1 + $0xf8] sm:$0xff] }
  0x63   :  { %834 = vmatprep.mubr.f32.mxu0 %v10416_v23  ;;  %9371 = vmatprep.subr.bf16.mxu0 %v9370_v34  ;;  %v486_v47 = vld [vmem:[%s17511_s1 + $0xf0] sm:$0xff]  ;;  %v10469_v49 = vld [vmem:[#allocation2 + $0x68] sm:$0xff]  ;;  %v10471_v52 = vld [vmem:[#allocation2 + $0x79] sm:$0xff] }
  0x64   :  { %8534 = vmatmul.mubr.f32.gmra.mrb[18].mxu1 %v651_v54  ;;  %9373 = vmatpush3.bf16.msra.mxu0 %v9370_v34  ;;  %v663_v53 = vld [vmem:[#allocation2 + $0x18a] sm:$0xff]  ;;  %v9368_v54 = vpack.c.bf16 %v487_v48, %v486_v47  ;;  %v10482_v59 = vld [vmem:[#allocation2 + $0x78] sm:$0xff]  ;;  %v10484_v60 = vld [vmem:[#allocation2 + $0x81] sm:$0xff] }
  0x65   :  { %8536 = vmatprep.mubr.f32.mxu1 %v652_v55  ;;  %9351 = vmatpush1.bf16.msra.mxu1 %v9350_v56  ;;  %v490_v55 = vld [vmem:[%s17511_s1 + $0x110] sm:$0xff]  ;;  %v491_v56 = vld [vmem:[%s17511_s1 + $0x118] sm:$0xff]  ;;  %v492_v5 = vld [vmem:[%s17511_s1 + $0x120] sm:$0xff] }
  0x66   :  { %9352 = vmatprep.subr.bf16.mxu1 %v17522_v0  ;;  %835 = vmatmul.mubr.f32.gmra.mrb[10].mxu0 %v10438_v31  ;;  %v664_v57 = vld [vmem:[#allocation2 + $0x1ca] sm:$0xff]  ;;  %v9374_v58 = vpack.c.bf16 %v491_v56, %v490_v55  ;;  %v665_v63 = vld [vmem:[#allocation2 + $0x1d2] sm:$0xff]  ;;  %v668_v8 = vld [vmem:[#allocation2 + $0x1fa] sm:$0xff] }
  0x67   :  { %839 = vmatprep.mubr.f32.mxu0 %v10445_v33  ;;  %v667_v6 = vld [vmem:[#allocation2 + $0x1ea] sm:$0xff]  ;;  %v669_v14 = vld [vmem:[#allocation2 + $0x202] sm:$0xff]  ;;  %v670_v15 = vld [vmem:[#allocation2 + $0x212] sm:$0xff] }
  0x68   :  { %8537 = vmatmul.mubr.f32.gmra.mrb[20].mxu1 %v653_v1  ;;  %9375 = vmatprep.subr.bf16.mxu0 %v9374_v58  ;;  %v666_v1 = vld [vmem:[#allocation2 + $0x1e2] sm:$0xff]  ;;  %v671_v18 = vld [vmem:[#allocation2 + $0x21a] sm:$0xff]  ;;  %v672_v20 = vld [vmem:[#allocation2 + $0x22a] sm:$0xff] }
  0x69   :  { %8539 = vmatprep.mubr.f32.mxu1 %v654_v2  ;;  %9354 = vmatpush1.bf16.msra.mxu1 %v9353_v3  ;;  %v10489_v2 = vld [vmem:[#allocation2 + $0x80] sm:$0xff]  ;;  %v10491_v3 = vld [vmem:[#allocation2 + $0x91] sm:$0xff]  ;;  %v493_v7 = vld [vmem:[%s17511_s1 + $0x128] sm:$0xff] }
  0x6a   :  { %9355 = vmatprep.subr.bf16.mxu1 %v17522_v0  ;;  %840 = vmatmul.mubr.f32.gmra.mrb[12].mxu0 %v10456_v41  ;;  %v9378_v10 = vpack.c.bf16 %v493_v7, %v492_v5  ;;  %v10509_v17 = vld [vmem:[#allocation2 + $0xa9] sm:$0xff]  ;;  %v10521_v27 = vld [vmem:[#allocation2 + $0xc1] sm:$0xff]  ;;  %v495_v47 = vld [vmem:[%s17511_s1 + $0x138] sm:$0xff] }
  0x6b   :  { %844 = vmatprep.mubr.f32.mxu0 %v10458_v43  ;;  %9377 = vmatpush3.bf16.msra.mxu0 %v9374_v58  ;;  %v10513_v21 = vld [vmem:[#allocation2 + $0xa8] sm:$0xff]  ;;  %v10519_v26 = vld [vmem:[#allocation2 + $0xb0] sm:$0xff]  ;;  %v676_v29 = vld [vmem:[#allocation2 + $0x25a] sm:$0xff] }
  0x6c   :  { %8540 = vmatmul.mubr.f32.gmra.mrb[22].mxu1 %v655_v12  ;;  %v10501_v12 = vld [vmem:[#allocation2 + $0x90] sm:$0xff]  ;;  %9379 = vmatprep.subr.bf16.mxu0 %v9378_v10  ;;  %v10525_v30 = vld [vmem:[#allocation2 + $0xc0] sm:$0xff]  ;;  %v10561_v7 = vld [vmem:[#allocation2 + $0xf8] sm:$0xff] }
  0x6d   :  { %8542 = vmatprep.mubr.f32.mxu1 %v656_v16  ;;  %9357 = vmatpush1.bf16.msra.mxu1 %v9356_v13  ;;  %v10503_v13 = vld [vmem:[#allocation2 + $0x99] sm:$0xff]  ;;  %v675_v28 = vld [vmem:[#allocation2 + $0x24a] sm:$0xff]  ;;  %v677_v34 = vld [vmem:[#allocation2 + $0x262] sm:$0xff] }
  0x6e   :  { %9358 = vmatprep.subr.bf16.mxu1 %v17522_v0  ;;  %845 = vmatmul.mubr.f32.gmra.mrb[14].mxu0 %v10469_v49  ;;  %v10507_v16 = vld [vmem:[#allocation2 + $0x98] sm:$0xff]  ;;  %v10527_v32 = vld [vmem:[#allocation2 + $0xc9] sm:$0xff]  ;;  %v10549_v55 = vld [vmem:[#allocation2 + $0xe0] sm:$0xff] }
  0x6f   :  { %849 = vmatprep.mubr.f32.mxu0 %v10471_v52  ;;  %9381 = vmatpush3.bf16.msra.mxu0 %v9378_v10  ;;  %v679_v38 = vld [vmem:[#allocation2 + $0x27a] sm:$0xff]  ;;  %v680_v40 = vld [vmem:[#allocation2 + $0x28a] sm:$0xff]  ;;  %v681_v48 = vld [vmem:[#allocation2 + $0x292] sm:$0xff] }
  0x70   :  { %8543 = vmatmul.mubr.f32.gmra.mrb[24].mxu1 %v657_v22  ;;  %v10515_v22 = vld [vmem:[#allocation2 + $0xb1] sm:$0xff]  ;;  %v684_v58 = vld [vmem:[#allocation2 + $0x2ba] sm:$0xff]  ;;  %v685_v5 = vld [vmem:[#allocation2 + $0x2c2] sm:$0xff] }
  0x71   :  { %8545 = vmatprep.mubr.f32.mxu1 %v658_v24  ;;  %9360 = vmatpush1.bf16.msra.mxu1 %v9359_v25  ;;  %v673_v24 = vld [vmem:[#allocation2 + $0x232] sm:$0xff]  ;;  %v674_v25 = vld [vmem:[#allocation2 + $0x242] sm:$0xff]  ;;  %v687_v10 = vld [vmem:[#allocation2 + $0x2da] sm:$0xff] }
  0x72   :  { %9361 = vmatprep.subr.bf16.mxu1 %v17522_v0  ;;  %850 = vmatmul.mubr.f32.gmra.mrb[16].mxu0 %v10482_v59  ;;  %v10551_v56 = vld [vmem:[#allocation2 + $0xf1] sm:$0xff] }
  0x73   :  { %854 = vmatprep.mubr.f32.mxu0 %v10484_v60 }
  0x74   :  { %8546 = vmatmul.mubr.f32.gmra.mrb[26].mxu1 %v659_v35  ;;  %v678_v35 = vld [vmem:[#allocation2 + $0x272] sm:$0xff] }
  0x75   :  { %8548 = vmatprep.mubr.f32.mxu1 %v660_v37  ;;  %9363 = vmatpush1.bf16.msra.mxu1 %v9362_v36  ;;  %v10531_v36 = vld [vmem:[#allocation2 + $0xc8] sm:$0xff]  ;;  %v10533_v37 = vld [vmem:[#allocation2 + $0xd9] sm:$0xff] }
  0x76   :  { %9364 = vmatprep.subr.bf16.mxu1 %v17522_v0  ;;  %855 = vmatmul.mubr.f32.gmra.mrb[18].mxu0 %v10489_v2 }
  0x77   :  { %859 = vmatprep.mubr.f32.mxu0 %v10491_v3 }
  0x78   :  { %8549 = vmatmul.mubr.f32.gmra.mrb[28].mxu1 %v661_v44  ;;  %v10537_v44 = vld [vmem:[#allocation2 + $0xd8] sm:$0xff] }
  0x79   :  { %8551 = vmatprep.mubr.f32.mxu1 %v662_v46  ;;  %9366 = vmatpush1.bf16.msra.mxu1 %v9365_v45  ;;  %v10539_v45 = vld [vmem:[#allocation2 + $0xe1] sm:$0xff]  ;;  %v494_v46 = vld [vmem:[%s17511_s1 + $0x130] sm:$0xff] }
  0x7a   :  { %9367 = vmatprep.subr.bf16.mxu1 %v17522_v0  ;;  %860 = vmatmul.mubr.f32.gmra.mrb[20].mxu0 %v10501_v12 }
  0x7b   :  { %864 = vmatprep.mubr.f32.mxu0 %v10503_v13 }
  0x7c   :  { %8552 = vmatmul.mubr.f32.gmra.mrb[30].mxu1 %v663_v53  ;;  %v9382_v53 = vpack.c.bf16 %v495_v47, %v494_v46  ;;  %v694_v46 = vld [vmem:[#allocation2 + $0x332] sm:$0xff]  ;;  %v10585_v47 = vld [vmem:[#allocation2 + $0x128] sm:$0xff] }
  0x7d   :  { %8554 = vmatprep.mubr.f32.mxu1 %v664_v57  ;;  %9369 = vmatpush1.bf16.msra.mxu1 %v9368_v54  ;;  %v682_v54 = vld [vmem:[#allocation2 + $0x2a2] sm:$0xff]  ;;  %v683_v57 = vld [vmem:[#allocation2 + $0x2aa] sm:$0xff] }
  0x7e   :  { %9402 = vmatprep.subr.bf16.mxu1 %v17522_v0  ;;  %865 = vmatmul.mubr.f32.gmra.mrb[22].mxu0 %v10507_v16 }
  0x7f   :  { %869 = vmatprep.mubr.f32.mxu0 %v10509_v17  ;;  %9383 = vmatprep.subr.bf16.mxu0 %v9382_v53 }
  0x80   :  { %8555 = vmatmul.mubr.f32.gmra.mrb[32].mxu1 %v665_v63  ;;  %9385 = vmatpush3.bf16.msra.mxu0 %v9382_v53  ;;  %v10555_v63 = vld [vmem:[#allocation2 + $0xf0] sm:$0xff]  ;;  %v695_v53 = vld [vmem:[#allocation2 + $0x33a] sm:$0xff] }
  0x81   :  { %8557 = vmatprep.mubr.f32.mxu1 %v666_v1  ;;  %v10557_v1 = vld [vmem:[#allocation2 + $0xf9] sm:$0xff] }
  0x82   :  { %870 = vmatmul.mubr.f32.gmra.mrb[24].mxu0 %v10513_v21 }
  0x83   :  { %874 = vmatprep.mubr.f32.mxu0 %v10515_v22 }
  0x84   :  { %8558 = vmatmul.mubr.f32.gmra.mrb[34].mxu1 %v667_v6  ;;  %v686_v6 = vld [vmem:[#allocation2 + $0x2d2] sm:$0xff] }
  0x85   :  { %8560 = vmatprep.mubr.f32.mxu1 %v668_v8  ;;  %v10563_v8 = vld [vmem:[#allocation2 + $0x109] sm:$0xff] }
  0x86   :  { %875 = vmatmul.mubr.f32.gmra.mrb[26].mxu0 %v10519_v26 }
  0x87   :  { %879 = vmatprep.mubr.f32.mxu0 %v10521_v27 }
  0x88   :  { %8561 = vmatmul.mubr.f32.gmra.mrb[36].mxu1 %v669_v14  ;;  %v688_v14 = vld [vmem:[#allocation2 + $0x2ea] sm:$0xff] }
  0x89   :  { %8563 = vmatprep.mubr.f32.mxu1 %v670_v15  ;;  %v10567_v15 = vld [vmem:[#allocation2 + $0x108] sm:$0xff] }
  0x8a   :  { %880 = vmatmul.mubr.f32.gmra.mrb[28].mxu0 %v10525_v30 }
  0x8b   :  { %884 = vmatprep.mubr.f32.mxu0 %v10527_v32 }
  0x8c   :  { %8564 = vmatmul.mubr.f32.gmra.mrb[38].mxu1 %v671_v18  ;;  %v10569_v18 = vld [vmem:[#allocation2 + $0x111] sm:$0xff] }
  0x8d   :  { %8566 = vmatprep.mubr.f32.mxu1 %v672_v20  ;;  %v689_v20 = vld [vmem:[#allocation2 + $0x2f2] sm:$0xff] }
  0x8e   :  { %885 = vmatmul.mubr.f32.gmra.mrb[30].mxu0 %v10531_v36 }
  0x8f   :  { %889 = vmatprep.mubr.f32.mxu0 %v10533_v37 }
  0x90   :  { %8567 = vmatmul.mubr.f32.gmra.mrb[40].mxu1 %v673_v24  ;;  %v690_v24 = vld [vmem:[#allocation2 + $0x302] sm:$0xff] }
  0x91   :  { %8569 = vmatprep.mubr.f32.mxu1 %v674_v25  ;;  %v10573_v25 = vld [vmem:[#allocation2 + $0x110] sm:$0xff] }
  0x92   :  { %890 = vmatmul.mubr.f32.gmra.mrb[32].mxu0 %v10537_v44 }
  0x93   :  { %894 = vmatprep.mubr.f32.mxu0 %v10539_v45 }
  0x94   :  { %8570 = vmatmul.mubr.f32.gmra.mrb[42].mxu1 %v675_v28  ;;  %v10575_v28 = vld [vmem:[#allocation2 + $0x121] sm:$0xff] }
  0x95   :  { %8572 = vmatprep.mubr.f32.mxu1 %v676_v29  ;;  %v691_v29 = vld [vmem:[#allocation2 + $0x30a] sm:$0xff] }
  0x96   :  { %895 = vmatmul.mubr.f32.gmra.mrb[34].mxu0 %v10549_v55 }
  0x97   :  { %899 = vmatprep.mubr.f32.mxu0 %v10551_v56 }
  0x98   :  { %8573 = vmatmul.mubr.f32.gmra.mrb[44].mxu1 %v677_v34  ;;  %v692_v34 = vld [vmem:[#allocation2 + $0x31a] sm:$0xff] }
  0x99   :  { %8575 = vmatprep.mubr.f32.mxu1 %v678_v35  ;;  %v10579_v35 = vld [vmem:[#allocation2 + $0x120] sm:$0xff] }
  0x9a   :  { %900 = vmatmul.mubr.f32.gmra.mrb[36].mxu0 %v10555_v63 }
  0x9b   :  { %904 = vmatprep.mubr.f32.mxu0 %v10557_v1 }
  0x9c   :  { %8576 = vmatmul.mubr.f32.gmra.mrb[46].mxu1 %v679_v38  ;;  %v10581_v38 = vld [vmem:[#allocation2 + $0x129] sm:$0xff] }
  0x9d   :  { %8578 = vmatprep.mubr.f32.mxu1 %v680_v40  ;;  %v693_v40 = vld [vmem:[#allocation2 + $0x322] sm:$0xff] }
  0x9e   :  { %905 = vmatmul.mubr.f32.gmra.mrb[38].mxu0 %v10561_v7 }
  0x9f   :  { %909 = vmatprep.mubr.f32.mxu0 %v10563_v8 }
  0xa0   :  { %8579 = vmatmul.mubr.f32.gmra.mrb[48].mxu1 %v681_v48  ;;  %v10587_v48 = vld [vmem:[#allocation2 + $0x139] sm:$0xff] }
  0xa1   :  { %8581 = vmatprep.mubr.f32.mxu1 %v682_v54  ;;  %v328_v54 = vld [vmem:[#allocation2 + $0x1] sm:$0xff] }
  0xa2   :  { %910 = vmatmul.mubr.f32.gmra.mrb[40].mxu0 %v10567_v15 }
  0xa3   :  { %914 = vmatprep.mubr.f32.mxu0 %v10569_v18 }
  0xa4   :  { %8582 = vmatmul.mubr.f32.gmra.mrb[50].mxu1 %v683_v57  ;;  %v7846_v57 = vld [vmem:[%s17511_s1 + $0x300] sm:$0xff] }
  0xa5   :  { %8584 = vmatprep.mubr.f32.mxu1 %v684_v58  ;;  %v7847_v58 = vld [vmem:[%s17511_s1 + $0x308] sm:$0xff] }
  0xa6   :  { %915 = vmatmul.mubr.f32.gmra.mrb[42].mxu0 %v10573_v25 }
  0xa7   :  { %919 = vmatprep.mubr.f32.mxu0 %v10575_v28 }
  0xa8   :  { %8585 = vmatmul.mubr.f32.gmra.mrb[52].mxu1 %v685_v5  ;;  %v10597_v5 = vld [vmem:[#allocation2 + $0x138] sm:$0xff] }
  0xa9   :  { %8587 = vmatprep.mubr.f32.mxu1 %v686_v6  ;;  %v10599_v6 = vld [vmem:[#allocation2 + $0x141] sm:$0xff] }
  0xaa   :  { %920 = vmatmul.mubr.f32.gmra.mrb[44].mxu0 %v10579_v35 }
  0xab   :  { %924 = vmatprep.mubr.f32.mxu0 %v10581_v38 }
  0xac   :  { %8588 = vmatmul.mubr.f32.gmra.mrb[54].mxu1 %v687_v10  ;;  %v496_v10 = vld [vmem:[%s17511_s1 + $0x140] sm:$0xff] }
  0xad   :  { %8590 = vmatprep.mubr.f32.mxu1 %v688_v14  ;;  %v497_v14 = vld [vmem:[%s17511_s1 + $0x148] sm:$0xff] }
  0xae   :  { %925 = vmatmul.mubr.f32.gmra.mrb[46].mxu0 %v10585_v47 }
  0xaf   :  { %929 = vmatprep.mubr.f32.mxu0 %v10587_v48 }
  0xb0   :  { %8591 = vmatmul.mubr.f32.gmra.mrb[56].mxu1 %v689_v20  ;;  %v9403_v20 = vpack.c.bf16 %v7847_v58, %v7846_v57  ;;  %v7850_v58 = vld [vmem:[%s17511_s1 + $0x320] sm:$0xff] }
  0xb1   :  { %8593 = vmatprep.mubr.f32.mxu1 %v690_v24  ;;  %v9386_v24 = vpack.c.bf16 %v497_v14, %v496_v10  ;;  %v7851_v10 = vld [vmem:[%s17511_s1 + $0x328] sm:$0xff]  ;;  %v10631_v14 = vld [vmem:[#allocation2 + $0x150] sm:$0xff] }
  0xb2   :  { %930 = vmatmul.mubr.f32.gmra.mrb[48].mxu0 %v10597_v5 }
  0xb3   :  { %934 = vmatprep.mubr.f32.mxu0 %v10599_v6  ;;  %9387 = vmatprep.subr.bf16.mxu0 %v9386_v24 }
  0xb4   :  { %8594 = vmatmul.mubr.f32.gmra.mrb[58].mxu1 %v691_v29  ;;  %v329_v29 = vld [vmem:[#allocation2 + $0x9] sm:$0xff]  ;;  %9389 = vmatpush3.bf16.msra.mxu0 %v9386_v24  ;;  %v9409_v24 = vpack.c.bf16 %v7851_v10, %v7850_v58  ;;  %v7854_v58 = vld [vmem:[%s17511_s1 + $0x340] sm:$0xff] }
  0xb5   :  { %8596 = vmatprep.mubr.f32.mxu1 %v692_v34  ;;  %v7848_v34 = vld [vmem:[%s17511_s1 + $0x310] sm:$0xff]  ;;  %v7855_v10 = vld [vmem:[%s17511_s1 + $0x348] sm:$0xff] }
  0xb8   :  { %8597 = vmatmul.mubr.f32.gmra.mrb[60].mxu1 %v693_v40  ;;  %v7849_v40 = vld [vmem:[%s17511_s1 + $0x318] sm:$0xff] }
  0xb9   :  { %8599 = vmatprep.mubr.f32.mxu1 %v694_v46  ;;  %v10615_v46 = vld [vmem:[#allocation2 + $0x140] sm:$0xff]  ;;  %v9406_v57 = vpack.c.bf16 %v7849_v40, %v7848_v34  ;;  %v7853_v34 = vld [vmem:[%s17511_s1 + $0x338] sm:$0xff] }
  0xba   :  { %935 = vmatmul.mubr.f32.gmra.mrb[50].mxu0 %v10615_v46  ;;  %v10646_v40 = vld [vmem:[#allocation2 + $0x158] sm:$0xff] }
  0xbc   :  { %8600 = vmatmul.mubr.f32.gmra.mrb[62].mxu1 %v695_v53  ;;  %v10617_v53 = vld [vmem:[#allocation2] sm:$0xff] }
  0xbd   :  { %1579 = vmatprep.mubr.f32.mxu1 %v328_v54  ;;  %17723 = vst [vmem:[#allocation3_spill] sm:$0xff] %v10617_v53  ;;  %v10620_v54 = vld [vmem:[#allocation2 + $0x151] sm:$0xff] }
  0xbe   :  { %939 = vmatprep.mubr.f32.mxu0 %v10620_v54 }
  0xbf   :  { %940 = vmatmul.mubr.f32.gmra.mrb[52].mxu0 %v10631_v14 }
  0xc0   :  { %1580 = vmatmul.mubr.f32.vlgmr.msra.gmra.mrb[64].mxu1 %v10617_v53 }
  0xc1   :  { %9404 = vmatpush1.bf16.msra.mxu1 %v9403_v20  ;;  %1584 = vmatprep.mubr.f32.mxu1 %v329_v29  ;;  %v10634_v20 = vld [vmem:[#allocation2 + $0x159] sm:$0xff]  ;;  %v7852_v29 = vld [vmem:[%s17511_s1 + $0x330] sm:$0xff] }
  0xc2   :  { %9405 = vmatprep.subr.bf16.mxu1 %v17522_v0  ;;  %944 = vmatprep.mubr.f32.mxu0 %v10634_v20 }
  0xc3   :  { %945 = vmatmul.mubr.f32.gmra.mrb[54].mxu0 %v10646_v40 }
  0xc4   :  { %1585 = vmatmul.mubr.f32.gmra.mrb[66].mxu1 %v10617_v53  ;;  %v7859_v53 = vld [vmem:[%s17511_s1 + $0x368] sm:$0xff] }
  0xc5   :  { %1589 = vmatprep.mubr.f32.mxu1 %v10058_v4  ;;  %9407 = vmatpush1.bf16.msra.mxu1 %v9406_v57  ;;  %v10649_v4 = vld [vmem:[#allocation2 + $0x169] sm:$0xff]  ;;  %v9412_v57 = vpack.c.bf16 %v7853_v34, %v7852_v29  ;;  %v7857_v34 = vld [vmem:[%s17511_s1 + $0x358] sm:$0xff] }
  0xc6   :  { %9408 = vmatprep.subr.bf16.mxu1 %v17522_v0  ;;  %949 = vmatprep.mubr.f32.mxu0 %v10649_v4  ;;  %v7856_v29 = vld [vmem:[%s17511_s1 + $0x350] sm:$0xff] }
  0xc8   :  { %1590 = vmatmul.mubr.f32.gmra.mrb[68].mxu1 %v10300_v39  ;;  %v10661_v39 = vld [vmem:[#allocation2 + $0x168] sm:$0xff] }
  0xc9   :  { %1594 = vmatprep.mubr.f32.mxu1 %v10308_v42  ;;  %9410 = vmatpush1.bf16.msra.mxu1 %v9409_v24  ;;  %v10664_v42 = vld [vmem:[#allocation2 + $0x171] sm:$0xff]  ;;  %v9415_v24 = vpack.c.bf16 %v7855_v10, %v7854_v58  ;;  %v9418_v58 = vpack.c.bf16 %v7857_v34, %v7856_v29  ;;  %v500_v29 = vld [vmem:[%s17511_s1 + $0x160] sm:$0xff]  ;;  %v501_v34 = vld [vmem:[%s17511_s1 + $0x168] sm:$0xff] }
  0xca   :  { %9411 = vmatprep.subr.bf16.mxu1 %v17522_v0  ;;  %17724 = vst [vmem:[#allocation4_spill] sm:$0xff] %v10664_v42  ;;  %950 = vmatmul.mubr.f32.gmra.mrb[56].mxu0 %v10661_v39  ;;  %v499_v10 = vld [vmem:[%s17511_s1 + $0x158] sm:$0xff] }
  0xcb   :  { %954 = vmatprep.mubr.f32.mxu0 %v10664_v42 }
  0xcc   :  { %1595 = vmatmul.mubr.f32.gmra.mrb[70].mxu1 %v10329_v50  ;;  %v10676_v50 = vld [vmem:[#allocation2 + $0x170] sm:$0xff] }
  0xcd   :  { %1599 = vmatprep.mubr.f32.mxu1 %v10331_v51  ;;  %9413 = vmatpush1.bf16.msra.mxu1 %v9412_v57  ;;  %17725 = vst [vmem:[#allocation5_spill] sm:$0xff] %v10676_v50  ;;  %v598_v51 = vld [vmem:[#allocation2 + $0x181] sm:$0xff]  ;;  %v498_v57 = vld [vmem:[%s17511_s1 + $0x150] sm:$0xff] }
  0xce   :  { %9414 = vmatprep.subr.bf16.mxu1 %v17522_v0  ;;  %955 = vmatmul.mubr.f32.gmra.mrb[58].mxu0 %v10676_v50  ;;  %v9390_v42 = vpack.c.bf16 %v499_v10, %v498_v57  ;;  %v9394_v50 = vpack.c.bf16 %v501_v34, %v500_v29  ;;  %v7861_v57 = vld [vmem:[%s17511_s1 + $0x378] sm:$0xff]  ;;  %v535_v10 = vld [vmem:[#allocation2 + $0x188] sm:$0xff]  ;;  %v7864_v29 = vld [vmem:[%s17511_s1 + $0x390] sm:$0xff] }
  0xcf   :  { %959 = vmatprep.mubr.f32.mxu0 %v598_v51  ;;  %v17726_v51 = vmov 0.0|0.0  }
  0xd0   :  { %1600 = vmatmul.mubr.f32.gmra.mrb[72].mxu1 %v10356_v61  ;;  %v7858_v61 = vld [vmem:[%s17511_s1 + $0x360] sm:$0xff]  ;;  %9391 = vmatprep.subr.bf16.mxu0 %v9390_v42 }
  0xd1   :  { %1604 = vmatprep.mubr.f32.mxu1 %v10360_v62  ;;  %9416 = vmatpush1.bf16.msra.mxu1 %v9415_v24  ;;  %v534_v62 = vld [vmem:[#allocation2 + $0x180] sm:$0xff]  ;;  %v599_v24 = vld [vmem:[#allocation2 + $0x189] sm:$0xff] }
  0xd2   :  { %9417 = vmatprep.subr.bf16.mxu1 %v17522_v0  ;;  %v9421_v0 = vpack.c.bf16 %v7859_v53, %v7858_v61  ;;  %960 = vmatmul.mubr.f32.gmra.mrb[60].mxu0 %v534_v62  ;;  %v502_v53 = vld [vmem:[%s17511_s1 + $0x170] sm:$0xff] }
  0xd3   :  { %964 = vmatprep.mubr.f32.mxu0 %v599_v24  ;;  %9393 = vmatpush3.bf16.msra.mxu0 %v9390_v42  ;;  %v7863_v42 = vld [vmem:[%s17511_s1 + $0x388] sm:$0xff] }
  0xd4   :  { %1605 = vmatmul.mubr.f32.gmra.mrb[74].mxu1 %v10382_v9  ;;  %v7860_v9 = vld [vmem:[%s17511_s1 + $0x370] sm:$0xff]  ;;  %9395 = vmatprep.subr.bf16.mxu0 %v9394_v50  ;;  %v10727_v24 = vld [vmem:[#allocation2 + $0x1c8] sm:$0xff] }
  0xd5   :  { %1609 = vmatprep.mubr.f32.mxu1 %v10388_v11  ;;  %9419 = vmatpush1.bf16.msra.mxu1 %v9418_v58  ;;  %v10710_v11 = vld [vmem:[#allocation2 + $0x1c9] sm:$0xff]  ;;  %v503_v58 = vld [vmem:[%s17511_s1 + $0x178] sm:$0xff]  ;;  %v9424_v61 = vpack.c.bf16 %v7861_v57, %v7860_v9  ;;  %v7866_v9 = vld [vmem:[%s17511_s1 + $0x3a0] sm:$0xff] }
  0xd6   :  { %9420 = vmatprep.subr.bf16.mxu1 %v17726_v51  ;;  %v9398_v62 = vpack.c.bf16 %v503_v58, %v502_v53  ;;  %965 = vmatmul.mubr.f32.gmra.mrb[62].mxu0 %v535_v10  ;;  %v7867_v57 = vld [vmem:[%s17511_s1 + $0x3a8] sm:$0xff]  ;;  %v10769_v58 = vld [vmem:[#allocation2 + $0x1f9] sm:$0xff] }
  0xd7   :  { %969 = vmatprep.mubr.f32.mxu0 %v10710_v11  ;;  %9397 = vmatpush3.bf16.msra.mxu0 %v9394_v50  ;;  %v7865_v50 = vld [vmem:[%s17511_s1 + $0x398] sm:$0xff]  ;;  %v9433_v10 = vpack.c.bf16 %v7867_v57, %v7866_v9  ;;  %v10766_v53 = vld [vmem:[#allocation2 + $0x1e8] sm:$0xff] }
  0xd8   :  { %1610 = vmatmul.mubr.f32.gmra.mrb[76].mxu1 %v10408_v19  ;;  %v7862_v19 = vld [vmem:[%s17511_s1 + $0x380] sm:$0xff]  ;;  %9399 = vmatprep.subr.bf16.mxu0 %v9398_v62  ;;  %v9430_v34 = vpack.c.bf16 %v7865_v50, %v7864_v29  ;;  %v7872_v50 = vld [vmem:[%s17511_s1 + $0x3d0] sm:$0xff] }
  0xd9   :  { %1614 = vmatprep.mubr.f32.mxu1 %v10416_v23  ;;  %9422 = vmatpush1.bf16.msra.mxu1 %v9421_v0  ;;  %v10730_v0 = vld [vmem:[#allocation2 + $0x1d1] sm:$0xff]  ;;  %v9427_v23 = vpack.c.bf16 %v7863_v42, %v7862_v19  ;;  %v10809_v19 = vld [vmem:[#allocation2 + $0x229] sm:$0xff]  ;;  %v7870_v42 = vld [vmem:[%s17511_s1 + $0x3c0] sm:$0xff] }
  0xda   :  { %9423 = vmatprep.subr.bf16.mxu1 %v17726_v51  ;;  %970 = vmatmul.mubr.f32.gmra.mrb[64].mxu0 %v10727_v24  ;;  %v10848_v29 = vld [vmem:[#allocation2 + $0x259] sm:$0xff] }
  0xdb   :  { %974 = vmatprep.mubr.f32.mxu0 %v10730_v0  ;;  %9401 = vmatpush3.bf16.msra.mxu0 %v9398_v62  ;;  %v10797_v62 = vld [vmem:[#allocation2 + $0x210] sm:$0xff]  ;;  %v10882_v57 = vld [vmem:[#allocation2 + $0x279] sm:$0xff] }
  0xdc   :  { %1615 = vmatmul.mubr.f32.gmra.mrb[78].mxu1 %v10438_v31  ;;  %v10742_v31 = vld [vmem:[#allocation2 + $0x1d0] sm:$0xff] }
  0xdd   :  { %1619 = vmatprep.mubr.f32.mxu1 %v10445_v33  ;;  %9425 = vmatpush1.bf16.msra.mxu1 %v9424_v61  ;;  %v10745_v33 = vld [vmem:[#allocation2 + $0x1e1] sm:$0xff]  ;;  %v7868_v61 = vld [vmem:[%s17511_s1 + $0x3b0] sm:$0xff] }
  0xde   :  { %9426 = vmatprep.subr.bf16.mxu1 %v17726_v51  ;;  %975 = vmatmul.mubr.f32.gmra.mrb[66].mxu0 %v10742_v31 }
  0xdf   :  { %979 = vmatprep.mubr.f32.mxu0 %v10745_v33 }
  0xe0   :  { %1620 = vmatmul.mubr.f32.gmra.mrb[80].mxu1 %v10456_v41  ;;  %v10757_v41 = vld [vmem:[#allocation2 + $0x1e0] sm:$0xff] }
  0xe1   :  { %1624 = vmatprep.mubr.f32.mxu1 %v10458_v43  ;;  %9428 = vmatpush1.bf16.msra.mxu1 %v9427_v23  ;;  %v10760_v43 = vld [vmem:[#allocation2 + $0x1e9] sm:$0xff]  ;;  %v10836_v23 = vld [vmem:[#allocation2 + $0x240] sm:$0xff] }
  0xe2   :  { %9429 = vmatprep.subr.bf16.mxu1 %v17726_v51  ;;  %980 = vmatmul.mubr.f32.gmra.mrb[68].mxu0 %v10757_v41 }
  0xe3   :  { %984 = vmatprep.mubr.f32.mxu0 %v10760_v43 }
  0xe4   :  { %1625 = vmatmul.mubr.f32.gmra.mrb[82].mxu1 %v10469_v49  ;;  %v10775_v49 = vld [vmem:[#allocation2 + $0x1f8] sm:$0xff] }
  0xe5   :  { %1629 = vmatprep.mubr.f32.mxu1 %v10471_v52  ;;  %9431 = vmatpush1.bf16.msra.mxu1 %v9430_v34  ;;  %v10778_v52 = vld [vmem:[#allocation2 + $0x201] sm:$0xff] }
  0xe6   :  { %9432 = vmatprep.subr.bf16.mxu1 %v17726_v51  ;;  %985 = vmatmul.mubr.f32.gmra.mrb[70].mxu0 %v10766_v53 }
  0xe7   :  { %989 = vmatprep.mubr.f32.mxu0 %v10769_v58 }
  0xe8   :  { %1630 = vmatmul.mubr.f32.gmra.mrb[84].mxu1 %v10482_v59  ;;  %v10783_v59 = vld [vmem:[#allocation2 + $0x200] sm:$0xff] }
  0xe9   :  { %1634 = vmatprep.mubr.f32.mxu1 %v10484_v60  ;;  %9434 = vmatpush1.bf16.msra.mxu1 %v9433_v10  ;;  %v10786_v60 = vld [vmem:[#allocation2 + $0x211] sm:$0xff] }
  0xea   :  { %9435 = vmatprep.subr.bf16.mxu1 %v17726_v51  ;;  %990 = vmatmul.mubr.f32.gmra.mrb[72].mxu0 %v10775_v49  ;;  %v10890_v10 = vld [vmem:[#allocation2 + $0x278] sm:$0xff] }
  0xeb   :  { %994 = vmatprep.mubr.f32.mxu0 %v10778_v52  ;;  %17727 = vst [vmem:[#allocation6_spill] sm:$0xff] %v10890_v10 }
  0xec   :  { %1635 = vmatmul.mubr.f32.gmra.mrb[86].mxu1 %v10489_v2  ;;  %v7869_v2 = vld [vmem:[%s17511_s1 + $0x3b8] sm:$0xff] }
  0xed   :  { %1639 = vmatprep.mubr.f32.mxu1 %v10491_v3  ;;  %v9436_v3 = vpack.c.bf16 %v7869_v2, %v7868_v61  ;;  %v10895_v2 = vld [vmem:[#allocation2 + $0x289] sm:$0xff] }
  0xee   :  { %995 = vmatmul.mubr.f32.gmra.mrb[74].mxu0 %v10783_v59  ;;  %17728 = vst [vmem:[#allocation7_spill] sm:$0xff] %v10895_v2 }
  0xef   :  { %999 = vmatprep.mubr.f32.mxu0 %v10786_v60  ;;  %9437 = vmatpush1.bf16.msra.mxu1 %v9436_v3 }
  0xf0   :  { %1640 = vmatmul.mubr.f32.gmra.mrb[88].mxu1 %v10501_v12  ;;  %v10800_v12 = vld [vmem:[#allocation2 + $0x219] sm:$0xff]  ;;  %9438 = vmatprep.subr.bf16.mxu1 %v17726_v51 }
  0xf1   :  { %1644 = vmatprep.mubr.f32.mxu1 %v10503_v13  ;;  %v10806_v13 = vld [vmem:[#allocation2 + $0x218] sm:$0xff] }
  0xf2   :  { %1000 = vmatmul.mubr.f32.gmra.mrb[76].mxu0 %v10797_v62 }
  0xf3   :  { %1004 = vmatprep.mubr.f32.mxu0 %v10800_v12 }
  0xf4   :  { %1645 = vmatmul.mubr.f32.gmra.mrb[90].mxu1 %v10507_v16  ;;  %v10814_v16 = vld [vmem:[#allocation2 + $0x228] sm:$0xff] }
  0xf5   :  { %1649 = vmatprep.mubr.f32.mxu1 %v10509_v17  ;;  %v10817_v17 = vld [vmem:[#allocation2 + $0x231] sm:$0xff] }
  0xf6   :  { %1005 = vmatmul.mubr.f32.gmra.mrb[78].mxu0 %v10806_v13 }
  0xf7   :  { %1009 = vmatprep.mubr.f32.mxu0 %v10809_v19 }
  0xf8   :  { %1650 = vmatmul.mubr.f32.gmra.mrb[92].mxu1 %v10513_v21  ;;  %v10822_v21 = vld [vmem:[#allocation2 + $0x230] sm:$0xff] }
  0xf9   :  { %1654 = vmatprep.mubr.f32.mxu1 %v10515_v22  ;;  %v10825_v22 = vld [vmem:[#allocation2 + $0x241] sm:$0xff] }
  0xfa   :  { %1010 = vmatmul.mubr.f32.gmra.mrb[80].mxu0 %v10814_v16 }
  0xfb   :  { %1014 = vmatprep.mubr.f32.mxu0 %v10817_v17 }
  0xfc   :  { %1655 = vmatmul.mubr.f32.gmra.mrb[94].mxu1 %v10519_v26  ;;  %v7871_v26 = vld [vmem:[%s17511_s1 + $0x3c8] sm:$0xff] }
  0xfd   :  { %1659 = vmatprep.mubr.f32.mxu1 %v10521_v27  ;;  %v9439_v27 = vpack.c.bf16 %v7871_v26, %v7870_v42  ;;  %v10907_v42 = vld [vmem:[#allocation2 + $0x291] sm:$0xff] }
  0xfe   :  { %1015 = vmatmul.mubr.f32.gmra.mrb[82].mxu0 %v10822_v21  ;;  %17730 = vst [vmem:[#allocation9_spill] sm:$0xff] %v10907_v42 }
  0xff   :  { %1019 = vmatprep.mubr.f32.mxu0 %v10825_v22  ;;  %9440 = vmatpush1.bf16.msra.mxu1 %v9439_v27  ;;  %v10919_v27 = vld [vmem:[#allocation2 + $0x2a1] sm:$0xff] }
 0x100   :  { %1660 = vmatmul.mubr.f32.gmra.mrb[96].mxu1 %v10525_v30  ;;  %v10839_v30 = vld [vmem:[#allocation2 + $0x249] sm:$0xff]  ;;  %9441 = vmatprep.subr.bf16.mxu1 %v17726_v51  ;;  %17732 = vst [vmem:[#allocation11_spill] sm:$0xff] %v10919_v27 }
 0x101   :  { %1664 = vmatprep.mubr.f32.mxu1 %v10527_v32  ;;  %v10845_v32 = vld [vmem:[#allocation2 + $0x248] sm:$0xff] }
 0x102   :  { %1020 = vmatmul.mubr.f32.gmra.mrb[84].mxu0 %v10836_v23 }
 0x103   :  { %1024 = vmatprep.mubr.f32.mxu0 %v10839_v30 }
 0x104   :  { %1665 = vmatmul.mubr.f32.gmra.mrb[98].mxu1 %v10531_v36  ;;  %v10853_v36 = vld [vmem:[#allocation2 + $0x258] sm:$0xff] }
 0x105   :  { %1669 = vmatprep.mubr.f32.mxu1 %v10533_v37  ;;  %v10856_v37 = vld [vmem:[#allocation2 + $0x261] sm:$0xff] }
 0x106   :  { %1025 = vmatmul.mubr.f32.gmra.mrb[86].mxu0 %v10845_v32 }
 0x107   :  { %1029 = vmatprep.mubr.f32.mxu0 %v10848_v29 }
 0x108   :  { %1670 = vmatmul.mubr.f32.gmra.mrb[100].mxu1 %v10537_v44  ;;  %v10861_v44 = vld [vmem:[#allocation2 + $0x260] sm:$0xff] }
 0x109   :  { %1674 = vmatprep.mubr.f32.mxu1 %v10539_v45  ;;  %v10864_v45 = vld [vmem:[#allocation2 + $0x271] sm:$0xff] }
 0x10a   :  { %1030 = vmatmul.mubr.f32.gmra.mrb[88].mxu0 %v10853_v36 }
 0x10b   :  { %1034 = vmatprep.mubr.f32.mxu0 %v10856_v37 }
 0x10c   :  { %1675 = vmatmul.mubr.f32.gmra.mrb[102].mxu1 %v10549_v55  ;;  %v7873_v55 = vld [vmem:[%s17511_s1 + $0x3d8] sm:$0xff] }
 0x10d   :  { %1679 = vmatprep.mubr.f32.mxu1 %v10551_v56  ;;  %v9442_v56 = vpack.c.bf16 %v7873_v55, %v7872_v50 }
 0x10e   :  { %1035 = vmatmul.mubr.f32.gmra.mrb[90].mxu0 %v10861_v44 }
 0x10f   :  { %1039 = vmatprep.mubr.f32.mxu0 %v10864_v45  ;;  %9443 = vmatpush1.bf16.msra.mxu1 %v9442_v56 }
 0x110   :  { %1680 = vmatmul.mubr.f32.gmra.mrb[104].mxu1 %v10555_v63  ;;  %v10877_v63 = vld [vmem:[#allocation2 + $0x270] sm:$0xff]  ;;  %9444 = vmatprep.subr.bf16.mxu1 %v17726_v51 }
 0x111   :  { %1684 = vmatprep.mubr.f32.mxu1 %v10557_v1 }
 0x112   :  { %1040 = vmatmul.mubr.f32.gmra.mrb[92].mxu0 %v10877_v63 }
 0x113   :  { %v10874_v34 = vpop.f32.mrb[0].mxu1  ;;  %1044 = vmatprep.mubr.f32.mxu0 %v10882_v57 }
 0x114   :  { %v10879_v9 = vpop.f32.mrb[1].mxu1  ;;  %1685 = vmatmul.mubr.f32.gmra.mrb[106].mxu1 %v10561_v7 }
 0x115   :  { %1689 = vmatprep.mubr.f32.mxu1 %v10563_v8  ;;  %v10902_v8 = vld [vmem:[#allocation2 + $0x288] sm:$0xff] }
 0x116   :  { %1045 = vmatmul.mubr.f32.gmra.mrb[94].mxu0 %v10890_v10  ;;  %17729 = vst [vmem:[#allocation8_spill] sm:$0xff] %v10902_v8  ;;  %v10995_v10 = vld [vmem:[#allocation2 + $0x2d9] sm:$0xff] }
 0x117   :  { %v10887_v1 = vpop.f32.mrb[2].mxu1  ;;  %1049 = vmatprep.mubr.f32.mxu0 %v10895_v2  ;;  %17743 = vst [vmem:[#allocation22_spill] sm:$0xff] %v10995_v10 }
 0x118   :  { %v10892_v61 = vpop.f32.mrb[3].mxu1  ;;  %1690 = vmatmul.mubr.f32.gmra.mrb[108].mxu1 %v10567_v15 }
 0x119   :  { %1694 = vmatprep.mubr.f32.mxu1 %v10569_v18  ;;  %v10914_v18 = vld [vmem:[#allocation2 + $0x290] sm:$0xff] }
 0x11a   :  { %1050 = vmatmul.mubr.f32.gmra.mrb[96].mxu0 %v10902_v8  ;;  %17731 = vst [vmem:[#allocation10_spill] sm:$0xff] %v10914_v18  ;;  %v10990_v8 = vld [vmem:[#allocation2 + $0x2d0] sm:$0xff] }
 0x11b   :  { %v10899_v7 = vpop.f32.mrb[4].mxu1  ;;  %1054 = vmatprep.mubr.f32.mxu0 %v10907_v42  ;;  %v10937_v42 = vld [vmem:[#allocation2 + $0x2a9] sm:$0xff]  ;;  %17742 = vst [vmem:[#allocation21_spill] sm:$0xff] %v10990_v8 }
 0x11c   :  { %v10904_v3 = vpop.f32.mrb[5].mxu1  ;;  %1695 = vmatmul.mubr.f32.gmra.mrb[110].mxu1 %v10573_v25  ;;  %v7874_v25 = vld [vmem:[%s17511_s1 + $0x3e0] sm:$0xff]  ;;  %17734 = vst [vmem:[#allocation13_spill] sm:$0xff] %v10937_v42 }
 0x11d   :  { %1699 = vmatprep.mubr.f32.mxu1 %v10575_v28  ;;  %v7875_v28 = vld [vmem:[%s17511_s1 + $0x3e8] sm:$0xff] }
 0x11e   :  { %v9445_v50 = vpack.c.bf16 %v7875_v28, %v7874_v25  ;;  %1055 = vmatmul.mubr.f32.gmra.mrb[98].mxu0 %v10914_v18  ;;  %v10945_v25 = vld [vmem:[#allocation2 + $0x2a8] sm:$0xff] }
 0x11f   :  { %v10911_v15 = vpop.f32.mrb[6].mxu1  ;;  %1059 = vmatprep.mubr.f32.mxu0 %v10919_v27  ;;  %17735 = vst [vmem:[#allocation14_spill] sm:$0xff] %v10945_v25 }
 0x120   :  { %v10916_v26 = vpop.f32.mrb[7].mxu1  ;;  %1700 = vmatmul.mubr.f32.gmra.mrb[112].mxu1 %v10579_v35  ;;  %v10932_v35 = vld [vmem:[#allocation2 + $0x2a0] sm:$0xff] }
 0x121   :  { %1704 = vmatprep.mubr.f32.mxu1 %v10581_v38  ;;  %17733 = vst [vmem:[#allocation12_spill] sm:$0xff] %v10932_v35  ;;  %9446 = vmatpush1.bf16.msra.mxu1 %v9445_v50  ;;  %v10950_v50 = vld [vmem:[#allocation2 + $0x2b9] sm:$0xff] }
 0x122   :  { %9447 = vmatprep.subr.bf16.mxu1 %v17726_v51  ;;  %1060 = vmatmul.mubr.f32.gmra.mrb[100].mxu0 %v10932_v35  ;;  %17736 = vst [vmem:[#allocation15_spill] sm:$0xff] %v10950_v50 }
 0x123   :  { %v10929_v55 = vpop.f32.mrb[8].mxu1  ;;  %1064 = vmatprep.mubr.f32.mxu0 %v10937_v42  ;;  %v10962_v42 = vld [vmem:[#allocation2 + $0x2c1] sm:$0xff] }
 0x124   :  { %v10934_v56 = vpop.f32.mrb[9].mxu1  ;;  %1705 = vmatmul.mubr.f32.gmra.mrb[114].mxu1 %v10585_v47  ;;  %17738 = vst [vmem:[#allocation17_spill] sm:$0xff] %v10962_v42 }
 0x125   :  { %1709 = vmatprep.mubr.f32.mxu1 %v10587_v48  ;;  %v10957_v48 = vld [vmem:[#allocation2 + $0x2b8] sm:$0xff] }
 0x126   :  { %1065 = vmatmul.mubr.f32.gmra.mrb[102].mxu0 %v10945_v25  ;;  %17737 = vst [vmem:[#allocation16_spill] sm:$0xff] %v10957_v48 }
 0x127   :  { %v10942_v38 = vpop.f32.mrb[10].mxu1  ;;  %1069 = vmatprep.mubr.f32.mxu0 %v10950_v50  ;;  %v10974_v50 = vld [vmem:[#allocation2 + $0x2d1] sm:$0xff] }
 0x128   :  { %v10947_v28 = vpop.f32.mrb[11].mxu1  ;;  %1710 = vmatmul.mubr.f32.gmra.mrb[116].mxu1 %v10597_v5  ;;  %17740 = vst [vmem:[#allocation19_spill] sm:$0xff] %v10974_v50 }
 0x129   :  { %1714 = vmatprep.mubr.f32.mxu1 %v10599_v6  ;;  %v10969_v6 = vld [vmem:[#allocation2 + $0x2c0] sm:$0xff] }
 0x12a   :  { %1070 = vmatmul.mubr.f32.gmra.mrb[104].mxu0 %v10957_v48  ;;  %17739 = vst [vmem:[#allocation18_spill] sm:$0xff] %v10969_v6  ;;  %v811_v48 = vpop.f32.mrb[0].mxu0 }
 0x12b   :  { %v10954_v47 = vpop.f32.mrb[12].mxu1  ;;  %1074 = vmatprep.mubr.f32.mxu0 %v10962_v42  ;;  %v10984_v27 = vadd.f32 %v10879_v9, %v811_v48 }
 0x12c   :  { %v10959_v35 = vpop.f32.mrb[13].mxu1  ;;  %1715 = vmatmul.mubr.f32.gmra.mrb[118].mxu1 %v10615_v46  ;;  %v7876_v46 = vld [vmem:[%s17511_s1 + $0x3f0] sm:$0xff] }
 0x12d   :  { %1719 = vmatprep.mubr.f32.mxu1 %v10620_v54  ;;  %v7877_v54 = vld [vmem:[%s17511_s1 + $0x3f8] sm:$0xff]  ;;  %17741 = vst [vmem:[#allocation20_spill] sm:$0xff] %v10984_v27 }
 0x12e   :  { %v9448_v42 = vpack.c.bf16 %v7877_v54, %v7876_v46  ;;  %1075 = vmatmul.mubr.f32.gmra.mrb[106].mxu0 %v10969_v6  ;;  %v11025_v6 = vld [vmem:[#allocation2 + $0x2f1] sm:$0xff] }
 0x12f   :  { %v10966_v5 = vpop.f32.mrb[14].mxu1  ;;  %1079 = vmatprep.mubr.f32.mxu0 %v10974_v50 }
 0x130   :  { %v10971_v25 = vpop.f32.mrb[15].mxu1  ;;  %1720 = vmatmul.mubr.f32.gmra.mrb[120].mxu1 %v10631_v14  ;;  %v813_v14 = vpop.f32.mrb[1].mxu0 }
 0x131   :  { %1724 = vmatprep.mubr.f32.mxu1 %v10634_v20  ;;  %9449 = vmatpush1.bf16.msra.mxu1 %v9448_v42  ;;  %v816_v20 = vpop.f32.mrb[2].mxu0  ;;  %v11005_v42 = vld [vmem:[#allocation2 + $0x2d8] sm:$0xff] }
 0x132   :  { %v10999_v9 = vadd.f32 %v10874_v34, %v816_v20  ;;  %1080 = vmatmul.mubr.f32.gmra.mrb[108].mxu0 %v10990_v8  ;;  %v818_v48 = vpop.f32.mrb[3].mxu0  ;;  %17745 = vst [vmem:[#allocation24_spill] sm:$0xff] %v11005_v42 }
 0x133   :  { %v10987_v18 = vpop.f32.mrb[16].mxu1  ;;  %1084 = vmatprep.mubr.f32.mxu0 %v10995_v10  ;;  %v821_v14 = vpop.f32.mrb[4].mxu0  ;;  %v360_v48 = vld [vmem:[#allocation2 + $0x1b1] sm:$0xff]  ;;  %v11020_v10 = vld [vmem:[#allocation2 + $0x2e8] sm:$0xff] }
 0x134   :  { %v10992_v2 = vpop.f32.mrb[17].mxu1  ;;  %1725 = vmatmul.mubr.f32.gmra.mrb[122].mxu1 %v10646_v40  ;;  %17744 = vst [vmem:[#allocation23_spill] sm:$0xff] %v10999_v9  ;;  %v11010_v40 = vld [vmem:[#allocation2 + $0x2e9] sm:$0xff]  ;;  %v11014_v34 = vadd.f32 %v10892_v61, %v821_v14  ;;  %v823_v20 = vpop.f32.mrb[5].mxu0  ;;  %17749 = vst [vmem:[#allocation26_spill] sm:$0xff] %v11020_v10  ;;  %v7878_v61 = vld [vmem:[%s17511_s1 + $0x400] sm:$0xff] }
 0x135   :  { %1729 = vmatprep.mubr.f32.mxu1 %v10649_v4  ;;  %17746 = vst [vmem:[#allocation25_spill] sm:$0xff] %v11010_v40  ;;  %v17747_v4 = vld [vmem:[#allocation4_spill] sm:$0xff]  ;;  %v11042_v9 = vld [vmem:[#allocation2 + $0x2f0] sm:$0xff] }
 0x136   :  { %17748 = vst [vmem:[#allocation4_spill] sm:$0xff] %v11014_v34  ;;  %1085 = vmatmul.mubr.f32.gmra.mrb[110].mxu0 %v11005_v42  ;;  %v7879_v14 = vld [vmem:[%s17511_s1 + $0x408] sm:$0xff]  ;;  %v361_v42 = vld [vmem:[#allocation2 + $0x1b9] sm:$0xff]  ;;  %17754 = vst [vmem:[#allocation29_spill] sm:$0xff] %v11042_v9 }
 0x137   :  { %v11002_v46 = vpop.f32.mrb[18].mxu1  ;;  %1089 = vmatprep.mubr.f32.mxu0 %v11010_v40  ;;  %v11033_v20 = vpack.c.bf16 %v7879_v14, %v7878_v61  ;;  %v11048_v61 = vld [vmem:[#allocation2 + $0x301] sm:$0xff] }
 0x138   :  { %v11007_v54 = vpop.f32.mrb[19].mxu1  ;;  %1730 = vmatmul.mubr.f32.gmra.mrb[124].mxu1 %v10661_v39  ;;  %v17750_v39 = vld [vmem:[#allocation5_spill] sm:$0xff] }
 0x139   :  { %1734 = vmatprep.mubr.f32.mxu1 %v17747_v4  ;;  %17751 = vst [vmem:[#allocation5_spill] sm:$0xff] %v11025_v6  ;;  %v826_v4 = vpop.f32.mrb[6].mxu0  ;;  %9451 = vmatprep.subr.bf16.mxu0 %v11033_v20 }
 0x13a   :  { %v11036_v40 = vadd.f32 %v10887_v1, %v826_v4  ;;  %1090 = vmatmul.mubr.f32.gmra.mrb[112].mxu0 %v11020_v10 }
 0x13b   :  { %v11017_v8 = vpop.f32.mrb[20].mxu1  ;;  %1094 = vmatprep.mubr.f32.mxu0 %v11025_v6  ;;  %v11057_v6 = vld [vmem:[#allocation2 + $0x300] sm:$0xff] }
 0x13c   :  { %v11022_v50 = vpop.f32.mrb[21].mxu1  ;;  %1735 = vmatmul.mubr.f32.gmra.mrb[126].mxu1 %v17750_v39  ;;  %17752 = vst [vmem:[#allocation27_spill] sm:$0xff] %v11036_v40  ;;  %v828_v39 = vpop.f32.mrb[7].mxu0  ;;  %17757 = vst [vmem:[#allocation30_spill] sm:$0xff] %v11057_v6  ;;  %v11062_v40 = vld [vmem:[#allocation2 + $0x309] sm:$0xff] }
 0x13d   :  { %1739 = vmatprep.mubr.f32.mxu1 %v360_v48  ;;  %v17755_v48 = vld [vmem:[#allocation3_spill] sm:$0xff]  ;;  %v831_v1 = vpop.f32.mrb[8].mxu0  ;;  %17758 = vst [vmem:[#allocation31_spill] sm:$0xff] %v11062_v40 }
 0x13e   :  { %17756 = vst [vmem:[#allocation3_spill] sm:$0xff] %v11048_v61  ;;  %v11051_v14 = vadd.f32 %v10904_v3, %v831_v1  ;;  %1095 = vmatmul.mubr.f32.gmra.mrb[114].mxu0 %v11042_v9  ;;  %v833_v4 = vpop.f32.mrb[9].mxu0 }
 0x13f   :  { %v11039_v34 = vpop.f32.mrb[22].mxu1  ;;  %1099 = vmatprep.mubr.f32.mxu0 %v11048_v61  ;;  %v11072_v4 = vld [vmem:[#allocation2 + $0x308] sm:$0xff] }
 0x140   :  { %17753 = vst [vmem:[#allocation28_spill] sm:$0xff] %v11039_v34  ;;  %v11045_v27 = vpop.f32.mrb[23].mxu1  ;;  %1740 = vmatmul.mubr.f32.gmra.mrb[128].mxu1 %v17755_v48  ;;  %v836_v34 = vpop.f32.mrb[10].mxu0  ;;  %17759 = vst [vmem:[#allocation32_spill] sm:$0xff] %v11072_v4 }
 0x141   :  { %1744 = vmatprep.mubr.f32.mxu1 %v361_v42  ;;  %v11066_v3 = vadd.f32 %v10899_v7, %v836_v34  ;;  %v838_v42 = vpop.f32.mrb[11].mxu0 }
 0x142   :  { %1100 = vmatmul.mubr.f32.gmra.mrb[116].mxu0 %v11057_v6  ;;  %v841_v9 = vpop.f32.mrb[12].mxu0  ;;  %v11087_v42 = vld [vmem:[#allocation2 + $0x318] sm:$0xff] }
 0x143   :  { %v11054_v39 = vpop.f32.mrb[24].mxu1  ;;  %1104 = vmatprep.mubr.f32.mxu0 %v11062_v40  ;;  %v843_v7 = vpop.f32.mrb[13].mxu0  ;;  %17761 = vst [vmem:[#allocation34_spill] sm:$0xff] %v11087_v42 }
 0x144   :  { %v11059_v10 = vpop.f32.mrb[25].mxu1  ;;  %1745 = vmatmul.mubr.f32.gmra.mrb[130].mxu1 %v17755_v48  ;;  %v11077_v48 = vld [vmem:[#allocation2 + $0x319] sm:$0xff]  ;;  %v846_v6 = vpop.f32.mrb[14].mxu0 }
 0x145   :  { %1749 = vmatprep.mubr.f32.mxu1 %v10710_v11  ;;  %17760 = vst [vmem:[#allocation33_spill] sm:$0xff] %v11077_v48  ;;  %v11081_v11 = vadd.f32 %v10916_v26, %v841_v9  ;;  %v848_v26 = vpop.f32.mrb[15].mxu0  ;;  %v11102_v7 = vld [vmem:[#allocation2 + $0x320] sm:$0xff] }
 0x146   :  { %1105 = vmatmul.mubr.f32.gmra.mrb[118].mxu0 %v11072_v4  ;;  %17763 = vst [vmem:[#allocation36_spill] sm:$0xff] %v11102_v7  ;;  %v851_v4 = vpop.f32.mrb[16].mxu0  ;;  %v566_v26 = vld [vmem:[#allocation2 + $0x330] sm:$0xff] }
 0x147   :  { %v11069_v1 = vpop.f32.mrb[26].mxu1  ;;  %1109 = vmatprep.mubr.f32.mxu0 %v11077_v48 }
 0x148   :  { %v11074_v61 = vpop.f32.mrb[27].mxu1  ;;  %1750 = vmatmul.mubr.f32.gmra.mrb[132].mxu1 %v10727_v24  ;;  %v11092_v24 = vld [vmem:[#allocation2 + $0x321] sm:$0xff] }
 0x149   :  { %1754 = vmatprep.mubr.f32.mxu1 %v10730_v0  ;;  %17762 = vst [vmem:[#allocation35_spill] sm:$0xff] %v11092_v24  ;;  %v11096_v0 = vadd.f32 %v10911_v15, %v846_v6  ;;  %v853_v15 = vpop.f32.mrb[17].mxu0 }
 0x14a   :  { %1110 = vmatmul.mubr.f32.gmra.mrb[120].mxu0 %v11087_v42  ;;  %v631_v42 = vld [vmem:[#allocation2 + $0x339] sm:$0xff] }
 0x14b   :  { %v11084_v34 = vpop.f32.mrb[28].mxu1  ;;  %1114 = vmatprep.mubr.f32.mxu0 %v11092_v24  ;;  %v567_v15 = vld [vmem:[#allocation2 + $0x338] sm:$0xff] }
 0x14c   :  { %v11089_v40 = vpop.f32.mrb[29].mxu1  ;;  %1755 = vmatmul.mubr.f32.gmra.mrb[134].mxu1 %v10742_v31  ;;  %v630_v31 = vld [vmem:[#allocation2 + $0x331] sm:$0xff] }
 0x14d   :  { %1759 = vmatprep.mubr.f32.mxu1 %v10745_v33  ;;  %v11109_v33 = vadd.f32 %v10934_v56, %v851_v4 }
 0x14e   :  { %1115 = vmatmul.mubr.f32.gmra.mrb[122].mxu0 %v11102_v7 }
 0x14f   :  { %v11099_v9 = vpop.f32.mrb[30].mxu1  ;;  %1119 = vmatprep.mubr.f32.mxu0 %v630_v31  ;;  %v392_v31 = vld [vmem:[#allocation2 + $0x2] sm:$0xff] }
 0x150   :  { %v11104_v48 = vpop.f32.mrb[31].mxu1  ;;  %1760 = vmatmul.mubr.f32.gmra.mrb[136].mxu1 %v10757_v41  ;;  %v856_v41 = vpop.f32.mrb[18].mxu0 }
 0x151   :  { %1764 = vmatprep.mubr.f32.mxu1 %v10760_v43  ;;  %v11119_v43 = vadd.f32 %v10929_v55, %v856_v41  ;;  %v858_v56 = vpop.f32.mrb[19].mxu0 }
 0x152   :  { %1120 = vmatmul.mubr.f32.gmra.mrb[124].mxu0 %v566_v26 }
 0x153   :  { %v11112_v6 = vpop.f32.mrb[32].mxu1  ;;  %1124 = vmatprep.mubr.f32.mxu0 %v631_v42 }
 0x154   :  { %17764 = vst [vmem:[#allocation37_spill] sm:$0xff] %v11112_v6  ;;  %v11114_v24 = vpop.f32.mrb[33].mxu1  ;;  %1765 = vmatmul.mubr.f32.gmra.mrb[138].mxu1 %v10766_v53  ;;  %v861_v6 = vpop.f32.mrb[20].mxu0  ;;  %v7880_v53 = vld [vmem:[%s17511_s1 + $0x410] sm:$0xff] }
 0x155   :  { %1769 = vmatprep.mubr.f32.mxu1 %v10769_v58  ;;  %v7881_v58 = vld [vmem:[%s17511_s1 + $0x418] sm:$0xff]  ;;  %v11134_v55 = vadd.f32 %v10947_v28, %v861_v6  ;;  %v863_v42 = vpop.f32.mrb[21].mxu0  ;;  %v7882_v28 = vld [vmem:[%s17511_s1 + $0x420] sm:$0xff]  ;;  %v7883_v6 = vld [vmem:[%s17511_s1 + $0x428] sm:$0xff] }
 0x156   :  { %1125 = vmatmul.mubr.f32.gmra.mrb[126].mxu0 %v567_v15  ;;  %v9454_v56 = vpack.c.bf16 %v7881_v58, %v7880_v53  ;;  %v11157_v53 = vld [vmem:[#allocation2 + $0x32] sm:$0xff]  ;;  %v9458_v58 = vpack.c.bf16 %v7883_v6, %v7882_v28  ;;  %v11177_v28 = vld [vmem:[#allocation2 + $0x4a] sm:$0xff] }
 0x157   :  { %v11121_v4 = vpop.f32.mrb[34].mxu1  ;;  %8634 = vmatprep.mubr.f32.mxu0 %v392_v31  ;;  %17768 = vst [vmem:[#allocation41_spill] sm:$0xff] %v11177_v28 }
 0x158   :  { %17765 = vst [vmem:[#allocation38_spill] sm:$0xff] %v11121_v4  ;;  %v11123_v7 = vpop.f32.mrb[35].mxu1  ;;  %1770 = vmatmul.mubr.f32.gmra.mrb[140].mxu1 %v10775_v49  ;;  %v393_v49 = vld [vmem:[#allocation2 + $0xa] sm:$0xff]  ;;  %v866_v4 = vpop.f32.mrb[22].mxu0 }
 0x159   :  { %1774 = vmatprep.mubr.f32.mxu1 %v10778_v52  ;;  %v394_v52 = vld [vmem:[#allocation2 + $0x1a] sm:$0xff]  ;;  %v11149_v15 = vadd.f32 %v10942_v38, %v866_v4  ;;  %v868_v31 = vpop.f32.mrb[23].mxu0  ;;  %v7884_v38 = vld [vmem:[%s17511_s1 + $0x430] sm:$0xff] }
 0x15a   :  { %8635 = vmatmul.mubr.f32.vlgmr.msra.gmra.mrb[128].mxu0 %v393_v49  ;;  %v7885_v4 = vld [vmem:[%s17511_s1 + $0x438] sm:$0xff] }
 0x15b   :  { %v11136_v26 = vpop.f32.mrb[36].mxu1  ;;  %8637 = vmatprep.mubr.f32.mxu0 %v394_v52  ;;  %9453 = vmatpush3.bf16.msra.mxu0 %v11033_v20  ;;  %v11172_v52 = vld [vmem:[#allocation2 + $0x3a] sm:$0xff]  ;;  %v9462_v6 = vpack.c.bf16 %v7885_v4, %v7884_v38  ;;  %v11193_v38 = vld [vmem:[#allocation2 + $0x52] sm:$0xff]  ;;  %v11198_v4 = vld [vmem:[#allocation2 + $0x62] sm:$0xff] }
 0x15c   :  { %17766 = vst [vmem:[#allocation39_spill] sm:$0xff] %v11136_v26  ;;  %v11138_v41 = vpop.f32.mrb[37].mxu1  ;;  %1775 = vmatmul.mubr.f32.gmra.mrb[142].mxu1 %v10783_v59  ;;  %v395_v59 = vld [vmem:[#allocation2 + $0x22] sm:$0xff]  ;;  %9455 = vmatprep.subr.bf16.mxu0 %v9454_v56  ;;  %v871_v26 = vpop.f32.mrb[24].mxu0  ;;  %17767 = vst [vmem:[#allocation40_spill] sm:$0xff] %v11172_v52 }
 0x15d   :  { %1779 = vmatprep.mubr.f32.mxu1 %v10786_v60  ;;  %v11167_v20 = vadd.f32 %v10959_v35, %v871_v26  ;;  %v7886_v35 = vld [vmem:[%s17511_s1 + $0x440] sm:$0xff]  ;;  %v7887_v26 = vld [vmem:[%s17511_s1 + $0x448] sm:$0xff]  ;;  %17769 = vst [vmem:[#allocation42_spill] sm:$0xff] %v11198_v4 }
 0x15e   :  { %8638 = vmatmul.mubr.f32.gmra.mrb[130].mxu0 %v395_v59 }
 0x15f   :  { %v11151_v42 = vpop.f32.mrb[38].mxu1  ;;  %8640 = vmatprep.mubr.f32.mxu0 %v11157_v53  ;;  %9457 = vmatpush3.bf16.msra.mxu0 %v9454_v56 }
 0x160   :  { %v11154_v60 = vpop.f32.mrb[39].mxu1  ;;  %1780 = vmatmul.mubr.f32.gmra.mrb[144].mxu1 %v10797_v62  ;;  %v873_v62 = vpop.f32.mrb[25].mxu0  ;;  %9459 = vmatprep.subr.bf16.mxu0 %v9458_v58 }
 0x161   :  { %1784 = vmatprep.mubr.f32.mxu1 %v10800_v12  ;;  %v876_v31 = vpop.f32.mrb[26].mxu0  ;;  %v9466_v62 = vpack.c.bf16 %v7887_v26, %v7886_v35  ;;  %v11214_v35 = vld [vmem:[#allocation2 + $0x6a] sm:$0xff]  ;;  %v11219_v26 = vld [vmem:[#allocation2 + $0x7a] sm:$0xff] }
 0x162   :  { %v11187_v56 = vadd.f32 %v10954_v47, %v876_v31  ;;  %8641 = vmatmul.mubr.f32.gmra.mrb[132].mxu0 %v11172_v52  ;;  %v7888_v31 = vld [vmem:[%s17511_s1 + $0x450] sm:$0xff] }
 0x163   :  { %v11169_v49 = vpop.f32.mrb[40].mxu1  ;;  %8643 = vmatprep.mubr.f32.mxu0 %v11177_v28  ;;  %9461 = vmatpush3.bf16.msra.mxu0 %v9458_v58 }
 0x164   :  { %v11174_v12 = vpop.f32.mrb[41].mxu1  ;;  %1785 = vmatmul.mubr.f32.gmra.mrb[146].mxu1 %v10806_v13  ;;  %v878_v13 = vpop.f32.mrb[27].mxu0  ;;  %9463 = vmatprep.subr.bf16.mxu0 %v9462_v6 }
 0x165   :  { %1789 = vmatprep.mubr.f32.mxu1 %v10809_v19  ;;  %v881_v47 = vpop.f32.mrb[28].mxu0  ;;  %v7889_v13 = vld [vmem:[%s17511_s1 + $0x458] sm:$0xff] }
 0x166   :  { %v11208_v58 = vadd.f32 %v10971_v25, %v881_v47  ;;  %8644 = vmatmul.mubr.f32.gmra.mrb[134].mxu0 %v11193_v38  ;;  %v9470_v52 = vpack.c.bf16 %v7889_v13, %v7888_v31  ;;  %v7890_v47 = vld [vmem:[%s17511_s1 + $0x460] sm:$0xff]  ;;  %v11240_v13 = vld [vmem:[#allocation2 + $0x92] sm:$0xff] }
 0x167   :  { %v11190_v59 = vpop.f32.mrb[42].mxu1  ;;  %8646 = vmatprep.mubr.f32.mxu0 %v11198_v4  ;;  %9465 = vmatpush3.bf16.msra.mxu0 %v9462_v6  ;;  %v11235_v31 = vld [vmem:[#allocation2 + $0x82] sm:$0xff] }
 0x168   :  { %v11195_v19 = vpop.f32.mrb[43].mxu1  ;;  %1790 = vmatmul.mubr.f32.gmra.mrb[148].mxu1 %v10814_v16  ;;  %v883_v16 = vpop.f32.mrb[29].mxu0  ;;  %9467 = vmatprep.subr.bf16.mxu0 %v9466_v62 }
 0x169   :  { %1794 = vmatprep.mubr.f32.mxu1 %v10817_v17  ;;  %v886_v25 = vpop.f32.mrb[30].mxu0  ;;  %v7891_v16 = vld [vmem:[%s17511_s1 + $0x468] sm:$0xff] }
 0x16a   :  { %v11229_v6 = vadd.f32 %v10966_v5, %v886_v25  ;;  %8647 = vmatmul.mubr.f32.gmra.mrb[136].mxu0 %v11214_v35  ;;  %v9474_v4 = vpack.c.bf16 %v7891_v16, %v7890_v47  ;;  %v7892_v25 = vld [vmem:[%s17511_s1 + $0x470] sm:$0xff]  ;;  %v11256_v47 = vld [vmem:[#allocation2 + $0x9a] sm:$0xff] }
 0x16b   :  { %v11211_v28 = vpop.f32.mrb[44].mxu1  ;;  %8649 = vmatprep.mubr.f32.mxu0 %v11219_v26  ;;  %9469 = vmatpush3.bf16.msra.mxu0 %v9466_v62  ;;  %v11261_v16 = vld [vmem:[#allocation2 + $0xaa] sm:$0xff] }
 0x16c   :  { %17770 = vst [vmem:[#allocation43_spill] sm:$0xff] %v11211_v28  ;;  %v11216_v17 = vpop.f32.mrb[45].mxu1  ;;  %1795 = vmatmul.mubr.f32.gmra.mrb[150].mxu1 %v10822_v21  ;;  %v888_v21 = vpop.f32.mrb[31].mxu0  ;;  %9471 = vmatprep.subr.bf16.mxu0 %v9470_v52 }
 0x16d   :  { %1799 = vmatprep.mubr.f32.mxu1 %v10825_v22  ;;  %v891_v5 = vpop.f32.mrb[32].mxu0  ;;  %v7893_v21 = vld [vmem:[%s17511_s1 + $0x478] sm:$0xff] }
 0x16e   :  { %v11250_v62 = vadd.f32 %v10992_v2, %v891_v5  ;;  %8650 = vmatmul.mubr.f32.gmra.mrb[138].mxu0 %v11235_v31 }
 0x16f   :  { %v11232_v28 = vpop.f32.mrb[46].mxu1  ;;  %8652 = vmatprep.mubr.f32.mxu0 %v11240_v13  ;;  %9473 = vmatpush3.bf16.msra.mxu0 %v9470_v52  ;;  %v11271_v52 = vld [vmem:[#allocation2 + $0xb2] sm:$0xff] }
 0x170   :  { %17771 = vst [vmem:[#allocation44_spill] sm:$0xff] %v11232_v28  ;;  %v11237_v22 = vpop.f32.mrb[47].mxu1  ;;  %1800 = vmatmul.mubr.f32.gmra.mrb[152].mxu1 %v10836_v23  ;;  %v893_v23 = vpop.f32.mrb[33].mxu0  ;;  %9475 = vmatprep.subr.bf16.mxu0 %v9474_v4 }
 0x171   :  { %17772 = vst [vmem:[#allocation45_spill] sm:$0xff] %v11237_v22  ;;  %1804 = vmatprep.mubr.f32.mxu1 %v10839_v30  ;;  %v9478_v22 = vpack.c.bf16 %v7893_v21, %v7892_v25  ;;  %v896_v2 = vpop.f32.mrb[34].mxu0  ;;  %v11276_v25 = vld [vmem:[#allocation2 + $0xc2] sm:$0xff] }
 0x172   :  { %v11265_v5 = vadd.f32 %v10987_v18, %v896_v2  ;;  %8653 = vmatmul.mubr.f32.gmra.mrb[140].mxu0 %v11256_v47  ;;  %v898_v23 = vpop.f32.mrb[35].mxu0 }
 0x173   :  { %v11253_v28 = vpop.f32.mrb[48].mxu1  ;;  %8655 = vmatprep.mubr.f32.mxu0 %v11261_v16  ;;  %9477 = vmatpush3.bf16.msra.mxu0 %v9474_v4  ;;  %v11286_v4 = vld [vmem:[#allocation2 + $0xca] sm:$0xff]  ;;  %v11291_v23 = vld [vmem:[#allocation2 + $0xda] sm:$0xff] }
 0x174   :  { %17773 = vst [vmem:[#allocation46_spill] sm:$0xff] %v11253_v28  ;;  %v11258_v30 = vpop.f32.mrb[49].mxu1  ;;  %1805 = vmatmul.mubr.f32.gmra.mrb[154].mxu1 %v10845_v32  ;;  %9479 = vmatprep.subr.bf16.mxu0 %v9478_v22  ;;  %17777 = vst [vmem:[#allocation50_spill] sm:$0xff] %v11286_v4 }
 0x175   :  { %1809 = vmatprep.mubr.f32.mxu1 %v10848_v29  ;;  %v901_v29 = vpop.f32.mrb[36].mxu0  ;;  %17779 = vst [vmem:[#allocation52_spill] sm:$0xff] %v11291_v23 }
 0x176   :  { %v11280_v18 = vadd.f32 %v11007_v54, %v901_v29  ;;  %8656 = vmatmul.mubr.f32.gmra.mrb[142].mxu0 %v11271_v52  ;;  %v903_v21 = vpop.f32.mrb[37].mxu0 }
 0x177   :  { %v11268_v28 = vpop.f32.mrb[50].mxu1  ;;  %8658 = vmatprep.mubr.f32.mxu0 %v11276_v25  ;;  %9481 = vmatpush3.bf16.msra.mxu0 %v9478_v22  ;;  %v11302_v22 = vld [vmem:[#allocation2 + $0xe2] sm:$0xff] }
 0x178   :  { %17774 = vst [vmem:[#allocation47_spill] sm:$0xff] %v11268_v28  ;;  %v11273_v32 = vpop.f32.mrb[51].mxu1  ;;  %1810 = vmatmul.mubr.f32.gmra.mrb[156].mxu1 %v10853_v36  ;;  %9482 = vmatprep.subr.bf16.mxu0 %v17726_v51  ;;  %17781 = vst [vmem:[#allocation54_spill] sm:$0xff] %v11302_v22  ;;  %v11307_v51 = vld [vmem:[#allocation2 + $0xf2] sm:$0xff]  ;;  %v11337_v28 = vld [vmem:[#allocation2 + $0x122] sm:$0xff] }
 0x179   :  { %17775 = vst [vmem:[#allocation48_spill] sm:$0xff] %v11273_v32  ;;  %1814 = vmatprep.mubr.f32.mxu1 %v10856_v37  ;;  %v906_v37 = vpop.f32.mrb[38].mxu0  ;;  %17783 = vst [vmem:[#allocation56_spill] sm:$0xff] %v11307_v51  ;;  %v422_v32 = vld [vmem:[#allocation2 + $0x16a] sm:$0xff] }
 0x17a   :  { %v11296_v54 = vadd.f32 %v11002_v46, %v906_v37  ;;  %8659 = vmatmul.mubr.f32.gmra.mrb[144].mxu0 %v11286_v4  ;;  %v908_v29 = vpop.f32.mrb[39].mxu0 }
 0x17b   :  { %v11283_v2 = vpop.f32.mrb[52].mxu1  ;;  %8661 = vmatprep.mubr.f32.mxu0 %v11291_v23  ;;  %v11317_v29 = vld [vmem:[#allocation2 + $0xfa] sm:$0xff] }
 0x17c   :  { %17776 = vst [vmem:[#allocation49_spill] sm:$0xff] %v11283_v2  ;;  %v11288_v36 = vpop.f32.mrb[53].mxu1  ;;  %1815 = vmatmul.mubr.f32.gmra.mrb[158].mxu1 %v10861_v44  ;;  %v911_v2 = vpop.f32.mrb[40].mxu0  ;;  %17785 = vst [vmem:[#allocation58_spill] sm:$0xff] %v11317_v29 }
 0x17d   :  { %17778 = vst [vmem:[#allocation51_spill] sm:$0xff] %v11288_v36  ;;  %1819 = vmatprep.mubr.f32.mxu1 %v10864_v45  ;;  %v11311_v45 = vadd.f32 %v11022_v50, %v911_v2  ;;  %v913_v46 = vpop.f32.mrb[41].mxu0 }
 0x17e   :  { %8662 = vmatmul.mubr.f32.gmra.mrb[146].mxu0 %v11302_v22  ;;  %v916_v36 = vpop.f32.mrb[42].mxu0 }
 0x17f   :  { %v11299_v21 = vpop.f32.mrb[54].mxu1  ;;  %8664 = vmatprep.mubr.f32.mxu0 %v11307_v51  ;;  %v11326_v50 = vadd.f32 %v11017_v8, %v916_v36  ;;  %v918_v2 = vpop.f32.mrb[43].mxu0 }
 0x180   :  { %17780 = vst [vmem:[#allocation53_spill] sm:$0xff] %v11299_v21  ;;  %v11304_v44 = vpop.f32.mrb[55].mxu1  ;;  %1820 = vmatmul.mubr.f32.gmra.mrb[160].mxu1 %v10877_v63  ;;  %v17787_v63 = vld [vmem:[#allocation6_spill] sm:$0xff]  ;;  %v921_v51 = vpop.f32.mrb[44].mxu0 }
 0x181   :  { %17782 = vst [vmem:[#allocation55_spill] sm:$0xff] %v11304_v44  ;;  %1824 = vmatprep.mubr.f32.mxu1 %v10882_v57  ;;  %v11322_v44 = vld [vmem:[#allocation2 + $0x10a] sm:$0xff]  ;;  %v17789_v57 = vld [vmem:[#allocation7_spill] sm:$0xff]  ;;  %v11341_v8 = vadd.f32 %v11045_v27, %v921_v51  ;;  %v923_v36 = vpop.f32.mrb[45].mxu0 }
 0x182   :  { %17788 = vst [vmem:[#allocation6_spill] sm:$0xff] %v11322_v44  ;;  %8665 = vmatmul.mubr.f32.gmra.mrb[148].mxu0 %v11317_v29  ;;  %v926_v29 = vpop.f32.mrb[46].mxu0  ;;  %v17802_v51 = vld [vmem:[#allocation28_spill] sm:$0xff] }
 0x183   :  { %v11314_v37 = vpop.f32.mrb[56].mxu1  ;;  %8667 = vmatprep.mubr.f32.mxu0 %v11322_v44  ;;  %v11352_v44 = vld [vmem:[#allocation2 + $0x13a] sm:$0xff]  ;;  %v11356_v27 = vadd.f32 %v17802_v51, %v926_v29  ;;  %v928_v36 = vpop.f32.mrb[47].mxu0 }
 0x184   :  { %17784 = vst [vmem:[#allocation57_spill] sm:$0xff] %v11314_v37  ;;  %v11319_v21 = vpop.f32.mrb[57].mxu1  ;;  %1825 = vmatmul.mubr.f32.gmra.mrb[162].mxu1 %v17787_v63  ;;  %v11332_v37 = vld [vmem:[#allocation2 + $0x112] sm:$0xff]  ;;  %v17793_v63 = vld [vmem:[#allocation8_spill] sm:$0xff] }
 0x185   :  { %17786 = vst [vmem:[#allocation59_spill] sm:$0xff] %v11319_v21  ;;  %1829 = vmatprep.mubr.f32.mxu1 %v17789_v57  ;;  %17791 = vst [vmem:[#allocation60_spill] sm:$0xff] %v11332_v37  ;;  %v17795_v57 = vld [vmem:[#allocation9_spill] sm:$0xff]  ;;  %v931_v22 = vpop.f32.mrb[48].mxu0 }
 0x186   :  { %17794 = vst [vmem:[#allocation8_spill] sm:$0xff] %v11337_v28  ;;  %8668 = vmatmul.mubr.f32.gmra.mrb[150].mxu0 %v11332_v37  ;;  %v11367_v37 = vld [vmem:[#allocation2 + $0x152] sm:$0xff]  ;;  %v11371_v29 = vadd.f32 %v11059_v10, %v931_v22  ;;  %v933_v51 = vpop.f32.mrb[49].mxu0 }
 0x187   :  { %v11329_v46 = vpop.f32.mrb[58].mxu1  ;;  %8670 = vmatprep.mubr.f32.mxu0 %v11337_v28  ;;  %v11362_v28 = vld [vmem:[#allocation2 + $0x142] sm:$0xff] }
 0x188   :  { %17790 = vst [vmem:[#allocation7_spill] sm:$0xff] %v11329_v46  ;;  %v11334_v21 = vpop.f32.mrb[59].mxu1  ;;  %1830 = vmatmul.mubr.f32.gmra.mrb[164].mxu1 %v17793_v63  ;;  %v11347_v46 = vld [vmem:[#allocation2 + $0x12a] sm:$0xff]  ;;  %v17799_v63 = vld [vmem:[#allocation10_spill] sm:$0xff]  ;;  %17804 = vst [vmem:[#allocation28_spill] sm:$0xff] %v11362_v28 }
 0x189   :  { %17792 = vst [vmem:[#allocation61_spill] sm:$0xff] %v11334_v21  ;;  %1834 = vmatprep.mubr.f32.mxu1 %v17795_v57  ;;  %17797 = vst [vmem:[#allocation62_spill] sm:$0xff] %v11347_v46  ;;  %v17801_v57 = vld [vmem:[#allocation11_spill] sm:$0xff] }
 0x18a   :  { %17800 = vst [vmem:[#allocation10_spill] sm:$0xff] %v11352_v44  ;;  %8671 = vmatmul.mubr.f32.gmra.mrb[152].mxu0 %v11347_v46  ;;  %v17812_v46 = vld [vmem:[#allocation14_spill] sm:$0xff] }
 0x18b   :  { %v11344_v2 = vpop.f32.mrb[60].mxu1  ;;  %8673 = vmatprep.mubr.f32.mxu0 %v11352_v44  ;;  %v17810_v44 = vld [vmem:[#allocation20_spill] sm:$0xff] }
 0x18c   :  { %17796 = vst [vmem:[#allocation9_spill] sm:$0xff] %v11344_v2  ;;  %v11349_v21 = vpop.f32.mrb[61].mxu1  ;;  %1835 = vmatmul.mubr.f32.gmra.mrb[166].mxu1 %v17799_v63  ;;  %v17806_v63 = vld [vmem:[#allocation12_spill] sm:$0xff] }
 0x18d   :  { %17798 = vst [vmem:[#allocation63_spill] sm:$0xff] %v11349_v21  ;;  %1839 = vmatprep.mubr.f32.mxu1 %v17801_v57  ;;  %17807 = vst [vmem:[#allocation12_spill] sm:$0xff] %v11367_v37  ;;  %v17808_v57 = vld [vmem:[#allocation13_spill] sm:$0xff]  ;;  %v936_v23 = vpop.f32.mrb[50].mxu0 }
 0x18e   :  { %8674 = vmatmul.mubr.f32.gmra.mrb[154].mxu0 %v11362_v28  ;;  %v11383_v10 = vadd.f32 %v11054_v39, %v936_v23  ;;  %v938_v22 = vpop.f32.mrb[51].mxu0  ;;  %v17814_v28 = vld [vmem:[#allocation23_spill] sm:$0xff] }
 0x18f   :  { %v11359_v2 = vpop.f32.mrb[62].mxu1  ;;  %8676 = vmatprep.mubr.f32.mxu0 %v11367_v37  ;;  %v423_v37 = vld [vmem:[#allocation2 + $0x172] sm:$0xff]  ;;  %v425_v22 = vld [vmem:[#allocation2 + $0x1ba] sm:$0xff] }
 0x190   :  { %17803 = vst [vmem:[#allocation11_spill] sm:$0xff] %v11359_v2  ;;  %v11364_v21 = vpop.f32.mrb[63].mxu1  ;;  %1840 = vmatmul.mubr.f32.gmra.mrb[168].mxu1 %v17806_v63  ;;  %v11375_v2 = vld [vmem:[#allocation2 + $0x15a] sm:$0xff] }
 0x191   :  { %17805 = vst [vmem:[#allocation64_spill] sm:$0xff] %v11364_v21  ;;  %1844 = vmatprep.mubr.f32.mxu1 %v17808_v57  ;;  %17809 = vst [vmem:[#allocation13_spill] sm:$0xff] %v11375_v2  ;;  %v17813_v57 = vld [vmem:[#allocation15_spill] sm:$0xff] }
 0x192   :  { %8677 = vmatmul.mubr.f32.gmra.mrb[156].mxu0 %v11375_v2 }
 0x193   :  { %v1581_v36 = vpop.f32.mrb[64].mxu1  ;;  %8679 = vmatprep.mubr.f32.mxu0 %v422_v32  ;;  %v17818_v32 = vld [vmem:[#allocation4_spill] sm:$0xff] }
 0x194   :  { %v11378_v21 = vadd.f32 %v1581_v36, %v17810_v44  ;;  %v1583_v63 = vpop.f32.mrb[65].mxu1  ;;  %1845 = vmatmul.mubr.f32.gmra.mrb[170].mxu1 %v17812_v46  ;;  %v17816_v36 = vld [vmem:[#allocation16_spill] sm:$0xff]  ;;  %v424_v46 = vld [vmem:[#allocation2 + $0x1b2] sm:$0xff] }
 0x195   :  { %1849 = vmatprep.mubr.f32.mxu1 %v17813_v57  ;;  %v941_v63 = vpop.f32.mrb[52].mxu0 }
 0x196   :  { %17811 = vst [vmem:[#allocation20_spill] sm:$0xff] %v11378_v21  ;;  %v17817_v21 = vld [vmem:[#allocation17_spill] sm:$0xff]  ;;  %v11392_v57 = vadd.f32 %v11074_v61, %v941_v63  ;;  %8680 = vmatmul.mubr.f32.gmra.mrb[158].mxu0 %v423_v37  ;;  %v943_v39 = vpop.f32.mrb[53].mxu0 }
 0x197   :  { %v1586_v51 = vpop.f32.mrb[66].mxu1  ;;  %8682 = vmatprep.mubr.f32.mxu0 %v424_v46  ;;  %v427_v63 = vld [vmem:[#allocation2 + $0x1d2] sm:$0xff]  ;;  %v17822_v46 = vld [vmem:[#allocation27_spill] sm:$0xff] }
 0x198   :  { %v11387_v4 = vadd.f32 %v1586_v51, %v17814_v28  ;;  %v1588_v44 = vpop.f32.mrb[67].mxu1  ;;  %1850 = vmatmul.mubr.f32.gmra.mrb[172].mxu1 %v17816_v36  ;;  %v17820_v51 = vld [vmem:[#allocation18_spill] sm:$0xff]  ;;  %v946_v36 = vpop.f32.mrb[54].mxu0 }
 0x199   :  { %1854 = vmatprep.mubr.f32.mxu1 %v17817_v21  ;;  %v426_v44 = vld [vmem:[#allocation2 + $0x1ca] sm:$0xff]  ;;  %v11400_v21 = vadd.f32 %v11069_v1, %v946_v36  ;;  %v948_v61 = vpop.f32.mrb[55].mxu0 }
 0x19a   :  { %17815 = vst [vmem:[#allocation14_spill] sm:$0xff] %v11387_v4  ;;  %v17821_v4 = vld [vmem:[#allocation19_spill] sm:$0xff]  ;;  %8683 = vmatmul.mubr.f32.gmra.mrb[160].mxu0 %v425_v22  ;;  %v429_v36 = vld [vmem:[#allocation2 + $0x1ea] sm:$0xff] }
 0x19b   :  { %v1591_v23 = vpop.f32.mrb[68].mxu1  ;;  %8685 = vmatprep.mubr.f32.mxu0 %v426_v44 }
 0x19c   :  { %v11395_v2 = vadd.f32 %v1591_v23, %v17818_v32  ;;  %v1593_v28 = vpop.f32.mrb[69].mxu1  ;;  %1855 = vmatmul.mubr.f32.gmra.mrb[174].mxu1 %v17820_v51  ;;  %v17823_v32 = vld [vmem:[#allocation21_spill] sm:$0xff] }
 0x19d   :  { %1859 = vmatprep.mubr.f32.mxu1 %v17821_v4  ;;  %v428_v28 = vld [vmem:[#allocation2 + $0x1e2] sm:$0xff]  ;;  %v951_v51 = vpop.f32.mrb[56].mxu0 }
 0x19e   :  { %17819 = vst [vmem:[#allocation15_spill] sm:$0xff] %v11395_v2  ;;  %v17824_v2 = vld [vmem:[#allocation22_spill] sm:$0xff]  ;;  %v11408_v4 = vadd.f32 %v11089_v40, %v951_v51  ;;  %8686 = vmatmul.mubr.f32.gmra.mrb[162].mxu0 %v427_v63  ;;  %v953_v1 = vpop.f32.mrb[57].mxu0  ;;  %v431_v51 = vld [vmem:[#allocation2 + $0x202] sm:$0xff] }
 0x19f   :  { %v1596_v37 = vpop.f32.mrb[70].mxu1  ;;  %8688 = vmatprep.mubr.f32.mxu0 %v428_v28  ;;  %v17827_v1 = vld [vmem:[#allocation26_spill] sm:$0xff] }
 0x1a0   :  { %v11403_v39 = vadd.f32 %v1596_v37, %v17822_v46  ;;  %v1598_v23 = vpop.f32.mrb[71].mxu1  ;;  %1860 = vmatmul.mubr.f32.gmra.mrb[176].mxu1 %v17823_v32  ;;  %v17825_v37 = vld [vmem:[#allocation24_spill] sm:$0xff]  ;;  %v430_v46 = vld [vmem:[#allocation2 + $0x1fa] sm:$0xff]  ;;  %v17826_v32 = vld [vmem:[#allocation25_spill] sm:$0xff] }
 0x1a1   :  { %1864 = vmatprep.mubr.f32.mxu1 %v17824_v2  ;;  %v956_v23 = vpop.f32.mrb[58].mxu0 }
 0x1a2   :  { %v11416_v2 = vadd.f32 %v11084_v34, %v956_v23  ;;  %8689 = vmatmul.mubr.f32.gmra.mrb[164].mxu0 %v429_v36  ;;  %v958_v40 = vpop.f32.mrb[59].mxu0  ;;  %v433_v23 = vld [vmem:[#allocation2 + $0x21a] sm:$0xff] }
 0x1a3   :  { %v1601_v22 = vpop.f32.mrb[72].mxu1  ;;  %8691 = vmatprep.mubr.f32.mxu0 %v430_v46  ;;  %v17830_v40 = vld [vmem:[#allocation29_spill] sm:$0xff] }
 0x1a4   :  { %v11411_v44 = vadd.f32 %v1601_v22, %v11051_v14  ;;  %v1603_v61 = vpop.f32.mrb[73].mxu1  ;;  %1865 = vmatmul.mubr.f32.gmra.mrb[178].mxu1 %v17825_v37  ;;  %v432_v22 = vld [vmem:[#allocation2 + $0x212] sm:$0xff] }
 0x1a5   :  { %1869 = vmatprep.mubr.f32.mxu1 %v17826_v32  ;;  %v961_v61 = vpop.f32.mrb[60].mxu0  ;;  %v17828_v37 = vld [vmem:[#allocation5_spill] sm:$0xff] }
 0x1a6   :  { %v11424_v32 = vadd.f32 %v11104_v48, %v961_v61  ;;  %8692 = vmatmul.mubr.f32.gmra.mrb[166].mxu0 %v431_v51  ;;  %v963_v34 = vpop.f32.mrb[61].mxu0  ;;  %v435_v61 = vld [vmem:[#allocation2 + $0x232] sm:$0xff] }
 0x1a7   :  { %v1606_v63 = vpop.f32.mrb[74].mxu1  ;;  %8694 = vmatprep.mubr.f32.mxu0 %v432_v22  ;;  %v17832_v34 = vld [vmem:[#allocation30_spill] sm:$0xff] }
 0x1a8   :  { %v11419_v28 = vadd.f32 %v1606_v63, %v11066_v3  ;;  %v1608_v14 = vpop.f32.mrb[75].mxu1  ;;  %1870 = vmatmul.mubr.f32.gmra.mrb[180].mxu1 %v17827_v1  ;;  %v434_v63 = vld [vmem:[#allocation2 + $0x22a] sm:$0xff]  ;;  %v17831_v1 = vld [vmem:[#allocation3_spill] sm:$0xff] }
 0x1a9   :  { %1874 = vmatprep.mubr.f32.mxu1 %v17828_v37  ;;  %v966_v14 = vpop.f32.mrb[62].mxu0 }
 0x1aa   :  { %v11432_v37 = vadd.f32 %v11099_v9, %v966_v14  ;;  %8695 = vmatmul.mubr.f32.gmra.mrb[168].mxu0 %v433_v23  ;;  %v968_v48 = vpop.f32.mrb[63].mxu0  ;;  %v437_v14 = vld [vmem:[#allocation2 + $0x24a] sm:$0xff] }
 0x1ab   :  { %v1611_v36 = vpop.f32.mrb[76].mxu1  ;;  %8697 = vmatprep.mubr.f32.mxu0 %v434_v63  ;;  %v17835_v48 = vld [vmem:[#allocation32_spill] sm:$0xff] }
 0x1ac   :  { %v11427_v46 = vadd.f32 %v1611_v36, %v11081_v11  ;;  %v1613_v3 = vpop.f32.mrb[77].mxu1  ;;  %1875 = vmatmul.mubr.f32.gmra.mrb[182].mxu1 %v17830_v40  ;;  %v436_v36 = vld [vmem:[#allocation2 + $0x242] sm:$0xff] }
 0x1ad   :  { %1879 = vmatprep.mubr.f32.mxu1 %v17831_v1  ;;  %v971_v3 = vpop.f32.mrb[64].mxu0  ;;  %v17833_v40 = vld [vmem:[#allocation31_spill] sm:$0xff] }
 0x1ae   :  { %17829 = vst [vmem:[#allocation23_spill] sm:$0xff] %v11427_v46  ;;  %v11440_v1 = vadd.f32 %v11114_v24, %v971_v3  ;;  %8698 = vmatmul.mubr.f32.gmra.mrb[170].mxu0 %v435_v61  ;;  %v973_v9 = vpop.f32.mrb[65].mxu0  ;;  %v17837_v46 = vld [vmem:[#allocation37_spill] sm:$0xff]  ;;  %v439_v3 = vld [vmem:[#allocation2 + $0x262] sm:$0xff] }
 0x1af   :  { %v1616_v51 = vpop.f32.mrb[78].mxu1  ;;  %8700 = vmatprep.mubr.f32.mxu0 %v436_v36  ;;  %v17839_v9 = vld [vmem:[#allocation34_spill] sm:$0xff] }
 0x1b0   :  { %v11435_v22 = vadd.f32 %v1616_v51, %v11096_v0  ;;  %v1618_v11 = vpop.f32.mrb[79].mxu1  ;;  %1880 = vmatmul.mubr.f32.gmra.mrb[184].mxu1 %v17832_v34  ;;  %v438_v51 = vld [vmem:[#allocation2 + $0x25a] sm:$0xff]  ;;  %v17836_v34 = vld [vmem:[#allocation33_spill] sm:$0xff] }
 0x1b1   :  { %1884 = vmatprep.mubr.f32.mxu1 %v17833_v40  ;;  %v976_v11 = vpop.f32.mrb[66].mxu0 }
 0x1b2   :  { %v11448_v40 = vadd.f32 %v17837_v46, %v976_v11  ;;  %8701 = vmatmul.mubr.f32.gmra.mrb[172].mxu0 %v437_v14  ;;  %v978_v24 = vpop.f32.mrb[67].mxu0  ;;  %v2350_v14 = vld [vmem:[#allocation2 + $0x31] sm:$0xff] }
 0x1b3   :  { %v1621_v23 = vpop.f32.mrb[80].mxu1  ;;  %8703 = vmatprep.mubr.f32.mxu0 %v438_v51  ;;  %v441_v51 = vld [vmem:[#allocation2 + $0x27a] sm:$0xff] }
 0x1b4   :  { %v11443_v63 = vadd.f32 %v1621_v23, %v11109_v33  ;;  %v1623_v0 = vpop.f32.mrb[81].mxu1  ;;  %1885 = vmatmul.mubr.f32.gmra.mrb[186].mxu1 %v17835_v48  ;;  %v440_v23 = vld [vmem:[#allocation2 + $0x272] sm:$0xff]  ;;  %v17840_v48 = vld [vmem:[#allocation35_spill] sm:$0xff] }
 0x1b5   :  { %1889 = vmatprep.mubr.f32.mxu1 %v17836_v34  ;;  %v981_v0 = vpop.f32.mrb[68].mxu0 }
 0x1b6   :  { %17834 = vst [vmem:[#allocation16_spill] sm:$0xff] %v11443_v63  ;;  %v11456_v34 = vadd.f32 %v11123_v7, %v981_v0  ;;  %8704 = vmatmul.mubr.f32.gmra.mrb[174].mxu0 %v439_v3  ;;  %v983_v46 = vpop.f32.mrb[69].mxu0  ;;  %v2286_v63 = vld [vmem:[#allocation2 + $0x30] sm:$0xff]  ;;  %v2351_v3 = vld [vmem:[#allocation2 + $0x39] sm:$0xff] }
 0x1b7   :  { %v1626_v61 = vpop.f32.mrb[82].mxu1  ;;  %8706 = vmatprep.mubr.f32.mxu0 %v440_v23  ;;  %v443_v23 = vld [vmem:[#allocation2 + $0x292] sm:$0xff] }
 0x1b8   :  { %v11451_v36 = vadd.f32 %v1626_v61, %v11119_v43  ;;  %v1628_v33 = vpop.f32.mrb[83].mxu1  ;;  %1890 = vmatmul.mubr.f32.gmra.mrb[188].mxu1 %v17839_v9  ;;  %v17842_v61 = vld [vmem:[#allocation36_spill] sm:$0xff] }
 0x1b9   :  { %1894 = vmatprep.mubr.f32.mxu1 %v17840_v48  ;;  %v442_v33 = vld [vmem:[#allocation2 + $0x28a] sm:$0xff]  ;;  %v986_v9 = vpop.f32.mrb[70].mxu0  ;;  %v17843_v48 = vld [vmem:[#allocation38_spill] sm:$0xff] }
 0x1ba   :  { %17838 = vst [vmem:[#allocation17_spill] sm:$0xff] %v11451_v36  ;;  %v11463_v36 = vadd.f32 %v17843_v48, %v986_v9  ;;  %8707 = vmatmul.mubr.f32.gmra.mrb[176].mxu0 %v441_v51  ;;  %v988_v7 = vpop.f32.mrb[71].mxu0  ;;  %v2352_v51 = vld [vmem:[#allocation2 + $0x49] sm:$0xff] }
 0x1bb   :  { %v1631_v11 = vpop.f32.mrb[84].mxu1  ;;  %8709 = vmatprep.mubr.f32.mxu0 %v442_v33  ;;  %v445_v7 = vld [vmem:[#allocation2 + $0x2aa] sm:$0xff] }
 0x1bc   :  { %v11459_v24 = vadd.f32 %v1631_v11, %v11134_v55  ;;  %v1633_v43 = vpop.f32.mrb[85].mxu1  ;;  %1895 = vmatmul.mubr.f32.gmra.mrb[190].mxu1 %v17842_v61  ;;  %v444_v11 = vld [vmem:[#allocation2 + $0x2a2] sm:$0xff]  ;;  %v2287_v61 = vld [vmem:[#allocation2 + $0x38] sm:$0xff] }
 0x1bd   :  { %2591 = vmatprep.mubr.f32.mxu1 %v2350_v14  ;;  %v991_v43 = vpop.f32.mrb[72].mxu0 }
 0x1be   :  { %17841 = vst [vmem:[#allocation4_spill] sm:$0xff] %v11459_v24  ;;  %v11469_v14 = vadd.f32 %v11138_v41, %v991_v43  ;;  %8710 = vmatmul.mubr.f32.gmra.mrb[178].mxu0 %v443_v23  ;;  %v993_v9 = vpop.f32.mrb[73].mxu0  ;;  %v2353_v23 = vld [vmem:[#allocation2 + $0x51] sm:$0xff] }
 0x1bf   :  { %v1636_v0 = vpop.f32.mrb[86].mxu1  ;;  %8712 = vmatprep.mubr.f32.mxu0 %v444_v11  ;;  %v447_v9 = vld [vmem:[#allocation2 + $0x2c2] sm:$0xff] }
 0x1c0   :  { %v11466_v46 = vadd.f32 %v1636_v0, %v11149_v15  ;;  %v1638_v55 = vpop.f32.mrb[87].mxu1  ;;  %2592 = vmatmul.mubr.f32.vlgmr.msra.gmra.mrb[192].mxu1 %v2286_v63  ;;  %v446_v0 = vld [vmem:[#allocation2 + $0x2ba] sm:$0xff] }
 0x1c1   :  { %2596 = vmatprep.mubr.f32.mxu1 %v2351_v3  ;;  %v996_v63 = vpop.f32.mrb[74].mxu0  ;;  %v2288_v55 = vld [vmem:[#allocation2 + $0x48] sm:$0xff]  ;;  %v17844_v3 = vld [vmem:[#allocation39_spill] sm:$0xff] }
 0x1c2   :  { %v11475_v24 = vadd.f32 %v17844_v3, %v996_v63  ;;  %8713 = vmatmul.mubr.f32.gmra.mrb[180].mxu0 %v445_v7  ;;  %v998_v41 = vpop.f32.mrb[75].mxu0  ;;  %v2354_v7 = vld [vmem:[#allocation2 + $0x61] sm:$0xff] }
 0x1c3   :  { %v1641_v48 = vpop.f32.mrb[88].mxu1  ;;  %8715 = vmatprep.mubr.f32.mxu0 %v446_v0  ;;  %v449_v41 = vld [vmem:[#allocation2 + $0x2da] sm:$0xff] }
 0x1c4   :  { %v11472_v33 = vadd.f32 %v1641_v48, %v11167_v20  ;;  %v1643_v15 = vpop.f32.mrb[89].mxu1  ;;  %2597 = vmatmul.mubr.f32.gmra.mrb[194].mxu1 %v2287_v61  ;;  %v448_v48 = vld [vmem:[#allocation2 + $0x2d2] sm:$0xff] }
 0x1c5   :  { %2601 = vmatprep.mubr.f32.mxu1 %v2352_v51  ;;  %v1001_v61 = vpop.f32.mrb[76].mxu0  ;;  %v2289_v15 = vld [vmem:[#allocation2 + $0x50] sm:$0xff] }
 0x1c6   :  { %v11481_v51 = vadd.f32 %v11154_v60, %v1001_v61  ;;  %8716 = vmatmul.mubr.f32.gmra.mrb[182].mxu0 %v447_v9  ;;  %v1003_v63 = vpop.f32.mrb[77].mxu0  ;;  %v2355_v9 = vld [vmem:[#allocation2 + $0x69] sm:$0xff] }
 0x1c7   :  { %v1646_v43 = vpop.f32.mrb[90].mxu1  ;;  %8718 = vmatprep.mubr.f32.mxu0 %v448_v48  ;;  %v451_v63 = vld [vmem:[#allocation2 + $0x2f2] sm:$0xff] }
 0x1c8   :  { %v11478_v11 = vadd.f32 %v1646_v43, %v11187_v56  ;;  %v1648_v20 = vpop.f32.mrb[91].mxu1  ;;  %2602 = vmatmul.mubr.f32.gmra.mrb[196].mxu1 %v2288_v55  ;;  %v450_v43 = vld [vmem:[#allocation2 + $0x2ea] sm:$0xff] }
 0x1c9   :  { %2606 = vmatprep.mubr.f32.mxu1 %v2353_v23  ;;  %v1006_v55 = vpop.f32.mrb[78].mxu0  ;;  %v2290_v20 = vld [vmem:[#allocation2 + $0x60] sm:$0xff] }
 0x1ca   :  { %v11487_v23 = vadd.f32 %v11151_v42, %v1006_v55  ;;  %8719 = vmatmul.mubr.f32.gmra.mrb[184].mxu0 %v449_v41  ;;  %v1008_v60 = vpop.f32.mrb[79].mxu0  ;;  %v2356_v41 = vld [vmem:[#allocation2 + $0x79] sm:$0xff] }
 0x1cb   :  { %v1651_v3 = vpop.f32.mrb[92].mxu1  ;;  %8721 = vmatprep.mubr.f32.mxu0 %v450_v43  ;;  %v453_v60 = vld [vmem:[#allocation2 + $0x30a] sm:$0xff] }
 0x1cc   :  { %v11484_v0 = vadd.f32 %v1651_v3, %v11208_v58  ;;  %v1653_v56 = vpop.f32.mrb[93].mxu1  ;;  %2607 = vmatmul.mubr.f32.gmra.mrb[198].mxu1 %v2289_v15  ;;  %v452_v3 = vld [vmem:[#allocation2 + $0x302] sm:$0xff] }
 0x1cd   :  { %2611 = vmatprep.mubr.f32.mxu1 %v2354_v7  ;;  %v1011_v15 = vpop.f32.mrb[80].mxu0  ;;  %v2291_v56 = vld [vmem:[#allocation2 + $0x68] sm:$0xff] }
 0x1ce   :  { %v11493_v7 = vadd.f32 %v11174_v12, %v1011_v15  ;;  %8722 = vmatmul.mubr.f32.gmra.mrb[186].mxu0 %v451_v63  ;;  %v1013_v42 = vpop.f32.mrb[81].mxu0  ;;  %v2357_v63 = vld [vmem:[#allocation2 + $0x81] sm:$0xff] }
 0x1cf   :  { %v1656_v61 = vpop.f32.mrb[94].mxu1  ;;  %8724 = vmatprep.mubr.f32.mxu0 %v452_v3  ;;  %v455_v42 = vld [vmem:[#allocation2 + $0x322] sm:$0xff] }
 0x1d0   :  { %v11490_v48 = vadd.f32 %v1656_v61, %v11229_v6  ;;  %v1658_v58 = vpop.f32.mrb[95].mxu1  ;;  %2612 = vmatmul.mubr.f32.gmra.mrb[200].mxu1 %v2290_v20  ;;  %v454_v61 = vld [vmem:[#allocation2 + $0x31a] sm:$0xff] }
 0x1d1   :  { %2616 = vmatprep.mubr.f32.mxu1 %v2355_v9  ;;  %v1016_v20 = vpop.f32.mrb[82].mxu0  ;;  %v2292_v58 = vld [vmem:[#allocation2 + $0x78] sm:$0xff] }
 0x1d2   :  { %v11499_v9 = vadd.f32 %v11169_v49, %v1016_v20  ;;  %8725 = vmatmul.mubr.f32.gmra.mrb[188].mxu0 %v453_v60  ;;  %v1018_v12 = vpop.f32.mrb[83].mxu0 }
 0x1d3   :  { %v1661_v55 = vpop.f32.mrb[96].mxu1  ;;  %8727 = vmatprep.mubr.f32.mxu0 %v454_v61 }
 0x1d4   :  { %v11496_v43 = vadd.f32 %v1661_v55, %v11250_v62  ;;  %v1663_v6 = vpop.f32.mrb[97].mxu1  ;;  %2617 = vmatmul.mubr.f32.gmra.mrb[202].mxu1 %v2291_v56  ;;  %v2293_v56 = vld [vmem:[#allocation2 + $0x80] sm:$0xff] }
 0x1d5   :  { %2621 = vmatprep.mubr.f32.mxu1 %v2356_v41  ;;  %v1021_v55 = vpop.f32.mrb[84].mxu0  ;;  %v2358_v6 = vld [vmem:[#allocation2 + $0x91] sm:$0xff] }
 0x1d6   :  { %v11505_v41 = vadd.f32 %v11195_v19, %v1021_v55  ;;  %8728 = vmatmul.mubr.f32.gmra.mrb[190].mxu0 %v455_v42  ;;  %v1023_v49 = vpop.f32.mrb[85].mxu0 }
 0x1d7   :  { %v1666_v15 = vpop.f32.mrb[98].mxu1  ;;  %8762 = vmatprep.mubr.f32.mxu0 %v11157_v53 }
 0x1d8   :  { %v11502_v3 = vadd.f32 %v1666_v15, %v11265_v5  ;;  %v1668_v62 = vpop.f32.mrb[99].mxu1  ;;  %2622 = vmatmul.mubr.f32.gmra.mrb[204].mxu1 %v2292_v58  ;;  %v2294_v58 = vld [vmem:[#allocation2 + $0x90] sm:$0xff]  ;;  %v2359_v15 = vld [vmem:[#allocation2 + $0x99] sm:$0xff] }
 0x1d9   :  { %2626 = vmatprep.mubr.f32.mxu1 %v2357_v63  ;;  %v1026_v5 = vpop.f32.mrb[86].mxu0  ;;  %v17845_v63 = vld [vmem:[#allocation40_spill] sm:$0xff]  ;;  %v17846_v62 = vld [vmem:[#allocation41_spill] sm:$0xff] }
 0x1da   :  { %v11512_v12 = vadd.f32 %v11190_v59, %v1026_v5  ;;  %8763 = vmatmul.mubr.f32.vlgmr.msra.gmra.mrb[192].mxu0 %v17845_v63  ;;  %v1028_v19 = vpop.f32.mrb[87].mxu0 }
 0x1db   :  { %v1671_v60 = vpop.f32.mrb[100].mxu1  ;;  %8765 = vmatprep.mubr.f32.mxu0 %v17846_v62  ;;  %v17848_v19 = vld [vmem:[#allocation43_spill] sm:$0xff] }
 0x1dc   :  { %v11509_v61 = vadd.f32 %v1671_v60, %v11280_v18  ;;  %v1673_v20 = vpop.f32.mrb[101].mxu1  ;;  %2627 = vmatmul.mubr.f32.gmra.mrb[206].mxu1 %v2293_v56  ;;  %v2295_v56 = vld [vmem:[#allocation2 + $0x98] sm:$0xff] }
 0x1dd   :  { %2631 = vmatprep.mubr.f32.mxu1 %v2358_v6  ;;  %v1031_v55 = vpop.f32.mrb[88].mxu0  ;;  %v2360_v6 = vld [vmem:[#allocation2 + $0xa9] sm:$0xff]  ;;  %v17847_v20 = vld [vmem:[#allocation42_spill] sm:$0xff] }
 0x1de   :  { %v11520_v49 = vadd.f32 %v11216_v17, %v1031_v55  ;;  %8766 = vmatmul.mubr.f32.gmra.mrb[194].mxu0 %v11193_v38  ;;  %v1033_v59 = vpop.f32.mrb[89].mxu0  ;;  %v2361_v38 = vld [vmem:[#allocation2 + $0xb1] sm:$0xff] }
 0x1df   :  { %v1676_v42 = vpop.f32.mrb[102].mxu1  ;;  %8768 = vmatprep.mubr.f32.mxu0 %v17847_v20  ;;  %v2297_v55 = vld [vmem:[#allocation2 + $0xb0] sm:$0xff] }
 0x1e0   :  { %v11517_v53 = vadd.f32 %v1676_v42, %v11296_v54  ;;  %v1678_v18 = vpop.f32.mrb[103].mxu1  ;;  %2632 = vmatmul.mubr.f32.gmra.mrb[208].mxu1 %v2294_v58  ;;  %v2296_v58 = vld [vmem:[#allocation2 + $0xa8] sm:$0xff] }
 0x1e1   :  { %2636 = vmatprep.mubr.f32.mxu1 %v2359_v15  ;;  %v1036_v63 = vpop.f32.mrb[90].mxu0 }
 0x1e2   :  { %v11528_v15 = vadd.f32 %v17848_v19, %v1036_v63  ;;  %8769 = vmatmul.mubr.f32.gmra.mrb[196].mxu0 %v11214_v35  ;;  %v1038_v17 = vpop.f32.mrb[91].mxu0  ;;  %v2362_v35 = vld [vmem:[#allocation2 + $0xc1] sm:$0xff] }
 0x1e3   :  { %v1681_v60 = vpop.f32.mrb[104].mxu1  ;;  %8771 = vmatprep.mubr.f32.mxu0 %v11219_v26  ;;  %v17850_v63 = vld [vmem:[#allocation44_spill] sm:$0xff] }
 0x1e4   :  { %v11525_v5 = vadd.f32 %v1681_v60, %v11311_v45  ;;  %v1683_v54 = vpop.f32.mrb[105].mxu1  ;;  %2637 = vmatmul.mubr.f32.gmra.mrb[210].mxu1 %v2295_v56  ;;  %v17849_v56 = vld [vmem:[#allocation45_spill] sm:$0xff] }
 0x1e5   :  { %2641 = vmatprep.mubr.f32.mxu1 %v2360_v6  ;;  %v1041_v18 = vpop.f32.mrb[92].mxu0  ;;  %v2298_v54 = vld [vmem:[#allocation2 + $0xc0] sm:$0xff] }
 0x1e6   :  { %v11536_v59 = vadd.f32 %v17849_v56, %v1041_v18  ;;  %8772 = vmatmul.mubr.f32.gmra.mrb[198].mxu0 %v11235_v31  ;;  %v1043_v6 = vpop.f32.mrb[93].mxu0  ;;  %v2363_v31 = vld [vmem:[#allocation2 + $0xc9] sm:$0xff] }
 0x1e7   :  { %v1686_v42 = vpop.f32.mrb[106].mxu1  ;;  %8774 = vmatprep.mubr.f32.mxu0 %v11240_v13  ;;  %v2300_v6 = vld [vmem:[#allocation2 + $0xd8] sm:$0xff] }
 0x1e8   :  { %v11533_v62 = vadd.f32 %v1686_v42, %v11326_v50  ;;  %v1688_v45 = vpop.f32.mrb[107].mxu1  ;;  %2642 = vmatmul.mubr.f32.gmra.mrb[212].mxu1 %v2296_v58  ;;  %v2299_v42 = vld [vmem:[#allocation2 + $0xc8] sm:$0xff] }
 0x1e9   :  { %2646 = vmatprep.mubr.f32.mxu1 %v2361_v38  ;;  %v1046_v20 = vpop.f32.mrb[94].mxu0 }
 0x1ea   :  { %v11544_v58 = vadd.f32 %v17850_v63, %v1046_v20  ;;  %8775 = vmatmul.mubr.f32.gmra.mrb[200].mxu0 %v11256_v47  ;;  %v1048_v19 = vpop.f32.mrb[95].mxu0  ;;  %v2364_v47 = vld [vmem:[#allocation2 + $0xd9] sm:$0xff] }
 0x1eb   :  { %v1691_v60 = vpop.f32.mrb[108].mxu1  ;;  %8777 = vmatprep.mubr.f32.mxu0 %v11261_v16  ;;  %v2301_v19 = vld [vmem:[#allocation2 + $0xe0] sm:$0xff] }
 0x1ec   :  { %v11541_v26 = vadd.f32 %v1691_v60, %v11341_v8  ;;  %v1693_v50 = vpop.f32.mrb[109].mxu1  ;;  %2647 = vmatmul.mubr.f32.gmra.mrb[214].mxu1 %v2297_v55 }
 0x1ed   :  { %2651 = vmatprep.mubr.f32.mxu1 %v2362_v35  ;;  %v1051_v38 = vpop.f32.mrb[96].mxu0  ;;  %v17851_v35 = vld [vmem:[#allocation46_spill] sm:$0xff] }
 0x1ee   :  { %v11552_v45 = vadd.f32 %v11258_v30, %v1051_v38  ;;  %8778 = vmatmul.mubr.f32.gmra.mrb[202].mxu0 %v11271_v52  ;;  %v1053_v18 = vpop.f32.mrb[97].mxu0  ;;  %v17852_v30 = vld [vmem:[#allocation50_spill] sm:$0xff]  ;;  %v2365_v52 = vld [vmem:[#allocation2 + $0xe1] sm:$0xff] }
 0x1ef   :  { %v1696_v17 = vpop.f32.mrb[110].mxu1  ;;  %8780 = vmatprep.mubr.f32.mxu0 %v11276_v25 }
 0x1f0   :  { %v11549_v13 = vadd.f32 %v1696_v17, %v11356_v27  ;;  %v1698_v8 = vpop.f32.mrb[111].mxu1  ;;  %2652 = vmatmul.mubr.f32.gmra.mrb[216].mxu1 %v2298_v54  ;;  %v17853_v54 = vld [vmem:[#allocation52_spill] sm:$0xff] }
 0x1f1   :  { %2656 = vmatprep.mubr.f32.mxu1 %v2363_v31  ;;  %v1056_v56 = vpop.f32.mrb[98].mxu0  ;;  %v17854_v31 = vld [vmem:[#allocation48_spill] sm:$0xff]  ;;  %v17855_v8 = vld [vmem:[#allocation54_spill] sm:$0xff] }
 0x1f2   :  { %v11560_v60 = vadd.f32 %v17851_v35, %v1056_v56  ;;  %8781 = vmatmul.mubr.f32.gmra.mrb[204].mxu0 %v17852_v30  ;;  %v1058_v50 = vpop.f32.mrb[99].mxu0  ;;  %v2302_v56 = vld [vmem:[#allocation2 + $0xf0] sm:$0xff]  ;;  %v17858_v30 = vld [vmem:[#allocation58_spill] sm:$0xff] }
 0x1f3   :  { %v1701_v55 = vpop.f32.mrb[112].mxu1  ;;  %8783 = vmatprep.mubr.f32.mxu0 %v17853_v54  ;;  %v17859_v54 = vld [vmem:[#allocation6_spill] sm:$0xff] }
 0x1f4   :  { %v11557_v16 = vadd.f32 %v1701_v55, %v11371_v29  ;;  %v1703_v27 = vpop.f32.mrb[113].mxu1  ;;  %2657 = vmatmul.mubr.f32.gmra.mrb[218].mxu1 %v2299_v42  ;;  %v2366_v42 = vld [vmem:[#allocation2 + $0xf1] sm:$0xff] }
 0x1f5   :  { %2661 = vmatprep.mubr.f32.mxu1 %v2364_v47  ;;  %v1061_v63 = vpop.f32.mrb[100].mxu0  ;;  %v17856_v47 = vld [vmem:[#allocation56_spill] sm:$0xff] }
 0x1f6   :  { %v11568_v17 = vadd.f32 %v17854_v31, %v1061_v63  ;;  %8784 = vmatmul.mubr.f32.gmra.mrb[206].mxu0 %v17855_v8  ;;  %v1063_v38 = vpop.f32.mrb[101].mxu0  ;;  %v17860_v31 = vld [vmem:[#allocation51_spill] sm:$0xff] }
 0x1f7   :  { %v1706_v20 = vpop.f32.mrb[114].mxu1  ;;  %8786 = vmatprep.mubr.f32.mxu0 %v17856_v47 }
 0x1f8   :  { %v11565_v25 = vadd.f32 %v1706_v20, %v11383_v10  ;;  %v1708_v29 = vpop.f32.mrb[115].mxu1  ;;  %2662 = vmatmul.mubr.f32.gmra.mrb[220].mxu1 %v2300_v6  ;;  %v17857_v6 = vld [vmem:[#allocation47_spill] sm:$0xff] }
 0x1f9   :  { %2666 = vmatprep.mubr.f32.mxu1 %v2365_v52  ;;  %v1066_v27 = vpop.f32.mrb[102].mxu0  ;;  %v2367_v52 = vld [vmem:[#allocation2 + $0xf9] sm:$0xff] }
 0x1fa   :  { %v11576_v35 = vadd.f32 %v17857_v6, %v1066_v27  ;;  %8787 = vmatmul.mubr.f32.gmra.mrb[208].mxu0 %v17858_v30  ;;  %v1068_v50 = vpop.f32.mrb[103].mxu0  ;;  %v17863_v30 = vld [vmem:[#allocation49_spill] sm:$0xff] }
 0x1fb   :  { %v1711_v18 = vpop.f32.mrb[116].mxu1  ;;  %8789 = vmatprep.mubr.f32.mxu0 %v17859_v54  ;;  %v17864_v54 = vld [vmem:[#allocation62_spill] sm:$0xff] }
 0x1fc   :  { %v11573_v55 = vadd.f32 %v1711_v18, %v11392_v57  ;;  %v1713_v10 = vpop.f32.mrb[117].mxu1  ;;  %2667 = vmatmul.mubr.f32.gmra.mrb[222].mxu1 %v2301_v19  ;;  %v2303_v19 = vld [vmem:[#allocation2 + $0xf8] sm:$0xff]  ;;  %v17861_v18 = vld [vmem:[#allocation60_spill] sm:$0xff] }
 0x1fd   :  { %2671 = vmatprep.mubr.f32.mxu1 %v2366_v42  ;;  %v1071_v63 = vpop.f32.mrb[104].mxu0  ;;  %v2368_v42 = vld [vmem:[#allocation2 + $0x109] sm:$0xff] }
 0x1fe   :  { %v11584_v8 = vadd.f32 %v17860_v31, %v1071_v63  ;;  %v1073_v38 = vpop.f32.mrb[105].mxu0  ;;  %8790 = vmatmul.mubr.f32.gmra.mrb[210].mxu0 %v17861_v18  ;;  %v17862_v10 = vld [vmem:[#allocation8_spill] sm:$0xff]  ;;  %v17865_v63 = vld [vmem:[#allocation10_spill] sm:$0xff] }
 0x1ff   :  { %v1716_v20 = vpop.f32.mrb[118].mxu1  ;;  %8792 = vmatprep.mubr.f32.mxu0 %v17862_v10  ;;  %v2370_v10 = vld [vmem:[#allocation2 + $0x121] sm:$0xff] }
 0x200   :  { %v11581_v29 = vadd.f32 %v1716_v20, %v11400_v21  ;;  %v1718_v57 = vpop.f32.mrb[119].mxu1  ;;  %2672 = vmatmul.mubr.f32.gmra.mrb[224].mxu1 %v2302_v56  ;;  %v2304_v56 = vld [vmem:[#allocation2 + $0x108] sm:$0xff]  ;;  %v2369_v20 = vld [vmem:[#allocation2 + $0x111] sm:$0xff] }
 0x201   :  { %2676 = vmatprep.mubr.f32.mxu1 %v2367_v52  ;;  %v1076_v6 = vpop.f32.mrb[106].mxu0 }
 0x202   :  { %v11592_v50 = vadd.f32 %v17863_v30, %v1076_v6  ;;  %v1078_v52 = vpop.f32.mrb[107].mxu0  ;;  %8793 = vmatmul.mubr.f32.gmra.mrb[212].mxu0 %v17864_v54  ;;  %v17868_v30 = vld [vmem:[#allocation12_spill] sm:$0xff] }
 0x203   :  { %v1721_v47 = vpop.f32.mrb[120].mxu1  ;;  %8795 = vmatprep.mubr.f32.mxu0 %v17865_v63  ;;  %v2440_v54 = vld [vmem:[#allocation2 + $0x16a] sm:$0xff] }
 0x204   :  { %v11589_v27 = vadd.f32 %v1721_v47, %v11408_v4  ;;  %v1723_v21 = vpop.f32.mrb[121].mxu1  ;;  %2677 = vmatmul.mubr.f32.gmra.mrb[226].mxu1 %v2303_v19  ;;  %v2305_v19 = vld [vmem:[#allocation2 + $0x110] sm:$0xff] }
 0x205   :  { %2681 = vmatprep.mubr.f32.mxu1 %v2368_v42  ;;  %v1081_v38 = vpop.f32.mrb[108].mxu0  ;;  %v17866_v42 = vld [vmem:[#allocation55_spill] sm:$0xff]  ;;  %v17867_v21 = vld [vmem:[#allocation28_spill] sm:$0xff] }
 0x206   :  { %v11600_v18 = vadd.f32 %v17866_v42, %v1081_v38  ;;  %v1083_v47 = vpop.f32.mrb[109].mxu0  ;;  %8796 = vmatmul.mubr.f32.gmra.mrb[214].mxu0 %v17867_v21  ;;  %v2371_v38 = vld [vmem:[#allocation2 + $0x129] sm:$0xff]  ;;  %v2441_v21 = vld [vmem:[#allocation2 + $0x172] sm:$0xff] }
 0x207   :  { %v1726_v57 = vpop.f32.mrb[122].mxu1  ;;  %8798 = vmatprep.mubr.f32.mxu0 %v17868_v30  ;;  %v17872_v42 = vld [vmem:[#allocation13_spill] sm:$0xff] }
 0x208   :  { %v11597_v31 = vadd.f32 %v1726_v57, %v11416_v2  ;;  %v1728_v4 = vpop.f32.mrb[123].mxu1  ;;  %2682 = vmatmul.mubr.f32.gmra.mrb[228].mxu1 %v2304_v56  ;;  %v17870_v57 = vld [vmem:[#allocation53_spill] sm:$0xff] }
 0x209   :  { %2686 = vmatprep.mubr.f32.mxu1 %v2369_v20  ;;  %v1086_v56 = vpop.f32.mrb[110].mxu0  ;;  %v2306_v20 = vld [vmem:[#allocation2 + $0x120] sm:$0xff] }
 0x20a   :  { %v11608_v63 = vadd.f32 %v17870_v57, %v1086_v56  ;;  %v1088_v4 = vpop.f32.mrb[111].mxu0  ;;  %8799 = vmatmul.mubr.f32.gmra.mrb[216].mxu0 %v17872_v42  ;;  %v2372_v57 = vld [vmem:[#allocation2 + $0x139] sm:$0xff]  ;;  %v2443_v42 = vld [vmem:[#allocation2 + $0x18a] sm:$0xff] }
 0x20b   :  { %v1731_v6 = vpop.f32.mrb[124].mxu1  ;;  %8801 = vmatprep.mubr.f32.mxu0 %v2440_v54 }
 0x20c   :  { %v11605_v52 = vadd.f32 %v1731_v6, %v11424_v32  ;;  %v1733_v2 = vpop.f32.mrb[125].mxu1  ;;  %2687 = vmatmul.mubr.f32.gmra.mrb[230].mxu1 %v2305_v19  ;;  %17871 = vst [vmem:[#allocation19_spill] sm:$0xff] %v11608_v63  ;;  %v2442_v19 = vld [vmem:[#allocation2 + $0x182] sm:$0xff] }
 0x20d   :  { %2691 = vmatprep.mubr.f32.mxu1 %v2370_v10  ;;  %v1091_v6 = vpop.f32.mrb[112].mxu0  ;;  %v2307_v10 = vld [vmem:[#allocation2 + $0x128] sm:$0xff]  ;;  %v17873_v2 = vld [vmem:[#allocation59_spill] sm:$0xff] }
 0x20e   :  { %17869 = vst [vmem:[#allocation18_spill] sm:$0xff] %v11605_v52  ;;  %v11615_v52 = vadd.f32 %v17873_v2, %v1091_v6  ;;  %v1093_v56 = vpop.f32.mrb[113].mxu0  ;;  %8802 = vmatmul.mubr.f32.gmra.mrb[218].mxu0 %v2441_v21  ;;  %v2373_v2 = vld [vmem:[#allocation2 + $0x141] sm:$0xff] }
 0x20f   :  { %v1736_v47 = vpop.f32.mrb[126].mxu1  ;;  %8804 = vmatprep.mubr.f32.mxu0 %v2442_v19  ;;  %v2445_v21 = vld [vmem:[#allocation2 + $0x1a2] sm:$0xff] }
 0x210   :  { %v11612_v30 = vadd.f32 %v1736_v47, %v11432_v37  ;;  %v1738_v32 = vpop.f32.mrb[127].mxu1  ;;  %2692 = vmatmul.mubr.f32.gmra.mrb[232].mxu1 %v2306_v20  ;;  %17874 = vst [vmem:[#allocation27_spill] sm:$0xff] %v11615_v52  ;;  %v2444_v47 = vld [vmem:[#allocation2 + $0x19a] sm:$0xff] }
 0x211   :  { %2696 = vmatprep.mubr.f32.mxu1 %v2371_v38  ;;  %v1096_v20 = vpop.f32.mrb[114].mxu0  ;;  %v2308_v32 = vld [vmem:[#allocation2 + $0x138] sm:$0xff]  ;;  %v17875_v38 = vld [vmem:[#allocation57_spill] sm:$0xff] }
 0x212   :  { %v11621_v63 = vadd.f32 %v17875_v38, %v1096_v20  ;;  %v1098_v6 = vpop.f32.mrb[115].mxu0  ;;  %8805 = vmatmul.mubr.f32.gmra.mrb[220].mxu0 %v2443_v42  ;;  %v2374_v38 = vld [vmem:[#allocation2 + $0x151] sm:$0xff] }
 0x213   :  { %v1741_v4 = vpop.f32.mrb[128].mxu1  ;;  %8807 = vmatprep.mubr.f32.mxu0 %v2444_v47  ;;  %v2447_v42 = vld [vmem:[#allocation2 + $0x1ea] sm:$0xff] }
 0x214   :  { %v11618_v54 = vadd.f32 %v1741_v4, %v11440_v1  ;;  %v1743_v37 = vpop.f32.mrb[129].mxu1  ;;  %2697 = vmatmul.mubr.f32.gmra.mrb[234].mxu1 %v2307_v10  ;;  %17876 = vst [vmem:[#allocation21_spill] sm:$0xff] %v11621_v63  ;;  %v2446_v4 = vld [vmem:[#allocation2 + $0x1e2] sm:$0xff] }
 0x215   :  { %2701 = vmatprep.mubr.f32.mxu1 %v2372_v57  ;;  %v1101_v10 = vpop.f32.mrb[116].mxu0  ;;  %v2309_v37 = vld [vmem:[#allocation2 + $0x140] sm:$0xff]  ;;  %v17877_v57 = vld [vmem:[#allocation61_spill] sm:$0xff] }
 0x216   :  { %v11627_v52 = vadd.f32 %v17877_v57, %v1101_v10  ;;  %v1103_v20 = vpop.f32.mrb[117].mxu0  ;;  %8808 = vmatmul.mubr.f32.gmra.mrb[222].mxu0 %v2445_v21  ;;  %v2375_v57 = vld [vmem:[#allocation2 + $0x159] sm:$0xff]  ;;  %v2449_v21 = vld [vmem:[#allocation2 + $0x202] sm:$0xff] }
 0x217   :  { %v1746_v56 = vpop.f32.mrb[130].mxu1  ;;  %8810 = vmatprep.mubr.f32.mxu0 %v2446_v4 }
 0x218   :  { %v11624_v19 = vadd.f32 %v1746_v56, %v11448_v40  ;;  %v1748_v1 = vpop.f32.mrb[131].mxu1  ;;  %2702 = vmatmul.mubr.f32.gmra.mrb[236].mxu1 %v2308_v32  ;;  %17878 = vst [vmem:[#allocation22_spill] sm:$0xff] %v11627_v52  ;;  %v2448_v56 = vld [vmem:[#allocation2 + $0x1fa] sm:$0xff] }
 0x219   :  { %2706 = vmatprep.mubr.f32.mxu1 %v2373_v2  ;;  %v1106_v32 = vpop.f32.mrb[118].mxu0  ;;  %v2310_v1 = vld [vmem:[#allocation2 + $0x150] sm:$0xff]  ;;  %v17879_v2 = vld [vmem:[#allocation7_spill] sm:$0xff] }
 0x21a   :  { %v11633_v63 = vadd.f32 %v17879_v2, %v1106_v32  ;;  %v1108_v10 = vpop.f32.mrb[119].mxu0  ;;  %8811 = vmatmul.mubr.f32.gmra.mrb[224].mxu0 %v2447_v42  ;;  %v2376_v2 = vld [vmem:[#allocation2 + $0x169] sm:$0xff]  ;;  %v2451_v42 = vld [vmem:[#allocation2 + $0x21a] sm:$0xff] }
 0x21b   :  { %v1751_v6 = vpop.f32.mrb[132].mxu1  ;;  %8813 = vmatprep.mubr.f32.mxu0 %v2448_v56 }
 0x21c   :  { %v11630_v47 = vadd.f32 %v1751_v6, %v11456_v34  ;;  %v1753_v40 = vpop.f32.mrb[133].mxu1  ;;  %2707 = vmatmul.mubr.f32.gmra.mrb[238].mxu1 %v2309_v37  ;;  %17880 = vst [vmem:[#allocation24_spill] sm:$0xff] %v11633_v63  ;;  %v2450_v6 = vld [vmem:[#allocation2 + $0x212] sm:$0xff] }
 0x21d   :  { %2711 = vmatprep.mubr.f32.mxu1 %v2374_v38  ;;  %v1111_v37 = vpop.f32.mrb[120].mxu0  ;;  %v2311_v40 = vld [vmem:[#allocation2 + $0x158] sm:$0xff]  ;;  %v17881_v38 = vld [vmem:[#allocation63_spill] sm:$0xff] }
 0x21e   :  { %v11639_v52 = vadd.f32 %v17881_v38, %v1111_v37  ;;  %v1113_v32 = vpop.f32.mrb[121].mxu0  ;;  %8814 = vmatmul.mubr.f32.gmra.mrb[226].mxu0 %v2449_v21  ;;  %v2377_v38 = vld [vmem:[#allocation2 + $0x171] sm:$0xff] }
 0x21f   :  { %v1756_v20 = vpop.f32.mrb[134].mxu1  ;;  %8816 = vmatprep.mubr.f32.mxu0 %v2450_v6  ;;  %v2453_v21 = vld [vmem:[#allocation2 + $0x232] sm:$0xff] }
 0x220   :  { %v11636_v4 = vadd.f32 %v1756_v20, %v11463_v36  ;;  %v1758_v34 = vpop.f32.mrb[135].mxu1  ;;  %2712 = vmatmul.mubr.f32.gmra.mrb[240].mxu1 %v2310_v1  ;;  %17882 = vst [vmem:[#allocation25_spill] sm:$0xff] %v11639_v52  ;;  %v2452_v20 = vld [vmem:[#allocation2 + $0x22a] sm:$0xff] }
 0x221   :  { %2716 = vmatprep.mubr.f32.mxu1 %v2375_v57  ;;  %v1116_v1 = vpop.f32.mrb[122].mxu0  ;;  %v2312_v34 = vld [vmem:[#allocation2 + $0x168] sm:$0xff]  ;;  %v17883_v57 = vld [vmem:[#allocation9_spill] sm:$0xff] }
 0x222   :  { %v11645_v63 = vadd.f32 %v17883_v57, %v1116_v1  ;;  %v1118_v37 = vpop.f32.mrb[123].mxu0  ;;  %8817 = vmatmul.mubr.f32.gmra.mrb[228].mxu0 %v2451_v42  ;;  %v2378_v57 = vld [vmem:[#allocation2 + $0x181] sm:$0xff]  ;;  %v2455_v42 = vld [vmem:[#allocation2 + $0x24a] sm:$0xff] }
 0x223   :  { %v1761_v10 = vpop.f32.mrb[136].mxu1  ;;  %8819 = vmatprep.mubr.f32.mxu0 %v2452_v20 }
 0x224   :  { %v11642_v56 = vadd.f32 %v1761_v10, %v11469_v14  ;;  %v1763_v36 = vpop.f32.mrb[137].mxu1  ;;  %2717 = vmatmul.mubr.f32.gmra.mrb[242].mxu1 %v2311_v40  ;;  %17884 = vst [vmem:[#allocation26_spill] sm:$0xff] %v11645_v63  ;;  %v2454_v10 = vld [vmem:[#allocation2 + $0x242] sm:$0xff] }
 0x225   :  { %2721 = vmatprep.mubr.f32.mxu1 %v2376_v2  ;;  %v1121_v40 = vpop.f32.mrb[124].mxu0  ;;  %v2313_v36 = vld [vmem:[#allocation2 + $0x170] sm:$0xff]  ;;  %v17885_v2 = vld [vmem:[#allocation64_spill] sm:$0xff] }
 0x226   :  { %v11651_v52 = vadd.f32 %v17885_v2, %v1121_v40  ;;  %v1123_v1 = vpop.f32.mrb[125].mxu0  ;;  %8820 = vmatmul.mubr.f32.gmra.mrb[230].mxu0 %v2453_v21  ;;  %v2379_v2 = vld [vmem:[#allocation2 + $0x189] sm:$0xff] }
 0x227   :  { %v1766_v32 = vpop.f32.mrb[138].mxu1  ;;  %8822 = vmatprep.mubr.f32.mxu0 %v2454_v10  ;;  %v2457_v21 = vld [vmem:[#allocation2 + $0x262] sm:$0xff] }
 0x228   :  { %v11648_v6 = vadd.f32 %v1766_v32, %v11475_v24  ;;  %v1768_v14 = vpop.f32.mrb[139].mxu1  ;;  %2722 = vmatmul.mubr.f32.gmra.mrb[244].mxu1 %v2312_v34  ;;  %17886 = vst [vmem:[#allocation5_spill] sm:$0xff] %v11651_v52  ;;  %v2456_v32 = vld [vmem:[#allocation2 + $0x25a] sm:$0xff] }
 0x229   :  { %2726 = vmatprep.mubr.f32.mxu1 %v2377_v38  ;;  %v1126_v34 = vpop.f32.mrb[126].mxu0  ;;  %v2314_v14 = vld [vmem:[#allocation2 + $0x180] sm:$0xff] }
 0x22a   :  { %v17887_v38 = vld [vmem:[#allocation11_spill] sm:$0xff]  ;;  %v1128_v40 = vpop.f32.mrb[127].mxu0  ;;  %8823 = vmatmul.mubr.f32.gmra.mrb[232].mxu0 %v2455_v42  ;;  %v17891_v42 = vld [vmem:[#allocation20_spill] sm:$0xff] }
 0x22b   :  { %v1771_v37 = vpop.f32.mrb[140].mxu1  ;;  %v11657_v63 = vadd.f32 %v17887_v38, %v1126_v34  ;;  %8825 = vmatprep.mubr.f32.mxu0 %v2456_v32  ;;  %v2380_v38 = vld [vmem:[#allocation2 + $0x199] sm:$0xff] }
 0x22c   :  { %v11654_v20 = vadd.f32 %v1771_v37, %v11481_v51  ;;  %v1773_v24 = vpop.f32.mrb[141].mxu1  ;;  %2727 = vmatmul.mubr.f32.gmra.mrb[246].mxu1 %v2313_v36  ;;  %v2458_v37 = vld [vmem:[#allocation2 + $0x272] sm:$0xff]  ;;  %v2459_v32 = vld [vmem:[#allocation2 + $0x27a] sm:$0xff] }
 0x22d   :  { %2731 = vmatprep.mubr.f32.mxu1 %v2378_v57  ;;  %17888 = vst [vmem:[#allocation29_spill] sm:$0xff] %v11657_v63  ;;  %v8636_v36 = vpop.f32.mrb[128].mxu0  ;;  %v2315_v24 = vld [vmem:[#allocation2 + $0x188] sm:$0xff]  ;;  %v17889_v57 = vld [vmem:[#allocation14_spill] sm:$0xff] }
 0x22e   :  { %v11663_v52 = vadd.f32 %v8636_v36, %v17889_v57  ;;  %v1966_v34 = vpop.f32.mrb[129].mxu0  ;;  %8826 = vmatmul.mubr.f32.gmra.mrb[234].mxu0 %v2457_v21  ;;  %v2381_v57 = vld [vmem:[#allocation2 + $0x1a1] sm:$0xff] }
 0x22f   :  { %v1776_v1 = vpop.f32.mrb[142].mxu1  ;;  %v11666_v63 = vadd.f32 %v1966_v34, %v17891_v42  ;;  %8828 = vmatprep.mubr.f32.mxu0 %v2458_v37  ;;  %v2461_v37 = vld [vmem:[#allocation2 + $0x292] sm:$0xff] }
 0x230   :  { %v11660_v10 = vadd.f32 %v1776_v1, %v11487_v23  ;;  %v1778_v51 = vpop.f32.mrb[143].mxu1  ;;  %2732 = vmatmul.mubr.f32.gmra.mrb[248].mxu1 %v2314_v14  ;;  %17890 = vst [vmem:[#allocation3_spill] sm:$0xff] %v11663_v52  ;;  %v2460_v1 = vld [vmem:[#allocation2 + $0x28a] sm:$0xff]  ;;  %v17892_v52 = vld [vmem:[#allocation15_spill] sm:$0xff] }
 0x231   :  { %2736 = vmatprep.mubr.f32.mxu1 %v2379_v2  ;;  %v8639_v2 = vpop.f32.mrb[130].mxu0 }
 0x232   :  { %v11672_v51 = vadd.f32 %v8639_v2, %v11403_v39  ;;  %v1976_v36 = vpop.f32.mrb[131].mxu0  ;;  %8829 = vmatmul.mubr.f32.gmra.mrb[236].mxu0 %v2459_v32 }
 0x233   :  { %v1781_v40 = vpop.f32.mrb[144].mxu1  ;;  %v11675_v34 = vadd.f32 %v1976_v36, %v17892_v52  ;;  %8831 = vmatprep.mubr.f32.mxu0 %v2460_v1 }
 0x234   :  { %v11669_v23 = vadd.f32 %v1781_v40, %v11493_v7  ;;  %v1783_v14 = vpop.f32.mrb[145].mxu1  ;;  %2737 = vmatmul.mubr.f32.gmra.mrb[250].mxu1 %v2315_v24  ;;  %v11680_v24 = vld [vmem:[#allocation2] sm:$0xff] }
 0x235   :  { %2741 = vmatprep.mubr.f32.mxu1 %v2380_v38  ;;  %17893 = vst [vmem:[#allocation30_spill] sm:$0xff] %v11675_v34  ;;  %v2462_v38 = vld [vmem:[#allocation2 + $0x2a2] sm:$0xff]  ;;  %v8642_v39 = vpop.f32.mrb[132].mxu0 }
 0x236   :  { %v11684_v42 = vadd.f32 %v8642_v39, %v11419_v28  ;;  %v1986_v32 = vpop.f32.mrb[133].mxu0  ;;  %v2382_v14 = vld [vmem:[#allocation2 + $0x1e1] sm:$0xff]  ;;  %8832 = vmatmul.mubr.f32.gmra.mrb[238].mxu0 %v2461_v37  ;;  %v2383_v39 = vld [vmem:[#allocation2 + $0x1e9] sm:$0xff] }
 0x237   :  { %v1786_v21 = vpop.f32.mrb[146].mxu1  ;;  %v11687_v1 = vadd.f32 %v1986_v32, %v11411_v44  ;;  %8834 = vmatprep.mubr.f32.mxu0 %v2462_v38  ;;  %v2318_v28 = vld [vmem:[#allocation2 + $0x1e0] sm:$0xff] }
 0x238   :  { %v11678_v7 = vadd.f32 %v1786_v21, %v11499_v9  ;;  %v1788_v40 = vpop.f32.mrb[147].mxu1  ;;  %2742 = vmatmul.mubr.f32.gmra.mrb[252].mxu1 %v11680_v24  ;;  %17894 = vst [vmem:[#allocation31_spill] sm:$0xff] %v11684_v42  ;;  %v2463_v9 = vld [vmem:[#allocation2 + $0x2aa] sm:$0xff]  ;;  %v2464_v21 = vld [vmem:[#allocation2 + $0x2ba] sm:$0xff] }
 0x239   :  { %2746 = vmatprep.mubr.f32.mxu1 %v2381_v57  ;;  %17895 = vst [vmem:[#allocation32_spill] sm:$0xff] %v11687_v1  ;;  %v8645_v57 = vpop.f32.mrb[134].mxu0  ;;  %v17897_v32 = vld [vmem:[#allocation23_spill] sm:$0xff]  ;;  %v2466_v1 = vld [vmem:[#allocation2 + $0x2d2] sm:$0xff]  ;;  %v2319_v42 = vld [vmem:[#allocation2 + $0x1e8] sm:$0xff] }
 0x23a   :  { %v11694_v40 = vadd.f32 %v8645_v57, %v11435_v22  ;;  %v1996_v37 = vpop.f32.mrb[135].mxu0  ;;  %8835 = vmatmul.mubr.f32.gmra.mrb[240].mxu0 %v2463_v9  ;;  %v17898_v22 = vld [vmem:[#allocation17_spill] sm:$0xff]  ;;  %v2384_v9 = vld [vmem:[#allocation2 + $0x1f9] sm:$0xff] }
 0x23b   :  { %v1791_v52 = vpop.f32.mrb[148].mxu1  ;;  %v11697_v38 = vadd.f32 %v1996_v37, %v17897_v32  ;;  %8837 = vmatprep.mubr.f32.mxu0 %v2464_v21  ;;  %v17900_v37 = vld [vmem:[#allocation16_spill] sm:$0xff]  ;;  %v2467_v21 = vld [vmem:[#allocation2 + $0x2da] sm:$0xff] }
 0x23c   :  { %v11690_v2 = vadd.f32 %v1791_v52, %v11505_v41  ;;  %v1793_v36 = vpop.f32.mrb[149].mxu1  ;;  %2747 = vmatmul.mubr.f32.gmra.mrb[254].mxu1 %v11680_v24  ;;  %17896 = vst [vmem:[#allocation33_spill] sm:$0xff] %v11694_v40  ;;  %v2465_v41 = vld [vmem:[#allocation2 + $0x2c2] sm:$0xff] }
 0x23d   :  { %2751 = vmatprep.mubr.f32.mxu1 %v2382_v14  ;;  %v8648_v14 = vpop.f32.mrb[136].mxu0 }
 0x23e   :  { %v11703_v57 = vadd.f32 %v8648_v14, %v17898_v22  ;;  %v2006_v40 = vpop.f32.mrb[137].mxu0  ;;  %8838 = vmatmul.mubr.f32.gmra.mrb[242].mxu0 %v2465_v41  ;;  %v2385_v41 = vld [vmem:[#allocation2 + $0x201] sm:$0xff] }
 0x23f   :  { %v1796_v44 = vpop.f32.mrb[150].mxu1  ;;  %v11706_v32 = vadd.f32 %v2006_v40, %v17900_v37  ;;  %8840 = vmatprep.mubr.f32.mxu0 %v2466_v1  ;;  %v17902_v40 = vld [vmem:[#allocation4_spill] sm:$0xff]  ;;  %v2469_v1 = vld [vmem:[#allocation2 + $0x2f2] sm:$0xff] }
 0x240   :  { %v11700_v52 = vadd.f32 %v1796_v44, %v11512_v12  ;;  %v1798_v36 = vpop.f32.mrb[151].mxu1  ;;  %2752 = vmatmul.mubr.f32.gmra.mrb[0].mxu1 %v2318_v28  ;;  %17899 = vst [vmem:[#allocation37_spill] sm:$0xff] %v11703_v57  ;;  %v2468_v44 = vld [vmem:[#allocation2 + $0x2ea] sm:$0xff] }
 0x241   :  { %2756 = vmatprep.mubr.f32.mxu1 %v2383_v39  ;;  %v8651_v39 = vpop.f32.mrb[138].mxu0  ;;  %v2320_v36 = vld [vmem:[#allocation2 + $0x1f8] sm:$0xff] }
 0x242   :  { %v11712_v14 = vadd.f32 %v8651_v39, %v11466_v46  ;;  %v2016_v22 = vpop.f32.mrb[139].mxu0  ;;  %8841 = vmatmul.mubr.f32.gmra.mrb[244].mxu0 %v2467_v21  ;;  %v2386_v21 = vld [vmem:[#allocation2 + $0x211] sm:$0xff] }
 0x243   :  { %v1801_v34 = vpop.f32.mrb[152].mxu1  ;;  %v11715_v37 = vadd.f32 %v2016_v22, %v17902_v40  ;;  %8843 = vmatprep.mubr.f32.mxu0 %v2468_v44  ;;  %v2471_v44 = vld [vmem:[#allocation2 + $0x30a] sm:$0xff] }
 0x244   :  { %v11709_v12 = vadd.f32 %v1801_v34, %v11520_v49  ;;  %v1803_v28 = vpop.f32.mrb[153].mxu1  ;;  %2757 = vmatmul.mubr.f32.gmra.mrb[2].mxu1 %v2319_v42  ;;  %17901 = vst [vmem:[#allocation34_spill] sm:$0xff] %v11712_v14  ;;  %v2470_v42 = vld [vmem:[#allocation2 + $0x302] sm:$0xff]  ;;  %v2322_v40 = vld [vmem:[#allocation2 + $0x210] sm:$0xff] }
 0x245   :  { %2761 = vmatprep.mubr.f32.mxu1 %v2384_v9  ;;  %v8654_v9 = vpop.f32.mrb[140].mxu0  ;;  %v2321_v28 = vld [vmem:[#allocation2 + $0x200] sm:$0xff] }
 0x246   :  { %v11721_v46 = vadd.f32 %v8654_v9, %v11478_v11  ;;  %v2026_v39 = vpop.f32.mrb[141].mxu0  ;;  %8844 = vmatmul.mubr.f32.gmra.mrb[246].mxu0 %v2469_v1  ;;  %v2387_v1 = vld [vmem:[#allocation2 + $0x219] sm:$0xff] }
 0x247   :  { %v1806_v57 = vpop.f32.mrb[154].mxu1  ;;  %v11724_v22 = vadd.f32 %v2026_v39, %v11472_v33  ;;  %8846 = vmatprep.mubr.f32.mxu0 %v2470_v42  ;;  %v2473_v42 = vld [vmem:[#allocation2 + $0x322] sm:$0xff] }
 0x248   :  { %v11718_v49 = vadd.f32 %v1806_v57, %v11528_v15  ;;  %v1808_v34 = vpop.f32.mrb[155].mxu1  ;;  %2762 = vmatmul.mubr.f32.gmra.mrb[4].mxu1 %v2320_v36  ;;  %v2472_v36 = vld [vmem:[#allocation2 + $0x31a] sm:$0xff] }
 0x249   :  { %2766 = vmatprep.mubr.f32.mxu1 %v2385_v41  ;;  %v8657_v41 = vpop.f32.mrb[142].mxu0 }
 0x24a   :  { %v11730_v11 = vadd.f32 %v8657_v41, %v11490_v48  ;;  %v2036_v34 = vpop.f32.mrb[143].mxu0  ;;  %8847 = vmatmul.mubr.f32.gmra.mrb[248].mxu0 %v2471_v44  ;;  %v2388_v44 = vld [vmem:[#allocation2 + $0x229] sm:$0xff] }
 0x24b   :  { %v1811_v14 = vpop.f32.mrb[156].mxu1  ;;  %v11733_v33 = vadd.f32 %v2036_v34, %v11484_v0  ;;  %8849 = vmatprep.mubr.f32.mxu0 %v2472_v36  ;;  %v2475_v36 = vld [vmem:[#allocation2 + $0x33a] sm:$0xff]  ;;  %v2476_v34 = vld [vmem:[#allocation2 + $0x34a] sm:$0xff] }
 0x24c   :  { %v11727_v15 = vadd.f32 %v1811_v14, %v11536_v59  ;;  %v1813_v57 = vpop.f32.mrb[157].mxu1  ;;  %2767 = vmatmul.mubr.f32.gmra.mrb[6].mxu1 %v2321_v28  ;;  %v2474_v28 = vld [vmem:[#allocation2 + $0x332] sm:$0xff] }
 0x24d   :  { %2771 = vmatprep.mubr.f32.mxu1 %v2386_v21  ;;  %v8660_v39 = vpop.f32.mrb[144].mxu0  ;;  %v2323_v21 = vld [vmem:[#allocation2 + $0x218] sm:$0xff] }
 0x24e   :  { %v11739_v48 = vadd.f32 %v8660_v39, %v11502_v3  ;;  %v2046_v57 = vpop.f32.mrb[145].mxu0  ;;  %8850 = vmatmul.mubr.f32.gmra.mrb[250].mxu0 %v2473_v42  ;;  %v2389_v42 = vld [vmem:[#allocation2 + $0x231] sm:$0xff] }
 0x24f   :  { %v1816_v9 = vpop.f32.mrb[158].mxu1  ;;  %v11742_v0 = vadd.f32 %v2046_v57, %v11496_v43  ;;  %8852 = vmatprep.mubr.f32.mxu0 %v2474_v28  ;;  %v2477_v28 = vld [vmem:[#allocation2 + $0x352] sm:$0xff] }
 0x250   :  { %v11736_v59 = vadd.f32 %v1816_v9, %v11544_v58  ;;  %v1818_v14 = vpop.f32.mrb[159].mxu1  ;;  %2772 = vmatmul.mubr.f32.gmra.mrb[8].mxu1 %v2322_v40  ;;  %v2324_v9 = vld [vmem:[#allocation2 + $0x228] sm:$0xff] }
 0x251   :  { %2776 = vmatprep.mubr.f32.mxu1 %v2387_v1  ;;  %v8663_v1 = vpop.f32.mrb[146].mxu0 }
 0x252   :  { %v11748_v3 = vadd.f32 %v8663_v1, %v11517_v53  ;;  %v2056_v14 = vpop.f32.mrb[147].mxu0  ;;  %8853 = vmatmul.mubr.f32.gmra.mrb[252].mxu0 %v2475_v36 }
 0x253   :  { %v1821_v41 = vpop.f32.mrb[160].mxu1  ;;  %v11751_v43 = vadd.f32 %v2056_v14, %v11509_v61  ;;  %8855 = vmatprep.mubr.f32.mxu0 %v2476_v34 }
 0x254   :  { %v11745_v58 = vadd.f32 %v1821_v41, %v11552_v45  ;;  %v1823_v40 = vpop.f32.mrb[161].mxu1  ;;  %2777 = vmatmul.mubr.f32.gmra.mrb[10].mxu1 %v2323_v21 }
 0x255   :  { %2781 = vmatprep.mubr.f32.mxu1 %v2388_v44  ;;  %v8666_v57 = vpop.f32.mrb[148].mxu0  ;;  %v2325_v44 = vld [vmem:[#allocation2 + $0x230] sm:$0xff]  ;;  %v2390_v40 = vld [vmem:[#allocation2 + $0x241] sm:$0xff] }
 0x256   :  { %v11757_v53 = vadd.f32 %v8666_v57, %v11533_v62  ;;  %v2066_v41 = vpop.f32.mrb[149].mxu0  ;;  %8856 = vmatmul.mubr.f32.gmra.mrb[254].mxu0 %v2477_v28  ;;  %v2327_v57 = vld [vmem:[#allocation2 + $0x248] sm:$0xff] }
 0x257   :  { %v1826_v39 = vpop.f32.mrb[162].mxu1  ;;  %v11760_v61 = vadd.f32 %v2066_v41, %v11525_v5 }
 0x258   :  { %v11754_v45 = vadd.f32 %v1826_v39, %v11560_v60  ;;  %v1828_v21 = vpop.f32.mrb[163].mxu1  ;;  %2782 = vmatmul.mubr.f32.gmra.mrb[12].mxu1 %v2324_v9  ;;  %v2326_v9 = vld [vmem:[#allocation2 + $0x240] sm:$0xff] }
 0x259   :  { %2786 = vmatprep.mubr.f32.mxu1 %v2389_v42  ;;  %v8669_v1 = vpop.f32.mrb[150].mxu0  ;;  %v2391_v42 = vld [vmem:[#allocation2 + $0x249] sm:$0xff] }
 0x25a   :  { %v11766_v14 = vadd.f32 %v8669_v1, %v11549_v13  ;;  %v2076_v62 = vpop.f32.mrb[151].mxu0  ;;  %v2392_v13 = vld [vmem:[#allocation2 + $0x259] sm:$0xff] }
 0x25b   :  { %v1831_v36 = vpop.f32.mrb[164].mxu1  ;;  %v11769_v28 = vadd.f32 %v2076_v62, %v11541_v26  ;;  %v2328_v1 = vld [vmem:[#allocation2 + $0x258] sm:$0xff] }
 0x25c   :  { %v11763_v34 = vadd.f32 %v1831_v36, %v11568_v17  ;;  %v1833_v60 = vpop.f32.mrb[165].mxu1  ;;  %2787 = vmatmul.mubr.f32.gmra.mrb[14].mxu1 %v2325_v44 }
 0x25d   :  { %2791 = vmatprep.mubr.f32.mxu1 %v2390_v40  ;;  %v8672_v17 = vpop.f32.mrb[152].mxu0 }
 0x25e   :  { %v11775_v44 = vadd.f32 %v8672_v17, %v11565_v25  ;;  %v2086_v41 = vpop.f32.mrb[153].mxu0  ;;  %v2393_v25 = vld [vmem:[#allocation2 + $0x261] sm:$0xff] }
 0x25f   :  { %v1836_v39 = vpop.f32.mrb[166].mxu1  ;;  %v11778_v36 = vadd.f32 %v2086_v41, %v11557_v16  ;;  %v2329_v17 = vld [vmem:[#allocation2 + $0x260] sm:$0xff] }
 0x260   :  { %v11772_v5 = vadd.f32 %v1836_v39, %v11576_v35  ;;  %v1838_v21 = vpop.f32.mrb[167].mxu1  ;;  %2792 = vmatmul.mubr.f32.gmra.mrb[16].mxu1 %v2326_v9 }
 0x261   :  { %2796 = vmatprep.mubr.f32.mxu1 %v2391_v42  ;;  %v8675_v35 = vpop.f32.mrb[154].mxu0 }
 0x262   :  { %v11784_v9 = vadd.f32 %v8675_v35, %v11581_v29  ;;  %v2096_v62 = vpop.f32.mrb[155].mxu0  ;;  %v2394_v29 = vld [vmem:[#allocation2 + $0x271] sm:$0xff] }
 0x263   :  { %v1841_v40 = vpop.f32.mrb[168].mxu1  ;;  %v11787_v39 = vadd.f32 %v2096_v62, %v11573_v55  ;;  %v2330_v35 = vld [vmem:[#allocation2 + $0x270] sm:$0xff] }
 0x264   :  { %v11781_v26 = vadd.f32 %v1841_v40, %v11584_v8  ;;  %v1843_v60 = vpop.f32.mrb[169].mxu1  ;;  %2797 = vmatmul.mubr.f32.gmra.mrb[18].mxu1 %v2327_v57 }
 0x265   :  { %2801 = vmatprep.mubr.f32.mxu1 %v2392_v13  ;;  %v8678_v8 = vpop.f32.mrb[156].mxu0 }
 0x266   :  { %v11793_v57 = vadd.f32 %v8678_v8, %v11597_v31  ;;  %v2106_v41 = vpop.f32.mrb[157].mxu0  ;;  %v2395_v31 = vld [vmem:[#allocation2 + $0x279] sm:$0xff] }
 0x267   :  { %v1846_v42 = vpop.f32.mrb[170].mxu1  ;;  %v11796_v40 = vadd.f32 %v2106_v41, %v11589_v27  ;;  %v17905_v8 = vld [vmem:[#allocation19_spill] sm:$0xff] }
 0x268   :  { %v11790_v16 = vadd.f32 %v1846_v42, %v11592_v50  ;;  %v1848_v21 = vpop.f32.mrb[171].mxu1  ;;  %2802 = vmatmul.mubr.f32.gmra.mrb[20].mxu1 %v2328_v1  ;;  %v17904_v42 = vld [vmem:[#allocation18_spill] sm:$0xff] }
 0x269   :  { %2806 = vmatprep.mubr.f32.mxu1 %v2393_v25  ;;  %v8681_v50 = vpop.f32.mrb[158].mxu0 }
 0x26a   :  { %v11802_v1 = vadd.f32 %v8681_v50, %v11612_v30  ;;  %v2116_v62 = vpop.f32.mrb[159].mxu0  ;;  %v2396_v30 = vld [vmem:[#allocation2 + $0x289] sm:$0xff] }
 0x26b   :  { %v1851_v13 = vpop.f32.mrb[172].mxu1  ;;  %v11805_v21 = vadd.f32 %v2116_v62, %v17904_v42 }
 0x26c   :  { %v11799_v55 = vadd.f32 %v1851_v13, %v11600_v18  ;;  %v1853_v60 = vpop.f32.mrb[173].mxu1  ;;  %2807 = vmatmul.mubr.f32.gmra.mrb[22].mxu1 %v2329_v17  ;;  %17903 = vst [vmem:[#allocation35_spill] sm:$0xff] %v11802_v1  ;;  %v2331_v17 = vld [vmem:[#allocation2 + $0x278] sm:$0xff]  ;;  %v17907_v1 = vld [vmem:[#allocation27_spill] sm:$0xff] }
 0x26d   :  { %2811 = vmatprep.mubr.f32.mxu1 %v2394_v29  ;;  %v8684_v18 = vpop.f32.mrb[160].mxu0 }
 0x26e   :  { %v11811_v29 = vadd.f32 %v8684_v18, %v11624_v19  ;;  %v2126_v13 = vpop.f32.mrb[161].mxu0  ;;  %v2397_v19 = vld [vmem:[#allocation2 + $0x291] sm:$0xff] }
 0x26f   :  { %v1856_v25 = vpop.f32.mrb[174].mxu1  ;;  %v11814_v50 = vadd.f32 %v2126_v13, %v11618_v54 }
 0x270   :  { %v11808_v27 = vadd.f32 %v1856_v25, %v17905_v8  ;;  %v1858_v41 = vpop.f32.mrb[175].mxu1  ;;  %2812 = vmatmul.mubr.f32.gmra.mrb[24].mxu1 %v2330_v35  ;;  %17906 = vst [vmem:[#allocation36_spill] sm:$0xff] %v11811_v29  ;;  %v2332_v35 = vld [vmem:[#allocation2 + $0x288] sm:$0xff]  ;;  %v17909_v29 = vld [vmem:[#allocation21_spill] sm:$0xff] }
 0x271   :  { %2816 = vmatprep.mubr.f32.mxu1 %v2395_v31  ;;  %v8687_v25 = vpop.f32.mrb[162].mxu0 }
 0x272   :  { %v11820_v31 = vadd.f32 %v8687_v25, %v11636_v4  ;;  %v2136_v8 = vpop.f32.mrb[163].mxu0  ;;  %v2398_v4 = vld [vmem:[#allocation2 + $0x2a1] sm:$0xff] }
 0x273   :  { %v1861_v60 = vpop.f32.mrb[176].mxu1  ;;  %v11823_v18 = vadd.f32 %v2136_v8, %v11630_v47 }
 0x274   :  { %v11817_v62 = vadd.f32 %v1861_v60, %v17907_v1  ;;  %v1863_v42 = vpop.f32.mrb[177].mxu1  ;;  %2817 = vmatmul.mubr.f32.gmra.mrb[26].mxu1 %v2331_v17  ;;  %17908 = vst [vmem:[#allocation38_spill] sm:$0xff] %v11820_v31  ;;  %v2333_v17 = vld [vmem:[#allocation2 + $0x290] sm:$0xff]  ;;  %v17911_v31 = vld [vmem:[#allocation22_spill] sm:$0xff] }
 0x275   :  { %2821 = vmatprep.mubr.f32.mxu1 %v2396_v30  ;;  %v8690_v1 = vpop.f32.mrb[164].mxu0 }
 0x276   :  { %v11829_v30 = vadd.f32 %v8690_v1, %v11648_v6  ;;  %v2146_v60 = vpop.f32.mrb[165].mxu0  ;;  %v2399_v6 = vld [vmem:[#allocation2 + $0x2a9] sm:$0xff] }
 0x277   :  { %v1866_v41 = vpop.f32.mrb[178].mxu1  ;;  %v11832_v25 = vadd.f32 %v2146_v60, %v11642_v56 }
 0x278   :  { %v11826_v54 = vadd.f32 %v1866_v41, %v17909_v29  ;;  %v1868_v13 = vpop.f32.mrb[179].mxu1  ;;  %2822 = vmatmul.mubr.f32.gmra.mrb[28].mxu1 %v2332_v35  ;;  %17910 = vst [vmem:[#allocation39_spill] sm:$0xff] %v11829_v30  ;;  %v2334_v35 = vld [vmem:[#allocation2 + $0x2a0] sm:$0xff]  ;;  %v17913_v30 = vld [vmem:[#allocation24_spill] sm:$0xff] }
 0x279   :  { %2826 = vmatprep.mubr.f32.mxu1 %v2397_v19  ;;  %v8693_v29 = vpop.f32.mrb[166].mxu0 }
 0x27a   :  { %v11838_v19 = vadd.f32 %v8693_v29, %v11660_v10  ;;  %v2156_v41 = vpop.f32.mrb[167].mxu0  ;;  %v2400_v10 = vld [vmem:[#allocation2 + $0x2b9] sm:$0xff] }
 0x27b   :  { %v1871_v42 = vpop.f32.mrb[180].mxu1  ;;  %v11841_v1 = vadd.f32 %v2156_v41, %v11654_v20 }
 0x27c   :  { %v11835_v47 = vadd.f32 %v1871_v42, %v17911_v31  ;;  %v1873_v8 = vpop.f32.mrb[181].mxu1  ;;  %2827 = vmatmul.mubr.f32.gmra.mrb[30].mxu1 %v2333_v17  ;;  %17912 = vst [vmem:[#allocation40_spill] sm:$0xff] %v11838_v19  ;;  %v2335_v17 = vld [vmem:[#allocation2 + $0x2a8] sm:$0xff]  ;;  %v17915_v19 = vld [vmem:[#allocation25_spill] sm:$0xff] }
 0x27d   :  { %2831 = vmatprep.mubr.f32.mxu1 %v2398_v4  ;;  %v8696_v31 = vpop.f32.mrb[168].mxu0 }
 0x27e   :  { %v11847_v4 = vadd.f32 %v8696_v31, %v11678_v7  ;;  %v2166_v42 = vpop.f32.mrb[169].mxu0  ;;  %v2401_v7 = vld [vmem:[#allocation2 + $0x2c1] sm:$0xff] }
 0x27f   :  { %v1876_v13 = vpop.f32.mrb[182].mxu1  ;;  %v11850_v29 = vadd.f32 %v2166_v42, %v11669_v23 }
 0x280   :  { %v11844_v56 = vadd.f32 %v1876_v13, %v17913_v30  ;;  %v1878_v60 = vpop.f32.mrb[183].mxu1  ;;  %2832 = vmatmul.mubr.f32.gmra.mrb[32].mxu1 %v2334_v35  ;;  %17914 = vst [vmem:[#allocation41_spill] sm:$0xff] %v11847_v4  ;;  %v2336_v35 = vld [vmem:[#allocation2 + $0x2b8] sm:$0xff] }
 0x281   :  { %2836 = vmatprep.mubr.f32.mxu1 %v2399_v6  ;;  %v8699_v30 = vpop.f32.mrb[170].mxu0  ;;  %v17917_v4 = vld [vmem:[#allocation26_spill] sm:$0xff] }
 0x282   :  { %v11856_v6 = vadd.f32 %v8699_v30, %v11700_v52  ;;  %v2176_v13 = vpop.f32.mrb[171].mxu0  ;;  %v2402_v52 = vld [vmem:[#allocation2 + $0x2d1] sm:$0xff] }
 0x283   :  { %v1881_v8 = vpop.f32.mrb[184].mxu1  ;;  %v11859_v31 = vadd.f32 %v2176_v13, %v11690_v2 }
 0x284   :  { %v11853_v20 = vadd.f32 %v1881_v8, %v17915_v19  ;;  %v1883_v41 = vpop.f32.mrb[185].mxu1  ;;  %2837 = vmatmul.mubr.f32.gmra.mrb[34].mxu1 %v2335_v17  ;;  %17916 = vst [vmem:[#allocation42_spill] sm:$0xff] %v11856_v6  ;;  %v2337_v17 = vld [vmem:[#allocation2 + $0x2c0] sm:$0xff]  ;;  %v17919_v6 = vld [vmem:[#allocation5_spill] sm:$0xff] }
 0x285   :  { %2841 = vmatprep.mubr.f32.mxu1 %v2400_v10  ;;  %v8702_v19 = vpop.f32.mrb[172].mxu0 }
 0x286   :  { %v11865_v10 = vadd.f32 %v8702_v19, %v11718_v49  ;;  %v2186_v8 = vpop.f32.mrb[173].mxu0  ;;  %v2403_v49 = vld [vmem:[#allocation2 + $0x2d9] sm:$0xff] }
 0x287   :  { %v1886_v60 = vpop.f32.mrb[186].mxu1  ;;  %v11868_v30 = vadd.f32 %v2186_v8, %v11709_v12 }
 0x288   :  { %v11862_v23 = vadd.f32 %v1886_v60, %v17917_v4  ;;  %v1888_v42 = vpop.f32.mrb[187].mxu1  ;;  %2842 = vmatmul.mubr.f32.gmra.mrb[36].mxu1 %v2336_v35  ;;  %17918 = vst [vmem:[#allocation43_spill] sm:$0xff] %v11865_v10  ;;  %v2338_v35 = vld [vmem:[#allocation2 + $0x2d0] sm:$0xff] }
 0x289   :  { %2846 = vmatprep.mubr.f32.mxu1 %v2401_v7  ;;  %v8705_v4 = vpop.f32.mrb[174].mxu0  ;;  %v17920_v10 = vld [vmem:[#allocation29_spill] sm:$0xff] }
 0x28a   :  { %v11874_v7 = vadd.f32 %v8705_v4, %v11736_v59  ;;  %v2196_v60 = vpop.f32.mrb[175].mxu0  ;;  %v2404_v59 = vld [vmem:[#allocation2 + $0x2e9] sm:$0xff] }
 0x28b   :  { %v1891_v41 = vpop.f32.mrb[188].mxu1  ;;  %v11877_v19 = vadd.f32 %v2196_v60, %v11727_v15 }
 0x28c   :  { %v11871_v2 = vadd.f32 %v1891_v41, %v17919_v6  ;;  %v1893_v13 = vpop.f32.mrb[189].mxu1  ;;  %2847 = vmatmul.mubr.f32.gmra.mrb[38].mxu1 %v2337_v17  ;;  %v2339_v17 = vld [vmem:[#allocation2 + $0x2d8] sm:$0xff] }
 0x28d   :  { %2851 = vmatprep.mubr.f32.mxu1 %v2402_v52  ;;  %v8708_v6 = vpop.f32.mrb[176].mxu0 }
 0x28e   :  { %v11883_v52 = vadd.f32 %v8708_v6, %v11754_v45  ;;  %v2206_v41 = vpop.f32.mrb[177].mxu0 }
 0x28f   :  { %v1896_v42 = vpop.f32.mrb[190].mxu1  ;;  %v11886_v13 = vadd.f32 %v2206_v41, %v11745_v58  ;;  %v2341_v41 = vld [vmem:[#allocation2 + $0x2f0] sm:$0xff] }
 0x290   :  { %v11880_v12 = vadd.f32 %v1896_v42, %v17920_v10  ;;  %v1898_v8 = vpop.f32.mrb[191].mxu1  ;;  %2852 = vmatmul.mubr.f32.gmra.mrb[40].mxu1 %v2338_v35  ;;  %17921 = vst [vmem:[#allocation45_spill] sm:$0xff] %v11883_v52  ;;  %v2340_v10 = vld [vmem:[#allocation2 + $0x2e8] sm:$0xff]  ;;  %v2405_v42 = vld [vmem:[#allocation2 + $0x2f1] sm:$0xff] }
 0x291   :  { %2856 = vmatprep.mubr.f32.mxu1 %v2403_v49  ;;  %v8711_v60 = vpop.f32.mrb[178].mxu0 }
 0x292   :  { %v11891_v35 = vadd.f32 %v8711_v60, %v11772_v5  ;;  %v2216_v49 = vpop.f32.mrb[179].mxu0 }
 0x293   :  { %v11888_v4 = vpop.f32.mrb[192].mxu1  ;;  %v11894_v45 = vadd.f32 %v2216_v49, %v11763_v34  ;;  %v2342_v49 = vld [vmem:[#allocation2 + $0x300] sm:$0xff] }
 0x294   :  { %v2595_v15 = vpop.f32.mrb[193].mxu1  ;;  %2857 = vmatmul.mubr.f32.gmra.mrb[42].mxu1 %v2339_v17  ;;  %17922 = vst [vmem:[#allocation44_spill] sm:$0xff] %v11891_v35 }
 0x295   :  { %2861 = vmatprep.mubr.f32.mxu1 %v2404_v59  ;;  %17923 = vst [vmem:[#allocation46_spill] sm:$0xff] %v11894_v45  ;;  %v8714_v58 = vpop.f32.mrb[180].mxu0  ;;  %v2406_v15 = vld [vmem:[#allocation2 + $0x301] sm:$0xff] }
 0x296   :  { %v11899_v17 = vadd.f32 %v8714_v58, %v11790_v16  ;;  %v2226_v59 = vpop.f32.mrb[181].mxu0 }
 0x297   :  { %v11896_v8 = vpop.f32.mrb[194].mxu1  ;;  %v11902_v5 = vadd.f32 %v2226_v59, %v11781_v26  ;;  %v2343_v59 = vld [vmem:[#allocation2 + $0x308] sm:$0xff] }
 0x298   :  { %v2600_v6 = vpop.f32.mrb[195].mxu1  ;;  %2862 = vmatmul.mubr.f32.gmra.mrb[44].mxu1 %v2340_v10  ;;  %17924 = vst [vmem:[#allocation50_spill] sm:$0xff] %v11899_v17 }
 0x299   :  { %2866 = vmatprep.mubr.f32.mxu1 %v2405_v42  ;;  %17925 = vst [vmem:[#allocation52_spill] sm:$0xff] %v11902_v5  ;;  %v8717_v34 = vpop.f32.mrb[182].mxu0  ;;  %v2407_v6 = vld [vmem:[#allocation2 + $0x309] sm:$0xff] }
 0x29a   :  { %v11907_v10 = vadd.f32 %v8717_v34, %v11808_v27  ;;  %v2236_v42 = vpop.f32.mrb[183].mxu0 }
 0x29b   :  { %v11904_v60 = vpop.f32.mrb[196].mxu1  ;;  %v11910_v16 = vadd.f32 %v2236_v42, %v11799_v55  ;;  %v2344_v55 = vld [vmem:[#allocation2 + $0x318] sm:$0xff]  ;;  %v2409_v42 = vld [vmem:[#allocation2 + $0x321] sm:$0xff] }
 0x29c   :  { %v2605_v35 = vpop.f32.mrb[197].mxu1  ;;  %2867 = vmatmul.mubr.f32.gmra.mrb[46].mxu1 %v2341_v41  ;;  %17926 = vst [vmem:[#allocation48_spill] sm:$0xff] %v11907_v10 }
 0x29d   :  { %2871 = vmatprep.mubr.f32.mxu1 %v2406_v15  ;;  %17927 = vst [vmem:[#allocation54_spill] sm:$0xff] %v11910_v16  ;;  %v8720_v26 = vpop.f32.mrb[184].mxu0  ;;  %v2408_v15 = vld [vmem:[#allocation2 + $0x319] sm:$0xff] }
 0x29e   :  { %v11913_v35 = vadd.f32 %v8720_v26, %v11826_v54  ;;  %v2246_v41 = vpop.f32.mrb[185].mxu0 }
 0x29f   :  { %v2608_v58 = vpop.f32.mrb[198].mxu1  ;;  %v11916_v5 = vadd.f32 %v2246_v41, %v11817_v62  ;;  %v2345_v62 = vld [vmem:[#allocation2 + $0x320] sm:$0xff] }
 0x2a0   :  { %v2610_v17 = vpop.f32.mrb[199].mxu1  ;;  %2872 = vmatmul.mubr.f32.gmra.mrb[48].mxu1 %v2342_v49  ;;  %17928 = vst [vmem:[#allocation56_spill] sm:$0xff] %v11913_v35 }
 0x2a1   :  { %2876 = vmatprep.mubr.f32.mxu1 %v2407_v6  ;;  %17929 = vst [vmem:[#allocation47_spill] sm:$0xff] %v11916_v5  ;;  %v8723_v10 = vpop.f32.mrb[186].mxu0 }
 0x2a2   :  { %v11919_v17 = vadd.f32 %v8723_v10, %v11844_v56  ;;  %v2256_v49 = vpop.f32.mrb[187].mxu0 }
 0x2a3   :  { %v2613_v27 = vpop.f32.mrb[200].mxu1  ;;  %v11922_v6 = vadd.f32 %v2256_v49, %v11835_v47  ;;  %v2346_v47 = vld [vmem:[#allocation2 + $0x330] sm:$0xff] }
 0x2a4   :  { %v2615_v34 = vpop.f32.mrb[201].mxu1  ;;  %2877 = vmatmul.mubr.f32.gmra.mrb[50].mxu1 %v2343_v59  ;;  %17930 = vst [vmem:[#allocation58_spill] sm:$0xff] %v11919_v17 }
 0x2a5   :  { %2881 = vmatprep.mubr.f32.mxu1 %v2408_v15  ;;  %17931 = vst [vmem:[#allocation6_spill] sm:$0xff] %v11922_v6  ;;  %v8726_v35 = vpop.f32.mrb[188].mxu0  ;;  %v2410_v15 = vld [vmem:[#allocation2 + $0x331] sm:$0xff] }
 0x2a6   :  { %v11925_v41 = vadd.f32 %v8726_v35, %v11862_v23  ;;  %v2266_v59 = vpop.f32.mrb[189].mxu0  ;;  %v17946_v6 = vld [vmem:[#allocation33_spill] sm:$0xff] }
 0x2a7   :  { %v2618_v54 = vpop.f32.mrb[202].mxu1  ;;  %v11928_v34 = vadd.f32 %v2266_v59, %v11853_v20  ;;  %v2347_v20 = vld [vmem:[#allocation2 + $0x338] sm:$0xff] }
 0x2a8   :  { %v2620_v26 = vpop.f32.mrb[203].mxu1  ;;  %2882 = vmatmul.mubr.f32.gmra.mrb[52].mxu1 %v2344_v55  ;;  %17932 = vst [vmem:[#allocation51_spill] sm:$0xff] %v11925_v41 }
 0x2a9   :  { %2886 = vmatprep.mubr.f32.mxu1 %v2409_v42  ;;  %17933 = vst [vmem:[#allocation60_spill] sm:$0xff] %v11928_v34  ;;  %v8729_v17 = vpop.f32.mrb[190].mxu0  ;;  %v2411_v42 = vld [vmem:[#allocation2 + $0x339] sm:$0xff] }
 0x2aa   :  { %v11931_v49 = vadd.f32 %v8729_v17, %v11880_v12  ;;  %v2276_v55 = vpop.f32.mrb[191].mxu0  ;;  %v17936_v12 = vld [vmem:[#allocation3_spill] sm:$0xff] }
 0x2ab   :  { %v2623_v56 = vpop.f32.mrb[204].mxu1  ;;  %v11934_v26 = vadd.f32 %v2276_v55, %v11871_v2 }
 0x2ac   :  { %v2625_v10 = vpop.f32.mrb[205].mxu1  ;;  %2887 = vmatmul.mubr.f32.gmra.mrb[54].mxu1 %v2345_v62  ;;  %17934 = vst [vmem:[#allocation8_spill] sm:$0xff] %v11931_v49 }
 0x2ad   :  { %2891 = vmatprep.mubr.f32.mxu1 %v2410_v15  ;;  %17935 = vst [vmem:[#allocation49_spill] sm:$0xff] %v11934_v26  ;;  %v8764_v41 = vpop.f32.mrb[192].mxu0  ;;  %v2412_v10 = vld [vmem:[#allocation2 + $0x349] sm:$0xff] }
 0x2ae   :  { %v2984_v59 = vadd.f32 %v8764_v41, %v11896_v8  ;;  %v2978_v62 = vpop.f32.mrb[193].mxu0 }
 0x2af   :  { %v2628_v23 = vpop.f32.mrb[206].mxu1  ;;  %v2979_v34 = vadd.f32 %v2978_v62, %v11888_v4 }
 0x2b0   :  { %v2630_v35 = vpop.f32.mrb[207].mxu1  ;;  %2892 = vmatmul.mubr.f32.gmra.mrb[56].mxu1 %v2346_v47  ;;  %v11939_v17 = vadd.f32 %v2984_v59, %v17936_v12  ;;  %v17940_v59 = vld [vmem:[#allocation30_spill] sm:$0xff] }
 0x2b1   :  { %2896 = vmatprep.mubr.f32.mxu1 %v2411_v42  ;;  %v11942_v2 = vadd.f32 %v2979_v34, %v11666_v63  ;;  %v8767_v55 = vpop.f32.mrb[194].mxu0  ;;  %v2413_v35 = vld [vmem:[#allocation2 + $0x351] sm:$0xff] }
 0x2b2   :  { %17937 = vst [vmem:[#allocation62_spill] sm:$0xff] %v11939_v17  ;;  %v2994_v47 = vadd.f32 %v8767_v55, %v2608_v58  ;;  %v2988_v42 = vpop.f32.mrb[195].mxu0 }
 0x2b3   :  { %v2633_v15 = vpop.f32.mrb[208].mxu1  ;;  %17938 = vst [vmem:[#allocation10_spill] sm:$0xff] %v11942_v2  ;;  %v2989_v8 = vadd.f32 %v2988_v42, %v11904_v60 }
 0x2b4   :  { %v2635_v49 = vpop.f32.mrb[209].mxu1  ;;  %2897 = vmatmul.mubr.f32.gmra.mrb[58].mxu1 %v2347_v20  ;;  %v11946_v41 = vadd.f32 %v2994_v47, %v11672_v51  ;;  %v17944_v51 = vld [vmem:[#allocation32_spill] sm:$0xff] }
 0x2b5   :  { %2901 = vmatprep.mubr.f32.mxu1 %v2412_v10  ;;  %v11950_v49 = vadd.f32 %v2989_v8, %v17940_v59  ;;  %v8770_v20 = vpop.f32.mrb[196].mxu0  ;;  %v17942_v10 = vld [vmem:[#allocation31_spill] sm:$0xff] }
 0x2b6   :  { %17939 = vst [vmem:[#allocation55_spill] sm:$0xff] %v11946_v41  ;;  %v3004_v63 = vadd.f32 %v8770_v20, %v2618_v54  ;;  %v2998_v34 = vpop.f32.mrb[197].mxu0 }
 0x2b7   :  { %v2638_v26 = vpop.f32.mrb[210].mxu1  ;;  %17941 = vst [vmem:[#allocation28_spill] sm:$0xff] %v11950_v49  ;;  %v2999_v58 = vadd.f32 %v2998_v34, %v2613_v27 }
 0x2b8   :  { %v2640_v4 = vpop.f32.mrb[211].mxu1  ;;  %2902 = vmatmul.mubr.f32.gmra.mrb[60].mxu1 %v11680_v24  ;;  %v11953_v12 = vadd.f32 %v3004_v63, %v17942_v10 }
 0x2b9   :  { %2906 = vmatprep.mubr.f32.mxu1 %v2413_v35  ;;  %v11957_v60 = vadd.f32 %v2999_v58, %v17944_v51  ;;  %v8773_v47 = vpop.f32.mrb[198].mxu0 }
 0x2ba   :  { %17943 = vst [vmem:[#allocation12_spill] sm:$0xff] %v11953_v12  ;;  %v3014_v42 = vadd.f32 %v8773_v47, %v2628_v23  ;;  %v3008_v4 = vpop.f32.mrb[199].mxu0 }
 0x2bb   :  { %v2643_v62 = vpop.f32.mrb[212].mxu1  ;;  %17945 = vst [vmem:[#allocation53_spill] sm:$0xff] %v11957_v60  ;;  %v3009_v59 = vadd.f32 %v3008_v4, %v2623_v56 }
 0x2bc   :  { %v2645_v55 = vpop.f32.mrb[213].mxu1  ;;  %2907 = vmatmul.mubr.f32.gmra.mrb[62].mxu1 %v11680_v24  ;;  %v11960_v35 = vadd.f32 %v3014_v42, %v17946_v6 }
 0x2bd   :  { %v11963_v27 = vadd.f32 %v3009_v59, %v11697_v38  ;;  %v8776_v20 = vpop.f32.mrb[200].mxu0  ;;  %v17949_v55 = vld [vmem:[#allocation37_spill] sm:$0xff] }
 0x2be   :  { %17947 = vst [vmem:[#allocation13_spill] sm:$0xff] %v11960_v35  ;;  %v3024_v63 = vadd.f32 %v8776_v20, %v2638_v26  ;;  %v3018_v34 = vpop.f32.mrb[201].mxu0 }
 0x2bf   :  { %v2648_v8 = vpop.f32.mrb[214].mxu1  ;;  %17948 = vst [vmem:[#allocation59_spill] sm:$0xff] %v11963_v27  ;;  %v3019_v24 = vadd.f32 %v3018_v34, %v2633_v15 }
 0x2c0   :  { %v2650_v54 = vpop.f32.mrb[215].mxu1  ;;  %v11966_v58 = vadd.f32 %v3024_v63, %v17949_v55 }
 0x2c1   :  { %v11969_v23 = vadd.f32 %v3019_v24, %v11706_v32  ;;  %v8779_v56 = vpop.f32.mrb[202].mxu0  ;;  %v17952_v54 = vld [vmem:[#allocation34_spill] sm:$0xff] }
 0x2c2   :  { %17950 = vst [vmem:[#allocation57_spill] sm:$0xff] %v11966_v58  ;;  %v3034_v47 = vadd.f32 %v8779_v56, %v2648_v8  ;;  %v3028_v6 = vpop.f32.mrb[203].mxu0 }
 0x2c3   :  { %v2653_v10 = vpop.f32.mrb[216].mxu1  ;;  %17951 = vst [vmem:[#allocation61_spill] sm:$0xff] %v11969_v23  ;;  %v3029_v4 = vadd.f32 %v3028_v6, %v2643_v62 }
 0x2c4   :  { %v2655_v51 = vpop.f32.mrb[217].mxu1  ;;  %v11972_v38 = vadd.f32 %v3034_v47, %v17952_v54 }
 0x2c5   :  { %v11975_v26 = vadd.f32 %v3029_v4, %v11715_v37  ;;  %v8782_v15 = vpop.f32.mrb[204].mxu0 }
 0x2c6   :  { %17953 = vst [vmem:[#allocation7_spill] sm:$0xff] %v11972_v38  ;;  %v3038_v63 = vpop.f32.mrb[205].mxu0 }
 0x2c7   :  { %v2658_v42 = vpop.f32.mrb[218].mxu1  ;;  %17954 = vst [vmem:[#allocation63_spill] sm:$0xff] %v11975_v26  ;;  %v3039_v55 = vadd.f32 %v3038_v63, %v2653_v10 }
 0x2c8   :  { %v2660_v59 = vpop.f32.mrb[219].mxu1  ;;  %v3044_v20 = vadd.f32 %v8782_v15, %v2658_v42 }
 0x2c9   :  { %v11981_v8 = vadd.f32 %v3039_v55, %v11724_v22  ;;  %v8785_v62 = vpop.f32.mrb[206].mxu0 }
 0x2ca   :  { %v11978_v32 = vadd.f32 %v3044_v20, %v11721_v46  ;;  %v3048_v51 = vpop.f32.mrb[207].mxu0 }
 0x2cb   :  { %v2663_v34 = vpop.f32.mrb[220].mxu1  ;;  %17956 = vst [vmem:[#allocation64_spill] sm:$0xff] %v11981_v8 }
 0x2cc   :  { %17955 = vst [vmem:[#allocation9_spill] sm:$0xff] %v11978_v32  ;;  %v2665_v24 = vpop.f32.mrb[221].mxu1  ;;  %v3049_v47 = vadd.f32 %v3048_v51, %v2663_v34 }
 0x2cd   :  { %v8788_v42 = vpop.f32.mrb[208].mxu0 }
 0x2ce   :  { %v11984_v37 = vadd.f32 %v3049_v47, %v11733_v33  ;;  %v3058_v10 = vpop.f32.mrb[209].mxu0 }
 0x2cf   :  { %v2668_v56 = vpop.f32.mrb[222].mxu1 }
 0x2d0   :  { %v3054_v6 = vadd.f32 %v8785_v62, %v2668_v56  ;;  %v2670_v54 = vpop.f32.mrb[223].mxu1  ;;  %17957 = vst [vmem:[#allocation11_spill] sm:$0xff] %v11984_v37 }
 0x2d1   :  { %v8791_v20 = vpop.f32.mrb[210].mxu0 }
 0x2d2   :  { %v11987_v4 = vadd.f32 %v3054_v6, %v11730_v11  ;;  %v3068_v63 = vpop.f32.mrb[211].mxu0 }
 0x2d3   :  { %v2673_v46 = vpop.f32.mrb[224].mxu1 }
 0x2d4   :  { %17958 = vst [vmem:[#allocation14_spill] sm:$0xff] %v11987_v4  ;;  %v3059_v59 = vadd.f32 %v3058_v10, %v2673_v46  ;;  %v2675_v15 = vpop.f32.mrb[225].mxu1 }
 0x2d5   :  { %v8794_v62 = vpop.f32.mrb[212].mxu0 }
 0x2d6   :  { %v11990_v22 = vadd.f32 %v3059_v59, %v11742_v0  ;;  %v3078_v51 = vpop.f32.mrb[213].mxu0 }
 0x2d7   :  { %v2678_v55 = vpop.f32.mrb[226].mxu1 }
 0x2d8   :  { %v3064_v34 = vadd.f32 %v8788_v42, %v2678_v55  ;;  %v2680_v24 = vpop.f32.mrb[227].mxu1 }
 0x2d9   :  { %v8797_v6 = vpop.f32.mrb[214].mxu0 }
 0x2da   :  { %v11993_v33 = vadd.f32 %v3064_v34, %v11739_v48  ;;  %v3088_v10 = vpop.f32.mrb[215].mxu0 }
 0x2db   :  { %v2683_v56 = vpop.f32.mrb[228].mxu1 }
 0x2dc   :  { %v3069_v11 = vadd.f32 %v3068_v63, %v2683_v56  ;;  %v2685_v47 = vpop.f32.mrb[229].mxu1 }
 0x2dd   :  { %v8800_v15 = vpop.f32.mrb[216].mxu0 }
 0x2de   :  { %v11996_v54 = vadd.f32 %v3069_v11, %v11751_v43  ;;  %v3098_v55 = vpop.f32.mrb[217].mxu0 }
 0x2df   :  { %v2688_v46 = vpop.f32.mrb[230].mxu1 }
 0x2e0   :  { %17959 = vst [vmem:[#allocation20_spill] sm:$0xff] %v11996_v54  ;;  %v3074_v0 = vadd.f32 %v8791_v20, %v2688_v46  ;;  %v2690_v59 = vpop.f32.mrb[231].mxu1 }
 0x2e1   :  { %v8803_v5 = vpop.f32.mrb[218].mxu0 }
 0x2e2   :  { %v11999_v42 = vadd.f32 %v3074_v0, %v11748_v3  ;;  %v3108_v56 = vpop.f32.mrb[219].mxu0 }
 0x2e3   :  { %v2693_v24 = vpop.f32.mrb[232].mxu1 }
 0x2e4   :  { %17960 = vst [vmem:[#allocation15_spill] sm:$0xff] %v11999_v42  ;;  %v3079_v48 = vadd.f32 %v3078_v51, %v2693_v24  ;;  %v2695_v34 = vpop.f32.mrb[233].mxu1  ;;  %v3361_v51 = vadd.f32 %v11939_v17, %v11942_v2 }
 0x2e5   :  { %v8806_v16 = vpop.f32.mrb[220].mxu0 }
 0x2e6   :  { %v12002_v63 = vadd.f32 %v3079_v48, %v11760_v61  ;;  %v3118_v46 = vpop.f32.mrb[221].mxu0 }
 0x2e7   :  { %v2698_v47 = vpop.f32.mrb[234].mxu1 }
 0x2e8   :  { %v3084_v43 = vadd.f32 %v8794_v62, %v2698_v47  ;;  %v2700_v11 = vpop.f32.mrb[235].mxu1  ;;  %v3362_v62 = vadd.f32 %v3361_v51, %v11950_v49 }
 0x2e9   :  { %v8809_v45 = vpop.f32.mrb[222].mxu0 }
 0x2ea   :  { %v12005_v20 = vadd.f32 %v3084_v43, %v11757_v53  ;;  %v3128_v61 = vpop.f32.mrb[223].mxu0 }
 0x2eb   :  { %v2703_v59 = vpop.f32.mrb[236].mxu1 }
 0x2ec   :  { %v3089_v3 = vadd.f32 %v3088_v10, %v2703_v59  ;;  %v2705_v0 = vpop.f32.mrb[237].mxu1  ;;  %v3363_v59 = vadd.f32 %v3362_v62, %v11946_v41 }
 0x2ed   :  { %v12013_v11 = vpop.f32.mrb[224].mxu0 }
 0x2ee   :  { %v12010_v24 = vadd.f32 %v3089_v3, %v11769_v28  ;;  %v3138_v10 = vpop.f32.mrb[225].mxu0  ;;  %v3364_v51 = vadd.f32 %v3363_v59, %v11957_v60 }
 0x2ef   :  { %v2708_v48 = vpop.f32.mrb[238].mxu1 }
 0x2f0   :  { %v3094_v34 = vadd.f32 %v8797_v6, %v2708_v48  ;;  %v2710_v47 = vpop.f32.mrb[239].mxu1 }
 0x2f1   :  { %v12019_v2 = vpop.f32.mrb[226].mxu0 }
 0x2f2   :  { %v12016_v53 = vadd.f32 %v3094_v34, %v11766_v14  ;;  %v12024_v3 = vpop.f32.mrb[227].mxu0 }
 0x2f3   :  { %v2713_v43 = vpop.f32.mrb[240].mxu1 }
 0x2f4   :  { %v3099_v0 = vadd.f32 %v3098_v55, %v2713_v43  ;;  %v2715_v17 = vpop.f32.mrb[241].mxu1  ;;  %v3365_v55 = vadd.f32 %v3364_v51, %v11953_v12 }
 0x2f5   :  { %v12027_v14 = vpop.f32.mrb[228].mxu0 }
 0x2f6   :  { %v12022_v28 = vadd.f32 %v3099_v0, %v11778_v36  ;;  %v12032_v62 = vpop.f32.mrb[229].mxu0 }
 0x2f7   :  { %v2718_v6 = vpop.f32.mrb[242].mxu1 }
 0x2f8   :  { %v3104_v48 = vadd.f32 %v8800_v15, %v2718_v6  ;;  %v2720_v47 = vpop.f32.mrb[243].mxu1  ;;  %v3366_v6 = vadd.f32 %v3365_v55, %v11963_v27 }
 0x2f9   :  { %v12035_v0 = vpop.f32.mrb[230].mxu0 }
 0x2fa   :  { %v12030_v34 = vadd.f32 %v3104_v48, %v11775_v44  ;;  %v12040_v59 = vpop.f32.mrb[231].mxu0 }
 0x2fb   :  { %v2723_v17 = vpop.f32.mrb[244].mxu1 }
 0x2fc   :  { %v3109_v43 = vadd.f32 %v3108_v56, %v2723_v17  ;;  %v2725_v36 = vpop.f32.mrb[245].mxu1  ;;  %v3367_v17 = vadd.f32 %v3366_v6, %v11960_v35 }
 0x2fd   :  { %v12043_v48 = vpop.f32.mrb[232].mxu0 }
 0x2fe   :  { %v12038_v41 = vadd.f32 %v3109_v43, %v11787_v39  ;;  %v12048_v51 = vpop.f32.mrb[233].mxu0 }
 0x2ff   :  { %v2728_v15 = vpop.f32.mrb[246].mxu1 }
 0x300   :  { %v3114_v47 = vadd.f32 %v8803_v5, %v2728_v15  ;;  %v2730_v44 = vpop.f32.mrb[247].mxu1  ;;  %v3368_v15 = vadd.f32 %v3367_v17, %v11969_v23  ;;  %v17961_v23 = vld [vmem:[#allocation35_spill] sm:$0xff] }
 0x301   :  { %v12051_v43 = vpop.f32.mrb[234].mxu0 }
 0x302   :  { %v12046_v60 = vadd.f32 %v3114_v47, %v11784_v9  ;;  %v12056_v55 = vpop.f32.mrb[235].mxu0 }
 0x303   :  { %v2733_v56 = vpop.f32.mrb[248].mxu1 }
 0x304   :  { %v3119_v36 = vadd.f32 %v3118_v46, %v2733_v56  ;;  %v2735_v39 = vpop.f32.mrb[249].mxu1  ;;  %v3369_v56 = vadd.f32 %v3368_v15, %v11966_v58 }
 0x305   :  { %v12059_v47 = vpop.f32.mrb[236].mxu0 }
 0x306   :  { %v12054_v12 = vadd.f32 %v3119_v36, %v11796_v40  ;;  %v12064_v6 = vpop.f32.mrb[237].mxu0 }
 0x307   :  { %v2738_v5 = vpop.f32.mrb[250].mxu1 }
 0x308   :  { %v3124_v44 = vadd.f32 %v8806_v16, %v2738_v5  ;;  %v2740_v9 = vpop.f32.mrb[251].mxu1  ;;  %v3370_v5 = vadd.f32 %v3369_v56, %v11975_v26  ;;  %v17962_v26 = vld [vmem:[#allocation36_spill] sm:$0xff] }
 0x309   :  { %v12067_v36 = vpop.f32.mrb[238].mxu0 }
 0x30a   :  { %v12062_v27 = vadd.f32 %v3124_v44, %v11793_v57  ;;  %v12072_v17 = vpop.f32.mrb[239].mxu0 }
 0x30b   :  { %v2743_v46 = vpop.f32.mrb[252].mxu1 }
 0x30c   :  { %v3129_v39 = vadd.f32 %v3128_v61, %v2743_v46  ;;  %v2745_v40 = vpop.f32.mrb[253].mxu1  ;;  %v3371_v46 = vadd.f32 %v3370_v5, %v11972_v38  ;;  %v17963_v38 = vld [vmem:[#allocation38_spill] sm:$0xff] }
 0x30d   :  { %v12075_v44 = vpop.f32.mrb[240].mxu0 }
 0x30e   :  { %v12070_v35 = vadd.f32 %v3129_v39, %v11805_v21  ;;  %v12080_v15 = vpop.f32.mrb[241].mxu0 }
 0x30f   :  { %v2748_v16 = vpop.f32.mrb[254].mxu1 }
 0x310   :  { %v3134_v9 = vadd.f32 %v8809_v45, %v2748_v16  ;;  %v2750_v57 = vpop.f32.mrb[255].mxu1  ;;  %v3372_v16 = vadd.f32 %v3371_v46, %v11981_v8 }
 0x311   :  { %v12083_v39 = vpop.f32.mrb[242].mxu0 }
 0x312   :  { %v12078_v49 = vadd.f32 %v3134_v9, %v17961_v23  ;;  %v12088_v56 = vpop.f32.mrb[243].mxu0 }
 0x313   :  { %v2753_v61 = vpop.f32.mrb[0].mxu1 }
 0x314   :  { %v3139_v40 = vadd.f32 %v3138_v10, %v2753_v61  ;;  %v2755_v21 = vpop.f32.mrb[1].mxu1  ;;  %v3373_v61 = vadd.f32 %v3372_v16, %v11978_v32 }
 0x315   :  { %v12092_v57 = vpop.f32.mrb[244].mxu0 }
 0x316   :  { %v12086_v58 = vadd.f32 %v3139_v40, %v11814_v50  ;;  %v12097_v10 = vpop.f32.mrb[245].mxu0 }
 0x317   :  { %v2758_v45 = vpop.f32.mrb[2].mxu1 }
 0x318   :  { %v3144_v23 = vadd.f32 %v12013_v11, %v2758_v45  ;;  %v2760_v9 = vpop.f32.mrb[3].mxu1 }
 0x319   :  { %v12101_v21 = vpop.f32.mrb[246].mxu0  ;;  %v3374_v9 = vadd.f32 %v3373_v61, %v11984_v37 }
 0x31a   :  { %v12095_v52 = vadd.f32 %v3144_v23, %v17962_v26  ;;  %v12106_v11 = vpop.f32.mrb[247].mxu0 }
 0x31b   :  { %v2763_v5 = vpop.f32.mrb[4].mxu1 }
 0x31c   :  { %v3149_v50 = vadd.f32 %v12024_v3, %v2763_v5  ;;  %v2765_v40 = vpop.f32.mrb[5].mxu1 }
 0x31d   :  { %v12110_v8 = vpop.f32.mrb[248].mxu0  ;;  %v3375_v40 = vadd.f32 %v3374_v9, %v11987_v4  ;;  %v17966_v4 = vld [vmem:[#allocation39_spill] sm:$0xff] }
 0x31e   :  { %v12104_v46 = vadd.f32 %v3149_v50, %v11823_v18  ;;  %v12115_v3 = vpop.f32.mrb[249].mxu0 }
 0x31f   :  { %v2768_v45 = vpop.f32.mrb[6].mxu1 }
 0x320   :  { %v3154_v26 = vadd.f32 %v12019_v2, %v2768_v45  ;;  %v2770_v23 = vpop.f32.mrb[7].mxu1 }
 0x321   :  { %v12119_v32 = vpop.f32.mrb[250].mxu0  ;;  %v3376_v23 = vadd.f32 %v3375_v40, %v11990_v22 }
 0x322   :  { %v12113_v16 = vadd.f32 %v3154_v26, %v17963_v38  ;;  %17964 = vst [vmem:[#allocation23_spill] sm:$0xff] %v12119_v32  ;;  %v12124_v2 = vpop.f32.mrb[251].mxu0 }
 0x323   :  { %v2773_v5 = vpop.f32.mrb[8].mxu1  ;;  %17965 = vst [vmem:[#allocation17_spill] sm:$0xff] %v12124_v2  ;;  %v3377_v9 = vadd.f32 %v3376_v23, %v11993_v33 }
 0x324   :  { %v3159_v18 = vadd.f32 %v12032_v62, %v2773_v5  ;;  %v2775_v50 = vpop.f32.mrb[9].mxu1 }
 0x325   :  { %v12128_v37 = vpop.f32.mrb[252].mxu0 }
 0x326   :  { %v12122_v61 = vadd.f32 %v3159_v18, %v11832_v25  ;;  %v12134_v5 = vpop.f32.mrb[253].mxu0  ;;  %v3378_v25 = vadd.f32 %v3377_v9, %v11996_v54  ;;  %v17967_v54 = vld [vmem:[#allocation40_spill] sm:$0xff] }
 0x327   :  { %v2778_v45 = vpop.f32.mrb[10].mxu1 }
 0x328   :  { %v3164_v38 = vadd.f32 %v12027_v14, %v2778_v45  ;;  %v2780_v26 = vpop.f32.mrb[11].mxu1  ;;  %v3379_v14 = vadd.f32 %v3378_v25, %v11999_v42 }
 0x329   :  { %v12138_v2 = vpop.f32.mrb[254].mxu0 }
 0x32a   :  { %v12132_v62 = vadd.f32 %v3164_v38, %v17966_v4  ;;  %v12144_v45 = vpop.f32.mrb[255].mxu0  ;;  %v3380_v4 = vadd.f32 %v3379_v14, %v12002_v63 }
 0x32b   :  { %v2783_v50 = vpop.f32.mrb[12].mxu1 }
 0x32c   :  { %v3169_v18 = vadd.f32 %v12040_v59, %v2783_v50  ;;  %v2785_v32 = vpop.f32.mrb[13].mxu1  ;;  %v3381_v9 = vadd.f32 %v3380_v4, %v12005_v20 }
 0x32e   :  { %v12142_v40 = vadd.f32 %v3169_v18, %v11841_v1  ;;  %v3382_v50 = vadd.f32 %v3381_v9, %v12010_v24 }
 0x32f   :  { %v2788_v23 = vpop.f32.mrb[14].mxu1 }
 0x330   :  { %v3174_v38 = vadd.f32 %v12035_v0, %v2788_v23  ;;  %v2790_v26 = vpop.f32.mrb[15].mxu1  ;;  %v3383_v18 = vadd.f32 %v3382_v50, %v12016_v53 }
 0x332   :  { %v12150_v59 = vadd.f32 %v3174_v38, %v17967_v54  ;;  %v3384_v0 = vadd.f32 %v3383_v18, %v12022_v28  ;;  %v17968_v38 = vld [vmem:[#allocation41_spill] sm:$0xff] }
 0x333   :  { %v2793_v32 = vpop.f32.mrb[16].mxu1 }
 0x334   :  { %v3179_v25 = vadd.f32 %v12048_v51, %v2793_v32  ;;  %v2795_v1 = vpop.f32.mrb[17].mxu1  ;;  %v3385_v54 = vadd.f32 %v3384_v0, %v12030_v34 }
 0x336   :  { %v12156_v42 = vadd.f32 %v3179_v25, %v11850_v29  ;;  %v3386_v51 = vadd.f32 %v3385_v54, %v12038_v41 }
 0x337   :  { %v2798_v14 = vpop.f32.mrb[18].mxu1 }
 0x338   :  { %v3184_v23 = vadd.f32 %v12043_v48, %v2798_v14  ;;  %v2800_v4 = vpop.f32.mrb[19].mxu1  ;;  %v3387_v29 = vadd.f32 %v3386_v51, %v12046_v60 }
 0x33a   :  { %v12162_v26 = vadd.f32 %v3184_v23, %v17968_v38  ;;  %v3388_v48 = vadd.f32 %v3387_v29, %v12054_v12  ;;  %v17969_v23 = vld [vmem:[#allocation42_spill] sm:$0xff] }
 0x33b   :  { %v2803_v9 = vpop.f32.mrb[20].mxu1 }
 0x33c   :  { %v3189_v32 = vadd.f32 %v12056_v55, %v2803_v9  ;;  %v2805_v50 = vpop.f32.mrb[21].mxu1  ;;  %v3389_v0 = vadd.f32 %v3388_v48, %v12062_v27  ;;  %v17970_v48 = vld [vmem:[#allocation43_spill] sm:$0xff] }
 0x33e   :  { %v12168_v25 = vadd.f32 %v3189_v32, %v11859_v31  ;;  %v3390_v55 = vadd.f32 %v3389_v0, %v12070_v35 }
 0x33f   :  { %v2808_v1 = vpop.f32.mrb[22].mxu1 }
 0x340   :  { %v3194_v18 = vadd.f32 %v12051_v43, %v2808_v1  ;;  %v2810_v14 = vpop.f32.mrb[23].mxu1  ;;  %v3391_v31 = vadd.f32 %v3390_v55, %v12078_v49 }
 0x342   :  { %v12174_v4 = vadd.f32 %v3194_v18, %v17969_v23  ;;  %v3392_v43 = vadd.f32 %v3391_v31, %v12086_v58 }
 0x343   :  { %v2813_v54 = vpop.f32.mrb[24].mxu1 }
 0x344   :  { %v3199_v38 = vadd.f32 %v12064_v6, %v2813_v54  ;;  %v2815_v9 = vpop.f32.mrb[25].mxu1  ;;  %v3393_v1 = vadd.f32 %v3392_v43, %v12095_v52 }
 0x346   :  { %v12180_v51 = vadd.f32 %v3199_v38, %v11868_v30  ;;  %v3394_v6 = vadd.f32 %v3393_v1, %v12104_v46 }
 0x347   :  { %v2818_v32 = vpop.f32.mrb[26].mxu1 }
 0x348   :  { %v3204_v50 = vadd.f32 %v12059_v47, %v2818_v32  ;;  %v2820_v29 = vpop.f32.mrb[27].mxu1  ;;  %v3395_v30 = vadd.f32 %v3394_v6, %v12113_v16 }
 0x34a   :  { %v12186_v18 = vadd.f32 %v3204_v50, %v17970_v48  ;;  %v3396_v47 = vadd.f32 %v3395_v30, %v12122_v61 }
 0x34b   :  { %v2823_v14 = vpop.f32.mrb[28].mxu1 }
 0x34c   :  { %v3209_v0 = vadd.f32 %v12072_v17, %v2823_v14  ;;  %v2825_v23 = vpop.f32.mrb[29].mxu1  ;;  %v3397_v31 = vadd.f32 %v3396_v47, %v12132_v62 }
 0x34e   :  { %v12192_v54 = vadd.f32 %v3209_v0, %v11877_v19  ;;  %v3398_v17 = vadd.f32 %v3397_v31, %v12142_v40  ;;  %v17971_v0 = vld [vmem:[#allocation45_spill] sm:$0xff] }
 0x34f   :  { %v2828_v55 = vpop.f32.mrb[30].mxu1 }
 0x350   :  { %v3214_v38 = vadd.f32 %v12067_v36, %v2828_v55  ;;  %v2830_v9 = vpop.f32.mrb[31].mxu1  ;;  %v3399_v19 = vadd.f32 %v3398_v17, %v12150_v59 }
 0x352   :  { %v12198_v32 = vadd.f32 %v3214_v38, %v11874_v7  ;;  %v3400_v36 = vadd.f32 %v3399_v19, %v12156_v42  ;;  %v17972_v38 = vld [vmem:[#allocation46_spill] sm:$0xff] }
 0x353   :  { %v2833_v43 = vpop.f32.mrb[32].mxu1 }
 0x354   :  { %v3219_v50 = vadd.f32 %v12080_v15, %v2833_v43  ;;  %v2835_v29 = vpop.f32.mrb[33].mxu1  ;;  %v3401_v7 = vadd.f32 %v3400_v36, %v12162_v26 }
 0x355   :  { %v17973_v29 = vld [vmem:[#allocation44_spill] sm:$0xff] }
 0x356   :  { %v12204_v1 = vadd.f32 %v3219_v50, %v11886_v13  ;;  %v3402_v15 = vadd.f32 %v3401_v7, %v12168_v25  ;;  %v17974_v7 = vld [vmem:[#allocation52_spill] sm:$0xff] }
 0x357   :  { %v2838_v48 = vpop.f32.mrb[34].mxu1 }
 0x358   :  { %v3224_v14 = vadd.f32 %v12075_v44, %v2838_v48  ;;  %v2840_v6 = vpop.f32.mrb[35].mxu1  ;;  %v3403_v13 = vadd.f32 %v3402_v15, %v12174_v4 }
 0x35a   :  { %v12210_v23 = vadd.f32 %v3224_v14, %v17971_v0  ;;  %v3404_v44 = vadd.f32 %v3403_v13, %v12180_v51  ;;  %v17975_v13 = vld [vmem:[#allocation50_spill] sm:$0xff] }
 0x35b   :  { %v2843_v30 = vpop.f32.mrb[36].mxu1 }
 0x35c   :  { %v3229_v55 = vadd.f32 %v12088_v56, %v2843_v30  ;;  %v2845_v47 = vpop.f32.mrb[37].mxu1  ;;  %v3405_v50 = vadd.f32 %v3404_v44, %v12186_v18 }
 0x35e   :  { %v12216_v9 = vadd.f32 %v3229_v55, %v17972_v38  ;;  %v3406_v56 = vadd.f32 %v3405_v50, %v12192_v54  ;;  %v17977_v50 = vld [vmem:[#allocation54_spill] sm:$0xff] }
 0x35f   :  { %v2848_v31 = vpop.f32.mrb[38].mxu1 }
 0x360   :  { %v3234_v43 = vadd.f32 %v12083_v39, %v2848_v31  ;;  %v2850_v17 = vpop.f32.mrb[39].mxu1  ;;  %v3407_v6 = vadd.f32 %v3406_v56, %v12198_v32 }
 0x362   :  { %v12222_v19 = vadd.f32 %v3234_v43, %v17973_v29  ;;  %v3408_v39 = vadd.f32 %v3407_v6, %v12204_v1  ;;  %v17979_v6 = vld [vmem:[#allocation48_spill] sm:$0xff] }
 0x363   :  { %v2853_v48 = vpop.f32.mrb[40].mxu1 }
 0x364   :  { %v3239_v36 = vadd.f32 %v12097_v10, %v2853_v48  ;;  %v2855_v14 = vpop.f32.mrb[41].mxu1  ;;  %v3409_v47 = vadd.f32 %v3408_v39, %v12210_v23 }
 0x366   :  { %v12228_v0 = vadd.f32 %v3239_v36, %v17974_v7  ;;  %v3410_v10 = vadd.f32 %v3409_v47, %v12216_v9  ;;  %v17980_v47 = vld [vmem:[#allocation47_spill] sm:$0xff] }
 0x367   :  { %v2858_v30 = vpop.f32.mrb[42].mxu1 }
 0x368   :  { %v3244_v15 = vadd.f32 %v12092_v57, %v2858_v30  ;;  %v2860_v55 = vpop.f32.mrb[43].mxu1  ;;  %v3411_v17 = vadd.f32 %v3410_v10, %v12222_v19 }
 0x36a   :  { %v12234_v38 = vadd.f32 %v3244_v15, %v17975_v13  ;;  %v3412_v57 = vadd.f32 %v3411_v17, %v12228_v0 }
 0x36b   :  { %v2863_v31 = vpop.f32.mrb[44].mxu1 }
 0x36c   :  { %17976 = vst [vmem:[#allocation16_spill] sm:$0xff] %v12234_v38  ;;  %v3249_v44 = vadd.f32 %v12106_v11, %v2863_v31  ;;  %v2865_v43 = vpop.f32.mrb[45].mxu1  ;;  %v3413_v14 = vadd.f32 %v3412_v57, %v12234_v38  ;;  %v17982_v57 = vld [vmem:[#allocation17_spill] sm:$0xff] }
 0x36e   :  { %v12240_v29 = vadd.f32 %v3249_v44, %v17977_v50 }
 0x36f   :  { %v2868_v48 = vpop.f32.mrb[46].mxu1 }
 0x370   :  { %17978 = vst [vmem:[#allocation4_spill] sm:$0xff] %v12240_v29  ;;  %v3254_v56 = vadd.f32 %v12101_v21, %v2868_v48  ;;  %v2870_v36 = vpop.f32.mrb[47].mxu1  ;;  %v3414_v39 = vadd.f32 %v3413_v14, %v12240_v29  ;;  %v17981_v21 = vld [vmem:[#allocation56_spill] sm:$0xff] }
 0x372   :  { %v3352_v7 = vadd.f32 %v3254_v56, %v17979_v6  ;;  %v17983_v6 = vld [vmem:[#allocation6_spill] sm:$0xff] }
 0x373   :  { %v2873_v30 = vpop.f32.mrb[48].mxu1 }
 0x374   :  { %v3259_v11 = vadd.f32 %v12115_v3, %v2873_v30  ;;  %v2875_v15 = vpop.f32.mrb[49].mxu1  ;;  %v3415_v55 = vadd.f32 %v3414_v39, %v3352_v7  ;;  %v17984_v30 = vld [vmem:[#allocation23_spill] sm:$0xff] }
 0x376   :  { %v3353_v13 = vadd.f32 %v3259_v11, %v17980_v47  ;;  %v17985_v11 = vld [vmem:[#allocation58_spill] sm:$0xff] }
 0x377   :  { %v2878_v31 = vpop.f32.mrb[50].mxu1 }
 0x378   :  { %v3416_v10 = vadd.f32 %v3415_v55, %v3353_v13  ;;  %v3264_v44 = vadd.f32 %v12110_v8, %v2878_v31  ;;  %v2880_v43 = vpop.f32.mrb[51].mxu1 }
 0x37a   :  { %v3354_v17 = vadd.f32 %v3264_v44, %v17981_v21  ;;  %v17986_v44 = vld [vmem:[#allocation60_spill] sm:$0xff] }
 0x37b   :  { %v2883_v50 = vpop.f32.mrb[52].mxu1 }
 0x37c   :  { %v3417_v48 = vadd.f32 %v3416_v10, %v3354_v17  ;;  %v3269_v56 = vadd.f32 %v17982_v57, %v2883_v50  ;;  %v2885_v36 = vpop.f32.mrb[53].mxu1 }
 0x37e   :  { %v3355_v14 = vadd.f32 %v3269_v56, %v17983_v6  ;;  %v17987_v56 = vld [vmem:[#allocation51_spill] sm:$0xff] }
 0x37f   :  { %v2888_v29 = vpop.f32.mrb[54].mxu1 }
 0x380   :  { %v3418_v3 = vadd.f32 %v3417_v48, %v3355_v14  ;;  %v3274_v39 = vadd.f32 %v17984_v30, %v2888_v29  ;;  %v2890_v15 = vpop.f32.mrb[55].mxu1 }
 0x382   :  { %v3356_v47 = vadd.f32 %v3274_v39, %v17985_v11  ;;  %v17988_v39 = vld [vmem:[#allocation49_spill] sm:$0xff] }
 0x383   :  { %v2893_v55 = vpop.f32.mrb[56].mxu1 }
 0x384   :  { %v3419_v38 = vadd.f32 %v3418_v3, %v3356_v47  ;;  %v3279_v8 = vadd.f32 %v12134_v5, %v2893_v55  ;;  %v2895_v31 = vpop.f32.mrb[57].mxu1 }
 0x386   :  { %v3357_v43 = vadd.f32 %v3279_v8, %v17986_v44  ;;  %v17989_v8 = vld [vmem:[#allocation8_spill] sm:$0xff] }
 0x387   :  { %v2898_v10 = vpop.f32.mrb[58].mxu1 }
 0x388   :  { %v3420_v21 = vadd.f32 %v3419_v38, %v3357_v43  ;;  %v3284_v50 = vadd.f32 %v12128_v37, %v2898_v10  ;;  %v2900_v57 = vpop.f32.mrb[59].mxu1 }
 0x38a   :  { %v3358_v36 = vadd.f32 %v3284_v50, %v17987_v56 }
 0x38b   :  { %v2903_v48 = vpop.f32.mrb[60].mxu1 }
 0x38c   :  { %v3421_v6 = vadd.f32 %v3420_v21, %v3358_v36  ;;  %v3289_v29 = vadd.f32 %v12144_v45, %v2903_v48  ;;  %v2905_v30 = vpop.f32.mrb[61].mxu1 }
 0x38e   :  { %v3359_v15 = vadd.f32 %v3289_v29, %v17988_v39 }
 0x38f   :  { %v2908_v3 = vpop.f32.mrb[62].mxu1 }
 0x390   :  { %v3422_v11 = vadd.f32 %v3421_v6, %v3359_v15  ;;  %v3294_v5 = vadd.f32 %v12138_v2, %v2908_v3  ;;  %v2910_v55 = vpop.f32.mrb[63].mxu1 }
 0x392   :  { %v3360_v31 = vadd.f32 %v3294_v5, %v17989_v8  ;;  %v17993_v5 = vld [vmem:[#allocation55_spill] sm:$0xff]  ;;  %v17995_v8 = vld [vmem:[#allocation53_spill] sm:$0xff] }
 0x394   :  { %v3423_v38 = vadd.f32 %v3422_v11, %v3360_v31 }
 0x396   :  { %v3424_v44 = vrot.slane %v3423_v38, 4 }
 0x398   :  { %v3425_v37 = vadd.f32 %v3424_v44, %v3423_v38 }
 0x39a   :  { %v3426_v10 = vrot.slane %v3425_v37, 2 }
 0x39c   :  { %v3427_v57 = vadd.f32 %v3426_v10, %v3425_v37  ;;  %v17997_v37 = vld [vmem:[#allocation12_spill] sm:$0xff] }
 0x39e   :  { %v3428_v50 = vrot.slane %v3427_v57, 1 }
 0x3a0   :  { %v3429_v56 = vadd.f32 %v3428_v50, %v3427_v57 }
 0x3a2   :  { %v12263_v21 = vmul.f32 0.001953125, %v3429_v56  ;;  %v17999_v56 = vld [vmem:[#allocation59_spill] sm:$0xff] }
 0x3a4   :  { %v12266_v45 = vsub.f32 %v3352_v7, %v12263_v21  ;;  %v12269_v48 = vsub.f32 %v3353_v13, %v12263_v21  ;;  %v12272_v2 = vsub.f32 %v3354_v17, %v12263_v21  ;;  %v12275_v6 = vsub.f32 %v3355_v14, %v12263_v21  ;;  %v17990_v17 = vld [vmem:[#allocation10_spill] sm:$0xff] }
 0x3a5   :  { %v12278_v29 = vsub.f32 %v3356_v47, %v12263_v21  ;;  %v12281_v30 = vsub.f32 %v3357_v43, %v12263_v21  ;;  %v12284_v39 = vsub.f32 %v3358_v36, %v12263_v21  ;;  %v12287_v7 = vsub.f32 %v3359_v15, %v12263_v21  ;;  %v17991_v14 = vld [vmem:[#allocation62_spill] sm:$0xff]  ;;  %v17992_v43 = vld [vmem:[#allocation28_spill] sm:$0xff] }
 0x3a6   :  { %v12290_v13 = vsub.f32 %v3360_v31, %v12263_v21  ;;  %v12294_v3 = vsub.f32 %v17990_v17, %v12263_v21  ;;  %v12298_v47 = vsub.f32 %v17991_v14, %v12263_v21  ;;  %v12302_v11 = vsub.f32 %v17992_v43, %v12263_v21 }
 0x3a7   :  { %v12310_v55 = vsub.f32 %v17993_v5, %v12263_v21  ;;  %v12314_v31 = vsub.f32 %v17995_v8, %v12263_v21  ;;  %v12320_v10 = vsub.f32 %v17997_v37, %v12263_v21  ;;  %v12326_v17 = vsub.f32 %v17999_v56, %v12263_v21  ;;  %v18001_v5 = vld [vmem:[#allocation13_spill] sm:$0xff] }
 0x3a8   :  { %v3496_v36 = vmul.f32 %v12294_v3, %v12294_v3  ;;  %v3497_v15 = vmul.f32 %v12298_v47, %v12298_v47  ;;  %v3498_v38 = vmul.f32 %v12302_v11, %v12302_v11  ;;  %v12332_v8 = vsub.f32 %v18001_v5, %v12263_v21  ;;  %v18003_v37 = vld [vmem:[#allocation61_spill] sm:$0xff]  ;;  %v18007_v5 = vld [vmem:[#allocation63_spill] sm:$0xff] }
 0x3a9   :  { %17994 = vst [vmem:[#allocation18_spill] sm:$0xff] %v12310_v55  ;;  %17996 = vst [vmem:[#allocation19_spill] sm:$0xff] %v12314_v31  ;;  %v3499_v57 = vmul.f32 %v12310_v55, %v12310_v55  ;;  %v3500_v14 = vmul.f32 %v12314_v31, %v12314_v31  ;;  %v12338_v55 = vsub.f32 %v18003_v37, %v12263_v21  ;;  %v18005_v56 = vld [vmem:[#allocation57_spill] sm:$0xff]  ;;  %v18009_v37 = vld [vmem:[#allocation7_spill] sm:$0xff] }
 0x3aa   :  { %v3560_v44 = vadd.f32 %v3497_v15, %v3496_v36  ;;  %17998 = vst [vmem:[#allocation27_spill] sm:$0xff] %v12320_v10  ;;  %18000 = vst [vmem:[#allocation21_spill] sm:$0xff] %v12326_v17  ;;  %v3501_v36 = vmul.f32 %v12320_v10, %v12320_v10  ;;  %v12344_v31 = vsub.f32 %v18005_v56, %v12263_v21  ;;  %v18010_v56 = vld [vmem:[#allocation64_spill] sm:$0xff] }
 0x3ab   :  { %18002 = vst [vmem:[#allocation22_spill] sm:$0xff] %v12332_v8  ;;  %18004 = vst [vmem:[#allocation24_spill] sm:$0xff] %v12338_v55  ;;  %v12350_v10 = vsub.f32 %v18007_v5, %v12263_v21  ;;  %v18011_v5 = vld [vmem:[#allocation9_spill] sm:$0xff] }
 0x3ac   :  { %v3561_v50 = vadd.f32 %v3560_v44, %v3498_v38  ;;  %v3502_v38 = vmul.f32 %v12326_v17, %v12326_v17  ;;  %18006 = vst [vmem:[#allocation25_spill] sm:$0xff] %v12344_v31  ;;  %v12356_v17 = vsub.f32 %v18009_v37, %v12263_v21  ;;  %v18013_v37 = vld [vmem:[#allocation11_spill] sm:$0xff] }
 0x3ad   :  { %18008 = vst [vmem:[#allocation26_spill] sm:$0xff] %v12350_v10 }
 0x3ae   :  { %v3562_v43 = vadd.f32 %v3561_v50, %v3499_v57  ;;  %v3503_v57 = vmul.f32 %v12332_v8, %v12332_v8  ;;  %v12362_v8 = vsub.f32 %v18010_v56, %v12263_v21  ;;  %v18015_v56 = vld [vmem:[#allocation14_spill] sm:$0xff] }
 0x3b0   :  { %v3563_v15 = vadd.f32 %v3562_v43, %v3500_v14  ;;  %v3504_v14 = vmul.f32 %v12338_v55, %v12338_v55  ;;  %v12368_v55 = vsub.f32 %v18011_v5, %v12263_v21  ;;  %v12386_v5 = vsub.f32 %v11990_v22, %v12263_v21 }
 0x3b2   :  { %v3564_v44 = vadd.f32 %v3563_v15, %v3501_v36  ;;  %v3505_v36 = vmul.f32 %v12344_v31, %v12344_v31  ;;  %18012 = vst [vmem:[#allocation5_spill] sm:$0xff] %v12368_v55  ;;  %v12374_v31 = vsub.f32 %v18013_v37, %v12263_v21  ;;  %v12392_v37 = vsub.f32 %v11993_v33, %v12263_v21 }
 0x3b3   :  { %v3512_v22 = vmul.f32 %v12386_v5, %v12386_v5 }
 0x3b4   :  { %v3565_v50 = vadd.f32 %v3564_v44, %v3502_v38  ;;  %v3506_v38 = vmul.f32 %v12350_v10, %v12350_v10  ;;  %18014 = vst [vmem:[#allocation29_spill] sm:$0xff] %v12374_v31  ;;  %v12380_v10 = vsub.f32 %v18015_v56, %v12263_v21  ;;  %18016 = vst [vmem:[#allocation3_spill] sm:$0xff] %v12392_v37  ;;  %v18017_v56 = vld [vmem:[#allocation20_spill] sm:$0xff] }
 0x3b5   :  { %v3513_v33 = vmul.f32 %v12392_v37, %v12392_v37 }
 0x3b6   :  { %v3566_v43 = vadd.f32 %v3565_v50, %v3503_v57  ;;  %v3507_v57 = vmul.f32 %v12356_v17, %v12356_v17 }
 0x3b8   :  { %v3567_v15 = vadd.f32 %v3566_v43, %v3504_v14  ;;  %v3508_v14 = vmul.f32 %v12362_v8, %v12362_v8 }
 0x3ba   :  { %v3568_v44 = vadd.f32 %v3567_v15, %v3505_v36  ;;  %v3509_v36 = vmul.f32 %v12368_v55, %v12368_v55  ;;  %v12398_v55 = vsub.f32 %v18017_v56, %v12263_v21 }
 0x3bc   :  { %v3569_v50 = vadd.f32 %v3568_v44, %v3506_v38  ;;  %v3510_v38 = vmul.f32 %v12374_v31, %v12374_v31  ;;  %18018 = vst [vmem:[#allocation30_spill] sm:$0xff] %v12398_v55 }
 0x3be   :  { %v3570_v43 = vadd.f32 %v3569_v50, %v3507_v57  ;;  %v3511_v57 = vmul.f32 %v12380_v10, %v12380_v10 }
 0x3c0   :  { %v3571_v15 = vadd.f32 %v3570_v43, %v3508_v14  ;;  %v18019_v43 = vld [vmem:[#allocation15_spill] sm:$0xff] }
 0x3c1   :  { %v12404_v31 = vsub.f32 %v18019_v43, %v12263_v21  ;;  %v12428_v43 = vsub.f32 %v12010_v24, %v12263_v21  ;;  %v7929_v24 = vld [vmem:[%s17513_s2 + $0x288] sm:$0xff] }
 0x3c2   :  { %v3572_v44 = vadd.f32 %v3571_v15, %v3509_v36  ;;  %v12410_v15 = vsub.f32 %v12002_v63, %v12263_v21 }
 0x3c3   :  { %18020 = vst [vmem:[#allocation31_spill] sm:$0xff] %v12404_v31  ;;  %v3515_v63 = vmul.f32 %v12404_v31, %v12404_v31  ;;  %v3518_v31 = vmul.f32 %v12428_v43, %v12428_v43 }
 0x3c4   :  { %v3573_v50 = vadd.f32 %v3572_v44, %v3510_v38  ;;  %18021 = vst [vmem:[#allocation32_spill] sm:$0xff] %v12410_v15  ;;  %v3514_v38 = vmul.f32 %v12398_v55, %v12398_v55  ;;  %v18022_v55 = vmov 0.0|0.0  }
 0x3c6   :  { %v3574_v14 = vadd.f32 %v3573_v50, %v3511_v57  ;;  %v7896_v57 = vld [vmem:[%s17513_s2 + $0x180] sm:$0xff]  ;;  %v7897_v50 = vld [vmem:[%s17513_s2 + $0x188] sm:$0xff] }
 0x3c7   :  { %v9483_v56 = vpack.c.bf16 %v7897_v50, %v7896_v57  ;;  %v7899_v57 = vld [vmem:[%s17513_s2 + $0x198] sm:$0xff]  ;;  %v12447_v50 = vsub.f32 %v12016_v53, %v12263_v21  ;;  %v7900_v53 = vld [vmem:[%s17513_s2 + $0x1a0] sm:$0xff] }
 0x3c8   :  { %v3575_v36 = vadd.f32 %v3574_v14, %v3512_v22  ;;  %v12422_v22 = vsub.f32 %v12005_v20, %v12263_v21  ;;  %v7898_v20 = vld [vmem:[%s17513_s2 + $0x190] sm:$0xff] }
 0x3c9   :  { %9484 = vmatpush1.bf16.msra.mxu0 %v9483_v56 }
 0x3ca   :  { %v3576_v44 = vadd.f32 %v3575_v36, %v3513_v33  ;;  %v3516_v33 = vmul.f32 %v12410_v15, %v12410_v15  ;;  %9485 = vmatprep.subr.bf16.mxu0 %v18022_v55  ;;  %v3517_v56 = vmul.f32 %v12422_v22, %v12422_v22  ;;  %v12453_v15 = vsub.f32 %v12022_v28, %v12263_v21 }
 0x3cb   :  { %v12466_v28 = vsub.f32 %v12030_v34, %v12263_v21  ;;  %v7902_v34 = vld [vmem:[%s17513_s2 + $0x1b0] sm:$0xff] }
 0x3cc   :  { %v3577_v14 = vadd.f32 %v3576_v44, %v3514_v38  ;;  %v7928_v38 = vld [vmem:[%s17513_s2 + $0x280] sm:$0xff]  ;;  %v9486_v44 = vpack.c.bf16 %v7899_v57, %v7898_v20  ;;  %v3519_v20 = vmul.f32 %v12447_v50, %v12447_v50 }
 0x3ce   :  { %v3578_v36 = vadd.f32 %v3577_v14, %v3515_v63  ;;  %v9530_v14 = vpack.c.bf16 %v7929_v24, %v7928_v38  ;;  %9487 = vmatpush1.bf16.msra.mxu0 %v9486_v44  ;;  %v12472_v38 = vsub.f32 %v12038_v41, %v12263_v21  ;;  %v3520_v24 = vmul.f32 %v12453_v15, %v12453_v15 }
 0x3cf   :  { %9488 = vmatprep.subr.bf16.mxu0 %v18022_v55  ;;  %v3521_v41 = vmul.f32 %v12466_v28, %v12466_v28 }
 0x3d0   :  { %v3579_v63 = vadd.f32 %v3578_v36, %v3516_v33  ;;  %9531 = vmatprep.subr.bf16.mxu1 %v9530_v14  ;;  %v7901_v33 = vld [vmem:[%s17513_s2 + $0x1a8] sm:$0xff] }
 0x3d1   :  { %9533 = vmatpush3.bf16.msra.mxu1 %v9530_v14  ;;  %v9489_v36 = vpack.c.bf16 %v7901_v33, %v7900_v53  ;;  %v12491_v14 = vsub.f32 %v12054_v12, %v12263_v21  ;;  %v3522_v53 = vmul.f32 %v12472_v38, %v12472_v38 }
 0x3d2   :  { %v3580_v37 = vadd.f32 %v3579_v63, %v3517_v56  ;;  %v7903_v56 = vld [vmem:[%s17513_s2 + $0x1b8] sm:$0xff] }
 0x3d3   :  { %9490 = vmatpush1.bf16.msra.mxu0 %v9489_v36  ;;  %v7905_v36 = vld [vmem:[%s17513_s2 + $0x1c8] sm:$0xff] }
 0x3d4   :  { %v3581_v57 = vadd.f32 %v3580_v37, %v3518_v31  ;;  %9491 = vmatprep.subr.bf16.mxu0 %v18022_v55  ;;  %v9492_v31 = vpack.c.bf16 %v7903_v56, %v7902_v34  ;;  %v12485_v37 = vsub.f32 %v12046_v60, %v12263_v21  ;;  %v7904_v60 = vld [vmem:[%s17513_s2 + $0x1c0] sm:$0xff]  ;;  %v3524_v34 = vmul.f32 %v12491_v14, %v12491_v14 }
 0x3d6   :  { %v3582_v44 = vadd.f32 %v3581_v57, %v3519_v20  ;;  %v9495_v20 = vpack.c.bf16 %v7905_v36, %v7904_v60  ;;  %v12504_v57 = vsub.f32 %v12062_v27, %v12263_v21  ;;  %v3523_v12 = vmul.f32 %v12485_v37, %v12485_v37  ;;  %v7906_v27 = vld [vmem:[%s17513_s2 + $0x1d0] sm:$0xff] }
 0x3d7   :  { %9493 = vmatpush1.bf16.msra.mxu0 %v9492_v31  ;;  %v7907_v31 = vld [vmem:[%s17513_s2 + $0x1d8] sm:$0xff] }
 0x3d8   :  { %v3583_v63 = vadd.f32 %v3582_v44, %v3520_v24  ;;  %9494 = vmatprep.subr.bf16.mxu0 %v18022_v55  ;;  %v12510_v44 = vsub.f32 %v12070_v35, %v12263_v21  ;;  %v3525_v35 = vmul.f32 %v12504_v57, %v12504_v57 }
 0x3da   :  { %v3584_v33 = vadd.f32 %v3583_v63, %v3521_v41  ;;  %v9498_v41 = vpack.c.bf16 %v7907_v31, %v7906_v27  ;;  %v12523_v63 = vsub.f32 %v12078_v49, %v12263_v21  ;;  %v3526_v60 = vmul.f32 %v12510_v44, %v12510_v44  ;;  %v7908_v49 = vld [vmem:[%s17513_s2 + $0x1e0] sm:$0xff] }
 0x3db   :  { %9496 = vmatpush1.bf16.msra.mxu0 %v9495_v20  ;;  %v7909_v20 = vld [vmem:[%s17513_s2 + $0x1e8] sm:$0xff] }
 0x3dc   :  { %v3585_v24 = vadd.f32 %v3584_v33, %v3522_v53  ;;  %9497 = vmatprep.subr.bf16.mxu0 %v18022_v55  ;;  %v12529_v33 = vsub.f32 %v12086_v58, %v12263_v21  ;;  %v3527_v58 = vmul.f32 %v12523_v63, %v12523_v63 }
 0x3de   :  { %v3586_v56 = vadd.f32 %v3585_v24, %v3523_v12  ;;  %v9501_v12 = vpack.c.bf16 %v7909_v20, %v7908_v49  ;;  %v12542_v24 = vsub.f32 %v12095_v52, %v12263_v21  ;;  %v3528_v27 = vmul.f32 %v12529_v33, %v12529_v33  ;;  %v7910_v52 = vld [vmem:[%s17513_s2 + $0x1f0] sm:$0xff] }
 0x3df   :  { %9499 = vmatpush1.bf16.msra.mxu0 %v9498_v41  ;;  %v7911_v41 = vld [vmem:[%s17513_s2 + $0x1f8] sm:$0xff] }
 0x3e0   :  { %v3587_v53 = vadd.f32 %v3586_v56, %v3524_v34  ;;  %9500 = vmatprep.subr.bf16.mxu0 %v18022_v55  ;;  %v12548_v56 = vsub.f32 %v12104_v46, %v12263_v21  ;;  %v3529_v46 = vmul.f32 %v12542_v24, %v12542_v24 }
 0x3e2   :  { %v3588_v36 = vadd.f32 %v3587_v53, %v3525_v35  ;;  %v9504_v35 = vpack.c.bf16 %v7911_v41, %v7910_v52  ;;  %v12561_v53 = vsub.f32 %v12113_v16, %v12263_v21  ;;  %v3530_v49 = vmul.f32 %v12548_v56, %v12548_v56  ;;  %v7912_v16 = vld [vmem:[%s17513_s2 + $0x200] sm:$0xff] }
 0x3e3   :  { %9502 = vmatpush1.bf16.msra.mxu0 %v9501_v12  ;;  %v7913_v12 = vld [vmem:[%s17513_s2 + $0x208] sm:$0xff] }
 0x3e4   :  { %v3589_v34 = vadd.f32 %v3588_v36, %v3526_v60  ;;  %9503 = vmatprep.subr.bf16.mxu0 %v18022_v55  ;;  %v12567_v36 = vsub.f32 %v12122_v61, %v12263_v21  ;;  %v3531_v61 = vmul.f32 %v12561_v53, %v12561_v53 }
 0x3e6   :  { %v3590_v31 = vadd.f32 %v3589_v34, %v3527_v58  ;;  %v9507_v58 = vpack.c.bf16 %v7913_v12, %v7912_v16  ;;  %v12580_v34 = vsub.f32 %v12132_v62, %v12263_v21  ;;  %v3532_v52 = vmul.f32 %v12567_v36, %v12567_v36  ;;  %v7931_v62 = vld [vmem:[%s17513_s2 + $0x298] sm:$0xff] }
 0x3e7   :  { %9505 = vmatpush1.bf16.msra.mxu0 %v9504_v35  ;;  %v7930_v35 = vld [vmem:[%s17513_s2 + $0x290] sm:$0xff] }
 0x3e8   :  { %v3591_v60 = vadd.f32 %v3590_v31, %v3528_v27  ;;  %9506 = vmatprep.subr.bf16.mxu0 %v18022_v55  ;;  %v12586_v31 = vsub.f32 %v12142_v40, %v12263_v21  ;;  %v9534_v40 = vpack.c.bf16 %v7931_v62, %v7930_v35  ;;  %v7933_v35 = vld [vmem:[%s17513_s2 + $0x2a8] sm:$0xff]  ;;  %v12630_v62 = vsub.f32 %v12162_v26, %v12263_v21  ;;  %v7918_v26 = vld [vmem:[%s17513_s2 + $0x230] sm:$0xff] }
 0x3ea   :  { %v3592_v20 = vadd.f32 %v3591_v60, %v3529_v46  ;;  %v7914_v46 = vld [vmem:[%s17513_s2 + $0x210] sm:$0xff]  ;;  %v7915_v60 = vld [vmem:[%s17513_s2 + $0x218] sm:$0xff]  ;;  %9535 = vmatprep.subr.bf16.mxu1 %v9534_v40 }
 0x3eb   :  { %9508 = vmatpush1.bf16.msra.mxu0 %v9507_v58  ;;  %v9510_v12 = vpack.c.bf16 %v7915_v60, %v7914_v46  ;;  %v12611_v58 = vsub.f32 %v12156_v42, %v12263_v21  ;;  %9537 = vmatpush3.bf16.msra.mxu1 %v9534_v40 }
 0x3ec   :  { %v3593_v27 = vadd.f32 %v3592_v20, %v3530_v49  ;;  %9509 = vmatprep.subr.bf16.mxu0 %v18022_v55  ;;  %v12605_v49 = vsub.f32 %v12150_v59, %v12263_v21  ;;  %v3533_v20 = vmul.f32 %v12580_v34, %v12580_v34  ;;  %v7932_v59 = vld [vmem:[%s17513_s2 + $0x2a0] sm:$0xff] }
 0x3ed   :  { %v9538_v42 = vpack.c.bf16 %v7933_v35, %v7932_v59  ;;  %v7935_v59 = vld [vmem:[%s17513_s2 + $0x2b8] sm:$0xff]  ;;  %v12655_v35 = vsub.f32 %v12174_v4, %v12263_v21  ;;  %v7920_v4 = vld [vmem:[%s17513_s2 + $0x240] sm:$0xff] }
 0x3ee   :  { %v3594_v41 = vadd.f32 %v3593_v27, %v3531_v61  ;;  %v3534_v61 = vmul.f32 %v12586_v31, %v12586_v31  ;;  %v3535_v46 = vmul.f32 %v12605_v49, %v12605_v49 }
 0x3ef   :  { %9511 = vmatpush1.bf16.msra.mxu0 %v9510_v12  ;;  %9539 = vmatprep.subr.bf16.mxu1 %v9538_v42 }
 0x3f0   :  { %v3595_v16 = vadd.f32 %v3594_v41, %v3532_v52  ;;  %v7916_v52 = vld [vmem:[%s17513_s2 + $0x220] sm:$0xff]  ;;  %9512 = vmatprep.subr.bf16.mxu0 %v18022_v55  ;;  %v7917_v41 = vld [vmem:[%s17513_s2 + $0x228] sm:$0xff]  ;;  %9541 = vmatpush3.bf16.msra.mxu1 %v9538_v42 }
 0x3f1   :  { %v9513_v60 = vpack.c.bf16 %v7917_v41, %v7916_v52  ;;  %v3537_v52 = vmul.f32 %v12630_v62, %v12630_v62 }
 0x3f2   :  { %v3596_v27 = vadd.f32 %v3595_v16, %v3533_v20  ;;  %v12636_v20 = vsub.f32 %v12168_v25, %v12263_v21  ;;  %v3536_v16 = vmul.f32 %v12611_v58, %v12611_v58 }
 0x3f3   :  { %9514 = vmatpush1.bf16.msra.mxu0 %v9513_v60 }
 0x3f4   :  { %v3597_v40 = vadd.f32 %v3596_v27, %v3534_v61  ;;  %v7919_v61 = vld [vmem:[%s17513_s2 + $0x238] sm:$0xff]  ;;  %v7934_v27 = vld [vmem:[%s17513_s2 + $0x2b0] sm:$0xff]  ;;  %9515 = vmatprep.subr.bf16.mxu0 %v18022_v55 }
 0x3f5   :  { %v9516_v25 = vpack.c.bf16 %v7919_v61, %v7918_v26  ;;  %v9542_v41 = vpack.c.bf16 %v7935_v59, %v7934_v27  ;;  %v7921_v26 = vld [vmem:[%s17513_s2 + $0x248] sm:$0xff]  ;;  %v12680_v61 = vsub.f32 %v12186_v18, %v12263_v21  ;;  %v3539_v27 = vmul.f32 %v12655_v35, %v12655_v35  ;;  %v7923_v18 = vld [vmem:[%s17513_s2 + $0x258] sm:$0xff] }
 0x3f6   :  { %v3598_v12 = vadd.f32 %v3597_v40, %v3535_v46  ;;  %v12661_v46 = vsub.f32 %v12180_v51, %v12263_v21  ;;  %v3538_v40 = vmul.f32 %v12636_v20, %v12636_v20  ;;  %v9519_v51 = vpack.c.bf16 %v7921_v26, %v7920_v4  ;;  %v7922_v4 = vld [vmem:[%s17513_s2 + $0x250] sm:$0xff] }
 0x3f7   :  { %9517 = vmatpush1.bf16.msra.mxu0 %v9516_v25  ;;  %9543 = vmatprep.subr.bf16.mxu1 %v9542_v41  ;;  %18023 = vst [vmem:[#allocation33_spill] sm:$0xff] %v12680_v61  ;;  %v12705_v26 = vsub.f32 %v12198_v32, %v12263_v21  ;;  %v7925_v32 = vld [vmem:[%s17513_s2 + $0x268] sm:$0xff] }
 0x3f8   :  { %v3599_v42 = vadd.f32 %v3598_v12, %v3536_v16  ;;  %v7936_v16 = vld [vmem:[%s17513_s2 + $0x2c0] sm:$0xff]  ;;  %9545 = vmatpush3.bf16.msra.mxu1 %v9542_v41  ;;  %9518 = vmatprep.subr.bf16.mxu0 %v18022_v55  ;;  %v7937_v12 = vld [vmem:[%s17513_s2 + $0x2c8] sm:$0xff] }
 0x3f9   :  { %v9546_v59 = vpack.c.bf16 %v7937_v12, %v7936_v16  ;;  %18025 = vst [vmem:[#allocation34_spill] sm:$0xff] %v12705_v26  ;;  %v3541_v16 = vmul.f32 %v12680_v61, %v12680_v61 }
 0x3fa   :  { %v3600_v60 = vadd.f32 %v3599_v42, %v3537_v52  ;;  %v12686_v52 = vsub.f32 %v12192_v54, %v12263_v21  ;;  %v3540_v42 = vmul.f32 %v12661_v46, %v12661_v46  ;;  %v9522_v54 = vpack.c.bf16 %v7923_v18, %v7922_v4  ;;  %v7924_v4 = vld [vmem:[%s17513_s2 + $0x260] sm:$0xff] }
 0x3fb   :  { %9520 = vmatpush1.bf16.msra.mxu0 %v9519_v51  ;;  %9547 = vmatprep.subr.bf16.mxu1 %v9546_v59  ;;  %v12730_v18 = vsub.f32 %v12210_v23, %v12263_v21  ;;  %v12745_v23 = vsub.f32 %v12216_v9, %v12263_v21 }
 0x3fc   :  { %v3601_v25 = vadd.f32 %v3600_v60, %v3538_v40  ;;  %18024 = vst [vmem:[#allocation37_spill] sm:$0xff] %v12686_v52  ;;  %v7938_v40 = vld [vmem:[%s17513_s2 + $0x2d0] sm:$0xff]  ;;  %9521 = vmatprep.subr.bf16.mxu0 %v18022_v55  ;;  %9549 = vmatpush3.bf16.msra.mxu1 %v9546_v59  ;;  %v7939_v60 = vld [vmem:[%s17513_s2 + $0x2d8] sm:$0xff] }
 0x3fd   :  { %v9550_v12 = vpack.c.bf16 %v7939_v60, %v7938_v40  ;;  %v3543_v40 = vmul.f32 %v12705_v26, %v12705_v26  ;;  %v12763_v26 = vsub.f32 %v12222_v19, %v12263_v21  ;;  %v18028_v19 = vld [vmem:[#allocation16_spill] sm:$0xff] }
 0x3fe   :  { %v3602_v41 = vadd.f32 %v3601_v25, %v3539_v27  ;;  %v12711_v27 = vsub.f32 %v12204_v1, %v12263_v21  ;;  %v3542_v25 = vmul.f32 %v12686_v52, %v12686_v52  ;;  %v9525_v1 = vpack.c.bf16 %v7925_v32, %v7924_v4  ;;  %v4190_v4 = vld [vmem:[%s17513_s2 + $0x100] sm:$0xff]  ;;  %v4191_v32 = vld [vmem:[%s17513_s2 + $0x108] sm:$0xff] }
 0x3ff   :  { %9523 = vmatpush1.bf16.msra.mxu0 %v9522_v54  ;;  %9551 = vmatprep.subr.bf16.mxu1 %v9550_v12  ;;  %v3545_v52 = vmul.f32 %v12730_v18, %v12730_v18 }
 0x400   :  { %v3603_v51 = vadd.f32 %v3602_v41, %v3540_v42  ;;  %18026 = vst [vmem:[#allocation35_spill] sm:$0xff] %v12711_v27  ;;  %v7940_v42 = vld [vmem:[%s17513_s2 + $0x2e0] sm:$0xff]  ;;  %9524 = vmatprep.subr.bf16.mxu0 %v18022_v55  ;;  %9553 = vmatpush3.bf16.msra.mxu1 %v9550_v12  ;;  %v7941_v41 = vld [vmem:[%s17513_s2 + $0x2e8] sm:$0xff]  ;;  %v7942_v12 = vld [vmem:[%s17513_s2 + $0x2f0] sm:$0xff] }
 0x401   :  { %v9554_v60 = vpack.c.bf16 %v7941_v41, %v7940_v42 }
 0x402   :  { %v3604_v59 = vadd.f32 %v3603_v51, %v3541_v16  ;;  %v7926_v16 = vld [vmem:[%s17513_s2 + $0x270] sm:$0xff]  ;;  %v7927_v51 = vld [vmem:[%s17513_s2 + $0x278] sm:$0xff] }
 0x403   :  { %9526 = vmatpush1.bf16.msra.mxu0 %v9525_v1  ;;  %9555 = vmatprep.subr.bf16.mxu1 %v9554_v60  ;;  %v9528_v9 = vpack.c.bf16 %v7927_v51, %v7926_v16  ;;  %v12769_v1 = vsub.f32 %v12228_v0, %v12263_v21  ;;  %v3547_v16 = vmul.f32 %v12763_v26, %v12763_v26  ;;  %v18029_v0 = vld [vmem:[#allocation4_spill] sm:$0xff] }
 0x404   :  { %v3605_v54 = vadd.f32 %v3604_v59, %v3542_v25  ;;  %v3544_v25 = vmul.f32 %v12711_v27, %v12711_v27  ;;  %v7943_v59 = vld [vmem:[%s17513_s2 + $0x2f8] sm:$0xff]  ;;  %9527 = vmatprep.subr.bf16.mxu0 %v18022_v55  ;;  %9557 = vmatpush3.bf16.msra.mxu1 %v9554_v60  ;;  %v12759_v27 = vpack.c.bf16 %v4191_v32, %v4190_v4 }
 0x405   :  { %v9558_v41 = vpack.c.bf16 %v7943_v59, %v7942_v12  ;;  %v12776_v60 = vsub.f32 %v18028_v19, %v12263_v21  ;;  %v12783_v12 = vsub.f32 %v18029_v0, %v12263_v21  ;;  %v3552_v21 = vmul.f32 %v12269_v48, %v12269_v48 }
 0x406   :  { %v3606_v42 = vadd.f32 %v3605_v54, %v3543_v40  ;;  %18027 = vst [vmem:[#allocation36_spill] sm:$0xff] %v12759_v27  ;;  %v3546_v40 = vmul.f32 %v12745_v23, %v12745_v23  ;;  %v3554_v19 = vmul.f32 %v12275_v6, %v12275_v6 }
 0x407   :  { %9559 = vmatprep.subr.bf16.mxu1 %v9558_v41  ;;  %9529 = vmatpush1.bf16.msra.mxu0 %v9528_v9  ;;  %v3550_v4 = vmul.f32 %v12783_v12, %v12783_v12 }
 0x408   :  { %v3607_v61 = vadd.f32 %v3606_v42, %v3544_v25  ;;  %9561 = vmatpush3.bf16.msra.mxu1 %v9558_v41  ;;  %9611 = vmatprep.subr.bf16.mxu0 %v12759_v27  ;;  %v3549_v25 = vmul.f32 %v12776_v60, %v12776_v60  ;;  %v3551_v42 = vmul.f32 %v12266_v45, %v12266_v45 }
 0x409   :  { %9562 = vmatprep.subr.bf16.mxu1 %v18022_v55 }
 0x40a   :  { %v3608_v54 = vadd.f32 %v3607_v61, %v3545_v52  ;;  %v3548_v61 = vmul.f32 %v12769_v1, %v12769_v1 }
 0x40c   :  { %v3609_v51 = vadd.f32 %v3608_v54, %v3546_v40  ;;  %v3553_v40 = vmul.f32 %v12272_v2, %v12272_v2 }
 0x40e   :  { %v3610_v52 = vadd.f32 %v3609_v51, %v3547_v16  ;;  %v3555_v51 = vmul.f32 %v12278_v29, %v12278_v29 }
 0x410   :  { %v3611_v59 = vadd.f32 %v3610_v52, %v3548_v61  ;;  %v3556_v61 = vmul.f32 %v12281_v30, %v12281_v30 }
 0x412   :  { %v3612_v32 = vadd.f32 %v3611_v59, %v3549_v25  ;;  %v3557_v25 = vmul.f32 %v12284_v39, %v12284_v39 }
 0x414   :  { %v3613_v9 = vadd.f32 %v3612_v32, %v3550_v4  ;;  %v3558_v4 = vmul.f32 %v12287_v7, %v12287_v7 }
 0x416   :  { %v3614_v41 = vadd.f32 %v3613_v9, %v3551_v42  ;;  %v3559_v42 = vmul.f32 %v12290_v13, %v12290_v13 }
 0x418   :  { %v3615_v54 = vadd.f32 %v3614_v41, %v3552_v21 }
 0x41a   :  { %v3616_v16 = vadd.f32 %v3615_v54, %v3553_v40 }
 0x41c   :  { %v3617_v0 = vadd.f32 %v3616_v16, %v3554_v19 }
 0x41e   :  { %v3618_v52 = vadd.f32 %v3617_v0, %v3555_v51 }
 0x420   :  { %v3619_v59 = vadd.f32 %v3618_v52, %v3556_v61  ;;  %v4192_v61 = vld [vmem:[%s17513_s2 + $0x110] sm:$0xff]  ;;  %v4193_v52 = vld [vmem:[%s17513_s2 + $0x118] sm:$0xff] }
 0x422   :  { %v3620_v32 = vadd.f32 %v3619_v59, %v3557_v25  ;;  %v4194_v25 = vld [vmem:[%s17513_s2 + $0x120] sm:$0xff]  ;;  %v4195_v59 = vld [vmem:[%s17513_s2 + $0x128] sm:$0xff] }
 0x424   :  { %v3621_v9 = vadd.f32 %v3620_v32, %v3558_v4  ;;  %v12829_v4 = vld [vmem:[%s17513_s2 + $0x8] sm:$0xff] }
 0x425   :  { %18031 = vst [vmem:[#allocation39_spill] sm:$0xff] %v12829_v4 }
 0x426   :  { %v3622_v21 = vadd.f32 %v3621_v9, %v3559_v42  ;;  %v12836_v42 = vld [vmem:[%s17514_s3] ss:$0 sm:$0xff]  ;;  %v12838_v9 = vpack.c.bf16 %v4193_v52, %v4192_v61 }
 0x427   :  { %v18036_v61 = vld [vmem:[#allocation19_spill] sm:$0xff] }
 0x428   :  { %v3623_v41 = vrot.slane %v3622_v21, 4  ;;  %18032 = vst [vmem:[#allocation40_spill] sm:$0xff] %v12838_v9  ;;  %v18037_v52 = vld [vmem:[#allocation27_spill] sm:$0xff] }
 0x42a   :  { %v3624_v40 = vadd.f32 %v3623_v41, %v3622_v21  ;;  %v12840_v21 = vpack.c.bf16 %v4195_v59, %v4194_v25  ;;  %v18038_v25 = vld [vmem:[#allocation21_spill] sm:$0xff]  ;;  %v18039_v41 = vld [vmem:[#allocation22_spill] sm:$0xff] }
 0x42c   :  { %v3625_v54 = vrot.slane %v3624_v40, 2  ;;  %18033 = vst [vmem:[#allocation41_spill] sm:$0xff] %v12840_v21 }
 0x42e   :  { %v3626_v19 = vadd.f32 %v3625_v54, %v3624_v40 }
 0x430   :  { %v3627_v16 = vrot.slane %v3626_v19, 1 }
 0x432   :  { %v3628_v55 = vadd.f32 %v3627_v16, %v3626_v19 }
 0x434   :  { %v3629_v51 = vmul.f32 0.001953125, %v3628_v55  ;;  %v12824_v55 = vld [vmem:[%s17513_s2] sm:$0xff] }
 0x435   :  { %18030 = vst [vmem:[#allocation38_spill] sm:$0xff] %v12824_v55 }
 0x436   :  { %v3630_v0 = vadd.f32 1e-05, %v3629_v51  ;;  %v12861_v51 = vld [vmem:[%s17515_s4] ss:$0 sm:$0xff] }
 0x437   :  { %18034 = vst [vmem:[#allocation42_spill] sm:$0xff] %v12861_v51 }
 0x438   :  { %9724 = vrsqrt.f32 %v3630_v0  ;;  %v18035_v0 = vld [vmem:[#allocation18_spill] sm:$0xff] }
 0x442   :  { %v12831_v32 = vpop.eup %9724 }
 0x443   :  { %v3695_v40 = vmul.f32 %v12831_v32, %v12290_v13  ;;  %v12848_v54 = vmul.f32 %v12831_v32, %v12294_v3  ;;  %v12852_v19 = vmul.f32 %v12831_v32, %v12298_v47  ;;  %v12856_v16 = vmul.f32 %v12831_v32, %v12302_v11 }
 0x444   :  { %v12865_v13 = vmul.f32 %v12831_v32, %v18035_v0  ;;  %v12869_v3 = vmul.f32 %v12831_v32, %v18036_v61  ;;  %v12873_v47 = vmul.f32 %v12831_v32, %v18037_v52  ;;  %v12877_v11 = vmul.f32 %v12831_v32, %v18038_v25  ;;  %v18040_v0 = vld [vmem:[#allocation24_spill] sm:$0xff]  ;;  %v18041_v61 = vld [vmem:[#allocation25_spill] sm:$0xff]  ;;  %v18043_v52 = vld [vmem:[#allocation26_spill] sm:$0xff] }
 0x445   :  { %v3766_v59 = vmul.f32 %v12836_v42, %v3695_v40  ;;  %v12882_v21 = vmul.f32 %v12831_v32, %v18039_v41  ;;  %v12886_v55 = vmul.f32 %v12831_v32, %v18040_v0  ;;  %v12890_v4 = vmul.f32 %v12831_v32, %v18041_v61  ;;  %v18045_v40 = vld [vmem:[#allocation5_spill] sm:$0xff] }
 0x446   :  { %v12894_v9 = vmul.f32 %v12831_v32, %v18043_v52  ;;  %v12898_v25 = vmul.f32 %v12831_v32, %v12356_v17  ;;  %v12902_v41 = vmul.f32 %v12831_v32, %v12362_v8  ;;  %v12906_v0 = vmul.f32 %v12831_v32, %v18045_v40  ;;  %v18047_v61 = vld [vmem:[#allocation29_spill] sm:$0xff]  ;;  %v18049_v8 = vld [vmem:[#allocation3_spill] sm:$0xff]  ;;  %v18050_v40 = vld [vmem:[#allocation30_spill] sm:$0xff] }
 0x447   :  { %18042 = vst [vmem:[#allocation43_spill] sm:$0xff] %v12890_v4  ;;  %v3837_v27 = vadd.f32 %v12861_v51, %v3766_v59  ;;  %v12911_v4 = vmul.f32 %v12831_v32, %v18047_v61  ;;  %v12915_v52 = vmul.f32 %v12831_v32, %v12380_v10  ;;  %v12919_v17 = vmul.f32 %v12831_v32, %v12386_v5  ;;  %v18051_v59 = vld [vmem:[#allocation31_spill] sm:$0xff]  ;;  %v18052_v51 = vld [vmem:[#allocation32_spill] sm:$0xff] }
 0x448   :  { %18044 = vst [vmem:[#allocation45_spill] sm:$0xff] %v12902_v41  ;;  %18046 = vst [vmem:[#allocation46_spill] sm:$0xff] %v12906_v0  ;;  %v12923_v41 = vmul.f32 %v12831_v32, %v18049_v8  ;;  %v12927_v0 = vmul.f32 %v12831_v32, %v18050_v40  ;;  %v12931_v61 = vmul.f32 %v12831_v32, %v18051_v59 }
 0x449   :  { %18048 = vst [vmem:[#allocation44_spill] sm:$0xff] %v12915_v52  ;;  %v12935_v10 = vmul.f32 %v12831_v32, %v18052_v51  ;;  %v3901_v52 = vmax.f32 %v3837_v27, 0.0  ;;  %v12939_v5 = vmul.f32 %v12831_v32, %v12422_v22  ;;  %v12943_v8 = vmul.f32 %v12831_v32, %v12428_v43  ;;  %v18055_v27 = vld [vmem:[#allocation33_spill] sm:$0xff] }
 0x44a   :  { %v12947_v40 = vmul.f32 %v12831_v32, %v12447_v50  ;;  %v12951_v59 = vmul.f32 %v12831_v32, %v12453_v15  ;;  %v12955_v51 = vmul.f32 %v12831_v32, %v12466_v28  ;;  %v12959_v22 = vmul.f32 %v12831_v32, %v12472_v38 }
 0x44b   :  { %v12963_v43 = vmul.f32 %v12831_v32, %v12485_v37  ;;  %v12967_v50 = vmul.f32 %v12831_v32, %v12491_v14  ;;  %v12971_v15 = vmul.f32 %v12831_v32, %v12504_v57  ;;  %v12975_v28 = vmul.f32 %v12831_v32, %v12510_v44  ;;  %3965 = vst [vmem:[#allocation2 + $0x339] sm:$0xff] %v3901_v52  ;;  %v18056_v52 = vld [vmem:[#allocation37_spill] sm:$0xff] }
 0x44c   :  { %v12979_v38 = vmul.f32 %v12831_v32, %v12523_v63  ;;  %v12983_v37 = vmul.f32 %v12831_v32, %v12529_v33  ;;  %v12987_v14 = vmul.f32 %v12831_v32, %v12542_v24  ;;  %v12991_v57 = vmul.f32 %v12831_v32, %v12548_v56 }
 0x44d   :  { %v12995_v44 = vmul.f32 %v12831_v32, %v12561_v53  ;;  %v12999_v63 = vmul.f32 %v12831_v32, %v12567_v36  ;;  %v13003_v33 = vmul.f32 %v12831_v32, %v12580_v34  ;;  %v13007_v24 = vmul.f32 %v12831_v32, %v12586_v31 }
 0x44e   :  { %v13011_v56 = vmul.f32 %v12831_v32, %v12605_v49  ;;  %v13015_v53 = vmul.f32 %v12831_v32, %v12611_v58  ;;  %v13019_v36 = vmul.f32 %v12831_v32, %v12630_v62  ;;  %v13023_v34 = vmul.f32 %v12831_v32, %v12636_v20 }
 0x44f   :  { %v13027_v31 = vmul.f32 %v12831_v32, %v12655_v35  ;;  %v13031_v49 = vmul.f32 %v12831_v32, %v12661_v46  ;;  %v13035_v58 = vmul.f32 %v12831_v32, %v18055_v27  ;;  %v13039_v62 = vmul.f32 %v12831_v32, %v18056_v52 }
 0x450   :  { %18053 = vst [vmem:[#allocation52_spill] sm:$0xff] %v13019_v36  ;;  %18054 = vst [vmem:[#allocation50_spill] sm:$0xff] %v13023_v34  ;;  %v18057_v36 = vld [vmem:[#allocation34_spill] sm:$0xff]  ;;  %v18058_v34 = vld [vmem:[#allocation35_spill] sm:$0xff]  ;;  %v13051_v46 = vmul.f32 %v12831_v32, %v12730_v18  ;;  %v13055_v27 = vmul.f32 %v12831_v32, %v12745_v23  ;;  %v13059_v52 = vmul.f32 %v12831_v32, %v12763_v26 }
 0x451   :  { %v13043_v20 = vmul.f32 %v12831_v32, %v18057_v36  ;;  %v13047_v35 = vmul.f32 %v12831_v32, %v18058_v34  ;;  %v13063_v36 = vmul.f32 %v12831_v32, %v12769_v1  ;;  %v13067_v34 = vmul.f32 %v12831_v32, %v12776_v60 }
 0x452   :  { %v13071_v18 = vmul.f32 %v12831_v32, %v12783_v12  ;;  %v13075_v23 = vmul.f32 %v12831_v32, %v12266_v45  ;;  %v13079_v26 = vmul.f32 %v12831_v32, %v12269_v48  ;;  %v13083_v1 = vmul.f32 %v12831_v32, %v12272_v2 }
 0x453   :  { %v13087_v60 = vmul.f32 %v12831_v32, %v12275_v6  ;;  %v13091_v12 = vmul.f32 %v12831_v32, %v12278_v29  ;;  %v13095_v45 = vmul.f32 %v12831_v32, %v12281_v30  ;;  %v13099_v48 = vmul.f32 %v12831_v32, %v12284_v39 }
 0x454   :  { %v13103_v2 = vmul.f32 %v12831_v32, %v12287_v7  ;;  %v13107_v6 = vmul.f32 %v12836_v42, %v12848_v54  ;;  %v13111_v29 = vmul.f32 %v12836_v42, %v12852_v19  ;;  %v13115_v30 = vmul.f32 %v12836_v42, %v12856_v16 }
 0x455   :  { %v13119_v39 = vmul.f32 %v12836_v42, %v12865_v13  ;;  %v13123_v7 = vmul.f32 %v12836_v42, %v12869_v3  ;;  %v13127_v32 = vmul.f32 %v12836_v42, %v12873_v47  ;;  %v13131_v54 = vmul.f32 %v12836_v42, %v12877_v11  ;;  %v18061_v13 = vld [vmem:[#allocation43_spill] sm:$0xff] }
 0x456   :  { %v13135_v19 = vmul.f32 %v12836_v42, %v12882_v21  ;;  %v13139_v16 = vmul.f32 %v12836_v42, %v12886_v55  ;;  %v13143_v3 = vmul.f32 %v12836_v42, %v18061_v13  ;;  %v13147_v47 = vmul.f32 %v12836_v42, %v12894_v9 }
 0x457   :  { %18059 = vst [vmem:[#allocation54_spill] sm:$0xff] %v13131_v54  ;;  %v13151_v11 = vmul.f32 %v12836_v42, %v12898_v25  ;;  %v18063_v54 = vld [vmem:[#allocation45_spill] sm:$0xff]  ;;  %v13163_v13 = vmul.f32 %v12836_v42, %v12911_v4  ;;  %v13171_v25 = vmul.f32 %v12836_v42, %v12919_v17  ;;  %v13183_v4 = vmul.f32 %v12836_v42, %v12931_v61 }
 0x458   :  { %18060 = vst [vmem:[#allocation48_spill] sm:$0xff] %v13135_v19  ;;  %18062 = vst [vmem:[#allocation47_spill] sm:$0xff] %v13143_v3  ;;  %v13155_v21 = vmul.f32 %v12836_v42, %v18063_v54  ;;  %v18064_v19 = vld [vmem:[#allocation46_spill] sm:$0xff]  ;;  %v18065_v3 = vld [vmem:[#allocation44_spill] sm:$0xff]  ;;  %v13175_v54 = vmul.f32 %v12836_v42, %v12923_v41  ;;  %v13191_v17 = vmul.f32 %v12836_v42, %v12939_v5 }
 0x459   :  { %v13159_v55 = vmul.f32 %v12836_v42, %v18064_v19  ;;  %v13167_v9 = vmul.f32 %v12836_v42, %v18065_v3  ;;  %v13179_v19 = vmul.f32 %v12836_v42, %v12927_v0  ;;  %v13187_v3 = vmul.f32 %v12836_v42, %v12935_v10 }
 0x45a   :  { %v13195_v41 = vmul.f32 %v12836_v42, %v12943_v8  ;;  %v13199_v0 = vmul.f32 %v12836_v42, %v12947_v40  ;;  %v13203_v61 = vmul.f32 %v12836_v42, %v12951_v59  ;;  %v13207_v10 = vmul.f32 %v12836_v42, %v12955_v51 }
 0x45b   :  { %v13211_v5 = vmul.f32 %v12836_v42, %v12959_v22  ;;  %v13215_v8 = vmul.f32 %v12836_v42, %v12963_v43  ;;  %v13219_v40 = vmul.f32 %v12836_v42, %v12967_v50  ;;  %v13223_v59 = vmul.f32 %v12836_v42, %v12971_v15 }
 0x45c   :  { %v13227_v51 = vmul.f32 %v12836_v42, %v12975_v28  ;;  %v13231_v22 = vmul.f32 %v12836_v42, %v12979_v38  ;;  %v13235_v43 = vmul.f32 %v12836_v42, %v12983_v37  ;;  %v13239_v50 = vmul.f32 %v12836_v42, %v12987_v14 }
 0x45d   :  { %v13243_v15 = vmul.f32 %v12836_v42, %v12991_v57  ;;  %v13247_v28 = vmul.f32 %v12836_v42, %v12995_v44  ;;  %v13251_v38 = vmul.f32 %v12836_v42, %v12999_v63  ;;  %v13255_v37 = vmul.f32 %v12836_v42, %v13003_v33 }
 0x45e   :  { %v13259_v14 = vmul.f32 %v12836_v42, %v13007_v24  ;;  %v13263_v57 = vmul.f32 %v12836_v42, %v13011_v56  ;;  %v13267_v44 = vmul.f32 %v12836_v42, %v13015_v53  ;;  %v13279_v24 = vmul.f32 %v12836_v42, %v13027_v31 }
 0x45f   :  { %18066 = vst [vmem:[#allocation56_spill] sm:$0xff] %v13247_v28  ;;  %18067 = vst [vmem:[#allocation17_spill] sm:$0xff] %v13251_v38  ;;  %v18068_v28 = vld [vmem:[#allocation52_spill] sm:$0xff]  ;;  %v18069_v38 = vld [vmem:[#allocation50_spill] sm:$0xff]  ;;  %v13283_v56 = vmul.f32 %v12836_v42, %v13031_v49  ;;  %v13287_v53 = vmul.f32 %v12836_v42, %v13035_v58  ;;  %v13299_v31 = vmul.f32 %v12836_v42, %v13047_v35 }
 0x460   :  { %v13271_v63 = vmul.f32 %v12836_v42, %v18068_v28  ;;  %v13275_v33 = vmul.f32 %v12836_v42, %v18069_v38  ;;  %v13291_v28 = vmul.f32 %v12836_v42, %v13039_v62  ;;  %v13295_v38 = vmul.f32 %v12836_v42, %v13043_v20 }
 0x461   :  { %v13303_v49 = vmul.f32 %v12836_v42, %v13051_v46  ;;  %v13307_v58 = vmul.f32 %v12836_v42, %v13055_v27  ;;  %v13311_v62 = vmul.f32 %v12836_v42, %v13059_v52  ;;  %v13315_v20 = vmul.f32 %v12836_v42, %v13063_v36 }
 0x462   :  { %v13319_v35 = vmul.f32 %v12836_v42, %v13067_v34  ;;  %v13323_v46 = vmul.f32 %v12836_v42, %v13071_v18  ;;  %v13327_v27 = vmul.f32 %v12836_v42, %v13075_v23  ;;  %v13331_v52 = vmul.f32 %v12836_v42, %v13079_v26 }
 0x463   :  { %v13335_v36 = vmul.f32 %v12836_v42, %v13083_v1  ;;  %v13339_v34 = vmul.f32 %v12836_v42, %v13087_v60  ;;  %v13343_v18 = vmul.f32 %v12836_v42, %v13091_v12  ;;  %v13347_v23 = vmul.f32 %v12836_v42, %v13095_v45 }
 0x464   :  { %v13351_v26 = vmul.f32 %v12836_v42, %v13099_v48  ;;  %v13355_v1 = vmul.f32 %v12836_v42, %v13103_v2 }
 0x465   :  { %18070 = vst [vmem:[#allocation6_spill] sm:$0xff] %v13335_v36  ;;  %v18071_v36 = vld [vmem:[#allocation42_spill] sm:$0xff] }
 0x466   :  { %v13359_v60 = vadd.f32 %v18071_v36, %v13107_v6  ;;  %v13363_v12 = vadd.f32 %v18071_v36, %v13111_v29  ;;  %v13367_v45 = vadd.f32 %v18071_v36, %v13115_v30  ;;  %v13371_v48 = vadd.f32 %v18071_v36, %v13119_v39  ;;  %v18074_v6 = vld [vmem:[#allocation54_spill] sm:$0xff] }
 0x467   :  { %v13375_v42 = vadd.f32 %v18071_v36, %v13123_v7  ;;  %v13379_v2 = vadd.f32 %v18071_v36, %v13127_v32  ;;  %v13383_v29 = vadd.f32 %v18071_v36, %v18074_v6  ;;  %v13391_v39 = vadd.f32 %v18071_v36, %v13139_v16 }
 0x468   :  { %18072 = vst [vmem:[#allocation23_spill] sm:$0xff] %v13363_v12  ;;  %18073 = vst [vmem:[#allocation58_spill] sm:$0xff] %v13371_v48  ;;  %v18075_v12 = vld [vmem:[#allocation48_spill] sm:$0xff]  ;;  %v18076_v48 = vld [vmem:[#allocation47_spill] sm:$0xff]  ;;  %v13399_v32 = vadd.f32 %v18071_v36, %v13147_v47  ;;  %v13403_v6 = vadd.f32 %v18071_v36, %v13151_v11  ;;  %v13411_v16 = vadd.f32 %v18071_v36, %v13159_v55 }
 0x469   :  { %v13387_v30 = vadd.f32 %v18071_v36, %v18075_v12  ;;  %v13395_v7 = vadd.f32 %v18071_v36, %v18076_v48  ;;  %v13407_v12 = vadd.f32 %v18071_v36, %v13155_v21  ;;  %v13415_v48 = vadd.f32 %v18071_v36, %v13163_v13 }
 0x46a   :  { %v13419_v47 = vadd.f32 %v18071_v36, %v13167_v9  ;;  %v13423_v11 = vadd.f32 %v18071_v36, %v13171_v25  ;;  %v13427_v21 = vadd.f32 %v18071_v36, %v13175_v54  ;;  %v13431_v55 = vadd.f32 %v18071_v36, %v13179_v19 }
 0x46b   :  { %v13435_v13 = vadd.f32 %v18071_v36, %v13183_v4  ;;  %v13439_v9 = vadd.f32 %v18071_v36, %v13187_v3  ;;  %v13443_v25 = vadd.f32 %v18071_v36, %v13191_v17  ;;  %v13447_v54 = vadd.f32 %v18071_v36, %v13195_v41 }
 0x46c   :  { %v13451_v19 = vadd.f32 %v18071_v36, %v13199_v0  ;;  %v13455_v4 = vadd.f32 %v18071_v36, %v13203_v61  ;;  %v13459_v3 = vadd.f32 %v18071_v36, %v13207_v10  ;;  %v13463_v17 = vadd.f32 %v18071_v36, %v13211_v5 }
 0x46d   :  { %v13467_v41 = vadd.f32 %v18071_v36, %v13215_v8  ;;  %v13471_v0 = vadd.f32 %v18071_v36, %v13219_v40  ;;  %v13475_v61 = vadd.f32 %v18071_v36, %v13223_v59  ;;  %v13479_v10 = vadd.f32 %v18071_v36, %v13227_v51 }
 0x46e   :  { %v13483_v5 = vadd.f32 %v18071_v36, %v13231_v22  ;;  %v13487_v8 = vadd.f32 %v18071_v36, %v13235_v43  ;;  %v13491_v40 = vadd.f32 %v18071_v36, %v13239_v50  ;;  %v13495_v59 = vadd.f32 %v18071_v36, %v13243_v15 }
 0x46f   :  { %18077 = vst [vmem:[#allocation60_spill] sm:$0xff] %v13475_v61  ;;  %18078 = vst [vmem:[#allocation51_spill] sm:$0xff] %v13479_v10  ;;  %v18079_v61 = vld [vmem:[#allocation56_spill] sm:$0xff]  ;;  %v18080_v10 = vld [vmem:[#allocation17_spill] sm:$0xff]  ;;  %v13507_v43 = vadd.f32 %v18071_v36, %v13255_v37  ;;  %v13511_v50 = vadd.f32 %v18071_v36, %v13259_v14  ;;  %v13515_v15 = vadd.f32 %v18071_v36, %v13263_v57 }
 0x470   :  { %v13499_v51 = vadd.f32 %v18071_v36, %v18079_v61  ;;  %v13503_v22 = vadd.f32 %v18071_v36, %v18080_v10  ;;  %v13519_v61 = vadd.f32 %v18071_v36, %v13267_v44  ;;  %v13523_v10 = vadd.f32 %v18071_v36, %v13271_v63 }
 0x471   :  { %v13527_v37 = vadd.f32 %v18071_v36, %v13275_v33  ;;  %v13531_v14 = vadd.f32 %v18071_v36, %v13279_v24  ;;  %v13535_v57 = vadd.f32 %v18071_v36, %v13283_v56  ;;  %v13539_v44 = vadd.f32 %v18071_v36, %v13287_v53 }
 0x472   :  { %v13543_v63 = vadd.f32 %v18071_v36, %v13291_v28  ;;  %v13547_v33 = vadd.f32 %v18071_v36, %v13295_v38  ;;  %v13551_v24 = vadd.f32 %v18071_v36, %v13299_v31  ;;  %v13555_v56 = vadd.f32 %v18071_v36, %v13303_v49 }
 0x473   :  { %v13559_v53 = vadd.f32 %v18071_v36, %v13307_v58  ;;  %v13563_v28 = vadd.f32 %v18071_v36, %v13311_v62  ;;  %v13567_v38 = vadd.f32 %v18071_v36, %v13315_v20  ;;  %v13571_v31 = vadd.f32 %v18071_v36, %v13319_v35 }
 0x474   :  { %v13575_v49 = vadd.f32 %v18071_v36, %v13323_v46  ;;  %v13579_v58 = vadd.f32 %v18071_v36, %v13327_v27  ;;  %v13583_v62 = vadd.f32 %v18071_v36, %v13331_v52  ;;  %v13591_v35 = vadd.f32 %v18071_v36, %v13339_v34  ;;  %v18090_v34 = vld [vmem:[#allocation23_spill] sm:$0xff] }
 0x475   :  { %18081 = vst [vmem:[#allocation49_spill] sm:$0xff] %v13563_v28  ;;  %v18084_v28 = vld [vmem:[#allocation6_spill] sm:$0xff]  ;;  %v13595_v46 = vadd.f32 %v18071_v36, %v13343_v18  ;;  %v13599_v27 = vadd.f32 %v18071_v36, %v13347_v23  ;;  %v13603_v52 = vadd.f32 %v18071_v36, %v13351_v26  ;;  %v17624_v23 = vmax.f32 %v13379_v2, 0.0 }
 0x476   :  { %18082 = vst [vmem:[#allocation8_spill] sm:$0xff] %v13579_v58  ;;  %18083 = vst [vmem:[#allocation10_spill] sm:$0xff] %v13583_v62  ;;  %v13587_v20 = vadd.f32 %v18071_v36, %v18084_v28  ;;  %v13607_v28 = vadd.f32 %v18071_v36, %v13355_v1  ;;  %v17621_v62 = vmax.f32 %v13367_v45, 0.0  ;;  %v18091_v18 = vld [vmem:[#allocation58_spill] sm:$0xff]  ;;  %v17625_v58 = vmax.f32 %v13375_v42, 0.0 }
 0x477   :  { %18086 = vst [vmem:[#allocation28_spill] sm:$0xff] %v13591_v35  ;;  %18087 = vst [vmem:[#allocation55_spill] sm:$0xff] %v13595_v46  ;;  %v17622_v35 = vmax.f32 %v18090_v34, 0.0  ;;  %v17623_v46 = vmax.f32 %v18091_v18, 0.0  ;;  %v17626_v36 = vmax.f32 %v13395_v7, 0.0  ;;  %v17627_v1 = vmax.f32 %v13399_v32, 0.0 }
 0x478   :  { %18085 = vst [vmem:[#allocation62_spill] sm:$0xff] %v13587_v20  ;;  %18088 = vst [vmem:[#allocation53_spill] sm:$0xff] %v13599_v27  ;;  %v3838_v20 = vmax.f32 %v13359_v60, 0.0  ;;  %v17628_v60 = vmax.f32 %v13403_v6, 0.0  ;;  %v17631_v26 = vmax.f32 %v13427_v21, 0.0  ;;  %v18093_v27 = vmax.f32 %v13387_v30, 0.0 }
 0x479   :  { %18089 = vst [vmem:[#allocation12_spill] sm:$0xff] %v13603_v52  ;;  %3903 = vst [vmem:[#allocation2 + $0x21] sm:$0xff] %v17622_v35  ;;  %v17630_v35 = vmax.f32 %v13423_v11, 0.0  ;;  %v3872_v52 = vmax.f32 %v13495_v59, 0.0  ;;  %v3876_v59 = vmax.f32 %v13511_v50, 0.0  ;;  %v3879_v50 = vmax.f32 %v13523_v10, 0.0 }
 0x47a   :  { %3902 = vst [vmem:[#allocation2 + $0x19] sm:$0xff] %v3838_v20  ;;  %3904 = vst [vmem:[#allocation2 + $0x31] sm:$0xff] %v17621_v62  ;;  %4511 = vmatprep.mubr.f32.mxu0 %v3838_v20  ;;  %v18092_v62 = vmax.f32 %v13383_v29, 0.0  ;;  %v17629_v20 = vmax.f32 %v13419_v47, 0.0  ;;  %v3882_v10 = vmax.f32 %v13535_v57, 0.0  ;;  %v3888_v57 = vmax.f32 %v13559_v53, 0.0 }
 0x47b   :  { %3905 = vst [vmem:[#allocation2 + $0x39] sm:$0xff] %v17623_v46  ;;  %3906 = vst [vmem:[#allocation2 + $0x49] sm:$0xff] %v17625_v58  ;;  %v18094_v46 = vmax.f32 %v13391_v39, 0.0  ;;  %v3875_v58 = vmax.f32 %v13507_v43, 0.0  ;;  %v3878_v43 = vmax.f32 %v13519_v61, 0.0  ;;  %v3881_v61 = vmax.f32 %v13531_v14, 0.0 }
 0x47c   :  { %3907 = vst [vmem:[#allocation2 + $0x51] sm:$0xff] %v17624_v23  ;;  %3908 = vst [vmem:[#allocation2 + $0x61] sm:$0xff] %v18092_v62  ;;  %v17632_v62 = vmax.f32 %v13435_v13, 0.0  ;;  %v18100_v23 = vld [vmem:[#allocation51_spill] sm:$0xff]  ;;  %v3887_v14 = vmax.f32 %v13555_v56, 0.0  ;;  %v3890_v56 = vmax.f32 %v13567_v38, 0.0 }
 0x47d   :  { %3909 = vst [vmem:[#allocation2 + $0x69] sm:$0xff] %v18093_v27  ;;  %3910 = vst [vmem:[#allocation2 + $0x79] sm:$0xff] %v18094_v46  ;;  %v18095_v27 = vmax.f32 %v13407_v12, 0.0  ;;  %v18096_v46 = vmax.f32 %v13411_v16, 0.0  ;;  %v3891_v53 = vmax.f32 %v13571_v31, 0.0  ;;  %v4162_v38 = vld [vmem:[%s17513_s2 + $0x20] sm:$0xff] }
 0x47e   :  { %3911 = vst [vmem:[#allocation2 + $0x81] sm:$0xff] %v17626_v36  ;;  %3912 = vst [vmem:[#allocation2 + $0x91] sm:$0xff] %v17627_v1  ;;  %v18097_v36 = vmax.f32 %v13415_v48, 0.0  ;;  %v17633_v1 = vmax.f32 %v13451_v19, 0.0  ;;  %v4163_v31 = vld [vmem:[%s17513_s2 + $0x28] sm:$0xff] }
 0x47f   :  { %3913 = vst [vmem:[#allocation2 + $0x99] sm:$0xff] %v17628_v60  ;;  %3914 = vst [vmem:[#allocation2 + $0xa9] sm:$0xff] %v18095_v27  ;;  %v18098_v27 = vmax.f32 %v13431_v55, 0.0  ;;  %v18099_v60 = vld [vmem:[#allocation60_spill] sm:$0xff] }
 0x480   :  { %3915 = vst [vmem:[#allocation2 + $0xb1] sm:$0xff] %v18096_v46  ;;  %3916 = vst [vmem:[#allocation2 + $0xc1] sm:$0xff] %v18097_v36  ;;  %v17634_v36 = vmax.f32 %v13467_v41, 0.0  ;;  %v3874_v46 = vmax.f32 %v13503_v22, 0.0  ;;  %v3877_v22 = vmax.f32 %v13515_v15, 0.0  ;;  %v4335_v15 = vld [vmem:[#allocation2 + $0x22] sm:$0xff] }
 0x481   :  { %3917 = vst [vmem:[#allocation2 + $0xc9] sm:$0xff] %v17629_v20  ;;  %3918 = vst [vmem:[#allocation2 + $0xd9] sm:$0xff] %v17630_v35  ;;  %v18101_v20 = vmax.f32 %v13439_v9, 0.0  ;;  %v18102_v35 = vmax.f32 %v13443_v25, 0.0 }
 0x482   :  { %3919 = vst [vmem:[#allocation2 + $0xe1] sm:$0xff] %v17631_v26  ;;  %3920 = vst [vmem:[#allocation2 + $0xf1] sm:$0xff] %v18098_v27  ;;  %v18103_v26 = vmax.f32 %v13447_v54, 0.0  ;;  %v3869_v27 = vmax.f32 %v13483_v5, 0.0 }
 0x483   :  { %3921 = vst [vmem:[#allocation2 + $0xf9] sm:$0xff] %v17632_v62  ;;  %3922 = vst [vmem:[#allocation2 + $0x109] sm:$0xff] %v18101_v20  ;;  %v18104_v62 = vmax.f32 %v13455_v4, 0.0  ;;  %v18105_v20 = vmax.f32 %v13459_v3, 0.0 }
 0x484   :  { %3923 = vst [vmem:[#allocation2 + $0x111] sm:$0xff] %v18102_v35  ;;  %3924 = vst [vmem:[#allocation2 + $0x121] sm:$0xff] %v18103_v26  ;;  %v18106_v35 = vmax.f32 %v13463_v17, 0.0  ;;  %v3873_v26 = vmax.f32 %v13499_v51, 0.0  ;;  %v13708_v51 = vld [vmem:[#allocation2 + $0x18] sm:$0xff] }
 0x485   :  { %3925 = vst [vmem:[#allocation2 + $0x129] sm:$0xff] %v17633_v1  ;;  %3926 = vst [vmem:[#allocation2 + $0x139] sm:$0xff] %v18104_v62  ;;  %v18107_v1 = vmax.f32 %v13471_v0, 0.0  ;;  %v18108_v62 = vmax.f32 %v18099_v60, 0.0  ;;  %4512 = vmatmul.mubr.f32.vlgmr.msra.gmra.mrb[0].mxu0 %v13708_v51 }
 0x486   :  { %3927 = vst [vmem:[#allocation2 + $0x141] sm:$0xff] %v18105_v20  ;;  %3928 = vst [vmem:[#allocation2 + $0x151] sm:$0xff] %v18106_v35  ;;  %v18109_v20 = vmax.f32 %v18100_v23, 0.0  ;;  %v4334_v35 = vld [vmem:[#allocation2 + $0x1a] sm:$0xff] }
 0x487   :  { %3929 = vst [vmem:[#allocation2 + $0x159] sm:$0xff] %v17634_v36  ;;  %3930 = vst [vmem:[#allocation2 + $0x169] sm:$0xff] %v18107_v1  ;;  %v3880_v36 = vmax.f32 %v13527_v37, 0.0  ;;  %v18110_v1 = vmax.f32 %v13487_v8, 0.0  ;;  %8890 = vmatprep.mubr.f32.mxu1 %v4334_v35  ;;  %v3883_v37 = vmax.f32 %v13539_v44, 0.0  ;;  %v3885_v35 = vmax.f32 %v13547_v33, 0.0 }
 0x488   :  { %3931 = vst [vmem:[#allocation2 + $0x171] sm:$0xff] %v18108_v62  ;;  %3932 = vst [vmem:[#allocation2 + $0x181] sm:$0xff] %v18109_v20  ;;  %v18111_v62 = vmax.f32 %v13491_v40, 0.0  ;;  %v3884_v20 = vmax.f32 %v13543_v63, 0.0  ;;  %8891 = vmatmul.mubr.f32.vlgmr.msra.gmra.mrb[64].mxu1 %v4335_v15  ;;  %v18113_v44 = vld [vmem:[#allocation36_spill] sm:$0xff]  ;;  %v4160_v63 = vld [vmem:[%s17513_s2 + $0x10] sm:$0xff] }
 0x489   :  { %3933 = vst [vmem:[#allocation2 + $0x189] sm:$0xff] %v3869_v27  ;;  %3934 = vst [vmem:[#allocation2 + $0x1c9] sm:$0xff] %v18110_v1  ;;  %v18112_v1 = vmax.f32 %v18090_v34, 0.0  ;;  %9613 = vmatpush3.bf16.msra.mxu0 %v18113_v44  ;;  %v4161_v33 = vld [vmem:[%s17513_s2 + $0x18] sm:$0xff]  ;;  %v3892_v34 = vmax.f32 %v13575_v49, 0.0  ;;  %v18119_v49 = vld [vmem:[#allocation8_spill] sm:$0xff] }
 0x48a   :  { %3935 = vst [vmem:[#allocation2 + $0x1d1] sm:$0xff] %v18111_v62  ;;  %3936 = vst [vmem:[#allocation2 + $0x1e1] sm:$0xff] %v3872_v52  ;;  %v4336_v52 = vld [vmem:[#allocation2 + $0x32] sm:$0xff]  ;;  %v3886_v62 = vmax.f32 %v13551_v24, 0.0 }
 0x48b   :  { %3937 = vst [vmem:[#allocation2 + $0x1e9] sm:$0xff] %v3873_v26  ;;  %3938 = vst [vmem:[#allocation2 + $0x1f9] sm:$0xff] %v3874_v46  ;;  %4516 = vmatprep.mubr.f32.mxu0 %v18112_v1  ;;  %8893 = vmatprep.mubr.f32.mxu1 %v4336_v52  ;;  %v18114_v24 = vld [vmem:[#allocation49_spill] sm:$0xff]  ;;  %v18115_v46 = vld [vmem:[#allocation40_spill] sm:$0xff]  ;;  %v18123_v52 = vmov 0.0|0.0  }
 0x48c   :  { %3939 = vst [vmem:[#allocation2 + $0x201] sm:$0xff] %v3875_v58  ;;  %3940 = vst [vmem:[#allocation2 + $0x211] sm:$0xff] %v3876_v59  ;;  %v3889_v58 = vmax.f32 %v18114_v24, 0.0  ;;  %9615 = vmatprep.subr.bf16.mxu0 %v18115_v46  ;;  %v18116_v26 = vld [vmem:[#allocation39_spill] sm:$0xff]  ;;  %v18117_v59 = vld [vmem:[#allocation38_spill] sm:$0xff] }
 0x48d   :  { %3941 = vst [vmem:[#allocation2 + $0x219] sm:$0xff] %v3877_v22  ;;  %3942 = vst [vmem:[#allocation2 + $0x229] sm:$0xff] %v3878_v43  ;;  %v18118_v22 = vpack.c.bf16 %v18116_v26, %v18117_v59  ;;  %v3893_v43 = vmax.f32 %v18119_v49, 0.0  ;;  %v4337_v1 = vld [vmem:[#allocation2 + $0x3a] sm:$0xff]  ;;  %v4196_v44 = vld [vmem:[%s17513_s2 + $0x130] sm:$0xff]  ;;  %9617 = vmatpush3.bf16.msra.mxu0 %v18115_v46 }
 0x48e   :  { %3943 = vst [vmem:[#allocation2 + $0x231] sm:$0xff] %v3879_v50  ;;  %3944 = vst [vmem:[#allocation2 + $0x241] sm:$0xff] %v3880_v36  ;;  %v13742_v36 = vld [vmem:[#allocation2 + $0x20] sm:$0xff]  ;;  %v18120_v50 = vld [vmem:[#allocation10_spill] sm:$0xff]  ;;  %8894 = vmatmul.mubr.f32.gmra.mrb[66].mxu1 %v4337_v1 }
 0x48f   :  { %3945 = vst [vmem:[#allocation2 + $0x249] sm:$0xff] %v3881_v61  ;;  %3946 = vst [vmem:[#allocation2 + $0x259] sm:$0xff] %v3882_v10  ;;  %9564 = vmatpush1.bf16.msra.mxu1 %v18118_v22  ;;  %v3894_v15 = vmax.f32 %v18120_v50, 0.0  ;;  %v18121_v61 = vld [vmem:[#allocation62_spill] sm:$0xff]  ;;  %4517 = vmatmul.mubr.f32.gmra.mrb[2].mxu0 %v13742_v36  ;;  %v18124_v24 = vld [vmem:[#allocation55_spill] sm:$0xff] }
 0x490   :  { %3947 = vst [vmem:[#allocation2 + $0x261] sm:$0xff] %v3883_v37  ;;  %3948 = vst [vmem:[#allocation2 + $0x271] sm:$0xff] %v3884_v20  ;;  %v3895_v10 = vmax.f32 %v18121_v61, 0.0  ;;  %v18122_v37 = vld [vmem:[#allocation28_spill] sm:$0xff]  ;;  %9565 = vmatprep.subr.bf16.mxu1 %v18123_v52  ;;  %v3897_v26 = vmax.f32 %v18124_v24, 0.0  ;;  %v18125_v59 = vld [vmem:[#allocation53_spill] sm:$0xff] }
 0x491   :  { %v3896_v20 = vmax.f32 %v18122_v37, 0.0  ;;  %3949 = vst [vmem:[#allocation2 + $0x279] sm:$0xff] %v3885_v35  ;;  %3950 = vst [vmem:[#allocation2 + $0x289] sm:$0xff] %v3886_v62  ;;  %v3898_v22 = vmax.f32 %v18125_v59, 0.0  ;;  %v18126_v49 = vld [vmem:[#allocation12_spill] sm:$0xff]  ;;  %v3900_v35 = vmax.f32 %v13607_v28, 0.0  ;;  %v9566_v28 = vpack.c.bf16 %v4161_v33, %v4160_v63 }
 0x492   :  { %3951 = vst [vmem:[#allocation2 + $0x291] sm:$0xff] %v3887_v14  ;;  %3952 = vst [vmem:[#allocation2 + $0x2a1] sm:$0xff] %v3888_v57  ;;  %v3899_v50 = vmax.f32 %v18126_v49, 0.0  ;;  %v18127_v62 = vmax.f32 %v13367_v45, 0.0  ;;  %v4338_v14 = vld [vmem:[#allocation2 + $0x4a] sm:$0xff]  ;;  %v4197_v57 = vld [vmem:[%s17513_s2 + $0x138] sm:$0xff] }
 0x493   :  { %3953 = vst [vmem:[#allocation2 + $0x2a9] sm:$0xff] %v3889_v58  ;;  %3954 = vst [vmem:[#allocation2 + $0x2b9] sm:$0xff] %v3890_v56  ;;  %8896 = vmatprep.mubr.f32.mxu1 %v4338_v14  ;;  %v13773_v58 = vld [vmem:[#allocation2 + $0x30] sm:$0xff]  ;;  %9567 = vmatpush1.bf16.msra.mxu1 %v9566_v28  ;;  %v4340_v46 = vld [vmem:[#allocation2 + $0x62] sm:$0xff] }
 0x494   :  { %3955 = vst [vmem:[#allocation2 + $0x2c1] sm:$0xff] %v3891_v53  ;;  %3956 = vst [vmem:[#allocation2 + $0x2d1] sm:$0xff] %v3892_v34  ;;  %4521 = vmatprep.mubr.f32.mxu0 %v18127_v62  ;;  %v18128_v45 = vld [vmem:[#allocation41_spill] sm:$0xff]  ;;  %v9569_v53 = vpack.c.bf16 %v4163_v31, %v4162_v38  ;;  %v9622_v34 = vpack.c.bf16 %v4197_v57, %v4196_v44  ;;  %v4165_v33 = vld [vmem:[%s17513_s2 + $0x38] sm:$0xff]  ;;  %9568 = vmatprep.subr.bf16.mxu1 %v18123_v52  ;;  %v18130_v31 = vmax.f32 %v13375_v42, 0.0 }
 0x495   :  { %3957 = vst [vmem:[#allocation2 + $0x2d9] sm:$0xff] %v3893_v43  ;;  %3958 = vst [vmem:[#allocation2 + $0x2e9] sm:$0xff] %v3894_v15  ;;  %9619 = vmatprep.subr.bf16.mxu0 %v18128_v45  ;;  %4522 = vmatmul.mubr.f32.gmra.mrb[4].mxu0 %v13773_v58  ;;  %v4339_v56 = vld [vmem:[#allocation2 + $0x52] sm:$0xff]  ;;  %v18129_v43 = vmax.f32 %v18091_v18, 0.0  ;;  %v4341_v18 = vld [vmem:[#allocation2 + $0x6a] sm:$0xff]  ;;  %v18131_v44 = vmax.f32 %v13379_v2, 0.0 }
 0x496   :  { %3959 = vst [vmem:[#allocation2 + $0x2f1] sm:$0xff] %v3895_v10  ;;  %3960 = vst [vmem:[#allocation2 + $0x301] sm:$0xff] %v3896_v20  ;;  %8897 = vmatmul.mubr.f32.gmra.mrb[68].mxu1 %v4339_v56  ;;  %v4164_v63 = vld [vmem:[%s17513_s2 + $0x30] sm:$0xff]  ;;  %9621 = vmatpush3.bf16.msra.mxu0 %v18128_v45  ;;  %v13786_v15 = vld [vmem:[#allocation2 + $0x38] sm:$0xff]  ;;  %v18133_v45 = vmax.f32 %v13387_v30, 0.0 }
 0x497   :  { %3961 = vst [vmem:[#allocation2 + $0x309] sm:$0xff] %v3897_v26  ;;  %3962 = vst [vmem:[#allocation2 + $0x319] sm:$0xff] %v3898_v22  ;;  %4526 = vmatprep.mubr.f32.mxu0 %v18129_v43  ;;  %8899 = vmatprep.mubr.f32.mxu1 %v4340_v46  ;;  %v9572_v38 = vpack.c.bf16 %v4165_v33, %v4164_v63  ;;  %v4342_v61 = vld [vmem:[#allocation2 + $0x7a] sm:$0xff]  ;;  %v4167_v37 = vld [vmem:[%s17513_s2 + $0x48] sm:$0xff]  ;;  %v18134_v63 = vmax.f32 %v13391_v39, 0.0 }
 0x498   :  { %3963 = vst [vmem:[#allocation2 + $0x321] sm:$0xff] %v3899_v50  ;;  %3964 = vst [vmem:[#allocation2 + $0x331] sm:$0xff] %v3900_v35  ;;  %9623 = vmatprep.subr.bf16.mxu0 %v9622_v34  ;;  %9570 = vmatpush1.bf16.msra.mxu1 %v9569_v53  ;;  %v4166_v10 = vld [vmem:[%s17513_s2 + $0x40] sm:$0xff]  ;;  %v13799_v20 = vld [vmem:[#allocation2 + $0x48] sm:$0xff]  ;;  %v18132_v50 = vmax.f32 %v13383_v29, 0.0 }
 0x499   :  { %4527 = vmatmul.mubr.f32.gmra.mrb[6].mxu0 %v13786_v15  ;;  %9571 = vmatprep.subr.bf16.mxu1 %v18123_v52  ;;  %v4343_v1 = vld [vmem:[#allocation2 + $0x82] sm:$0xff]  ;;  %v9575_v42 = vpack.c.bf16 %v4167_v37, %v4166_v10  ;;  %v4344_v24 = vld [vmem:[#allocation2 + $0x92] sm:$0xff]  ;;  %v4345_v49 = vld [vmem:[#allocation2 + $0x9a] sm:$0xff] }
 0x49a   :  { %8900 = vmatmul.mubr.f32.gmra.mrb[70].mxu1 %v4341_v18  ;;  %4531 = vmatprep.mubr.f32.mxu0 %v18130_v31  ;;  %v4168_v26 = vld [vmem:[%s17513_s2 + $0x50] sm:$0xff]  ;;  %v4169_v59 = vld [vmem:[%s17513_s2 + $0x58] sm:$0xff]  ;;  %v4170_v62 = vld [vmem:[%s17513_s2 + $0x60] sm:$0xff] }
 0x49b   :  { %8902 = vmatprep.mubr.f32.mxu1 %v4342_v61  ;;  %9625 = vmatpush3.bf16.msra.mxu0 %v9622_v34  ;;  %v13811_v22 = vld [vmem:[#allocation2 + $0x50] sm:$0xff]  ;;  %v9578_v2 = vpack.c.bf16 %v4169_v59, %v4168_v26  ;;  %v4171_v14 = vld [vmem:[%s17513_s2 + $0x68] sm:$0xff]  ;;  %v13823_v57 = vld [vmem:[#allocation2 + $0x60] sm:$0xff] }
 0x49c   :  { %9573 = vmatpush1.bf16.msra.mxu1 %v9572_v38  ;;  %v4346_v35 = vld [vmem:[#allocation2 + $0xaa] sm:$0xff]  ;;  %v4347_v28 = vld [vmem:[#allocation2 + $0xb2] sm:$0xff]  ;;  %v9581_v29 = vpack.c.bf16 %v4171_v14, %v4170_v62  ;;  %v4348_v56 = vld [vmem:[#allocation2 + $0xc2] sm:$0xff] }
 0x49d   :  { %4532 = vmatmul.mubr.f32.gmra.mrb[8].mxu0 %v13799_v20  ;;  %9574 = vmatprep.subr.bf16.mxu1 %v18123_v52  ;;  %v4172_v53 = vld [vmem:[%s17513_s2 + $0x70] sm:$0xff]  ;;  %v4173_v34 = vld [vmem:[%s17513_s2 + $0x78] sm:$0xff]  ;;  %v13835_v43 = vld [vmem:[#allocation2 + $0x68] sm:$0xff] }
 0x49e   :  { %8903 = vmatmul.mubr.f32.gmra.mrb[72].mxu1 %v4343_v1  ;;  %4536 = vmatprep.mubr.f32.mxu0 %v18131_v44  ;;  %v4349_v46 = vld [vmem:[#allocation2 + $0xca] sm:$0xff]  ;;  %v9584_v30 = vpack.c.bf16 %v4173_v34, %v4172_v53  ;;  %v4350_v33 = vld [vmem:[#allocation2 + $0xda] sm:$0xff]  ;;  %v4351_v61 = vld [vmem:[#allocation2 + $0xe2] sm:$0xff]  ;;  %v18135_v1 = vmax.f32 %v13395_v7, 0.0 }
 0x49f   :  { %8905 = vmatprep.mubr.f32.mxu1 %v4344_v24  ;;  %v4174_v18 = vld [vmem:[%s17513_s2 + $0x80] sm:$0xff]  ;;  %v4175_v38 = vld [vmem:[%s17513_s2 + $0x88] sm:$0xff]  ;;  %v13847_v31 = vld [vmem:[#allocation2 + $0x78] sm:$0xff] }
 0x4a0   :  { %9576 = vmatpush1.bf16.msra.mxu1 %v9575_v42  ;;  %v9587_v39 = vpack.c.bf16 %v4175_v38, %v4174_v18  ;;  %v4176_v10 = vld [vmem:[%s17513_s2 + $0x90] sm:$0xff]  ;;  %v4177_v37 = vld [vmem:[%s17513_s2 + $0x98] sm:$0xff]  ;;  %v4198_v44 = vld [vmem:[%s17513_s2 + $0x140] sm:$0xff]  ;;  %v18138_v18 = vmax.f32 %v13407_v12, 0.0 }
 0x4a1   :  { %4537 = vmatmul.mubr.f32.gmra.mrb[10].mxu0 %v13811_v22  ;;  %9577 = vmatprep.subr.bf16.mxu1 %v18123_v52  ;;  %v4352_v42 = vld [vmem:[#allocation2 + $0xf2] sm:$0xff]  ;;  %v4199_v24 = vld [vmem:[%s17513_s2 + $0x148] sm:$0xff]  ;;  %v13865_v26 = vld [vmem:[#allocation2 + $0x80] sm:$0xff]  ;;  %v9590_v7 = vpack.c.bf16 %v4177_v37, %v4176_v10 }
 0x4a2   :  { %8906 = vmatmul.mubr.f32.gmra.mrb[74].mxu1 %v4345_v49  ;;  %4541 = vmatprep.mubr.f32.mxu0 %v18132_v50  ;;  %v9626_v59 = vpack.c.bf16 %v4199_v24, %v4198_v44  ;;  %v4353_v49 = vld [vmem:[#allocation2 + $0xfa] sm:$0xff]  ;;  %v4354_v50 = vld [vmem:[#allocation2 + $0x10a] sm:$0xff]  ;;  %v4359_v37 = vld [vmem:[#allocation2 + $0x142] sm:$0xff] }
 0x4a3   :  { %8908 = vmatprep.mubr.f32.mxu1 %v4346_v35  ;;  %v4178_v35 = vld [vmem:[%s17513_s2 + $0xa0] sm:$0xff]  ;;  %v4179_v62 = vld [vmem:[%s17513_s2 + $0xa8] sm:$0xff]  ;;  %v13877_v14 = vld [vmem:[#allocation2 + $0x90] sm:$0xff] }
 0x4a4   :  { %9579 = vmatpush1.bf16.msra.mxu1 %v9578_v2  ;;  %v18136_v2 = vmax.f32 %v13399_v32, 0.0  ;;  %9627 = vmatprep.subr.bf16.mxu0 %v9626_v59  ;;  %v9593_v32 = vpack.c.bf16 %v4179_v62, %v4178_v35  ;;  %v4181_v53 = vld [vmem:[%s17513_s2 + $0xb8] sm:$0xff]  ;;  %v4200_v34 = vld [vmem:[%s17513_s2 + $0x150] sm:$0xff]  ;;  %v13907_v10 = vld [vmem:[#allocation2 + $0xa8] sm:$0xff] }
 0x4a5   :  { %4542 = vmatmul.mubr.f32.gmra.mrb[12].mxu0 %v13823_v57  ;;  %9580 = vmatprep.subr.bf16.mxu1 %v18123_v52  ;;  %v4358_v38 = vld [vmem:[#allocation2 + $0x13a] sm:$0xff]  ;;  %v4184_v44 = vld [vmem:[%s17513_s2 + $0xd0] sm:$0xff]  ;;  %v4187_v35 = vld [vmem:[%s17513_s2 + $0xe8] sm:$0xff] }
 0x4a6   :  { %8909 = vmatmul.mubr.f32.gmra.mrb[76].mxu1 %v4347_v28  ;;  %4546 = vmatprep.mubr.f32.mxu0 %v18133_v45  ;;  %v4355_v28 = vld [vmem:[#allocation2 + $0x112] sm:$0xff]  ;;  %v18137_v45 = vmax.f32 %v13403_v6, 0.0  ;;  %v13931_v62 = vld [vmem:[#allocation2 + $0xc0] sm:$0xff] }
 0x4a7   :  { %8911 = vmatprep.mubr.f32.mxu1 %v4348_v56  ;;  %v4356_v56 = vld [vmem:[#allocation2 + $0x122] sm:$0xff]  ;;  %9629 = vmatpush3.bf16.msra.mxu0 %v9626_v59  ;;  %v4185_v24 = vld [vmem:[%s17513_s2 + $0xd8] sm:$0xff]  ;;  %v13919_v59 = vld [vmem:[#allocation2 + $0xb0] sm:$0xff] }
 0x4a8   :  { %9582 = vmatpush1.bf16.msra.mxu1 %v9581_v29  ;;  %v4180_v29 = vld [vmem:[%s17513_s2 + $0xb0] sm:$0xff] }
 0x4a9   :  { %4547 = vmatmul.mubr.f32.gmra.mrb[14].mxu0 %v13835_v43  ;;  %9583 = vmatprep.subr.bf16.mxu1 %v18123_v52 }
 0x4aa   :  { %8912 = vmatmul.mubr.f32.gmra.mrb[78].mxu1 %v4349_v46  ;;  %4551 = vmatprep.mubr.f32.mxu0 %v18134_v63  ;;  %v4201_v46 = vld [vmem:[%s17513_s2 + $0x158] sm:$0xff]  ;;  %v4357_v63 = vld [vmem:[#allocation2 + $0x12a] sm:$0xff] }
 0x4ab   :  { %8914 = vmatprep.mubr.f32.mxu1 %v4350_v33  ;;  %v9630_v6 = vpack.c.bf16 %v4201_v46, %v4200_v34  ;;  %v9596_v33 = vpack.c.bf16 %v4181_v53, %v4180_v29  ;;  %v4364_v29 = vld [vmem:[#allocation2 + $0x182] sm:$0xff]  ;;  %v4365_v34 = vld [vmem:[#allocation2 + $0x18a] sm:$0xff]  ;;  %v18142_v46 = vmax.f32 %v13423_v11, 0.0 }
 0x4ac   :  { %9585 = vmatpush1.bf16.msra.mxu1 %v9584_v30  ;;  %v13895_v30 = vld [vmem:[#allocation2 + $0x98] sm:$0xff]  ;;  %v13943_v53 = vld [vmem:[#allocation2 + $0xc8] sm:$0xff]  ;;  %v4202_v11 = vld [vmem:[%s17513_s2 + $0x160] sm:$0xff] }
 0x4ad   :  { %4552 = vmatmul.mubr.f32.gmra.mrb[16].mxu0 %v13847_v31  ;;  %9586 = vmatprep.subr.bf16.mxu1 %v18123_v52 }
 0x4ae   :  { %8915 = vmatmul.mubr.f32.gmra.mrb[80].mxu1 %v4351_v61  ;;  %4556 = vmatprep.mubr.f32.mxu0 %v18135_v1  ;;  %v4182_v61 = vld [vmem:[%s17513_s2 + $0xc0] sm:$0xff]  ;;  %v18139_v1 = vmax.f32 %v13411_v16, 0.0  ;;  %v9602_v16 = vpack.c.bf16 %v4185_v24, %v4184_v44  ;;  %v18145_v24 = vmax.f32 %v13435_v13, 0.0  ;;  %v18147_v13 = vmax.f32 %v13443_v25, 0.0 }
 0x4af   :  { %8917 = vmatprep.mubr.f32.mxu1 %v4352_v42  ;;  %9631 = vmatprep.subr.bf16.mxu0 %v9630_v6  ;;  %v4360_v42 = vld [vmem:[#allocation2 + $0x152] sm:$0xff]  ;;  %v4371_v44 = vld [vmem:[#allocation2 + $0x202] sm:$0xff]  ;;  %v18149_v25 = vmax.f32 %v13451_v19, 0.0  ;;  %v18151_v19 = vmax.f32 %v13459_v3, 0.0  ;;  %v18152_v3 = vmax.f32 %v13463_v17, 0.0  ;;  %v4389_v17 = vld [vmem:[#allocation2 + $0x2da] sm:$0xff] }
 0x4b0   :  { %9588 = vmatpush1.bf16.msra.mxu1 %v9587_v39  ;;  %v4183_v39 = vld [vmem:[%s17513_s2 + $0xc8] sm:$0xff]  ;;  %9633 = vmatpush3.bf16.msra.mxu0 %v9630_v6 }
 0x4b1   :  { %4557 = vmatmul.mubr.f32.gmra.mrb[18].mxu0 %v13865_v26  ;;  %9589 = vmatprep.subr.bf16.mxu1 %v18123_v52  ;;  %v9599_v12 = vpack.c.bf16 %v4183_v39, %v4182_v61  ;;  %v4366_v6 = vld [vmem:[#allocation2 + $0x1ca] sm:$0xff] }
 0x4b2   :  { %8918 = vmatmul.mubr.f32.gmra.mrb[82].mxu1 %v4353_v49  ;;  %4561 = vmatprep.mubr.f32.mxu0 %v18136_v2  ;;  %v4361_v49 = vld [vmem:[#allocation2 + $0x15a] sm:$0xff]  ;;  %v4362_v2 = vld [vmem:[#allocation2 + $0x16a] sm:$0xff] }
 0x4b3   :  { %8920 = vmatprep.mubr.f32.mxu1 %v4354_v50  ;;  %v4186_v50 = vld [vmem:[%s17513_s2 + $0xe0] sm:$0xff]  ;;  %v4203_v61 = vld [vmem:[%s17513_s2 + $0x168] sm:$0xff] }
 0x4b4   :  { %9591 = vmatpush1.bf16.msra.mxu1 %v9590_v7  ;;  %v18140_v7 = vmax.f32 %v13415_v48, 0.0  ;;  %v9605_v48 = vpack.c.bf16 %v4187_v35, %v4186_v50  ;;  %v9634_v39 = vpack.c.bf16 %v4203_v61, %v4202_v11  ;;  %v13975_v50 = vld [vmem:[#allocation2 + $0x108] sm:$0xff]  ;;  %v4375_v35 = vld [vmem:[#allocation2 + $0x232] sm:$0xff] }
 0x4b5   :  { %4562 = vmatmul.mubr.f32.gmra.mrb[20].mxu0 %v13877_v14  ;;  %9592 = vmatprep.subr.bf16.mxu1 %v18123_v52  ;;  %v4204_v11 = vld [vmem:[%s17513_s2 + $0x170] sm:$0xff] }
 0x4b6   :  { %8921 = vmatmul.mubr.f32.gmra.mrb[84].mxu1 %v4355_v28  ;;  %4566 = vmatprep.mubr.f32.mxu0 %v18137_v45  ;;  %v4363_v28 = vld [vmem:[#allocation2 + $0x172] sm:$0xff] }
 0x4b7   :  { %8923 = vmatprep.mubr.f32.mxu1 %v4356_v56  ;;  %v4188_v45 = vld [vmem:[%s17513_s2 + $0xf0] sm:$0xff]  ;;  %v4189_v56 = vld [vmem:[%s17513_s2 + $0xf8] sm:$0xff]  ;;  %9635 = vmatprep.subr.bf16.mxu0 %v9634_v39 }
 0x4b8   :  { %9594 = vmatpush1.bf16.msra.mxu1 %v9593_v32  ;;  %v18141_v32 = vmax.f32 %v13419_v47, 0.0  ;;  %v9608_v47 = vpack.c.bf16 %v4189_v56, %v4188_v45  ;;  %9637 = vmatpush3.bf16.msra.mxu0 %v9634_v39  ;;  %v13985_v45 = vld [vmem:[#allocation2 + $0x120] sm:$0xff] }
 0x4b9   :  { %4567 = vmatmul.mubr.f32.gmra.mrb[22].mxu0 %v13895_v30  ;;  %9595 = vmatprep.subr.bf16.mxu1 %v18123_v52  ;;  %v4379_v56 = vld [vmem:[#allocation2 + $0x262] sm:$0xff] }
 0x4ba   :  { %8924 = vmatmul.mubr.f32.gmra.mrb[86].mxu1 %v4357_v63  ;;  %4571 = vmatprep.mubr.f32.mxu0 %v18138_v18  ;;  %v13949_v63 = vld [vmem:[#allocation2 + $0xd8] sm:$0xff]  ;;  %v18143_v18 = vmax.f32 %v13427_v21, 0.0  ;;  %v18144_v21 = vmax.f32 %v13431_v55, 0.0  ;;  %v14006_v39 = vld [vmem:[#allocation2 + $0x140] sm:$0xff] }
 0x4bb   :  { %8926 = vmatprep.mubr.f32.mxu1 %v4358_v38  ;;  %v4368_v38 = vld [vmem:[#allocation2 + $0x1e2] sm:$0xff]  ;;  %v4373_v55 = vld [vmem:[#allocation2 + $0x21a] sm:$0xff] }
 0x4bc   :  { %9597 = vmatpush1.bf16.msra.mxu1 %v9596_v33  ;;  %v4367_v33 = vld [vmem:[#allocation2 + $0x1d2] sm:$0xff] }
 0x4bd   :  { %4572 = vmatmul.mubr.f32.gmra.mrb[24].mxu0 %v13907_v10  ;;  %9598 = vmatprep.subr.bf16.mxu1 %v18123_v52 }
 0x4be   :  { %8927 = vmatmul.mubr.f32.gmra.mrb[88].mxu1 %v4359_v37  ;;  %4576 = vmatprep.mubr.f32.mxu0 %v18139_v1  ;;  %v13960_v37 = vld [vmem:[#allocation2 + $0xe0] sm:$0xff] }
 0x4bf   :  { %8929 = vmatprep.mubr.f32.mxu1 %v4360_v42  ;;  %v4370_v1 = vld [vmem:[#allocation2 + $0x1fa] sm:$0xff]  ;;  %v13965_v42 = vld [vmem:[#allocation2 + $0xf0] sm:$0xff] }
 0x4c0   :  { %9600 = vmatpush1.bf16.msra.mxu1 %v9599_v12  ;;  %v4369_v12 = vld [vmem:[#allocation2 + $0x1ea] sm:$0xff] }
 0x4c1   :  { %4577 = vmatmul.mubr.f32.gmra.mrb[26].mxu0 %v13919_v59  ;;  %9601 = vmatprep.subr.bf16.mxu1 %v18123_v52 }
 0x4c2   :  { %8930 = vmatmul.mubr.f32.gmra.mrb[90].mxu1 %v4361_v49  ;;  %4581 = vmatprep.mubr.f32.mxu0 %v18140_v7  ;;  %v4372_v49 = vld [vmem:[#allocation2 + $0x212] sm:$0xff]  ;;  %v18146_v7 = vmax.f32 %v13439_v9, 0.0  ;;  %v18148_v9 = vmax.f32 %v13447_v54, 0.0  ;;  %v18150_v54 = vmax.f32 %v13455_v4, 0.0 }
 0x4c3   :  { %8932 = vmatprep.mubr.f32.mxu1 %v4362_v2  ;;  %v4374_v2 = vld [vmem:[#allocation2 + $0x22a] sm:$0xff]  ;;  %v4205_v4 = vld [vmem:[%s17513_s2 + $0x178] sm:$0xff] }
 0x4c4   :  { %9603 = vmatpush1.bf16.msra.mxu1 %v9602_v16  ;;  %v13970_v16 = vld [vmem:[#allocation2 + $0xf8] sm:$0xff]  ;;  %v9638_v61 = vpack.c.bf16 %v4205_v4, %v4204_v11  ;;  %v14050_v11 = vld [vmem:[#allocation2 + $0x1d0] sm:$0xff]  ;;  %v14053_v4 = vld [vmem:[#allocation2 + $0x1e1] sm:$0xff] }
 0x4c5   :  { %4582 = vmatmul.mubr.f32.gmra.mrb[28].mxu0 %v13931_v62  ;;  %9604 = vmatprep.subr.bf16.mxu1 %v18123_v52 }
 0x4c6   :  { %8933 = vmatmul.mubr.f32.gmra.mrb[92].mxu1 %v4363_v28  ;;  %4586 = vmatprep.mubr.f32.mxu0 %v18141_v32  ;;  %v4376_v28 = vld [vmem:[#allocation2 + $0x242] sm:$0xff]  ;;  %v4377_v32 = vld [vmem:[#allocation2 + $0x24a] sm:$0xff] }
 0x4c7   :  { %8935 = vmatprep.mubr.f32.mxu1 %v4364_v29  ;;  %v4378_v29 = vld [vmem:[#allocation2 + $0x25a] sm:$0xff]  ;;  %9639 = vmatprep.subr.bf16.mxu0 %v9638_v61 }
 0x4c8   :  { %9606 = vmatpush1.bf16.msra.mxu1 %v9605_v48  ;;  %v13980_v48 = vld [vmem:[#allocation2 + $0x110] sm:$0xff]  ;;  %9641 = vmatpush3.bf16.msra.mxu0 %v9638_v61  ;;  %v4032_v61 = vld [vmem:[#allocation2 + $0x19] sm:$0xff] }
 0x4c9   :  { %4587 = vmatmul.mubr.f32.gmra.mrb[30].mxu0 %v13943_v53  ;;  %9607 = vmatprep.subr.bf16.mxu1 %v18123_v52 }
 0x4ca   :  { %8936 = vmatmul.mubr.f32.gmra.mrb[94].mxu1 %v4365_v34  ;;  %4591 = vmatprep.mubr.f32.mxu0 %v18142_v46  ;;  %v4380_v34 = vld [vmem:[#allocation2 + $0x272] sm:$0xff]  ;;  %v4381_v46 = vld [vmem:[#allocation2 + $0x27a] sm:$0xff] }
 0x4cb   :  { %8938 = vmatprep.mubr.f32.mxu1 %v4366_v6  ;;  %v4382_v6 = vld [vmem:[#allocation2 + $0x28a] sm:$0xff]  ;;  %9642 = vmatprep.subr.bf16.mxu0 %v18123_v52 }
 0x4cc   :  { %9609 = vmatpush1.bf16.msra.mxu1 %v9608_v47  ;;  %v13990_v47 = vld [vmem:[#allocation2 + $0x128] sm:$0xff] }
 0x4cd   :  { %4592 = vmatmul.mubr.f32.gmra.mrb[32].mxu0 %v13949_v63 }
 0x4ce   :  { %8939 = vmatmul.mubr.f32.gmra.mrb[96].mxu1 %v4367_v33  ;;  %4596 = vmatprep.mubr.f32.mxu0 %v18143_v18  ;;  %v13995_v33 = vld [vmem:[#allocation2 + $0x138] sm:$0xff] }
 0x4cf   :  { %8941 = vmatprep.mubr.f32.mxu1 %v4368_v38  ;;  %v4383_v18 = vld [vmem:[#allocation2 + $0x292] sm:$0xff]  ;;  %v4384_v38 = vld [vmem:[#allocation2 + $0x2a2] sm:$0xff] }
 0x4d1   :  { %4597 = vmatmul.mubr.f32.gmra.mrb[34].mxu0 %v13960_v37 }
 0x4d2   :  { %8942 = vmatmul.mubr.f32.gmra.mrb[98].mxu1 %v4369_v12  ;;  %4601 = vmatprep.mubr.f32.mxu0 %v18144_v21  ;;  %v4385_v12 = vld [vmem:[#allocation2 + $0x2aa] sm:$0xff]  ;;  %v4386_v21 = vld [vmem:[#allocation2 + $0x2ba] sm:$0xff] }
 0x4d3   :  { %8944 = vmatprep.mubr.f32.mxu1 %v4370_v1  ;;  %v14011_v1 = vld [vmem:[#allocation2 + $0x150] sm:$0xff] }
 0x4d5   :  { %4602 = vmatmul.mubr.f32.gmra.mrb[36].mxu0 %v13965_v42 }
 0x4d6   :  { %8945 = vmatmul.mubr.f32.gmra.mrb[100].mxu1 %v4371_v44  ;;  %4606 = vmatprep.mubr.f32.mxu0 %v18145_v24  ;;  %v4387_v44 = vld [vmem:[#allocation2 + $0x2c2] sm:$0xff]  ;;  %v18153_v24 = vmax.f32 %v13467_v41, 0.0  ;;  %v18155_v41 = vmax.f32 %v18099_v60, 0.0  ;;  %v4396_v60 = vld [vmem:[#allocation2 + $0x332] sm:$0xff] }
 0x4d7   :  { %8947 = vmatprep.mubr.f32.mxu1 %v4372_v49  ;;  %v4388_v49 = vld [vmem:[#allocation2 + $0x2d2] sm:$0xff] }
 0x4d9   :  { %4607 = vmatmul.mubr.f32.gmra.mrb[38].mxu0 %v13970_v16 }
 0x4da   :  { %8948 = vmatmul.mubr.f32.gmra.mrb[102].mxu1 %v4373_v55  ;;  %4611 = vmatprep.mubr.f32.mxu0 %v18146_v7  ;;  %v14017_v55 = vld [vmem:[#allocation2 + $0x158] sm:$0xff]  ;;  %v18154_v7 = vmax.f32 %v13471_v0, 0.0  ;;  %v18156_v0 = vmax.f32 %v18100_v23, 0.0  ;;  %v7976_v23 = vld [vmem:[%s17513_s2 + $0x400] sm:$0xff] }
 0x4db   :  { %8950 = vmatprep.mubr.f32.mxu1 %v4374_v2  ;;  %v4390_v2 = vld [vmem:[#allocation2 + $0x2ea] sm:$0xff] }
 0x4dd   :  { %4612 = vmatmul.mubr.f32.gmra.mrb[40].mxu0 %v13975_v50 }
 0x4de   :  { %8951 = vmatmul.mubr.f32.gmra.mrb[104].mxu1 %v4375_v35  ;;  %4616 = vmatprep.mubr.f32.mxu0 %v18147_v13  ;;  %v14022_v35 = vld [vmem:[#allocation2 + $0x168] sm:$0xff]  ;;  %v4391_v13 = vld [vmem:[#allocation2 + $0x2f2] sm:$0xff] }
 0x4df   :  { %8953 = vmatprep.mubr.f32.mxu1 %v4376_v28  ;;  %v4392_v28 = vld [vmem:[#allocation2 + $0x302] sm:$0xff] }
 0x4e1   :  { %4617 = vmatmul.mubr.f32.gmra.mrb[42].mxu0 %v13980_v48 }
 0x4e2   :  { %8954 = vmatmul.mubr.f32.gmra.mrb[106].mxu1 %v4377_v32  ;;  %4621 = vmatprep.mubr.f32.mxu0 %v18148_v9  ;;  %v14027_v32 = vld [vmem:[#allocation2 + $0x170] sm:$0xff] }
 0x4e3   :  { %8956 = vmatprep.mubr.f32.mxu1 %v4378_v29  ;;  %v4393_v9 = vld [vmem:[#allocation2 + $0x30a] sm:$0xff]  ;;  %v4394_v29 = vld [vmem:[#allocation2 + $0x31a] sm:$0xff] }
 0x4e5   :  { %4622 = vmatmul.mubr.f32.gmra.mrb[44].mxu0 %v13985_v45 }
 0x4e6   :  { %8957 = vmatmul.mubr.f32.gmra.mrb[108].mxu1 %v4379_v56  ;;  %4626 = vmatprep.mubr.f32.mxu0 %v18149_v25  ;;  %v4236_v56 = vld [vmem:[#allocation2 + $0x180] sm:$0xff] }
 0x4e7   :  { %8959 = vmatprep.mubr.f32.mxu1 %v4380_v34  ;;  %v4395_v25 = vld [vmem:[#allocation2 + $0x322] sm:$0xff] }
 0x4e8   :  { %v4237_v34 = vld [vmem:[#allocation2 + $0x188] sm:$0xff] }
 0x4e9   :  { %4627 = vmatmul.mubr.f32.gmra.mrb[46].mxu0 %v13990_v47 }
 0x4ea   :  { %8960 = vmatmul.mubr.f32.gmra.mrb[110].mxu1 %v4381_v46  ;;  %4631 = vmatprep.mubr.f32.mxu0 %v18150_v54  ;;  %v4030_v46 = vld [vmem:[#allocation2 + $0x1] sm:$0xff] }
 0x4eb   :  { %8962 = vmatprep.mubr.f32.mxu1 %v4382_v6  ;;  %v4397_v54 = vld [vmem:[#allocation2 + $0x33a] sm:$0xff]  ;;  %v18157_v6 = vmax.f32 %v13487_v8, 0.0  ;;  %v18158_v8 = vmax.f32 %v13491_v40, 0.0  ;;  %v14060_v40 = vld [vmem:[#allocation2 + $0x1e9] sm:$0xff] }
 0x4ed   :  { %4632 = vmatmul.mubr.f32.gmra.mrb[48].mxu0 %v13995_v33 }
 0x4ee   :  { %8963 = vmatmul.mubr.f32.gmra.mrb[112].mxu1 %v4383_v18  ;;  %4636 = vmatprep.mubr.f32.mxu0 %v18151_v19  ;;  %v7977_v18 = vld [vmem:[%s17513_s2 + $0x408] sm:$0xff] }
 0x4ef   :  { %8965 = vmatprep.mubr.f32.mxu1 %v4384_v38  ;;  %v9690_v5 = vpack.c.bf16 %v7977_v18, %v7976_v23  ;;  %v4031_v19 = vld [vmem:[#allocation2 + $0x9] sm:$0xff]  ;;  %v14045_v38 = vld [vmem:[#allocation2] sm:$0xff]  ;;  %v4042_v18 = vld [vmem:[#allocation2 + $0x91] sm:$0xff] }
 0x4f0   :  { %v14126_v23 = vld [vmem:[#allocation2 + $0x248] sm:$0xff] }
 0x4f1   :  { %4637 = vmatmul.mubr.f32.gmra.mrb[50].mxu0 %v14006_v39  ;;  %9691 = vmatprep.subr.bf16.mxu1 %v9690_v5 }
 0x4f2   :  { %8966 = vmatmul.mubr.f32.gmra.mrb[114].mxu1 %v4385_v12  ;;  %4641 = vmatprep.mubr.f32.mxu0 %v18152_v3  ;;  %v14057_v12 = vld [vmem:[#allocation2 + $0x1e0] sm:$0xff] }
 0x4f3   :  { %8968 = vmatprep.mubr.f32.mxu1 %v4386_v21  ;;  %v4033_v3 = vld [vmem:[#allocation2 + $0x21] sm:$0xff] }
 0x4f4   :  { %v14064_v21 = vld [vmem:[#allocation2 + $0x1e8] sm:$0xff] }
 0x4f5   :  { %4642 = vmatmul.mubr.f32.gmra.mrb[52].mxu0 %v14011_v1 }
 0x4f6   :  { %8969 = vmatmul.mubr.f32.gmra.mrb[116].mxu1 %v4387_v44  ;;  %4646 = vmatprep.mubr.f32.mxu0 %v18153_v24  ;;  %v14067_v44 = vld [vmem:[#allocation2 + $0x1f9] sm:$0xff]  ;;  %v4034_v24 = vld [vmem:[#allocation2 + $0x31] sm:$0xff] }
 0x4f7   :  { %8971 = vmatprep.mubr.f32.mxu1 %v4388_v49  ;;  %v14071_v49 = vld [vmem:[#allocation2 + $0x1f8] sm:$0xff] }
 0x4f9   :  { %4647 = vmatmul.mubr.f32.gmra.mrb[54].mxu0 %v14017_v55 }
 0x4fa   :  { %8972 = vmatmul.mubr.f32.gmra.mrb[118].mxu1 %v4389_v17  ;;  %4651 = vmatprep.mubr.f32.mxu0 %v18154_v7  ;;  %v4035_v17 = vld [vmem:[#allocation2 + $0x39] sm:$0xff] }
 0x4fb   :  { %8974 = vmatprep.mubr.f32.mxu1 %v4390_v2  ;;  %v14078_v7 = vld [vmem:[#allocation2 + $0x200] sm:$0xff]  ;;  %v4036_v2 = vld [vmem:[#allocation2 + $0x49] sm:$0xff] }
 0x4fd   :  { %4652 = vmatmul.mubr.f32.gmra.mrb[56].mxu0 %v14022_v35 }
 0x4fe   :  { %8975 = vmatmul.mubr.f32.gmra.mrb[120].mxu1 %v4391_v13  ;;  %4656 = vmatprep.mubr.f32.mxu0 %v18155_v41  ;;  %v14085_v13 = vld [vmem:[#allocation2 + $0x210] sm:$0xff] }
 0x4ff   :  { %8977 = vmatprep.mubr.f32.mxu1 %v4392_v28  ;;  %v4037_v41 = vld [vmem:[#allocation2 + $0x51] sm:$0xff] }
 0x500   :  { %v14092_v28 = vld [vmem:[#allocation2 + $0x218] sm:$0xff] }
 0x501   :  { %4657 = vmatmul.mubr.f32.gmra.mrb[58].mxu0 %v14027_v32 }
 0x502   :  { %8978 = vmatmul.mubr.f32.gmra.mrb[122].mxu1 %v4393_v9  ;;  %4661 = vmatprep.mubr.f32.mxu0 %v18156_v0  ;;  %v4038_v9 = vld [vmem:[#allocation2 + $0x61] sm:$0xff]  ;;  %v7979_v0 = vld [vmem:[%s17513_s2 + $0x418] sm:$0xff] }
 0x503   :  { %8980 = vmatprep.mubr.f32.mxu1 %v4394_v29  ;;  %v14105_v29 = vld [vmem:[#allocation2 + $0x228] sm:$0xff] }
 0x505   :  { %4662 = vmatmul.mubr.f32.gmra.mrb[60].mxu0 %v4236_v56 }
 0x506   :  { %8981 = vmatmul.mubr.f32.gmra.mrb[124].mxu1 %v4395_v25  ;;  %4666 = vmatprep.mubr.f32.mxu0 %v3869_v27  ;;  %v14042_v27 = vld [vmem:[#allocation2 + $0x1c8] sm:$0xff]  ;;  %v14108_v25 = vld [vmem:[#allocation2 + $0x231] sm:$0xff] }
 0x507   :  { %8983 = vmatprep.mubr.f32.mxu1 %v4396_v60  ;;  %v14112_v60 = vld [vmem:[#allocation2 + $0x230] sm:$0xff] }
 0x509   :  { %4667 = vmatmul.mubr.f32.gmra.mrb[62].mxu0 %v4237_v34  ;;  %v14115_v34 = vld [vmem:[#allocation2 + $0x241] sm:$0xff] }
 0x50a   :  { %8984 = vmatmul.mubr.f32.gmra.mrb[126].mxu1 %v4397_v54  ;;  %4671 = vmatprep.mubr.f32.mxu0 %v18157_v6  ;;  %v14119_v54 = vld [vmem:[#allocation2 + $0x240] sm:$0xff] }
 0x50b   :  { %5281 = vmatprep.mubr.f32.mxu1 %v4030_v46  ;;  %v4040_v46 = vld [vmem:[#allocation2 + $0x79] sm:$0xff]  ;;  %v4041_v6 = vld [vmem:[#allocation2 + $0x81] sm:$0xff] }
 0x50d   :  { %4672 = vmatmul.mubr.f32.gmra.mrb[64].mxu0 %v14042_v27 }
 0x50e   :  { %5282 = vmatmul.mubr.f32.vlgmr.msra.gmra.mrb[128].mxu1 %v14045_v38  ;;  %4676 = vmatprep.mubr.f32.mxu0 %v18158_v8  ;;  %v14140_v8 = vld [vmem:[#allocation2 + $0x260] sm:$0xff] }
 0x50f   :  { %5286 = vmatprep.mubr.f32.mxu1 %v4031_v19  ;;  %9693 = vmatpush3.bf16.msra.mxu1 %v9690_v5  ;;  %v14133_v5 = vld [vmem:[#allocation2 + $0x258] sm:$0xff] }
 0x510   :  { %v4043_v19 = vld [vmem:[#allocation2 + $0x99] sm:$0xff] }
 0x511   :  { %4677 = vmatmul.mubr.f32.gmra.mrb[66].mxu0 %v14050_v11 }
 0x512   :  { %5287 = vmatmul.mubr.f32.gmra.mrb[130].mxu1 %v14045_v38  ;;  %4681 = vmatprep.mubr.f32.mxu0 %v14053_v4 }
 0x513   :  { %5291 = vmatprep.mubr.f32.mxu1 %v4032_v61  ;;  %v4044_v61 = vld [vmem:[#allocation2 + $0xa9] sm:$0xff] }
 0x515   :  { %4682 = vmatmul.mubr.f32.gmra.mrb[68].mxu0 %v14057_v12 }
 0x516   :  { %5292 = vmatmul.mubr.f32.gmra.mrb[132].mxu1 %v13708_v51  ;;  %4686 = vmatprep.mubr.f32.mxu0 %v14060_v40  ;;  %v14074_v51 = vld [vmem:[#allocation2 + $0x201] sm:$0xff] }
 0x517   :  { %5296 = vmatprep.mubr.f32.mxu1 %v4033_v3  ;;  %v14147_v3 = vld [vmem:[#allocation2 + $0x270] sm:$0xff] }
 0x519   :  { %4687 = vmatmul.mubr.f32.gmra.mrb[70].mxu0 %v14064_v21 }
 0x51a   :  { %5297 = vmatmul.mubr.f32.gmra.mrb[134].mxu1 %v13742_v36  ;;  %4691 = vmatprep.mubr.f32.mxu0 %v14067_v44  ;;  %v14081_v36 = vld [vmem:[#allocation2 + $0x211] sm:$0xff] }
 0x51b   :  { %5301 = vmatprep.mubr.f32.mxu1 %v4034_v24  ;;  %v4045_v24 = vld [vmem:[#allocation2 + $0xb1] sm:$0xff] }
 0x51d   :  { %4692 = vmatmul.mubr.f32.gmra.mrb[72].mxu0 %v14071_v49 }
 0x51e   :  { %5302 = vmatmul.mubr.f32.gmra.mrb[136].mxu1 %v13773_v58  ;;  %4696 = vmatprep.mubr.f32.mxu0 %v14074_v51  ;;  %v14088_v58 = vld [vmem:[#allocation2 + $0x219] sm:$0xff] }
 0x51f   :  { %5306 = vmatprep.mubr.f32.mxu1 %v4035_v17  ;;  %v14154_v17 = vld [vmem:[#allocation2 + $0x278] sm:$0xff] }
 0x521   :  { %4697 = vmatmul.mubr.f32.gmra.mrb[74].mxu0 %v14078_v7 }
 0x522   :  { %5307 = vmatmul.mubr.f32.gmra.mrb[138].mxu1 %v13786_v15  ;;  %4701 = vmatprep.mubr.f32.mxu0 %v14081_v36  ;;  %v14095_v15 = vld [vmem:[#allocation2 + $0x229] sm:$0xff] }
 0x523   :  { %5311 = vmatprep.mubr.f32.mxu1 %v4036_v2  ;;  %v4046_v2 = vld [vmem:[#allocation2 + $0xc1] sm:$0xff] }
 0x525   :  { %4702 = vmatmul.mubr.f32.gmra.mrb[76].mxu0 %v14085_v13 }
 0x526   :  { %5312 = vmatmul.mubr.f32.gmra.mrb[140].mxu1 %v13799_v20  ;;  %4706 = vmatprep.mubr.f32.mxu0 %v14088_v58  ;;  %v7978_v20 = vld [vmem:[%s17513_s2 + $0x410] sm:$0xff] }
 0x527   :  { %5316 = vmatprep.mubr.f32.mxu1 %v4037_v41  ;;  %v9694_v56 = vpack.c.bf16 %v7979_v0, %v7978_v20  ;;  %v7981_v41 = vld [vmem:[%s17513_s2 + $0x428] sm:$0xff]  ;;  %v14170_v0 = vld [vmem:[#allocation2 + $0x291] sm:$0xff] }
 0x529   :  { %4707 = vmatmul.mubr.f32.gmra.mrb[78].mxu0 %v14092_v28  ;;  %9695 = vmatprep.subr.bf16.mxu1 %v9694_v56 }
 0x52a   :  { %5317 = vmatmul.mubr.f32.gmra.mrb[142].mxu1 %v13811_v22  ;;  %4711 = vmatprep.mubr.f32.mxu0 %v14095_v15  ;;  %v4039_v22 = vld [vmem:[#allocation2 + $0x69] sm:$0xff] }
 0x52b   :  { %5321 = vmatprep.mubr.f32.mxu1 %v4038_v9  ;;  %9697 = vmatpush3.bf16.msra.mxu1 %v9694_v56  ;;  %v14167_v9 = vld [vmem:[#allocation2 + $0x288] sm:$0xff]  ;;  %v14174_v56 = vld [vmem:[#allocation2 + $0x290] sm:$0xff] }
 0x52d   :  { %4712 = vmatmul.mubr.f32.gmra.mrb[80].mxu0 %v14105_v29 }
 0x52e   :  { %5322 = vmatmul.mubr.f32.gmra.mrb[144].mxu1 %v13823_v57  ;;  %4716 = vmatprep.mubr.f32.mxu0 %v14108_v25  ;;  %v14122_v57 = vld [vmem:[#allocation2 + $0x249] sm:$0xff] }
 0x52f   :  { %5326 = vmatprep.mubr.f32.mxu1 %v4039_v22  ;;  %v14177_v22 = vld [vmem:[#allocation2 + $0x2a1] sm:$0xff] }
 0x531   :  { %4717 = vmatmul.mubr.f32.gmra.mrb[82].mxu0 %v14112_v60 }
 0x532   :  { %5327 = vmatmul.mubr.f32.gmra.mrb[146].mxu1 %v13835_v43  ;;  %4721 = vmatprep.mubr.f32.mxu0 %v14115_v34  ;;  %v14129_v43 = vld [vmem:[#allocation2 + $0x259] sm:$0xff] }
 0x533   :  { %5331 = vmatprep.mubr.f32.mxu1 %v4040_v46  ;;  %v4048_v46 = vld [vmem:[#allocation2 + $0xd9] sm:$0xff] }
 0x535   :  { %4722 = vmatmul.mubr.f32.gmra.mrb[84].mxu0 %v14119_v54 }
 0x536   :  { %5332 = vmatmul.mubr.f32.gmra.mrb[148].mxu1 %v13847_v31  ;;  %4726 = vmatprep.mubr.f32.mxu0 %v14122_v57  ;;  %v14136_v31 = vld [vmem:[#allocation2 + $0x261] sm:$0xff] }
 0x537   :  { %5336 = vmatprep.mubr.f32.mxu1 %v4041_v6  ;;  %v14181_v6 = vld [vmem:[#allocation2 + $0x2a0] sm:$0xff] }
 0x538   :  { %18159 = vst [vmem:[#allocation59_spill] sm:$0xff] %v14181_v6 }
 0x539   :  { %4727 = vmatmul.mubr.f32.gmra.mrb[86].mxu0 %v14126_v23 }
 0x53a   :  { %5337 = vmatmul.mubr.f32.gmra.mrb[150].mxu1 %v13865_v26  ;;  %4731 = vmatprep.mubr.f32.mxu0 %v14129_v43  ;;  %v14143_v26 = vld [vmem:[#allocation2 + $0x271] sm:$0xff] }
 0x53b   :  { %5341 = vmatprep.mubr.f32.mxu1 %v4042_v18  ;;  %v4049_v18 = vld [vmem:[#allocation2 + $0xe1] sm:$0xff] }
 0x53d   :  { %4732 = vmatmul.mubr.f32.gmra.mrb[88].mxu0 %v14133_v5 }
 0x53e   :  { %5342 = vmatmul.mubr.f32.gmra.mrb[152].mxu1 %v13877_v14  ;;  %4736 = vmatprep.mubr.f32.mxu0 %v14136_v31  ;;  %v14150_v14 = vld [vmem:[#allocation2 + $0x279] sm:$0xff] }
 0x53f   :  { %5346 = vmatprep.mubr.f32.mxu1 %v4043_v19  ;;  %v14188_v19 = vld [vmem:[#allocation2 + $0x2a8] sm:$0xff] }
 0x540   :  { %18161 = vst [vmem:[#allocation61_spill] sm:$0xff] %v14188_v19 }
 0x541   :  { %4737 = vmatmul.mubr.f32.gmra.mrb[90].mxu0 %v14140_v8 }
 0x542   :  { %5347 = vmatmul.mubr.f32.gmra.mrb[154].mxu1 %v13895_v30  ;;  %4741 = vmatprep.mubr.f32.mxu0 %v14143_v26  ;;  %v14157_v30 = vld [vmem:[#allocation2 + $0x289] sm:$0xff] }
 0x543   :  { %5351 = vmatprep.mubr.f32.mxu1 %v4044_v61  ;;  %v4050_v61 = vld [vmem:[#allocation2 + $0xf1] sm:$0xff] }
 0x545   :  { %4742 = vmatmul.mubr.f32.gmra.mrb[92].mxu0 %v14147_v3 }
 0x546   :  { %5352 = vmatmul.mubr.f32.gmra.mrb[156].mxu1 %v13907_v10  ;;  %4746 = vmatprep.mubr.f32.mxu0 %v14150_v14  ;;  %v7980_v10 = vld [vmem:[%s17513_s2 + $0x420] sm:$0xff] }
 0x547   :  { %5356 = vmatprep.mubr.f32.mxu1 %v4045_v24  ;;  %v9698_v20 = vpack.c.bf16 %v7981_v41, %v7980_v10  ;;  %v14195_v24 = vld [vmem:[#allocation2 + $0x2b8] sm:$0xff]  ;;  %v14202_v41 = vld [vmem:[#allocation2 + $0x2c0] sm:$0xff] }
 0x548   :  { %18163 = vst [vmem:[#allocation63_spill] sm:$0xff] %v14195_v24  ;;  %18165 = vst [vmem:[#allocation64_spill] sm:$0xff] %v14202_v41 }
 0x549   :  { %4747 = vmatmul.mubr.f32.gmra.mrb[94].mxu0 %v14154_v17  ;;  %9699 = vmatprep.subr.bf16.mxu1 %v9698_v20 }
 0x54a   :  { %5357 = vmatmul.mubr.f32.gmra.mrb[158].mxu1 %v13919_v59  ;;  %4751 = vmatprep.mubr.f32.mxu0 %v14157_v30  ;;  %v4047_v59 = vld [vmem:[#allocation2 + $0xc9] sm:$0xff] }
 0x54b   :  { %5361 = vmatprep.mubr.f32.mxu1 %v4046_v2  ;;  %9701 = vmatpush3.bf16.msra.mxu1 %v9698_v20  ;;  %v4051_v2 = vld [vmem:[#allocation2 + $0xf9] sm:$0xff] }
 0x54d   :  { %4752 = vmatmul.mubr.f32.gmra.mrb[96].mxu0 %v14167_v9 }
 0x54e   :  { %5362 = vmatmul.mubr.f32.gmra.mrb[160].mxu1 %v13931_v62  ;;  %4756 = vmatprep.mubr.f32.mxu0 %v14170_v0  ;;  %v14184_v62 = vld [vmem:[#allocation2 + $0x2a9] sm:$0xff] }
 0x54f   :  { %5366 = vmatprep.mubr.f32.mxu1 %v4047_v59  ;;  %18160 = vst [vmem:[#allocation13_spill] sm:$0xff] %v14184_v62  ;;  %v14205_v59 = vld [vmem:[#allocation2 + $0x2d1] sm:$0xff] }
 0x550   :  { %18166 = vst [vmem:[#allocation9_spill] sm:$0xff] %v14205_v59 }
 0x551   :  { %4757 = vmatmul.mubr.f32.gmra.mrb[98].mxu0 %v14174_v56 }
 0x552   :  { %5367 = vmatmul.mubr.f32.gmra.mrb[162].mxu1 %v13943_v53  ;;  %4761 = vmatprep.mubr.f32.mxu0 %v14177_v22  ;;  %v14191_v53 = vld [vmem:[#allocation2 + $0x2b9] sm:$0xff] }
 0x553   :  { %5371 = vmatprep.mubr.f32.mxu1 %v4048_v46  ;;  %18162 = vst [vmem:[#allocation57_spill] sm:$0xff] %v14191_v53 }
 0x555   :  { %4762 = vmatmul.mubr.f32.gmra.mrb[100].mxu0 %v14181_v6  ;;  %v4096_v6 = vld [vmem:[#allocation2 + $0x1a] sm:$0xff] }
 0x556   :  { %5372 = vmatmul.mubr.f32.gmra.mrb[164].mxu1 %v13949_v63  ;;  %4766 = vmatprep.mubr.f32.mxu0 %v14184_v62  ;;  %v14198_v63 = vld [vmem:[#allocation2 + $0x2c1] sm:$0xff] }
 0x557   :  { %5376 = vmatprep.mubr.f32.mxu1 %v4049_v18  ;;  %18164 = vst [vmem:[#allocation7_spill] sm:$0xff] %v14198_v63  ;;  %v4052_v18 = vld [vmem:[#allocation2 + $0x109] sm:$0xff] }
 0x558   :  { %v4513_v10 = vpop.f32.mrb[0].mxu0 }
 0x559   :  { %4767 = vmatmul.mubr.f32.gmra.mrb[102].mxu0 %v14188_v19  ;;  %v4515_v20 = vpop.f32.mrb[1].mxu0  ;;  %v14220_v19 = vld [vmem:[#allocation2 + $0x2e9] sm:$0xff] }
 0x55a   :  { %5377 = vmatmul.mubr.f32.gmra.mrb[166].mxu1 %v13960_v37  ;;  %4771 = vmatprep.mubr.f32.mxu0 %v14191_v53  ;;  %v14214_v20 = vld [vmem:[#allocation2 + $0x2d9] sm:$0xff]  ;;  %18171 = vst [vmem:[#allocation16_spill] sm:$0xff] %v14220_v19 }
 0x55b   :  { %5381 = vmatprep.mubr.f32.mxu1 %v4050_v61  ;;  %v8892_v37 = vpop.f32.mrb[64].mxu1  ;;  %18169 = vst [vmem:[#allocation20_spill] sm:$0xff] %v14214_v20 }
 0x55c   :  { %v4898_v46 = vpop.f32.mrb[65].mxu1 }
 0x55d   :  { %4772 = vmatmul.mubr.f32.gmra.mrb[104].mxu0 %v14195_v24 }
 0x55e   :  { %5382 = vmatmul.mubr.f32.gmra.mrb[168].mxu1 %v13965_v42  ;;  %4776 = vmatprep.mubr.f32.mxu0 %v14198_v63  ;;  %v14209_v42 = vadd.f32 %v4898_v46, %v4513_v10  ;;  %v4261_v46 = vld [vmem:[#allocation2 + $0x2d8] sm:$0xff] }
 0x55f   :  { %5386 = vmatprep.mubr.f32.mxu1 %v4051_v2  ;;  %v14211_v2 = vld [vmem:[#allocation2 + $0x2d0] sm:$0xff] }
 0x560   :  { %18167 = vst [vmem:[#allocation11_spill] sm:$0xff] %v14209_v42  ;;  %18168 = vst [vmem:[#allocation14_spill] sm:$0xff] %v14211_v2 }
 0x561   :  { %4777 = vmatmul.mubr.f32.gmra.mrb[106].mxu0 %v14202_v41  ;;  %v8895_v63 = vpop.f32.mrb[66].mxu1 }
 0x562   :  { %5387 = vmatmul.mubr.f32.gmra.mrb[170].mxu1 %v13970_v16  ;;  %4781 = vmatprep.mubr.f32.mxu0 %v14205_v59  ;;  %v4518_v61 = vpop.f32.mrb[2].mxu0  ;;  %v4908_v53 = vpop.f32.mrb[67].mxu1  ;;  %v4053_v16 = vld [vmem:[#allocation2 + $0x111] sm:$0xff] }
 0x563   :  { %5391 = vmatprep.mubr.f32.mxu1 %v4052_v18  ;;  %v4520_v24 = vpop.f32.mrb[3].mxu0  ;;  %v14216_v41 = vadd.f32 %v8892_v37, %v4518_v61  ;;  %v4054_v37 = vld [vmem:[#allocation2 + $0x121] sm:$0xff] }
 0x565   :  { %4782 = vmatmul.mubr.f32.gmra.mrb[108].mxu0 %v14211_v2  ;;  %18170 = vst [vmem:[#allocation15_spill] sm:$0xff] %v14216_v41  ;;  %v4263_v41 = vld [vmem:[#allocation2 + $0x2f0] sm:$0xff] }
 0x566   :  { %5392 = vmatmul.mubr.f32.gmra.mrb[172].mxu1 %v13975_v50  ;;  %4786 = vmatprep.mubr.f32.mxu0 %v14214_v20  ;;  %v7982_v50 = vld [vmem:[%s17513_s2 + $0x430] sm:$0xff] }
 0x567   :  { %5396 = vmatprep.mubr.f32.mxu1 %v4053_v16  ;;  %v4262_v16 = vld [vmem:[#allocation2 + $0x2e8] sm:$0xff]  ;;  %v14232_v20 = vld [vmem:[#allocation2 + $0x2f1] sm:$0xff] }
 0x568   :  { %v4523_v10 = vpop.f32.mrb[4].mxu0  ;;  %18173 = vst [vmem:[#allocation18_spill] sm:$0xff] %v14232_v20 }
 0x569   :  { %v8898_v18 = vpop.f32.mrb[68].mxu1  ;;  %v4525_v59 = vpop.f32.mrb[5].mxu0  ;;  %4787 = vmatmul.mubr.f32.gmra.mrb[110].mxu0 %v4261_v46  ;;  %v14222_v24 = vadd.f32 %v4908_v53, %v4523_v10 }
 0x56a   :  { %v4918_v2 = vpop.f32.mrb[69].mxu1  ;;  %5397 = vmatmul.mubr.f32.gmra.mrb[174].mxu1 %v13980_v48  ;;  %4791 = vmatprep.mubr.f32.mxu0 %v14220_v19  ;;  %v7983_v59 = vld [vmem:[%s17513_s2 + $0x438] sm:$0xff] }
 0x56b   :  { %18172 = vst [vmem:[#allocation4_spill] sm:$0xff] %v14222_v24  ;;  %5401 = vmatprep.mubr.f32.mxu1 %v4054_v37  ;;  %v9702_v46 = vpack.c.bf16 %v7983_v59, %v7982_v50  ;;  %v4055_v37 = vld [vmem:[#allocation2 + $0x129] sm:$0xff]  ;;  %v4328_v59 = vld [vmem:[#allocation2 + $0x301] sm:$0xff] }
 0x56c   :  { %v4528_v61 = vpop.f32.mrb[6].mxu0 }
 0x56d   :  { %v8901_v53 = vpop.f32.mrb[70].mxu1  ;;  %v4530_v10 = vpop.f32.mrb[7].mxu0  ;;  %4792 = vmatmul.mubr.f32.gmra.mrb[112].mxu0 %v4262_v16  ;;  %v14234_v48 = vadd.f32 %v8895_v63, %v4528_v61  ;;  %9703 = vmatprep.subr.bf16.mxu1 %v9702_v46 }
 0x56e   :  { %v4928_v19 = vpop.f32.mrb[71].mxu1  ;;  %5402 = vmatmul.mubr.f32.gmra.mrb[176].mxu1 %v13985_v45  ;;  %4796 = vmatprep.mubr.f32.mxu0 %v14232_v20  ;;  %v4056_v45 = vld [vmem:[#allocation2 + $0x139] sm:$0xff] }
 0x56f   :  { %18174 = vst [vmem:[#allocation19_spill] sm:$0xff] %v14234_v48  ;;  %5406 = vmatprep.mubr.f32.mxu1 %v4055_v37  ;;  %9705 = vmatpush3.bf16.msra.mxu1 %v9702_v46  ;;  %v4264_v10 = vld [vmem:[#allocation2 + $0x300] sm:$0xff]  ;;  %v4329_v46 = vld [vmem:[#allocation2 + $0x309] sm:$0xff] }
 0x570   :  { %v4533_v24 = vpop.f32.mrb[8].mxu0 }
 0x571   :  { %v14238_v42 = vpop.f32.mrb[72].mxu1  ;;  %v4535_v50 = vpop.f32.mrb[9].mxu0  ;;  %4797 = vmatmul.mubr.f32.gmra.mrb[114].mxu0 %v4263_v41  ;;  %v14240_v16 = vadd.f32 %v4918_v2, %v4533_v24  ;;  %v4057_v41 = vld [vmem:[#allocation2 + $0x141] sm:$0xff] }
 0x572   :  { %v4938_v63 = vpop.f32.mrb[73].mxu1  ;;  %5407 = vmatmul.mubr.f32.gmra.mrb[178].mxu1 %v13990_v47  ;;  %4801 = vmatprep.mubr.f32.mxu0 %v4328_v59  ;;  %v4265_v2 = vld [vmem:[#allocation2 + $0x308] sm:$0xff] }
 0x573   :  { %18175 = vst [vmem:[#allocation27_spill] sm:$0xff] %v14240_v16  ;;  %5411 = vmatprep.mubr.f32.mxu1 %v4056_v45  ;;  %v4330_v45 = vld [vmem:[#allocation2 + $0x319] sm:$0xff] }
 0x574   :  { %v4538_v61 = vpop.f32.mrb[10].mxu0 }
 0x575   :  { %v14243_v37 = vpop.f32.mrb[74].mxu1  ;;  %v4540_v20 = vpop.f32.mrb[11].mxu0  ;;  %4802 = vmatmul.mubr.f32.gmra.mrb[116].mxu0 %v4264_v10  ;;  %v14245_v48 = vadd.f32 %v8898_v18, %v4538_v61  ;;  %v4058_v18 = vld [vmem:[#allocation2 + $0x151] sm:$0xff] }
 0x576   :  { %v14247_v50 = vpop.f32.mrb[75].mxu1  ;;  %5412 = vmatmul.mubr.f32.gmra.mrb[180].mxu1 %v13995_v33  ;;  %4806 = vmatprep.mubr.f32.mxu0 %v4329_v46  ;;  %v4266_v61 = vld [vmem:[#allocation2 + $0x318] sm:$0xff] }
 0x577   :  { %18176 = vst [vmem:[#allocation21_spill] sm:$0xff] %v14245_v48  ;;  %5416 = vmatprep.mubr.f32.mxu1 %v4057_v41  ;;  %v4331_v41 = vld [vmem:[#allocation2 + $0x321] sm:$0xff] }
 0x578   :  { %v4543_v47 = vpop.f32.mrb[12].mxu0 }
 0x579   :  { %v14250_v24 = vpop.f32.mrb[76].mxu1  ;;  %v4545_v59 = vpop.f32.mrb[13].mxu0  ;;  %4807 = vmatmul.mubr.f32.gmra.mrb[118].mxu0 %v4265_v2  ;;  %v14252_v16 = vadd.f32 %v4928_v19, %v4543_v47  ;;  %v4059_v19 = vld [vmem:[#allocation2 + $0x159] sm:$0xff]  ;;  %v7985_v47 = vld [vmem:[%s17513_s2 + $0x448] sm:$0xff] }
 0x57a   :  { %v14254_v20 = vpop.f32.mrb[77].mxu1  ;;  %5417 = vmatmul.mubr.f32.gmra.mrb[182].mxu1 %v14006_v39  ;;  %4811 = vmatprep.mubr.f32.mxu0 %v4330_v45  ;;  %v7984_v39 = vld [vmem:[%s17513_s2 + $0x440] sm:$0xff] }
 0x57b   :  { %18177 = vst [vmem:[#allocation22_spill] sm:$0xff] %v14252_v16  ;;  %5421 = vmatprep.mubr.f32.mxu1 %v4058_v18  ;;  %v9706_v59 = vpack.c.bf16 %v7985_v47, %v7984_v39  ;;  %v4267_v18 = vld [vmem:[#allocation2 + $0x320] sm:$0xff]  ;;  %v7987_v39 = vld [vmem:[%s17513_s2 + $0x458] sm:$0xff] }
 0x57c   :  { %v4548_v33 = vpop.f32.mrb[14].mxu0  ;;  %v7991_v16 = vld [vmem:[%s17513_s2 + $0x478] sm:$0xff] }
 0x57d   :  { %v14257_v10 = vpop.f32.mrb[78].mxu1  ;;  %v4550_v46 = vpop.f32.mrb[15].mxu0  ;;  %4812 = vmatmul.mubr.f32.gmra.mrb[120].mxu0 %v4266_v61  ;;  %v14259_v48 = vadd.f32 %v8901_v53, %v4548_v33  ;;  %v4332_v61 = vld [vmem:[#allocation2 + $0x331] sm:$0xff]  ;;  %9707 = vmatprep.subr.bf16.mxu1 %v9706_v59 }
 0x57e   :  { %v14261_v2 = vpop.f32.mrb[79].mxu1  ;;  %5422 = vmatmul.mubr.f32.gmra.mrb[184].mxu1 %v14011_v1  ;;  %4816 = vmatprep.mubr.f32.mxu0 %v4331_v41  ;;  %v4060_v41 = vld [vmem:[#allocation2 + $0x169] sm:$0xff] }
 0x57f   :  { %18178 = vst [vmem:[#allocation24_spill] sm:$0xff] %v14259_v48  ;;  %5426 = vmatprep.mubr.f32.mxu1 %v4059_v19  ;;  %v7986_v19 = vld [vmem:[%s17513_s2 + $0x450] sm:$0xff]  ;;  %9709 = vmatpush3.bf16.msra.mxu1 %v9706_v59  ;;  %v7988_v59 = vld [vmem:[%s17513_s2 + $0x460] sm:$0xff] }
 0x580   :  { %v4553_v45 = vpop.f32.mrb[16].mxu0  ;;  %v9710_v47 = vpack.c.bf16 %v7987_v39, %v7986_v19  ;;  %v4061_v48 = vld [vmem:[#allocation2 + $0x171] sm:$0xff]  ;;  %v4094_v39 = vld [vmem:[#allocation2 + $0x2] sm:$0xff] }
 0x581   :  { %v14270_v53 = vpop.f32.mrb[80].mxu1  ;;  %v4555_v33 = vpop.f32.mrb[17].mxu0  ;;  %4817 = vmatmul.mubr.f32.gmra.mrb[122].mxu0 %v4267_v18  ;;  %v14272_v1 = vadd.f32 %v4938_v63, %v4553_v45  ;;  %v4268_v63 = vld [vmem:[#allocation2 + $0x330] sm:$0xff]  ;;  %v4269_v19 = vld [vmem:[#allocation2 + $0x338] sm:$0xff] }
 0x582   :  { %v14274_v46 = vpop.f32.mrb[81].mxu1  ;;  %5427 = vmatmul.mubr.f32.gmra.mrb[186].mxu1 %v14017_v55  ;;  %4821 = vmatprep.mubr.f32.mxu0 %v4332_v61  ;;  %v4333_v55 = vld [vmem:[#allocation2 + $0x339] sm:$0xff] }
 0x583   :  { %18179 = vst [vmem:[#allocation25_spill] sm:$0xff] %v14272_v1  ;;  %5431 = vmatprep.mubr.f32.mxu1 %v4060_v41  ;;  %9711 = vmatprep.subr.bf16.mxu1 %v9710_v47  ;;  %v7989_v41 = vld [vmem:[%s17513_s2 + $0x468] sm:$0xff] }
 0x584   :  { %v4558_v18 = vpop.f32.mrb[18].mxu0  ;;  %9713 = vmatpush3.bf16.msra.mxu1 %v9710_v47 }
 0x585   :  { %v14283_v45 = vpop.f32.mrb[82].mxu1  ;;  %v4560_v33 = vpop.f32.mrb[19].mxu0  ;;  %4822 = vmatmul.mubr.f32.gmra.mrb[124].mxu0 %v4268_v63  ;;  %v14286_v61 = vadd.f32 %v14238_v42, %v4558_v18  ;;  %v9714_v42 = vpack.c.bf16 %v7989_v41, %v7988_v59  ;;  %v4062_v63 = vld [vmem:[#allocation2 + $0x1b1] sm:$0xff] }
 0x586   :  { %v14288_v1 = vpop.f32.mrb[83].mxu1  ;;  %5432 = vmatmul.mubr.f32.gmra.mrb[188].mxu1 %v14022_v35  ;;  %4826 = vmatprep.mubr.f32.mxu0 %v4333_v55  ;;  %v7944_v35 = vld [vmem:[%s17513_s2 + $0x300] sm:$0xff]  ;;  %v7945_v33 = vld [vmem:[%s17513_s2 + $0x308] sm:$0xff]  ;;  %v7990_v41 = vld [vmem:[%s17513_s2 + $0x470] sm:$0xff] }
 0x587   :  { %18180 = vst [vmem:[#allocation26_spill] sm:$0xff] %v14286_v61  ;;  %5436 = vmatprep.mubr.f32.mxu1 %v4061_v48  ;;  %9715 = vmatprep.subr.bf16.mxu1 %v9714_v42  ;;  %v4095_v59 = vld [vmem:[#allocation2 + $0xa] sm:$0xff] }
 0x588   :  { %v4563_v18 = vpop.f32.mrb[20].mxu0  ;;  %9717 = vmatpush3.bf16.msra.mxu1 %v9714_v42 }
 0x589   :  { %v14303_v55 = vpop.f32.mrb[84].mxu1  ;;  %v4565_v61 = vpop.f32.mrb[21].mxu0  ;;  %4827 = vmatmul.mubr.f32.gmra.mrb[126].mxu0 %v4269_v19  ;;  %v14306_v48 = vadd.f32 %v14247_v50, %v4563_v18  ;;  %v9718_v19 = vpack.c.bf16 %v7991_v16, %v7990_v41  ;;  %v4063_v18 = vld [vmem:[#allocation2 + $0x1b9] sm:$0xff] }
 0x58a   :  { %v14308_v47 = vpop.f32.mrb[85].mxu1  ;;  %5437 = vmatmul.mubr.f32.gmra.mrb[190].mxu1 %v14027_v32  ;;  %9018 = vmatprep.mubr.f32.mxu0 %v4094_v39  ;;  %v9643_v61 = vpack.c.bf16 %v7945_v33, %v7944_v35  ;;  %v7946_v32 = vld [vmem:[%s17513_s2 + $0x310] sm:$0xff]  ;;  %v7947_v39 = vld [vmem:[%s17513_s2 + $0x318] sm:$0xff]  ;;  %v4097_v33 = vld [vmem:[#allocation2 + $0x22] sm:$0xff] }
 0x58b   :  { %18181 = vst [vmem:[#allocation5_spill] sm:$0xff] %v14306_v48  ;;  %5441 = vmatprep.mubr.f32.mxu1 %v4062_v63  ;;  %9719 = vmatprep.subr.bf16.mxu1 %v9718_v19  ;;  %v9646_v42 = vpack.c.bf16 %v7947_v39, %v7946_v32  ;;  %v14349_v39 = vld [vmem:[#allocation2 + $0x3a] sm:$0xff] }
 0x58c   :  { %v4568_v50 = vpop.f32.mrb[22].mxu0  ;;  %9721 = vmatpush3.bf16.msra.mxu1 %v9718_v19 }
 0x58d   :  { %v14323_v48 = vpop.f32.mrb[86].mxu1  ;;  %v4570_v62 = vpop.f32.mrb[23].mxu0  ;;  %9019 = vmatmul.mubr.f32.vlgmr.msra.gmra.mrb[128].mxu0 %v4095_v59  ;;  %v14326_v63 = vadd.f32 %v14243_v37, %v4568_v50  ;;  %v7949_v37 = vld [vmem:[%s17513_s2 + $0x328] sm:$0xff] }
 0x58e   :  { %v14328_v16 = vpop.f32.mrb[87].mxu1  ;;  %5442 = vmatmul.mubr.f32.gmra.mrb[192].mxu1 %v14045_v38  ;;  %9021 = vmatprep.mubr.f32.mxu0 %v4096_v6  ;;  %v7948_v62 = vld [vmem:[%s17513_s2 + $0x320] sm:$0xff]  ;;  %v14340_v6 = vld [vmem:[#allocation2 + $0x32] sm:$0xff] }
 0x58f   :  { %18182 = vst [vmem:[#allocation29_spill] sm:$0xff] %v14326_v63  ;;  %9644 = vmatpush1.bf16.msra.mxu0 %v9643_v61  ;;  %5446 = vmatprep.mubr.f32.mxu1 %v4063_v18  ;;  %v4064_v18 = vld [vmem:[#allocation2 + $0x1c9] sm:$0xff]  ;;  %v9649_v32 = vpack.c.bf16 %v7949_v37, %v7948_v62  ;;  %v14370_v63 = vld [vmem:[#allocation2 + $0x52] sm:$0xff] }
 0x590   :  { %v4573_v35 = vpop.f32.mrb[24].mxu0  ;;  %9645 = vmatprep.subr.bf16.mxu0 %v18123_v52 }
 0x591   :  { %v14338_v59 = vpop.f32.mrb[88].mxu1  ;;  %v4575_v41 = vpop.f32.mrb[25].mxu0  ;;  %9022 = vmatmul.mubr.f32.gmra.mrb[130].mxu0 %v4097_v33  ;;  %v14343_v61 = vadd.f32 %v14254_v20, %v4573_v35  ;;  %v7950_v20 = vld [vmem:[%s17513_s2 + $0x330] sm:$0xff]  ;;  %v7951_v35 = vld [vmem:[%s17513_s2 + $0x338] sm:$0xff] }
 0x592   :  { %v14345_v50 = vpop.f32.mrb[89].mxu1  ;;  %5447 = vmatmul.mubr.f32.gmra.mrb[194].mxu1 %v14045_v38  ;;  %9024 = vmatprep.mubr.f32.mxu0 %v14340_v6  ;;  %v4065_v41 = vld [vmem:[#allocation2 + $0x1d1] sm:$0xff] }
 0x593   :  { %18183 = vst [vmem:[#allocation3_spill] sm:$0xff] %v14343_v61  ;;  %5451 = vmatprep.mubr.f32.mxu1 %v4064_v18  ;;  %9647 = vmatpush1.bf16.msra.mxu0 %v9646_v42  ;;  %v14361_v42 = vld [vmem:[#allocation2 + $0x4a] sm:$0xff]  ;;  %v9652_v18 = vpack.c.bf16 %v7951_v35, %v7950_v20 }
 0x594   :  { %v4578_v19 = vpop.f32.mrb[26].mxu0  ;;  %9648 = vmatprep.subr.bf16.mxu0 %v18123_v52  ;;  %18184 = vst [vmem:[#allocation30_spill] sm:$0xff] %v14361_v42 }
 0x595   :  { %v14358_v38 = vpop.f32.mrb[90].mxu1  ;;  %v4580_v33 = vpop.f32.mrb[27].mxu0  ;;  %9025 = vmatmul.mubr.f32.gmra.mrb[132].mxu0 %v14349_v39  ;;  %v14364_v62 = vadd.f32 %v14250_v24, %v4578_v19  ;;  %v7952_v24 = vld [vmem:[%s17513_s2 + $0x340] sm:$0xff]  ;;  %v7953_v19 = vld [vmem:[%s17513_s2 + $0x348] sm:$0xff] }
 0x596   :  { %v14366_v37 = vpop.f32.mrb[91].mxu1  ;;  %5452 = vmatmul.mubr.f32.gmra.mrb[196].mxu1 %v14042_v27  ;;  %9027 = vmatprep.mubr.f32.mxu0 %v14361_v42  ;;  %v14392_v42 = vld [vmem:[#allocation2 + $0x6a] sm:$0xff] }
 0x597   :  { %18185 = vst [vmem:[#allocation31_spill] sm:$0xff] %v14364_v62  ;;  %5456 = vmatprep.mubr.f32.mxu1 %v4065_v41  ;;  %9650 = vmatpush1.bf16.msra.mxu0 %v9649_v32  ;;  %v14382_v32 = vld [vmem:[#allocation2 + $0x62] sm:$0xff]  ;;  %v9655_v41 = vpack.c.bf16 %v7953_v19, %v7952_v24 }
 0x598   :  { %v4583_v61 = vpop.f32.mrb[28].mxu0  ;;  %9651 = vmatprep.subr.bf16.mxu0 %v18123_v52  ;;  %18186 = vst [vmem:[#allocation32_spill] sm:$0xff] %v14382_v32 }
 0x599   :  { %v14379_v27 = vpop.f32.mrb[92].mxu1  ;;  %v4585_v33 = vpop.f32.mrb[29].mxu0  ;;  %9028 = vmatmul.mubr.f32.gmra.mrb[134].mxu0 %v14370_v63  ;;  %v14385_v20 = vadd.f32 %v14261_v2, %v4583_v61  ;;  %v7954_v2 = vld [vmem:[%s17513_s2 + $0x350] sm:$0xff]  ;;  %v7955_v61 = vld [vmem:[%s17513_s2 + $0x358] sm:$0xff] }
 0x59a   :  { %v14387_v35 = vpop.f32.mrb[93].mxu1  ;;  %5457 = vmatmul.mubr.f32.gmra.mrb[198].mxu1 %v14050_v11  ;;  %9030 = vmatprep.mubr.f32.mxu0 %v14382_v32  ;;  %v9658_v19 = vpack.c.bf16 %v7955_v61, %v7954_v2  ;;  %v14414_v32 = vld [vmem:[#allocation2 + $0x82] sm:$0xff] }
 0x59b   :  { %18187 = vst [vmem:[#allocation33_spill] sm:$0xff] %v14385_v20  ;;  %5461 = vmatprep.mubr.f32.mxu1 %v14053_v4  ;;  %9653 = vmatpush1.bf16.msra.mxu0 %v9652_v18  ;;  %v14404_v4 = vld [vmem:[#allocation2 + $0x7a] sm:$0xff] }
 0x59c   :  { %v4588_v62 = vpop.f32.mrb[30].mxu0  ;;  %9654 = vmatprep.subr.bf16.mxu0 %v18123_v52  ;;  %18188 = vst [vmem:[#allocation37_spill] sm:$0xff] %v14404_v4 }
 0x59d   :  { %v14401_v11 = vpop.f32.mrb[94].mxu1  ;;  %v4590_v33 = vpop.f32.mrb[31].mxu0  ;;  %9031 = vmatmul.mubr.f32.gmra.mrb[136].mxu0 %v14392_v42  ;;  %v14407_v18 = vadd.f32 %v14257_v10, %v4588_v62  ;;  %v7956_v10 = vld [vmem:[%s17513_s2 + $0x360] sm:$0xff]  ;;  %v7957_v62 = vld [vmem:[%s17513_s2 + $0x368] sm:$0xff] }
 0x59e   :  { %v14409_v24 = vpop.f32.mrb[95].mxu1  ;;  %5462 = vmatmul.mubr.f32.gmra.mrb[200].mxu1 %v14057_v12  ;;  %9033 = vmatprep.mubr.f32.mxu0 %v14404_v4  ;;  %v9661_v61 = vpack.c.bf16 %v7957_v62, %v7956_v10  ;;  %v14436_v4 = vld [vmem:[#allocation2 + $0x9a] sm:$0xff] }
 0x59f   :  { %18189 = vst [vmem:[#allocation34_spill] sm:$0xff] %v14407_v18  ;;  %5466 = vmatprep.mubr.f32.mxu1 %v14060_v40  ;;  %9656 = vmatpush1.bf16.msra.mxu0 %v9655_v41  ;;  %v14426_v40 = vld [vmem:[#allocation2 + $0x92] sm:$0xff] }
 0x5a0   :  { %v4593_v20 = vpop.f32.mrb[32].mxu0  ;;  %9657 = vmatprep.subr.bf16.mxu0 %v18123_v52  ;;  %18190 = vst [vmem:[#allocation35_spill] sm:$0xff] %v14426_v40 }
 0x5a1   :  { %v14423_v12 = vpop.f32.mrb[96].mxu1  ;;  %v4595_v33 = vpop.f32.mrb[33].mxu0  ;;  %9034 = vmatmul.mubr.f32.gmra.mrb[138].mxu0 %v14414_v32  ;;  %v14429_v41 = vadd.f32 %v14274_v46, %v4593_v20  ;;  %v7958_v46 = vld [vmem:[%s17513_s2 + $0x370] sm:$0xff]  ;;  %v7959_v20 = vld [vmem:[%s17513_s2 + $0x378] sm:$0xff] }
 0x5a2   :  { %v14431_v2 = vpop.f32.mrb[97].mxu1  ;;  %5467 = vmatmul.mubr.f32.gmra.mrb[202].mxu1 %v14064_v21  ;;  %9036 = vmatprep.mubr.f32.mxu0 %v14426_v40  ;;  %v9664_v62 = vpack.c.bf16 %v7959_v20, %v7958_v46  ;;  %v14458_v40 = vld [vmem:[#allocation2 + $0xb2] sm:$0xff] }
 0x5a3   :  { %18191 = vst [vmem:[#allocation43_spill] sm:$0xff] %v14429_v41  ;;  %5471 = vmatprep.mubr.f32.mxu1 %v14067_v44  ;;  %9659 = vmatpush1.bf16.msra.mxu0 %v9658_v19  ;;  %v14448_v44 = vld [vmem:[#allocation2 + $0xaa] sm:$0xff] }
 0x5a4   :  { %v4598_v18 = vpop.f32.mrb[34].mxu0  ;;  %9660 = vmatprep.subr.bf16.mxu0 %v18123_v52  ;;  %18192 = vst [vmem:[#allocation45_spill] sm:$0xff] %v14448_v44 }
 0x5a5   :  { %v14445_v21 = vpop.f32.mrb[98].mxu1  ;;  %v4600_v33 = vpop.f32.mrb[35].mxu0  ;;  %9037 = vmatmul.mubr.f32.gmra.mrb[140].mxu0 %v14436_v4  ;;  %v14451_v19 = vadd.f32 %v14270_v53, %v4598_v18  ;;  %v7960_v53 = vld [vmem:[%s17513_s2 + $0x380] sm:$0xff]  ;;  %v7961_v18 = vld [vmem:[%s17513_s2 + $0x388] sm:$0xff] }
 0x5a6   :  { %v14453_v10 = vpop.f32.mrb[99].mxu1  ;;  %5472 = vmatmul.mubr.f32.gmra.mrb[204].mxu1 %v14071_v49  ;;  %9039 = vmatprep.mubr.f32.mxu0 %v14448_v44  ;;  %v9667_v20 = vpack.c.bf16 %v7961_v18, %v7960_v53  ;;  %v14480_v44 = vld [vmem:[#allocation2 + $0xca] sm:$0xff] }
 0x5a7   :  { %18193 = vst [vmem:[#allocation46_spill] sm:$0xff] %v14451_v19  ;;  %5476 = vmatprep.mubr.f32.mxu1 %v14074_v51  ;;  %9662 = vmatpush1.bf16.msra.mxu0 %v9661_v61  ;;  %v14470_v51 = vld [vmem:[#allocation2 + $0xc2] sm:$0xff] }
 0x5a8   :  { %v4603_v41 = vpop.f32.mrb[36].mxu0  ;;  %9663 = vmatprep.subr.bf16.mxu0 %v18123_v52  ;;  %18194 = vst [vmem:[#allocation44_spill] sm:$0xff] %v14470_v51 }
 0x5a9   :  { %v14467_v49 = vpop.f32.mrb[100].mxu1  ;;  %v4605_v33 = vpop.f32.mrb[37].mxu0  ;;  %9040 = vmatmul.mubr.f32.gmra.mrb[142].mxu0 %v14458_v40  ;;  %v14473_v61 = vadd.f32 %v14288_v1, %v4603_v41  ;;  %v7962_v1 = vld [vmem:[%s17513_s2 + $0x390] sm:$0xff]  ;;  %v7963_v41 = vld [vmem:[%s17513_s2 + $0x398] sm:$0xff] }
 0x5aa   :  { %v14475_v46 = vpop.f32.mrb[101].mxu1  ;;  %5477 = vmatmul.mubr.f32.gmra.mrb[206].mxu1 %v14078_v7  ;;  %9042 = vmatprep.mubr.f32.mxu0 %v14470_v51  ;;  %v9670_v18 = vpack.c.bf16 %v7963_v41, %v7962_v1  ;;  %v14502_v51 = vld [vmem:[#allocation2 + $0xe2] sm:$0xff] }
 0x5ab   :  { %18195 = vst [vmem:[#allocation52_spill] sm:$0xff] %v14473_v61  ;;  %5481 = vmatprep.mubr.f32.mxu1 %v14081_v36  ;;  %9665 = vmatpush1.bf16.msra.mxu0 %v9664_v62  ;;  %v14492_v36 = vld [vmem:[#allocation2 + $0xda] sm:$0xff] }
 0x5ac   :  { %v4608_v19 = vpop.f32.mrb[38].mxu0  ;;  %9666 = vmatprep.subr.bf16.mxu0 %v18123_v52  ;;  %18196 = vst [vmem:[#allocation50_spill] sm:$0xff] %v14492_v36 }
 0x5ad   :  { %v14489_v7 = vpop.f32.mrb[102].mxu1  ;;  %v4610_v33 = vpop.f32.mrb[39].mxu0  ;;  %9043 = vmatmul.mubr.f32.gmra.mrb[144].mxu0 %v14480_v44  ;;  %v14495_v62 = vadd.f32 %v14283_v45, %v4608_v19  ;;  %v7964_v45 = vld [vmem:[%s17513_s2 + $0x3a0] sm:$0xff]  ;;  %v7965_v19 = vld [vmem:[%s17513_s2 + $0x3a8] sm:$0xff] }
 0x5ae   :  { %v14497_v53 = vpop.f32.mrb[103].mxu1  ;;  %5482 = vmatmul.mubr.f32.gmra.mrb[208].mxu1 %v14085_v13  ;;  %9045 = vmatprep.mubr.f32.mxu0 %v14492_v36  ;;  %v9673_v41 = vpack.c.bf16 %v7965_v19, %v7964_v45  ;;  %v14524_v36 = vld [vmem:[#allocation2 + $0xfa] sm:$0xff] }
 0x5af   :  { %18197 = vst [vmem:[#allocation42_spill] sm:$0xff] %v14495_v62  ;;  %5486 = vmatprep.mubr.f32.mxu1 %v14088_v58  ;;  %9668 = vmatpush1.bf16.msra.mxu0 %v9667_v20  ;;  %v14514_v58 = vld [vmem:[#allocation2 + $0xf2] sm:$0xff] }
 0x5b0   :  { %v4613_v61 = vpop.f32.mrb[40].mxu0  ;;  %9669 = vmatprep.subr.bf16.mxu0 %v18123_v52  ;;  %18198 = vst [vmem:[#allocation54_spill] sm:$0xff] %v14514_v58 }
 0x5b1   :  { %v14511_v13 = vpop.f32.mrb[104].mxu1  ;;  %v4615_v33 = vpop.f32.mrb[41].mxu0  ;;  %9046 = vmatmul.mubr.f32.gmra.mrb[146].mxu0 %v14502_v51  ;;  %v14517_v20 = vadd.f32 %v14308_v47, %v4613_v61  ;;  %v7966_v47 = vld [vmem:[%s17513_s2 + $0x3b0] sm:$0xff]  ;;  %v7967_v61 = vld [vmem:[%s17513_s2 + $0x3b8] sm:$0xff] }
 0x5b2   :  { %v14519_v1 = vpop.f32.mrb[105].mxu1  ;;  %5487 = vmatmul.mubr.f32.gmra.mrb[210].mxu1 %v14092_v28  ;;  %9048 = vmatprep.mubr.f32.mxu0 %v14514_v58  ;;  %v9676_v19 = vpack.c.bf16 %v7967_v61, %v7966_v47  ;;  %v14546_v58 = vld [vmem:[#allocation2 + $0x112] sm:$0xff] }
 0x5b3   :  { %18199 = vst [vmem:[#allocation48_spill] sm:$0xff] %v14517_v20  ;;  %5491 = vmatprep.mubr.f32.mxu1 %v14095_v15  ;;  %9671 = vmatpush1.bf16.msra.mxu0 %v9670_v18  ;;  %v14536_v15 = vld [vmem:[#allocation2 + $0x10a] sm:$0xff] }
 0x5b4   :  { %v4618_v62 = vpop.f32.mrb[42].mxu0  ;;  %9672 = vmatprep.subr.bf16.mxu0 %v18123_v52  ;;  %18200 = vst [vmem:[#allocation47_spill] sm:$0xff] %v14536_v15 }
 0x5b5   :  { %v14533_v28 = vpop.f32.mrb[106].mxu1  ;;  %v4620_v33 = vpop.f32.mrb[43].mxu0  ;;  %9049 = vmatmul.mubr.f32.gmra.mrb[148].mxu0 %v14524_v36  ;;  %v14539_v18 = vadd.f32 %v14303_v55, %v4618_v62  ;;  %v7968_v55 = vld [vmem:[%s17513_s2 + $0x3c0] sm:$0xff]  ;;  %v7969_v62 = vld [vmem:[%s17513_s2 + $0x3c8] sm:$0xff] }
 0x5b6   :  { %v14541_v45 = vpop.f32.mrb[107].mxu1  ;;  %5492 = vmatmul.mubr.f32.gmra.mrb[212].mxu1 %v14105_v29  ;;  %9051 = vmatprep.mubr.f32.mxu0 %v14536_v15  ;;  %v9679_v61 = vpack.c.bf16 %v7969_v62, %v7968_v55  ;;  %v14568_v15 = vld [vmem:[#allocation2 + $0x12a] sm:$0xff] }
 0x5b7   :  { %18201 = vst [vmem:[#allocation56_spill] sm:$0xff] %v14539_v18  ;;  %5496 = vmatprep.mubr.f32.mxu1 %v14108_v25  ;;  %9674 = vmatpush1.bf16.msra.mxu0 %v9673_v41  ;;  %v14558_v25 = vld [vmem:[#allocation2 + $0x122] sm:$0xff] }
 0x5b8   :  { %v4623_v20 = vpop.f32.mrb[44].mxu0  ;;  %9675 = vmatprep.subr.bf16.mxu0 %v18123_v52  ;;  %18202 = vst [vmem:[#allocation17_spill] sm:$0xff] %v14558_v25 }
 0x5b9   :  { %v14555_v29 = vpop.f32.mrb[108].mxu1  ;;  %v4625_v33 = vpop.f32.mrb[45].mxu0  ;;  %9052 = vmatmul.mubr.f32.gmra.mrb[150].mxu0 %v14546_v58  ;;  %v14561_v41 = vadd.f32 %v14328_v16, %v4623_v20  ;;  %v7970_v16 = vld [vmem:[%s17513_s2 + $0x3d0] sm:$0xff]  ;;  %v7971_v20 = vld [vmem:[%s17513_s2 + $0x3d8] sm:$0xff] }
 0x5ba   :  { %v14563_v47 = vpop.f32.mrb[109].mxu1  ;;  %5497 = vmatmul.mubr.f32.gmra.mrb[214].mxu1 %v14112_v60  ;;  %9054 = vmatprep.mubr.f32.mxu0 %v14558_v25  ;;  %v9682_v62 = vpack.c.bf16 %v7971_v20, %v7970_v16  ;;  %v14590_v25 = vld [vmem:[#allocation2 + $0x142] sm:$0xff] }
 0x5bb   :  { %18203 = vst [vmem:[#allocation6_spill] sm:$0xff] %v14561_v41  ;;  %5501 = vmatprep.mubr.f32.mxu1 %v14115_v34  ;;  %9677 = vmatpush1.bf16.msra.mxu0 %v9676_v19  ;;  %v14580_v34 = vld [vmem:[#allocation2 + $0x13a] sm:$0xff] }
 0x5bc   :  { %v4628_v18 = vpop.f32.mrb[46].mxu0  ;;  %9678 = vmatprep.subr.bf16.mxu0 %v18123_v52  ;;  %18204 = vst [vmem:[#allocation23_spill] sm:$0xff] %v14580_v34 }
 0x5bd   :  { %v14577_v60 = vpop.f32.mrb[110].mxu1  ;;  %v4630_v33 = vpop.f32.mrb[47].mxu0  ;;  %9055 = vmatmul.mubr.f32.gmra.mrb[152].mxu0 %v14568_v15  ;;  %v14583_v19 = vadd.f32 %v14323_v48, %v4628_v18  ;;  %v7972_v48 = vld [vmem:[%s17513_s2 + $0x3e0] sm:$0xff]  ;;  %v7973_v18 = vld [vmem:[%s17513_s2 + $0x3e8] sm:$0xff] }
 0x5be   :  { %v14585_v55 = vpop.f32.mrb[111].mxu1  ;;  %5502 = vmatmul.mubr.f32.gmra.mrb[216].mxu1 %v14119_v54  ;;  %9057 = vmatprep.mubr.f32.mxu0 %v14580_v34  ;;  %v9685_v20 = vpack.c.bf16 %v7973_v18, %v7972_v48  ;;  %v14612_v34 = vld [vmem:[#allocation2 + $0x15a] sm:$0xff]  ;;  %v4126_v18 = vld [vmem:[#allocation2 + $0x1b2] sm:$0xff] }
 0x5bf   :  { %18205 = vst [vmem:[#allocation58_spill] sm:$0xff] %v14583_v19  ;;  %5506 = vmatprep.mubr.f32.mxu1 %v14122_v57  ;;  %9680 = vmatpush1.bf16.msra.mxu0 %v9679_v61  ;;  %v14602_v57 = vld [vmem:[#allocation2 + $0x152] sm:$0xff]  ;;  %18208 = vst [vmem:[#allocation36_spill] sm:$0xff] %v14612_v34 }
 0x5c0   :  { %v4633_v41 = vpop.f32.mrb[48].mxu0  ;;  %9681 = vmatprep.subr.bf16.mxu0 %v18123_v52  ;;  %18206 = vst [vmem:[#allocation60_spill] sm:$0xff] %v14602_v57 }
 0x5c1   :  { %v14599_v54 = vpop.f32.mrb[112].mxu1  ;;  %v4635_v33 = vpop.f32.mrb[49].mxu0  ;;  %9058 = vmatmul.mubr.f32.gmra.mrb[154].mxu0 %v14590_v25  ;;  %v14605_v61 = vadd.f32 %v14345_v50, %v4633_v41  ;;  %v7974_v50 = vld [vmem:[%s17513_s2 + $0x3f0] sm:$0xff]  ;;  %v7975_v41 = vld [vmem:[%s17513_s2 + $0x3f8] sm:$0xff] }
 0x5c2   :  { %v14607_v16 = vpop.f32.mrb[113].mxu1  ;;  %5507 = vmatmul.mubr.f32.gmra.mrb[218].mxu1 %v14126_v23  ;;  %9060 = vmatprep.mubr.f32.mxu0 %v14602_v57 }
 0x5c3   :  { %18207 = vst [vmem:[#allocation51_spill] sm:$0xff] %v14605_v61  ;;  %5511 = vmatprep.mubr.f32.mxu1 %v14129_v43  ;;  %9683 = vmatpush1.bf16.msra.mxu0 %v9682_v62  ;;  %v14624_v43 = vld [vmem:[#allocation2 + $0x16a] sm:$0xff]  ;;  %v9688_v61 = vpack.c.bf16 %v7975_v41, %v7974_v50 }
 0x5c4   :  { %v4638_v19 = vpop.f32.mrb[50].mxu0  ;;  %9684 = vmatprep.subr.bf16.mxu0 %v18123_v52  ;;  %v4128_v41 = vld [vmem:[#allocation2 + $0x1ca] sm:$0xff] }
 0x5c5   :  { %v14621_v23 = vpop.f32.mrb[114].mxu1  ;;  %v4640_v33 = vpop.f32.mrb[51].mxu0  ;;  %9061 = vmatmul.mubr.f32.gmra.mrb[156].mxu0 %v14612_v34  ;;  %v14627_v62 = vadd.f32 %v14338_v59, %v4638_v19 }
 0x5c6   :  { %v14629_v48 = vpop.f32.mrb[115].mxu1  ;;  %5512 = vmatmul.mubr.f32.gmra.mrb[220].mxu1 %v14133_v5  ;;  %9063 = vmatprep.mubr.f32.mxu0 %v14624_v43  ;;  %v14634_v33 = vld [vmem:[#allocation2 + $0x172] sm:$0xff] }
 0x5c7   :  { %5516 = vmatprep.mubr.f32.mxu1 %v14136_v31  ;;  %9686 = vmatpush1.bf16.msra.mxu0 %v9685_v20  ;;  %v4127_v31 = vld [vmem:[#allocation2 + $0x1ba] sm:$0xff] }
 0x5c8   :  { %v4643_v57 = vpop.f32.mrb[52].mxu0  ;;  %9687 = vmatprep.subr.bf16.mxu0 %v18123_v52 }
 0x5c9   :  { %v14637_v34 = vpop.f32.mrb[116].mxu1  ;;  %v4645_v59 = vpop.f32.mrb[53].mxu0  ;;  %9064 = vmatmul.mubr.f32.gmra.mrb[158].mxu0 %v14634_v33  ;;  %v14641_v19 = vadd.f32 %v14366_v37, %v4643_v57  ;;  %v4129_v57 = vld [vmem:[#allocation2 + $0x1d2] sm:$0xff] }
 0x5ca   :  { %v14643_v5 = vpop.f32.mrb[117].mxu1  ;;  %5517 = vmatmul.mubr.f32.gmra.mrb[222].mxu1 %v14140_v8  ;;  %9066 = vmatprep.mubr.f32.mxu0 %v4126_v18  ;;  %v14658_v18 = vld [vmem:[#allocation2 + $0x1e2] sm:$0xff] }
 0x5cb   :  { %5521 = vmatprep.mubr.f32.mxu1 %v14143_v26  ;;  %9689 = vmatpush1.bf16.msra.mxu0 %v9688_v61 }
 0x5cc   :  { %v4648_v20 = vpop.f32.mrb[54].mxu0 }
 0x5cd   :  { %v14647_v50 = vpop.f32.mrb[118].mxu1  ;;  %v4650_v52 = vpop.f32.mrb[55].mxu0  ;;  %9067 = vmatmul.mubr.f32.gmra.mrb[160].mxu0 %v4127_v31  ;;  %v14650_v59 = vadd.f32 %v14358_v38, %v4648_v20 }
 0x5ce   :  { %v14652_v37 = vpop.f32.mrb[119].mxu1  ;;  %5522 = vmatmul.mubr.f32.gmra.mrb[224].mxu1 %v14147_v3  ;;  %9069 = vmatprep.mubr.f32.mxu0 %v4128_v41  ;;  %v14673_v41 = vld [vmem:[#allocation2 + $0x1fa] sm:$0xff] }
 0x5cf   :  { %5526 = vmatprep.mubr.f32.mxu1 %v14150_v14  ;;  %v14668_v14 = vld [vmem:[#allocation2 + $0x1ea] sm:$0xff] }
 0x5d0   :  { %v4653_v8 = vpop.f32.mrb[56].mxu0 }
 0x5d1   :  { %v14656_v26 = vpop.f32.mrb[120].mxu1  ;;  %v4655_v61 = vpop.f32.mrb[57].mxu0  ;;  %9070 = vmatmul.mubr.f32.gmra.mrb[162].mxu0 %v4129_v57  ;;  %v14661_v31 = vadd.f32 %v14387_v35, %v4653_v8 }
 0x5d2   :  { %v14663_v38 = vpop.f32.mrb[121].mxu1  ;;  %5527 = vmatmul.mubr.f32.gmra.mrb[226].mxu1 %v14154_v17  ;;  %9072 = vmatprep.mubr.f32.mxu0 %v14658_v18 }
 0x5d3   :  { %5531 = vmatprep.mubr.f32.mxu1 %v14157_v30  ;;  %v14683_v30 = vld [vmem:[#allocation2 + $0x202] sm:$0xff] }
 0x5d4   :  { %v4658_v3 = vpop.f32.mrb[58].mxu0  ;;  %18210 = vst [vmem:[#allocation40_spill] sm:$0xff] %v14683_v30 }
 0x5d5   :  { %v14670_v20 = vpop.f32.mrb[122].mxu1  ;;  %v4660_v52 = vpop.f32.mrb[59].mxu0  ;;  %9073 = vmatmul.mubr.f32.gmra.mrb[164].mxu0 %v14668_v14  ;;  %v14676_v35 = vadd.f32 %v14379_v27, %v4658_v3 }
 0x5d6   :  { %v14678_v8 = vpop.f32.mrb[123].mxu1  ;;  %5532 = vmatmul.mubr.f32.gmra.mrb[228].mxu1 %v14167_v9  ;;  %9075 = vmatprep.mubr.f32.mxu0 %v14673_v41  ;;  %v14688_v52 = vld [vmem:[#allocation2 + $0x212] sm:$0xff] }
 0x5d7   :  { %18209 = vst [vmem:[#allocation49_spill] sm:$0xff] %v14676_v35  ;;  %5536 = vmatprep.mubr.f32.mxu1 %v14170_v0  ;;  %18212 = vst [vmem:[#allocation38_spill] sm:$0xff] %v14688_v52  ;;  %v14698_v0 = vld [vmem:[#allocation2 + $0x21a] sm:$0xff] }
 0x5d8   :  { %v4663_v17 = vpop.f32.mrb[60].mxu0  ;;  %18214 = vst [vmem:[#allocation10_spill] sm:$0xff] %v14698_v0 }
 0x5d9   :  { %v14685_v57 = vpop.f32.mrb[124].mxu1  ;;  %v4665_v61 = vpop.f32.mrb[61].mxu0  ;;  %9076 = vmatmul.mubr.f32.gmra.mrb[166].mxu0 %v14683_v30  ;;  %v14691_v27 = vadd.f32 %v14409_v24, %v4663_v17  ;;  %v14727_v30 = vld [vmem:[#allocation2 + $0x24a] sm:$0xff] }
 0x5da   :  { %18211 = vst [vmem:[#allocation39_spill] sm:$0xff] %v14685_v57  ;;  %v14693_v3 = vpop.f32.mrb[125].mxu1  ;;  %5537 = vmatmul.mubr.f32.gmra.mrb[230].mxu1 %v14174_v56  ;;  %9078 = vmatprep.mubr.f32.mxu0 %v14688_v52  ;;  %v14703_v57 = vld [vmem:[#allocation2 + $0x22a] sm:$0xff]  ;;  %v18219_v56 = vld [vmem:[#allocation59_spill] sm:$0xff]  ;;  %v14713_v52 = vld [vmem:[#allocation2 + $0x232] sm:$0xff] }
 0x5db   :  { %18213 = vst [vmem:[#allocation8_spill] sm:$0xff] %v14691_v27  ;;  %5541 = vmatprep.mubr.f32.mxu1 %v14177_v22  ;;  %18216 = vst [vmem:[#allocation28_spill] sm:$0xff] %v14703_v57  ;;  %v18220_v22 = vld [vmem:[#allocation13_spill] sm:$0xff] }
 0x5dc   :  { %v4668_v9 = vpop.f32.mrb[62].mxu0 }
 0x5dd   :  { %v14700_v35 = vpop.f32.mrb[126].mxu1  ;;  %v4670_v61 = vpop.f32.mrb[63].mxu0  ;;  %9079 = vmatmul.mubr.f32.gmra.mrb[168].mxu0 %v14698_v0  ;;  %v14706_v24 = vadd.f32 %v14401_v11, %v4668_v9  ;;  %v14719_v11 = vld [vmem:[#allocation2 + $0x242] sm:$0xff] }
 0x5de   :  { %18215 = vst [vmem:[#allocation62_spill] sm:$0xff] %v14700_v35  ;;  %v14708_v17 = vpop.f32.mrb[127].mxu1  ;;  %5542 = vmatmul.mubr.f32.gmra.mrb[232].mxu1 %v18219_v56  ;;  %9081 = vmatprep.mubr.f32.mxu0 %v14703_v57  ;;  %18222 = vst [vmem:[#allocation41_spill] sm:$0xff] %v14719_v11  ;;  %v18223_v9 = vld [vmem:[#allocation11_spill] sm:$0xff]  ;;  %v18225_v56 = vld [vmem:[#allocation61_spill] sm:$0xff] }
 0x5df   :  { %18217 = vst [vmem:[#allocation55_spill] sm:$0xff] %v14706_v24  ;;  %18218 = vst [vmem:[#allocation53_spill] sm:$0xff] %v14708_v17  ;;  %5546 = vmatprep.mubr.f32.mxu1 %v18220_v22  ;;  %v18226_v17 = vld [vmem:[#allocation57_spill] sm:$0xff] }
 0x5e0   :  { %v4673_v27 = vpop.f32.mrb[64].mxu0 }
 0x5e1   :  { %v14716_v61 = vadd.f32 %v14431_v2, %v4673_v27  ;;  %v5283_v35 = vpop.f32.mrb[128].mxu1  ;;  %v4675_v0 = vpop.f32.mrb[65].mxu0  ;;  %9082 = vmatmul.mubr.f32.gmra.mrb[170].mxu0 %v14713_v52 }
 0x5e2   :  { %v14722_v24 = vadd.f32 %v5283_v35, %v18223_v9  ;;  %5547 = vmatmul.mubr.f32.gmra.mrb[234].mxu1 %v18225_v56  ;;  %9084 = vmatprep.mubr.f32.mxu0 %v14719_v11  ;;  %v5285_v22 = vpop.f32.mrb[129].mxu1  ;;  %v18229_v35 = vld [vmem:[#allocation15_spill] sm:$0xff] }
 0x5e3   :  { %18221 = vst [vmem:[#allocation12_spill] sm:$0xff] %v14716_v61  ;;  %5551 = vmatprep.mubr.f32.mxu1 %v18226_v17  ;;  %v14733_v61 = vld [vmem:[#allocation2 + $0x25a] sm:$0xff]  ;;  %v14741_v11 = vld [vmem:[#allocation2 + $0x262] sm:$0xff] }
 0x5e4   :  { %18224 = vst [vmem:[#allocation59_spill] sm:$0xff] %v14722_v24  ;;  %v4678_v57 = vpop.f32.mrb[66].mxu0  ;;  %18228 = vst [vmem:[#allocation11_spill] sm:$0xff] %v14733_v61  ;;  %v18231_v56 = vld [vmem:[#allocation63_spill] sm:$0xff] }
 0x5e5   :  { %v14730_v2 = vadd.f32 %v14423_v12, %v4678_v57  ;;  %v5288_v27 = vpop.f32.mrb[130].mxu1  ;;  %v4680_v0 = vpop.f32.mrb[67].mxu0  ;;  %9085 = vmatmul.mubr.f32.gmra.mrb[172].mxu0 %v14727_v30  ;;  %v18232_v22 = vld [vmem:[#allocation7_spill] sm:$0xff] }
 0x5e6   :  { %v14736_v9 = vadd.f32 %v5288_v27, %v18229_v35  ;;  %5552 = vmatmul.mubr.f32.gmra.mrb[236].mxu1 %v18231_v56  ;;  %9087 = vmatprep.mubr.f32.mxu0 %v14733_v61  ;;  %v5290_v17 = vpop.f32.mrb[131].mxu1  ;;  %v18235_v27 = vld [vmem:[#allocation4_spill] sm:$0xff]  ;;  %v14755_v61 = vld [vmem:[#allocation2 + $0x27a] sm:$0xff] }
 0x5e7   :  { %18227 = vst [vmem:[#allocation13_spill] sm:$0xff] %v14730_v2  ;;  %5556 = vmatprep.mubr.f32.mxu1 %v18232_v22  ;;  %v14747_v2 = vld [vmem:[#allocation2 + $0x272] sm:$0xff]  ;;  %18239 = vst [vmem:[#allocation7_spill] sm:$0xff] %v14755_v61 }
 0x5e8   :  { %18230 = vst [vmem:[#allocation61_spill] sm:$0xff] %v14736_v9  ;;  %v4683_v24 = vpop.f32.mrb[68].mxu0  ;;  %18234 = vst [vmem:[#allocation15_spill] sm:$0xff] %v14747_v2  ;;  %v18237_v9 = vld [vmem:[#allocation64_spill] sm:$0xff]  ;;  %v18238_v17 = vld [vmem:[#allocation9_spill] sm:$0xff] }
 0x5e9   :  { %v14744_v12 = vadd.f32 %v14453_v10, %v4683_v24  ;;  %v5293_v57 = vpop.f32.mrb[132].mxu1  ;;  %v4685_v0 = vpop.f32.mrb[69].mxu0  ;;  %9088 = vmatmul.mubr.f32.gmra.mrb[174].mxu0 %v14741_v11 }
 0x5ea   :  { %v14750_v35 = vadd.f32 %v5293_v57, %v18235_v27  ;;  %v5295_v56 = vpop.f32.mrb[133].mxu1  ;;  %5557 = vmatmul.mubr.f32.gmra.mrb[238].mxu1 %v18237_v9  ;;  %9090 = vmatprep.mubr.f32.mxu0 %v14747_v2  ;;  %v18242_v57 = vld [vmem:[#allocation19_spill] sm:$0xff]  ;;  %v14769_v2 = vld [vmem:[#allocation2 + $0x292] sm:$0xff] }
 0x5eb   :  { %18233 = vst [vmem:[#allocation57_spill] sm:$0xff] %v14744_v12  ;;  %5561 = vmatprep.mubr.f32.mxu1 %v18238_v17  ;;  %v14761_v12 = vld [vmem:[#allocation2 + $0x28a] sm:$0xff]  ;;  %v18243_v56 = vld [vmem:[#allocation14_spill] sm:$0xff]  ;;  %18245 = vst [vmem:[#allocation9_spill] sm:$0xff] %v14769_v2 }
 0x5ec   :  { %18236 = vst [vmem:[#allocation63_spill] sm:$0xff] %v14750_v35  ;;  %v4688_v22 = vpop.f32.mrb[70].mxu0  ;;  %18241 = vst [vmem:[#allocation64_spill] sm:$0xff] %v14761_v12  ;;  %v18244_v17 = vld [vmem:[#allocation20_spill] sm:$0xff] }
 0x5ed   :  { %v14758_v10 = vadd.f32 %v14445_v21, %v4688_v22  ;;  %v5298_v24 = vpop.f32.mrb[134].mxu1  ;;  %v4690_v0 = vpop.f32.mrb[71].mxu0  ;;  %9091 = vmatmul.mubr.f32.gmra.mrb[176].mxu0 %v14755_v61  ;;  %v14782_v61 = vld [vmem:[#allocation2 + $0x2aa] sm:$0xff] }
 0x5ee   :  { %v14764_v27 = vadd.f32 %v5298_v24, %v18242_v57  ;;  %v5300_v9 = vpop.f32.mrb[135].mxu1  ;;  %5562 = vmatmul.mubr.f32.gmra.mrb[240].mxu1 %v18243_v56  ;;  %9093 = vmatprep.mubr.f32.mxu0 %v14761_v12  ;;  %v14775_v24 = vld [vmem:[#allocation2 + $0x2a2] sm:$0xff]  ;;  %18250 = vst [vmem:[#allocation20_spill] sm:$0xff] %v14782_v61 }
 0x5ef   :  { %18240 = vst [vmem:[#allocation4_spill] sm:$0xff] %v14758_v10  ;;  %5566 = vmatprep.mubr.f32.mxu1 %v18244_v17  ;;  %v4023_v10 = vld [vmem:[#allocation2 + $0x2d8] sm:$0xff]  ;;  %18247 = vst [vmem:[#allocation14_spill] sm:$0xff] %v14775_v24  ;;  %v18248_v57 = vld [vmem:[#allocation27_spill] sm:$0xff] }
 0x5f0   :  { %v4693_v35 = vpop.f32.mrb[72].mxu0  ;;  %v18249_v17 = vld [vmem:[#allocation16_spill] sm:$0xff] }
 0x5f1   :  { %v14772_v21 = vadd.f32 %v14475_v46, %v4693_v35  ;;  %v5303_v22 = vpop.f32.mrb[136].mxu1  ;;  %v4695_v0 = vpop.f32.mrb[73].mxu0  ;;  %9094 = vmatmul.mubr.f32.gmra.mrb[178].mxu0 %v14769_v2  ;;  %v14788_v2 = vld [vmem:[#allocation2 + $0x2ba] sm:$0xff] }
 0x5f2   :  { %v14778_v9 = vadd.f32 %v5303_v22, %v18248_v57  ;;  %v5305_v56 = vpop.f32.mrb[137].mxu1  ;;  %5567 = vmatmul.mubr.f32.gmra.mrb[242].mxu1 %v4023_v10  ;;  %9096 = vmatprep.mubr.f32.mxu0 %v14775_v24  ;;  %18252 = vst [vmem:[#allocation16_spill] sm:$0xff] %v14788_v2  ;;  %v18253_v22 = vld [vmem:[#allocation21_spill] sm:$0xff]  ;;  %v14795_v24 = vld [vmem:[#allocation2 + $0x2c2] sm:$0xff] }
 0x5f3   :  { %18246 = vst [vmem:[#allocation19_spill] sm:$0xff] %v14772_v21  ;;  %5571 = vmatprep.mubr.f32.mxu1 %v18249_v17  ;;  %v4024_v21 = vld [vmem:[#allocation2 + $0x2e8] sm:$0xff]  ;;  %v18254_v56 = vld [vmem:[#allocation18_spill] sm:$0xff]  ;;  %18255 = vst [vmem:[#allocation21_spill] sm:$0xff] %v14795_v24 }
 0x5f4   :  { %v4698_v12 = vpop.f32.mrb[74].mxu0 }
 0x5f5   :  { %v14785_v46 = vadd.f32 %v14467_v49, %v4698_v12  ;;  %v5308_v35 = vpop.f32.mrb[138].mxu1  ;;  %v4700_v0 = vpop.f32.mrb[75].mxu0  ;;  %9097 = vmatmul.mubr.f32.gmra.mrb[180].mxu0 %v14782_v61  ;;  %v14801_v61 = vld [vmem:[#allocation2 + $0x2d2] sm:$0xff] }
 0x5f6   :  { %v14791_v57 = vadd.f32 %v5308_v35, %v18253_v22  ;;  %v5310_v10 = vpop.f32.mrb[139].mxu1  ;;  %5572 = vmatmul.mubr.f32.gmra.mrb[244].mxu1 %v4024_v21  ;;  %9099 = vmatprep.mubr.f32.mxu0 %v14788_v2  ;;  %18257 = vst [vmem:[#allocation65_spill] sm:$0xff] %v14801_v61  ;;  %v18258_v35 = vld [vmem:[#allocation22_spill] sm:$0xff] }
 0x5f7   :  { %18251 = vst [vmem:[#allocation27_spill] sm:$0xff] %v14785_v46  ;;  %5576 = vmatprep.mubr.f32.mxu1 %v18254_v56  ;;  %v4025_v46 = vld [vmem:[#allocation2 + $0x2f0] sm:$0xff]  ;;  %v4090_v10 = vld [vmem:[#allocation2 + $0x301] sm:$0xff] }
 0x5f8   :  { %v4703_v17 = vpop.f32.mrb[76].mxu0  ;;  %v14807_v2 = vld [vmem:[#allocation2 + $0x2da] sm:$0xff] }
 0x5f9   :  { %v14798_v49 = vadd.f32 %v14497_v53, %v4703_v17  ;;  %v5313_v12 = vpop.f32.mrb[140].mxu1  ;;  %v4705_v0 = vpop.f32.mrb[77].mxu0  ;;  %9100 = vmatmul.mubr.f32.gmra.mrb[182].mxu0 %v14795_v24  ;;  %18259 = vst [vmem:[#allocation22_spill] sm:$0xff] %v14807_v2  ;;  %v14813_v24 = vld [vmem:[#allocation2 + $0x2ea] sm:$0xff] }
 0x5fa   :  { %v14804_v22 = vadd.f32 %v5313_v12, %v18258_v35  ;;  %v5315_v21 = vpop.f32.mrb[141].mxu1  ;;  %5577 = vmatmul.mubr.f32.gmra.mrb[246].mxu1 %v4025_v46  ;;  %9102 = vmatprep.mubr.f32.mxu0 %v14801_v61  ;;  %18261 = vst [vmem:[#allocation67_spill] sm:$0xff] %v14813_v24  ;;  %v18262_v12 = vld [vmem:[#allocation24_spill] sm:$0xff]  ;;  %v14819_v61 = vld [vmem:[#allocation2 + $0x2f2] sm:$0xff] }
 0x5fb   :  { %18256 = vst [vmem:[#allocation18_spill] sm:$0xff] %v14798_v49  ;;  %5581 = vmatprep.mubr.f32.mxu1 %v4090_v10  ;;  %v4026_v49 = vld [vmem:[#allocation2 + $0x300] sm:$0xff]  ;;  %v4091_v21 = vld [vmem:[#allocation2 + $0x309] sm:$0xff]  ;;  %18263 = vst [vmem:[#allocation24_spill] sm:$0xff] %v14819_v61 }
 0x5fc   :  { %v4708_v56 = vpop.f32.mrb[78].mxu0 }
 0x5fd   :  { %v14810_v53 = vadd.f32 %v14489_v7, %v4708_v56  ;;  %v5318_v17 = vpop.f32.mrb[142].mxu1  ;;  %v4710_v0 = vpop.f32.mrb[79].mxu0  ;;  %9103 = vmatmul.mubr.f32.gmra.mrb[184].mxu0 %v14807_v2  ;;  %v14825_v2 = vld [vmem:[#allocation2 + $0x302] sm:$0xff] }
 0x5fe   :  { %v14816_v35 = vadd.f32 %v5318_v17, %v18262_v12  ;;  %v5320_v46 = vpop.f32.mrb[143].mxu1  ;;  %5582 = vmatmul.mubr.f32.gmra.mrb[248].mxu1 %v4026_v49  ;;  %9105 = vmatprep.mubr.f32.mxu0 %v14813_v24  ;;  %18265 = vst [vmem:[#allocation69_spill] sm:$0xff] %v14825_v2  ;;  %v18266_v17 = vld [vmem:[#allocation25_spill] sm:$0xff] }
 0x5ff   :  { %18260 = vst [vmem:[#allocation66_spill] sm:$0xff] %v14810_v53  ;;  %5586 = vmatprep.mubr.f32.mxu1 %v4091_v21  ;;  %v4027_v53 = vld [vmem:[#allocation2 + $0x308] sm:$0xff]  ;;  %v4092_v46 = vld [vmem:[#allocation2 + $0x319] sm:$0xff] }
 0x600   :  { %v4713_v10 = vpop.f32.mrb[80].mxu0  ;;  %v14831_v24 = vld [vmem:[#allocation2 + $0x30a] sm:$0xff] }
 0x601   :  { %v14822_v7 = vadd.f32 %v14519_v1, %v4713_v10  ;;  %v5323_v56 = vpop.f32.mrb[144].mxu1  ;;  %v4715_v0 = vpop.f32.mrb[81].mxu0  ;;  %9106 = vmatmul.mubr.f32.gmra.mrb[186].mxu0 %v14819_v61  ;;  %18268 = vst [vmem:[#allocation70_spill] sm:$0xff] %v14831_v24  ;;  %v14837_v61 = vld [vmem:[#allocation2 + $0x31a] sm:$0xff] }
 0x602   :  { %v14828_v12 = vadd.f32 %v5323_v56, %v18266_v17  ;;  %v5325_v49 = vpop.f32.mrb[145].mxu1  ;;  %5587 = vmatmul.mubr.f32.gmra.mrb[250].mxu1 %v4027_v53  ;;  %9108 = vmatprep.mubr.f32.mxu0 %v14825_v2  ;;  %18270 = vst [vmem:[#allocation72_spill] sm:$0xff] %v14837_v61  ;;  %v18271_v56 = vld [vmem:[#allocation26_spill] sm:$0xff]  ;;  %v14843_v2 = vld [vmem:[#allocation2 + $0x322] sm:$0xff] }
 0x603   :  { %18264 = vst [vmem:[#allocation68_spill] sm:$0xff] %v14822_v7  ;;  %5591 = vmatprep.mubr.f32.mxu1 %v4092_v46  ;;  %v4028_v7 = vld [vmem:[#allocation2 + $0x318] sm:$0xff]  ;;  %v4093_v49 = vld [vmem:[#allocation2 + $0x321] sm:$0xff]  ;;  %18272 = vst [vmem:[#allocation26_spill] sm:$0xff] %v14843_v2 }
 0x604   :  { %18267 = vst [vmem:[#allocation25_spill] sm:$0xff] %v14828_v12  ;;  %v4718_v21 = vpop.f32.mrb[82].mxu0 }
 0x605   :  { %v14834_v1 = vadd.f32 %v14511_v13, %v4718_v21  ;;  %v5328_v10 = vpop.f32.mrb[146].mxu1  ;;  %v4720_v0 = vpop.f32.mrb[83].mxu0  ;;  %9109 = vmatmul.mubr.f32.gmra.mrb[188].mxu0 %v14831_v24  ;;  %v6051_v24 = vld [vmem:[#allocation2 + $0x31] sm:$0xff] }
 0x606   :  { %v14840_v17 = vadd.f32 %v5328_v10, %v18271_v56  ;;  %v5330_v53 = vpop.f32.mrb[147].mxu1  ;;  %5592 = vmatmul.mubr.f32.gmra.mrb[252].mxu1 %v4028_v7  ;;  %9111 = vmatprep.mubr.f32.mxu0 %v14837_v61  ;;  %v18274_v10 = vld [vmem:[#allocation5_spill] sm:$0xff] }
 0x607   :  { %18269 = vst [vmem:[#allocation71_spill] sm:$0xff] %v14834_v1  ;;  %5596 = vmatprep.mubr.f32.mxu1 %v4093_v49  ;;  %v4029_v1 = vld [vmem:[#allocation2 + $0x320] sm:$0xff]  ;;  %v5987_v49 = vld [vmem:[#allocation2 + $0x30] sm:$0xff] }
 0x608   :  { %v4723_v46 = vpop.f32.mrb[84].mxu0 }
 0x609   :  { %v14846_v13 = vadd.f32 %v14541_v45, %v4723_v46  ;;  %v5333_v21 = vpop.f32.mrb[148].mxu1  ;;  %v4725_v0 = vpop.f32.mrb[85].mxu0  ;;  %9112 = vmatmul.mubr.f32.gmra.mrb[190].mxu0 %v14843_v2 }
 0x60a   :  { %v14850_v56 = vadd.f32 %v5333_v21, %v18274_v10  ;;  %v5335_v7 = vpop.f32.mrb[149].mxu1  ;;  %5597 = vmatmul.mubr.f32.gmra.mrb[254].mxu1 %v4029_v1  ;;  %6292 = vmatprep.mubr.f32.mxu0 %v6051_v24  ;;  %v6052_v0 = vld [vmem:[#allocation2 + $0x39] sm:$0xff] }
 0x60b   :  { %18273 = vst [vmem:[#allocation73_spill] sm:$0xff] %v14846_v13  ;;  %9146 = vmatprep.mubr.f32.mxu1 %v14340_v6  ;;  %v18275_v13 = vld [vmem:[#allocation29_spill] sm:$0xff]  ;;  %v18276_v1 = vld [vmem:[#allocation30_spill] sm:$0xff] }
 0x60c   :  { %v4728_v53 = vpop.f32.mrb[86].mxu0  ;;  %v5988_v6 = vld [vmem:[#allocation2 + $0x38] sm:$0xff]  ;;  %v6053_v7 = vld [vmem:[#allocation2 + $0x49] sm:$0xff] }
 0x60d   :  { %v14854_v61 = vadd.f32 %v14533_v28, %v4728_v53  ;;  %v5338_v45 = vpop.f32.mrb[150].mxu1  ;;  %v4730_v46 = vpop.f32.mrb[87].mxu0  ;;  %6293 = vmatmul.mubr.f32.vlgmr.msra.gmra.mrb[192].mxu0 %v5987_v49  ;;  %v18277_v53 = vld [vmem:[#allocation3_spill] sm:$0xff] }
 0x60e   :  { %v14857_v2 = vadd.f32 %v5338_v45, %v18275_v13  ;;  %v5340_v12 = vpop.f32.mrb[151].mxu1  ;;  %9147 = vmatmul.mubr.f32.vlgmr.msra.gmra.mrb[0].mxu1 %v14349_v39  ;;  %6297 = vmatprep.mubr.f32.mxu0 %v6052_v0  ;;  %v18278_v39 = vld [vmem:[#allocation32_spill] sm:$0xff] }
 0x60f   :  { %9149 = vmatprep.mubr.f32.mxu1 %v18276_v1  ;;  %v5989_v45 = vld [vmem:[#allocation2 + $0x48] sm:$0xff]  ;;  %v6054_v1 = vld [vmem:[#allocation2 + $0x51] sm:$0xff] }
 0x610   :  { %v4733_v24 = vpop.f32.mrb[88].mxu0 }
 0x611   :  { %v14862_v21 = vadd.f32 %v14563_v47, %v4733_v24  ;;  %v5343_v28 = vpop.f32.mrb[152].mxu1  ;;  %v4735_v10 = vpop.f32.mrb[89].mxu0  ;;  %6298 = vmatmul.mubr.f32.gmra.mrb[194].mxu0 %v5988_v6  ;;  %v18279_v24 = vld [vmem:[#allocation31_spill] sm:$0xff] }
 0x612   :  { %v14865_v49 = vadd.f32 %v5343_v28, %v18277_v53  ;;  %v5345_v13 = vpop.f32.mrb[153].mxu1  ;;  %9150 = vmatmul.mubr.f32.gmra.mrb[2].mxu1 %v14370_v63  ;;  %6302 = vmatprep.mubr.f32.mxu0 %v6053_v7  ;;  %v18280_v63 = vld [vmem:[#allocation37_spill] sm:$0xff] }
 0x613   :  { %9152 = vmatprep.mubr.f32.mxu1 %v18278_v39  ;;  %v5990_v7 = vld [vmem:[#allocation2 + $0x50] sm:$0xff]  ;;  %v6055_v39 = vld [vmem:[#allocation2 + $0x61] sm:$0xff] }
 0x614   :  { %v4738_v12 = vpop.f32.mrb[90].mxu0 }
 0x615   :  { %v14870_v46 = vadd.f32 %v14555_v29, %v4738_v12  ;;  %v5348_v47 = vpop.f32.mrb[154].mxu1  ;;  %v4740_v0 = vpop.f32.mrb[91].mxu0  ;;  %6303 = vmatmul.mubr.f32.gmra.mrb[196].mxu0 %v5989_v45  ;;  %v18281_v12 = vld [vmem:[#allocation33_spill] sm:$0xff] }
 0x616   :  { %v14873_v6 = vadd.f32 %v5348_v47, %v18279_v24  ;;  %v5350_v28 = vpop.f32.mrb[155].mxu1  ;;  %9153 = vmatmul.mubr.f32.gmra.mrb[4].mxu1 %v14392_v42  ;;  %6307 = vmatprep.mubr.f32.mxu0 %v6054_v1  ;;  %v18282_v42 = vld [vmem:[#allocation35_spill] sm:$0xff] }
 0x617   :  { %9155 = vmatprep.mubr.f32.mxu1 %v18280_v63  ;;  %v5991_v1 = vld [vmem:[#allocation2 + $0x60] sm:$0xff]  ;;  %v6056_v63 = vld [vmem:[#allocation2 + $0x69] sm:$0xff] }
 0x618   :  { %v4743_v10 = vpop.f32.mrb[92].mxu0 }
 0x619   :  { %v14878_v53 = vadd.f32 %v14585_v55, %v4743_v10  ;;  %v5353_v29 = vpop.f32.mrb[156].mxu1  ;;  %v4745_v13 = vpop.f32.mrb[93].mxu0  ;;  %6308 = vmatmul.mubr.f32.gmra.mrb[198].mxu0 %v5990_v7  ;;  %v18283_v10 = vld [vmem:[#allocation34_spill] sm:$0xff] }
 0x61a   :  { %v14881_v45 = vadd.f32 %v5353_v29, %v18281_v12  ;;  %v5355_v47 = vpop.f32.mrb[157].mxu1  ;;  %9156 = vmatmul.mubr.f32.gmra.mrb[6].mxu1 %v14414_v32  ;;  %6312 = vmatprep.mubr.f32.mxu0 %v6055_v39  ;;  %v18284_v32 = vld [vmem:[#allocation45_spill] sm:$0xff]  ;;  %v5992_v39 = vld [vmem:[#allocation2 + $0x68] sm:$0xff] }
 0x61b   :  { %9158 = vmatprep.mubr.f32.mxu1 %v18282_v42  ;;  %v6057_v42 = vld [vmem:[#allocation2 + $0x79] sm:$0xff] }
 0x61c   :  { %v4748_v0 = vpop.f32.mrb[94].mxu0 }
 0x61d   :  { %v14886_v24 = vadd.f32 %v14577_v60, %v4748_v0  ;;  %v5358_v55 = vpop.f32.mrb[158].mxu1  ;;  %v4750_v28 = vpop.f32.mrb[95].mxu0  ;;  %6313 = vmatmul.mubr.f32.gmra.mrb[200].mxu0 %v5991_v1  ;;  %v18285_v0 = vld [vmem:[#allocation43_spill] sm:$0xff] }
 0x61e   :  { %v14889_v7 = vadd.f32 %v5358_v55, %v18283_v10  ;;  %v5360_v29 = vpop.f32.mrb[159].mxu1  ;;  %9159 = vmatmul.mubr.f32.gmra.mrb[8].mxu1 %v14436_v4  ;;  %6317 = vmatprep.mubr.f32.mxu0 %v6056_v63  ;;  %v18286_v4 = vld [vmem:[#allocation44_spill] sm:$0xff]  ;;  %v5993_v63 = vld [vmem:[#allocation2 + $0x78] sm:$0xff] }
 0x61f   :  { %9161 = vmatprep.mubr.f32.mxu1 %v18284_v32  ;;  %v6058_v32 = vld [vmem:[#allocation2 + $0x81] sm:$0xff] }
 0x620   :  { %v4753_v13 = vpop.f32.mrb[96].mxu0 }
 0x621   :  { %v14894_v12 = vadd.f32 %v14607_v16, %v4753_v13  ;;  %v5363_v60 = vpop.f32.mrb[160].mxu1  ;;  %v4755_v47 = vpop.f32.mrb[97].mxu0  ;;  %6318 = vmatmul.mubr.f32.gmra.mrb[202].mxu0 %v5992_v39  ;;  %v18287_v13 = vld [vmem:[#allocation46_spill] sm:$0xff] }
 0x622   :  { %v14897_v1 = vadd.f32 %v5363_v60, %v18285_v0  ;;  %v5365_v55 = vpop.f32.mrb[161].mxu1  ;;  %9162 = vmatmul.mubr.f32.gmra.mrb[10].mxu1 %v14458_v40  ;;  %6322 = vmatprep.mubr.f32.mxu0 %v6057_v42  ;;  %v18288_v40 = vld [vmem:[#allocation50_spill] sm:$0xff]  ;;  %v5994_v42 = vld [vmem:[#allocation2 + $0x80] sm:$0xff] }
 0x623   :  { %9164 = vmatprep.mubr.f32.mxu1 %v18286_v4  ;;  %v6059_v4 = vld [vmem:[#allocation2 + $0x91] sm:$0xff] }
 0x624   :  { %v4758_v28 = vpop.f32.mrb[98].mxu0 }
 0x625   :  { %v14902_v10 = vadd.f32 %v14599_v54, %v4758_v28  ;;  %v5368_v16 = vpop.f32.mrb[162].mxu1  ;;  %v4760_v29 = vpop.f32.mrb[99].mxu0  ;;  %6323 = vmatmul.mubr.f32.gmra.mrb[204].mxu0 %v5993_v63  ;;  %v18289_v28 = vld [vmem:[#allocation52_spill] sm:$0xff] }
 0x626   :  { %v14905_v39 = vadd.f32 %v5368_v16, %v18287_v13  ;;  %v5370_v60 = vpop.f32.mrb[163].mxu1  ;;  %9165 = vmatmul.mubr.f32.gmra.mrb[12].mxu1 %v14480_v44  ;;  %6327 = vmatprep.mubr.f32.mxu0 %v6058_v32  ;;  %v18290_v44 = vld [vmem:[#allocation54_spill] sm:$0xff]  ;;  %v5995_v32 = vld [vmem:[#allocation2 + $0x90] sm:$0xff] }
 0x627   :  { %9167 = vmatprep.mubr.f32.mxu1 %v18288_v40  ;;  %v6060_v40 = vld [vmem:[#allocation2 + $0x99] sm:$0xff] }
 0x628   :  { %v4763_v47 = vpop.f32.mrb[100].mxu0 }
 0x629   :  { %v14910_v0 = vadd.f32 %v14629_v48, %v4763_v47  ;;  %v5373_v54 = vpop.f32.mrb[164].mxu1  ;;  %v4765_v55 = vpop.f32.mrb[101].mxu0  ;;  %6328 = vmatmul.mubr.f32.gmra.mrb[206].mxu0 %v5994_v42  ;;  %v18291_v47 = vld [vmem:[#allocation42_spill] sm:$0xff] }
 0x62a   :  { %v14913_v63 = vadd.f32 %v5373_v54, %v18289_v28  ;;  %v5375_v16 = vpop.f32.mrb[165].mxu1  ;;  %9168 = vmatmul.mubr.f32.gmra.mrb[14].mxu1 %v14502_v51  ;;  %6332 = vmatprep.mubr.f32.mxu0 %v6059_v4  ;;  %v18292_v51 = vld [vmem:[#allocation47_spill] sm:$0xff]  ;;  %v5996_v4 = vld [vmem:[#allocation2 + $0x98] sm:$0xff] }
 0x62b   :  { %9170 = vmatprep.mubr.f32.mxu1 %v18290_v44  ;;  %v6061_v44 = vld [vmem:[#allocation2 + $0xa9] sm:$0xff] }
 0x62c   :  { %v4768_v29 = vpop.f32.mrb[102].mxu0 }
 0x62d   :  { %v14918_v13 = vadd.f32 %v14621_v23, %v4768_v29  ;;  %v5378_v48 = vpop.f32.mrb[166].mxu1  ;;  %v4770_v60 = vpop.f32.mrb[103].mxu0  ;;  %6333 = vmatmul.mubr.f32.gmra.mrb[208].mxu0 %v5995_v32  ;;  %v18293_v29 = vld [vmem:[#allocation48_spill] sm:$0xff] }
 0x62e   :  { %v14921_v42 = vadd.f32 %v5378_v48, %v18291_v47  ;;  %v5380_v54 = vpop.f32.mrb[167].mxu1  ;;  %9171 = vmatmul.mubr.f32.gmra.mrb[16].mxu1 %v14524_v36  ;;  %6337 = vmatprep.mubr.f32.mxu0 %v6060_v40  ;;  %v18294_v36 = vld [vmem:[#allocation17_spill] sm:$0xff]  ;;  %v5997_v40 = vld [vmem:[#allocation2 + $0xa8] sm:$0xff] }
 0x62f   :  { %9173 = vmatprep.mubr.f32.mxu1 %v18292_v51  ;;  %v6062_v51 = vld [vmem:[#allocation2 + $0xb1] sm:$0xff] }
 0x630   :  { %v4773_v55 = vpop.f32.mrb[104].mxu0 }
 0x631   :  { %v14926_v28 = vadd.f32 %v14643_v5, %v4773_v55  ;;  %v5383_v23 = vpop.f32.mrb[168].mxu1  ;;  %v4775_v16 = vpop.f32.mrb[105].mxu0  ;;  %6338 = vmatmul.mubr.f32.gmra.mrb[210].mxu0 %v5996_v4  ;;  %v18295_v55 = vld [vmem:[#allocation56_spill] sm:$0xff] }
 0x632   :  { %v14929_v32 = vadd.f32 %v5383_v23, %v18293_v29  ;;  %v5385_v48 = vpop.f32.mrb[169].mxu1  ;;  %9174 = vmatmul.mubr.f32.gmra.mrb[18].mxu1 %v14546_v58  ;;  %6342 = vmatprep.mubr.f32.mxu0 %v6061_v44  ;;  %v18296_v58 = vld [vmem:[#allocation23_spill] sm:$0xff]  ;;  %v5998_v44 = vld [vmem:[#allocation2 + $0xb0] sm:$0xff] }
 0x633   :  { %9176 = vmatprep.mubr.f32.mxu1 %v18294_v36  ;;  %v6063_v36 = vld [vmem:[#allocation2 + $0xc1] sm:$0xff] }
 0x634   :  { %v4778_v60 = vpop.f32.mrb[106].mxu0 }
 0x635   :  { %v14934_v47 = vadd.f32 %v14637_v34, %v4778_v60  ;;  %v5388_v5 = vpop.f32.mrb[170].mxu1  ;;  %v4780_v54 = vpop.f32.mrb[107].mxu0  ;;  %6343 = vmatmul.mubr.f32.gmra.mrb[212].mxu0 %v5997_v40  ;;  %v18297_v60 = vld [vmem:[#allocation6_spill] sm:$0xff] }
 0x636   :  { %v14937_v4 = vadd.f32 %v5388_v5, %v18295_v55  ;;  %v5390_v23 = vpop.f32.mrb[171].mxu1  ;;  %9177 = vmatmul.mubr.f32.gmra.mrb[20].mxu1 %v14568_v15  ;;  %6347 = vmatprep.mubr.f32.mxu0 %v6062_v51  ;;  %v18298_v15 = vld [vmem:[#allocation60_spill] sm:$0xff]  ;;  %v5999_v51 = vld [vmem:[#allocation2 + $0xc0] sm:$0xff] }
 0x637   :  { %9179 = vmatprep.mubr.f32.mxu1 %v18296_v58  ;;  %v6064_v58 = vld [vmem:[#allocation2 + $0xc9] sm:$0xff] }
 0x638   :  { %v4783_v16 = vpop.f32.mrb[108].mxu0 }
 0x639   :  { %v14942_v29 = vadd.f32 %v14652_v37, %v4783_v16  ;;  %v5393_v34 = vpop.f32.mrb[172].mxu1  ;;  %v4785_v48 = vpop.f32.mrb[109].mxu0  ;;  %6348 = vmatmul.mubr.f32.gmra.mrb[214].mxu0 %v5998_v44  ;;  %v18299_v16 = vld [vmem:[#allocation58_spill] sm:$0xff] }
 0x63a   :  { %v14945_v40 = vadd.f32 %v5393_v34, %v18297_v60  ;;  %v5395_v5 = vpop.f32.mrb[173].mxu1  ;;  %9180 = vmatmul.mubr.f32.gmra.mrb[22].mxu1 %v14590_v25  ;;  %6352 = vmatprep.mubr.f32.mxu0 %v6063_v36  ;;  %v18300_v48 = vld [vmem:[#allocation36_spill] sm:$0xff] }
 0x63b   :  { %9182 = vmatprep.mubr.f32.mxu1 %v18298_v15  ;;  %v6000_v36 = vld [vmem:[#allocation2 + $0xc8] sm:$0xff]  ;;  %v6065_v15 = vld [vmem:[#allocation2 + $0xd9] sm:$0xff] }
 0x63c   :  { %v4788_v54 = vpop.f32.mrb[110].mxu0 }
 0x63d   :  { %v14950_v55 = vadd.f32 %v14647_v50, %v4788_v54  ;;  %v5398_v37 = vpop.f32.mrb[174].mxu1  ;;  %v4790_v23 = vpop.f32.mrb[111].mxu0  ;;  %6353 = vmatmul.mubr.f32.gmra.mrb[216].mxu0 %v5999_v51  ;;  %v18301_v54 = vld [vmem:[#allocation51_spill] sm:$0xff] }
 0x63e   :  { %v14953_v44 = vadd.f32 %v5398_v37, %v18299_v16  ;;  %v5400_v34 = vpop.f32.mrb[175].mxu1  ;;  %9183 = vmatmul.mubr.f32.gmra.mrb[24].mxu1 %v18300_v48  ;;  %6357 = vmatprep.mubr.f32.mxu0 %v6064_v58  ;;  %v6143_v23 = vld [vmem:[#allocation2 + $0x182] sm:$0xff]  ;;  %v6145_v16 = vld [vmem:[#allocation2 + $0x19a] sm:$0xff] }
 0x63f   :  { %9185 = vmatprep.mubr.f32.mxu1 %v14624_v43  ;;  %v6001_v43 = vld [vmem:[#allocation2 + $0xd8] sm:$0xff] }
 0x640   :  { %v4793_v25 = vpop.f32.mrb[112].mxu0 }
 0x641   :  { %v14958_v60 = vadd.f32 %v14663_v38, %v4793_v25  ;;  %v5403_v50 = vpop.f32.mrb[176].mxu1  ;;  %v4795_v5 = vpop.f32.mrb[113].mxu0  ;;  %6358 = vmatmul.mubr.f32.gmra.mrb[218].mxu0 %v6000_v36  ;;  %v6144_v25 = vld [vmem:[#allocation2 + $0x18a] sm:$0xff]  ;;  %v6066_v36 = vld [vmem:[#allocation2 + $0xe1] sm:$0xff] }
 0x642   :  { %v14961_v51 = vadd.f32 %v5403_v50, %v18301_v54  ;;  %v5405_v37 = vpop.f32.mrb[177].mxu1  ;;  %9186 = vmatmul.mubr.f32.gmra.mrb[26].mxu1 %v14634_v33  ;;  %6362 = vmatprep.mubr.f32.mxu0 %v6065_v15  ;;  %v6146_v33 = vld [vmem:[#allocation2 + $0x1a2] sm:$0xff] }
 0x643   :  { %9188 = vmatprep.mubr.f32.mxu1 %v6143_v23  ;;  %v6002_v54 = vld [vmem:[#allocation2 + $0xe0] sm:$0xff] }
 0x644   :  { %v4798_v58 = vpop.f32.mrb[114].mxu0 }
 0x645   :  { %v14965_v34 = vadd.f32 %v14656_v26, %v4798_v58  ;;  %v5408_v38 = vpop.f32.mrb[178].mxu1  ;;  %v4800_v48 = vpop.f32.mrb[115].mxu0  ;;  %6363 = vmatmul.mubr.f32.gmra.mrb[220].mxu0 %v6001_v43  ;;  %v6067_v58 = vld [vmem:[#allocation2 + $0xf1] sm:$0xff] }
 0x646   :  { %v14968_v50 = vadd.f32 %v5408_v38, %v14627_v62  ;;  %v5410_v5 = vpop.f32.mrb[179].mxu1  ;;  %9189 = vmatmul.mubr.f32.gmra.mrb[28].mxu1 %v6144_v25  ;;  %6367 = vmatprep.mubr.f32.mxu0 %v6066_v36  ;;  %v6068_v36 = vld [vmem:[#allocation2 + $0xf9] sm:$0xff] }
 0x647   :  { %9191 = vmatprep.mubr.f32.mxu1 %v6145_v16  ;;  %v6003_v16 = vld [vmem:[#allocation2 + $0xf0] sm:$0xff] }
 0x648   :  { %v4803_v15 = vpop.f32.mrb[116].mxu0 }
 0x649   :  { %v14971_v37 = vadd.f32 %v14678_v8, %v4803_v15  ;;  %v5413_v26 = vpop.f32.mrb[180].mxu1  ;;  %v4805_v23 = vpop.f32.mrb[117].mxu0  ;;  %6368 = vmatmul.mubr.f32.gmra.mrb[222].mxu0 %v6002_v54 }
 0x64a   :  { %v14974_v43 = vadd.f32 %v5413_v26, %v14641_v19  ;;  %v5415_v48 = vpop.f32.mrb[181].mxu1  ;;  %9192 = vmatmul.mubr.f32.gmra.mrb[30].mxu1 %v6146_v33  ;;  %6372 = vmatprep.mubr.f32.mxu0 %v6067_v58  ;;  %v6069_v26 = vld [vmem:[#allocation2 + $0x109] sm:$0xff] }
 0x64b   :  { %9194 = vmatprep.mubr.f32.mxu1 %v14658_v18  ;;  %v6004_v18 = vld [vmem:[#allocation2 + $0xf8] sm:$0xff]  ;;  %v18302_v58 = vld [vmem:[#allocation40_spill] sm:$0xff] }
 0x64c   :  { %v4808_v62 = vpop.f32.mrb[118].mxu0 }
 0x64d   :  { %v14978_v38 = vadd.f32 %v14670_v20, %v4808_v62  ;;  %v5418_v25 = vpop.f32.mrb[182].mxu1  ;;  %v4810_v8 = vpop.f32.mrb[119].mxu0  ;;  %6373 = vmatmul.mubr.f32.gmra.mrb[224].mxu0 %v6003_v16  ;;  %v18304_v62 = vld [vmem:[#allocation39_spill] sm:$0xff] }
 0x64e   :  { %v14981_v5 = vadd.f32 %v5418_v25, %v14650_v59  ;;  %v5420_v15 = vpop.f32.mrb[183].mxu1  ;;  %9195 = vmatmul.mubr.f32.gmra.mrb[32].mxu1 %v14668_v14  ;;  %6377 = vmatprep.mubr.f32.mxu0 %v6068_v36  ;;  %v18303_v14 = vld [vmem:[#allocation38_spill] sm:$0xff]  ;;  %v18305_v36 = vld [vmem:[#allocation49_spill] sm:$0xff] }
 0x64f   :  { %9197 = vmatprep.mubr.f32.mxu1 %v14673_v41  ;;  %v6005_v41 = vld [vmem:[#allocation2 + $0x108] sm:$0xff]  ;;  %v6070_v8 = vld [vmem:[#allocation2 + $0x111] sm:$0xff] }
 0x650   :  { %v4813_v19 = vpop.f32.mrb[120].mxu0 }
 0x651   :  { %v14986_v33 = vadd.f32 %v14693_v3, %v4813_v19  ;;  %v5423_v20 = vpop.f32.mrb[184].mxu1  ;;  %v4815_v54 = vpop.f32.mrb[121].mxu0  ;;  %6378 = vmatmul.mubr.f32.gmra.mrb[226].mxu0 %v6004_v18  ;;  %v18306_v19 = vld [vmem:[#allocation10_spill] sm:$0xff]  ;;  %v18307_v18 = vld [vmem:[#allocation28_spill] sm:$0xff] }
 0x652   :  { %v14989_v23 = vadd.f32 %v5423_v20, %v14661_v31  ;;  %v5425_v59 = vpop.f32.mrb[185].mxu1  ;;  %9198 = vmatmul.mubr.f32.gmra.mrb[34].mxu1 %v18302_v58  ;;  %6382 = vmatprep.mubr.f32.mxu0 %v6069_v26  ;;  %v6006_v54 = vld [vmem:[#allocation2 + $0x110] sm:$0xff] }
 0x653   :  { %9200 = vmatprep.mubr.f32.mxu1 %v18303_v14  ;;  %v18308_v26 = vld [vmem:[#allocation53_spill] sm:$0xff] }
 0x654   :  { %v4818_v48 = vpop.f32.mrb[122].mxu0 }
 0x655   :  { %v14994_v16 = vadd.f32 %v18304_v62, %v4818_v48  ;;  %v5428_v3 = vpop.f32.mrb[186].mxu1  ;;  %v4820_v25 = vpop.f32.mrb[123].mxu0  ;;  %6383 = vmatmul.mubr.f32.gmra.mrb[228].mxu0 %v6005_v41  ;;  %v6071_v48 = vld [vmem:[#allocation2 + $0x121] sm:$0xff] }
 0x656   :  { %v14997_v15 = vadd.f32 %v5428_v3, %v18305_v36  ;;  %v5430_v31 = vpop.f32.mrb[187].mxu1  ;;  %9201 = vmatmul.mubr.f32.gmra.mrb[36].mxu1 %v18306_v19  ;;  %6387 = vmatprep.mubr.f32.mxu0 %v6070_v8  ;;  %v18310_v41 = vld [vmem:[#allocation8_spill] sm:$0xff]  ;;  %v18311_v25 = vld [vmem:[#allocation41_spill] sm:$0xff]  ;;  %v6007_v36 = vld [vmem:[#allocation2 + $0x120] sm:$0xff] }
 0x657   :  { %9203 = vmatprep.mubr.f32.mxu1 %v18307_v18  ;;  %v18312_v31 = vld [vmem:[#allocation62_spill] sm:$0xff] }
 0x658   :  { %v4823_v20 = vpop.f32.mrb[124].mxu0 }
 0x659   :  { %v15002_v59 = vadd.f32 %v18308_v26, %v4823_v20  ;;  %v5433_v58 = vpop.f32.mrb[188].mxu1  ;;  %v4825_v14 = vpop.f32.mrb[125].mxu0  ;;  %6388 = vmatmul.mubr.f32.gmra.mrb[230].mxu0 %v6006_v54  ;;  %v6072_v26 = vld [vmem:[#allocation2 + $0x129] sm:$0xff]  ;;  %v18314_v54 = vld [vmem:[#allocation55_spill] sm:$0xff] }
 0x65a   :  { %v15005_v62 = vadd.f32 %v5433_v58, %v18310_v41  ;;  %v5435_v3 = vpop.f32.mrb[189].mxu1  ;;  %9204 = vmatmul.mubr.f32.gmra.mrb[38].mxu1 %v14713_v52  ;;  %6392 = vmatprep.mubr.f32.mxu0 %v6071_v48  ;;  %v18315_v52 = vld [vmem:[#allocation11_spill] sm:$0xff]  ;;  %v6008_v41 = vld [vmem:[#allocation2 + $0x128] sm:$0xff] }
 0x65b   :  { %18309 = vst [vmem:[#allocation5_spill] sm:$0xff] %v15002_v59  ;;  %9206 = vmatprep.mubr.f32.mxu1 %v18311_v25  ;;  %v18316_v25 = vld [vmem:[#allocation61_spill] sm:$0xff] }
 0x65c   :  { %v4828_v8 = vpop.f32.mrb[126].mxu0 }
 0x65d   :  { %v15010_v19 = vadd.f32 %v18312_v31, %v4828_v8  ;;  %v5438_v18 = vpop.f32.mrb[190].mxu1  ;;  %v4830_v20 = vpop.f32.mrb[127].mxu0  ;;  %6393 = vmatmul.mubr.f32.gmra.mrb[232].mxu0 %v6007_v36  ;;  %v6073_v31 = vld [vmem:[#allocation2 + $0x139] sm:$0xff]  ;;  %v18318_v36 = vld [vmem:[#allocation12_spill] sm:$0xff] }
 0x65e   :  { %v15013_v14 = vadd.f32 %v5438_v18, %v18314_v54  ;;  %v5440_v58 = vpop.f32.mrb[191].mxu1  ;;  %9207 = vmatmul.mubr.f32.gmra.mrb[40].mxu1 %v14727_v30  ;;  %6397 = vmatprep.mubr.f32.mxu0 %v6072_v26  ;;  %v18319_v18 = vld [vmem:[#allocation59_spill] sm:$0xff] }
 0x65f   :  { %18313 = vst [vmem:[#allocation29_spill] sm:$0xff] %v15010_v19  ;;  %9209 = vmatprep.mubr.f32.mxu1 %v18315_v52  ;;  %v18321_v26 = vld [vmem:[#allocation15_spill] sm:$0xff]  ;;  %v6009_v52 = vld [vmem:[#allocation2 + $0x138] sm:$0xff] }
 0x660   :  { %v9020_v48 = vpop.f32.mrb[128].mxu0 }
 0x661   :  { %v5443_v3 = vpop.f32.mrb[192].mxu1  ;;  %v15018_v59 = vadd.f32 %v9020_v48, %v18316_v25  ;;  %v5668_v8 = vpop.f32.mrb[129].mxu0  ;;  %6398 = vmatmul.mubr.f32.gmra.mrb[234].mxu0 %v6008_v41  ;;  %v6074_v25 = vld [vmem:[#allocation2 + $0x141] sm:$0xff] }
 0x662   :  { %v15021_v20 = vadd.f32 %v5443_v3, %v18318_v36  ;;  %v15024_v54 = vadd.f32 %v5668_v8, %v18319_v18  ;;  %9210 = vmatmul.mubr.f32.gmra.mrb[42].mxu1 %v14741_v11  ;;  %6402 = vmatprep.mubr.f32.mxu0 %v6073_v31  ;;  %v5445_v30 = vpop.f32.mrb[193].mxu1  ;;  %v18323_v3 = vld [vmem:[#allocation13_spill] sm:$0xff]  ;;  %v18324_v8 = vld [vmem:[#allocation63_spill] sm:$0xff] }
 0x663   :  { %18317 = vst [vmem:[#allocation30_spill] sm:$0xff] %v15018_v59  ;;  %9212 = vmatprep.mubr.f32.mxu1 %v18321_v26  ;;  %v18325_v11 = vld [vmem:[#allocation7_spill] sm:$0xff]  ;;  %v18326_v30 = vld [vmem:[#allocation64_spill] sm:$0xff] }
 0x664   :  { %18320 = vst [vmem:[#allocation3_spill] sm:$0xff] %v15024_v54  ;;  %v9023_v58 = vpop.f32.mrb[130].mxu0  ;;  %v6010_v59 = vld [vmem:[#allocation2 + $0x140] sm:$0xff] }
 0x665   :  { %v5448_v19 = vpop.f32.mrb[194].mxu1  ;;  %v15029_v48 = vadd.f32 %v9023_v58, %v14764_v27  ;;  %v5678_v41 = vpop.f32.mrb[131].mxu0  ;;  %6403 = vmatmul.mubr.f32.gmra.mrb[236].mxu0 %v6009_v52  ;;  %v6075_v52 = vld [vmem:[#allocation2 + $0x151] sm:$0xff] }
 0x666   :  { %v15032_v36 = vadd.f32 %v5448_v19, %v18323_v3  ;;  %v15035_v18 = vadd.f32 %v5678_v41, %v18324_v8  ;;  %9213 = vmatmul.mubr.f32.gmra.mrb[44].mxu1 %v18325_v11  ;;  %6407 = vmatprep.mubr.f32.mxu0 %v6074_v25  ;;  %v5450_v31 = vpop.f32.mrb[195].mxu1  ;;  %v18328_v19 = vld [vmem:[#allocation57_spill] sm:$0xff]  ;;  %v18330_v11 = vld [vmem:[#allocation14_spill] sm:$0xff] }
 0x667   :  { %18322 = vst [vmem:[#allocation32_spill] sm:$0xff] %v15029_v48  ;;  %9215 = vmatprep.mubr.f32.mxu1 %v18326_v30  ;;  %v18329_v25 = vld [vmem:[#allocation9_spill] sm:$0xff] }
 0x668   :  { %v9026_v26 = vpop.f32.mrb[132].mxu0  ;;  %v6011_v30 = vld [vmem:[#allocation2 + $0x150] sm:$0xff] }
 0x669   :  { %v5453_v54 = vpop.f32.mrb[196].mxu1  ;;  %v15040_v27 = vadd.f32 %v9026_v26, %v14791_v57  ;;  %v5688_v58 = vpop.f32.mrb[133].mxu0  ;;  %6408 = vmatmul.mubr.f32.gmra.mrb[238].mxu0 %v6010_v59  ;;  %v6076_v26 = vld [vmem:[#allocation2 + $0x159] sm:$0xff] }
 0x66a   :  { %v15043_v3 = vadd.f32 %v5453_v54, %v18328_v19  ;;  %v5455_v41 = vpop.f32.mrb[197].mxu1  ;;  %v15046_v8 = vadd.f32 %v5688_v58, %v14778_v9  ;;  %9216 = vmatmul.mubr.f32.gmra.mrb[46].mxu1 %v18329_v25  ;;  %6412 = vmatprep.mubr.f32.mxu0 %v6075_v52  ;;  %v18332_v54 = vld [vmem:[#allocation4_spill] sm:$0xff] }
 0x66b   :  { %18327 = vst [vmem:[#allocation31_spill] sm:$0xff] %v15040_v27  ;;  %9218 = vmatprep.mubr.f32.mxu1 %v18330_v11  ;;  %v18334_v58 = vld [vmem:[#allocation20_spill] sm:$0xff]  ;;  %v6012_v11 = vld [vmem:[#allocation2 + $0x158] sm:$0xff] }
 0x66c   :  { %v9029_v31 = vpop.f32.mrb[134].mxu0  ;;  %v18335_v52 = vld [vmem:[#allocation16_spill] sm:$0xff] }
 0x66d   :  { %v5458_v48 = vpop.f32.mrb[198].mxu1  ;;  %v15051_v57 = vadd.f32 %v9029_v31, %v14816_v35  ;;  %v5698_v59 = vpop.f32.mrb[135].mxu0  ;;  %6413 = vmatmul.mubr.f32.gmra.mrb[240].mxu0 %v6011_v30  ;;  %v6077_v30 = vld [vmem:[#allocation2 + $0x169] sm:$0xff] }
 0x66e   :  { %v15054_v19 = vadd.f32 %v5458_v48, %v18332_v54  ;;  %v5460_v41 = vpop.f32.mrb[199].mxu1  ;;  %v15057_v9 = vadd.f32 %v5698_v59, %v14804_v22  ;;  %9219 = vmatmul.mubr.f32.gmra.mrb[48].mxu1 %v18334_v58  ;;  %6417 = vmatprep.mubr.f32.mxu0 %v6076_v26  ;;  %v18337_v48 = vld [vmem:[#allocation19_spill] sm:$0xff]  ;;  %v18338_v22 = vld [vmem:[#allocation25_spill] sm:$0xff] }
 0x66f   :  { %18331 = vst [vmem:[#allocation37_spill] sm:$0xff] %v15051_v57  ;;  %9221 = vmatprep.mubr.f32.mxu1 %v18335_v52  ;;  %v18339_v58 = vld [vmem:[#allocation21_spill] sm:$0xff]  ;;  %v6013_v57 = vld [vmem:[#allocation2 + $0x168] sm:$0xff] }
 0x670   :  { %18333 = vst [vmem:[#allocation33_spill] sm:$0xff] %v15057_v9  ;;  %v9032_v25 = vpop.f32.mrb[136].mxu0  ;;  %v18340_v26 = vld [vmem:[#allocation65_spill] sm:$0xff] }
 0x671   :  { %v5463_v27 = vpop.f32.mrb[200].mxu1  ;;  %v15062_v35 = vadd.f32 %v9032_v25, %v14840_v17  ;;  %v5708_v31 = vpop.f32.mrb[137].mxu0  ;;  %6418 = vmatmul.mubr.f32.gmra.mrb[242].mxu0 %v6012_v11  ;;  %v6078_v11 = vld [vmem:[#allocation2 + $0x171] sm:$0xff] }
 0x672   :  { %v15065_v54 = vadd.f32 %v5463_v27, %v18337_v48  ;;  %v5465_v41 = vpop.f32.mrb[201].mxu1  ;;  %v15068_v59 = vadd.f32 %v5708_v31, %v18338_v22  ;;  %9222 = vmatmul.mubr.f32.gmra.mrb[50].mxu1 %v18339_v58  ;;  %6422 = vmatprep.mubr.f32.mxu0 %v6077_v30  ;;  %v18342_v27 = vld [vmem:[#allocation27_spill] sm:$0xff]  ;;  %v18343_v22 = vld [vmem:[#allocation22_spill] sm:$0xff] }
 0x673   :  { %18336 = vst [vmem:[#allocation35_spill] sm:$0xff] %v15062_v35  ;;  %9224 = vmatprep.mubr.f32.mxu1 %v18340_v26  ;;  %v18344_v30 = vld [vmem:[#allocation67_spill] sm:$0xff]  ;;  %v6014_v26 = vld [vmem:[#allocation2 + $0x170] sm:$0xff] }
 0x674   :  { %v9035_v52 = vpop.f32.mrb[138].mxu0 }
 0x675   :  { %v5468_v9 = vpop.f32.mrb[202].mxu1  ;;  %v15073_v17 = vadd.f32 %v9035_v52, %v14857_v2  ;;  %v5718_v25 = vpop.f32.mrb[139].mxu0  ;;  %6423 = vmatmul.mubr.f32.gmra.mrb[244].mxu0 %v6013_v57  ;;  %v6079_v52 = vld [vmem:[#allocation2 + $0x181] sm:$0xff] }
 0x676   :  { %v15076_v48 = vadd.f32 %v5468_v9, %v18342_v27  ;;  %v5470_v41 = vpop.f32.mrb[203].mxu1  ;;  %v15079_v31 = vadd.f32 %v5718_v25, %v14850_v56  ;;  %9225 = vmatmul.mubr.f32.gmra.mrb[52].mxu1 %v18343_v22  ;;  %6427 = vmatprep.mubr.f32.mxu0 %v6078_v11  ;;  %v18346_v9 = vld [vmem:[#allocation18_spill] sm:$0xff]  ;;  %v18347_v25 = vld [vmem:[#allocation24_spill] sm:$0xff]  ;;  %v18348_v11 = vld [vmem:[#allocation69_spill] sm:$0xff] }
 0x677   :  { %18341 = vst [vmem:[#allocation34_spill] sm:$0xff] %v15073_v17  ;;  %9227 = vmatprep.mubr.f32.mxu1 %v18344_v30  ;;  %v6015_v30 = vld [vmem:[#allocation2 + $0x180] sm:$0xff] }
 0x678   :  { %v9038_v58 = vpop.f32.mrb[140].mxu0 }
 0x679   :  { %v5473_v35 = vpop.f32.mrb[204].mxu1  ;;  %v15084_v2 = vadd.f32 %v9038_v58, %v14873_v6  ;;  %v5728_v57 = vpop.f32.mrb[141].mxu0  ;;  %6428 = vmatmul.mubr.f32.gmra.mrb[246].mxu0 %v6014_v26  ;;  %v6080_v26 = vld [vmem:[#allocation2 + $0x189] sm:$0xff] }
 0x67a   :  { %v15087_v27 = vadd.f32 %v5473_v35, %v18346_v9  ;;  %v5475_v41 = vpop.f32.mrb[205].mxu1  ;;  %v15090_v56 = vadd.f32 %v5728_v57, %v14865_v49  ;;  %9228 = vmatmul.mubr.f32.gmra.mrb[54].mxu1 %v18347_v25  ;;  %6432 = vmatprep.mubr.f32.mxu0 %v6079_v52  ;;  %v18350_v35 = vld [vmem:[#allocation66_spill] sm:$0xff]  ;;  %v18352_v52 = vld [vmem:[#allocation72_spill] sm:$0xff] }
 0x67b   :  { %18345 = vst [vmem:[#allocation45_spill] sm:$0xff] %v15084_v2  ;;  %9230 = vmatprep.mubr.f32.mxu1 %v18348_v11  ;;  %v18351_v57 = vld [vmem:[#allocation70_spill] sm:$0xff]  ;;  %v6016_v2 = vld [vmem:[#allocation2 + $0x188] sm:$0xff] }
 0x67c   :  { %v9041_v22 = vpop.f32.mrb[142].mxu0  ;;  %v6081_v25 = vld [vmem:[#allocation2 + $0x199] sm:$0xff] }
 0x67d   :  { %v5478_v17 = vpop.f32.mrb[206].mxu1  ;;  %v15095_v6 = vadd.f32 %v9041_v22, %v14889_v7  ;;  %v5738_v58 = vpop.f32.mrb[143].mxu0  ;;  %6433 = vmatmul.mubr.f32.gmra.mrb[248].mxu0 %v6015_v30 }
 0x67e   :  { %v15098_v9 = vadd.f32 %v5478_v17, %v18350_v35  ;;  %v5480_v41 = vpop.f32.mrb[207].mxu1  ;;  %v15101_v49 = vadd.f32 %v5738_v58, %v14881_v45  ;;  %9231 = vmatmul.mubr.f32.gmra.mrb[56].mxu1 %v18351_v57  ;;  %6437 = vmatprep.mubr.f32.mxu0 %v6080_v26  ;;  %v18354_v17 = vld [vmem:[#allocation68_spill] sm:$0xff]  ;;  %v18356_v58 = vld [vmem:[#allocation26_spill] sm:$0xff] }
 0x67f   :  { %18349 = vst [vmem:[#allocation43_spill] sm:$0xff] %v15095_v6  ;;  %9233 = vmatprep.mubr.f32.mxu1 %v18352_v52  ;;  %v6175_v26 = vld [vmem:[#allocation2 + $0x332] sm:$0xff]  ;;  %v6082_v57 = vld [vmem:[#allocation2 + $0x1a1] sm:$0xff] }
 0x680   :  { %v9044_v11 = vpop.f32.mrb[144].mxu0 }
 0x681   :  { %v5483_v7 = vpop.f32.mrb[208].mxu1  ;;  %v15106_v22 = vadd.f32 %v9044_v11, %v14905_v39  ;;  %v5748_v30 = vpop.f32.mrb[145].mxu0  ;;  %6438 = vmatmul.mubr.f32.gmra.mrb[250].mxu0 %v6016_v2  ;;  %v15118_v2 = vld [vmem:[#allocation2] sm:$0xff] }
 0x682   :  { %v15109_v35 = vadd.f32 %v5483_v7, %v18354_v17  ;;  %v5485_v41 = vpop.f32.mrb[209].mxu1  ;;  %v15112_v45 = vadd.f32 %v5748_v30, %v14897_v1  ;;  %9234 = vmatmul.mubr.f32.gmra.mrb[58].mxu1 %v18356_v58  ;;  %6442 = vmatprep.mubr.f32.mxu0 %v6081_v25  ;;  %v6176_v7 = vld [vmem:[#allocation2 + $0x33a] sm:$0xff]  ;;  %v6177_v17 = vld [vmem:[#allocation2 + $0x34a] sm:$0xff] }
 0x683   :  { %18353 = vst [vmem:[#allocation44_spill] sm:$0xff] %v15106_v22  ;;  %9236 = vmatprep.mubr.f32.mxu1 %v6175_v26  ;;  %v18358_v1 = vld [vmem:[#allocation71_spill] sm:$0xff]  ;;  %v6178_v22 = vld [vmem:[#allocation2 + $0x352] sm:$0xff] }
 0x684   :  { %18355 = vst [vmem:[#allocation46_spill] sm:$0xff] %v15112_v45  ;;  %v9047_v52 = vpop.f32.mrb[146].mxu0  ;;  %v18359_v45 = vld [vmem:[#allocation73_spill] sm:$0xff] }
 0x685   :  { %v5488_v6 = vpop.f32.mrb[210].mxu1  ;;  %v15116_v39 = vadd.f32 %v9047_v52, %v14921_v42  ;;  %v5758_v11 = vpop.f32.mrb[147].mxu0  ;;  %6443 = vmatmul.mubr.f32.gmra.mrb[252].mxu0 %v15118_v2 }
 0x686   :  { %v15122_v30 = vadd.f32 %v5488_v6, %v18358_v1  ;;  %v5490_v41 = vpop.f32.mrb[211].mxu1  ;;  %v15125_v25 = vadd.f32 %v5758_v11, %v14913_v63  ;;  %9237 = vmatmul.mubr.f32.gmra.mrb[60].mxu1 %v6176_v7  ;;  %6447 = vmatprep.mubr.f32.mxu0 %v6082_v57  ;;  %v6019_v11 = vld [vmem:[#allocation2 + $0x1e0] sm:$0xff] }
 0x687   :  { %18357 = vst [vmem:[#allocation50_spill] sm:$0xff] %v15116_v39  ;;  %9239 = vmatprep.mubr.f32.mxu1 %v6177_v17  ;;  %v6083_v39 = vld [vmem:[#allocation2 + $0x1e1] sm:$0xff]  ;;  %v6084_v41 = vld [vmem:[#allocation2 + $0x1e9] sm:$0xff] }
 0x688   :  { %v9050_v58 = vpop.f32.mrb[148].mxu0 }
 0x689   :  { %v5493_v42 = vpop.f32.mrb[212].mxu1  ;;  %v15128_v26 = vadd.f32 %v9050_v58, %v14937_v4  ;;  %v5768_v52 = vpop.f32.mrb[149].mxu0  ;;  %6448 = vmatmul.mubr.f32.gmra.mrb[254].mxu0 %v15118_v2 }
 0x68a   :  { %v15132_v6 = vadd.f32 %v5493_v42, %v18359_v45  ;;  %v5495_v1 = vpop.f32.mrb[213].mxu1  ;;  %v15135_v63 = vadd.f32 %v5768_v52, %v14929_v32  ;;  %6452 = vmatprep.mubr.f32.mxu0 %v6083_v39  ;;  %9240 = vmatmul.mubr.f32.gmra.mrb[62].mxu1 %v6178_v22  ;;  %v6020_v39 = vld [vmem:[#allocation2 + $0x1e8] sm:$0xff] }
 0x68c   :  { %v9053_v57 = vpop.f32.mrb[150].mxu0 }
 0x68d   :  { %v5498_v7 = vpop.f32.mrb[214].mxu1  ;;  %v15138_v4 = vadd.f32 %v9053_v57, %v14953_v44  ;;  %v5778_v17 = vpop.f32.mrb[151].mxu0  ;;  %6453 = vmatmul.mubr.f32.gmra.mrb[0].mxu0 %v6019_v11  ;;  %v6085_v44 = vld [vmem:[#allocation2 + $0x1f9] sm:$0xff] }
 0x68e   :  { %v15141_v58 = vadd.f32 %v5498_v7, %v14854_v61  ;;  %v5500_v45 = vpop.f32.mrb[215].mxu1  ;;  %v15144_v42 = vadd.f32 %v5778_v17, %v14945_v40  ;;  %6457 = vmatprep.mubr.f32.mxu0 %v6084_v41  ;;  %v6021_v7 = vld [vmem:[#allocation2 + $0x1f8] sm:$0xff] }
 0x690   :  { %v9056_v32 = vpop.f32.mrb[152].mxu0 }
 0x691   :  { %v5503_v22 = vpop.f32.mrb[216].mxu1  ;;  %v15147_v52 = vadd.f32 %v9056_v32, %v14968_v50  ;;  %v5788_v1 = vpop.f32.mrb[153].mxu0  ;;  %6458 = vmatmul.mubr.f32.gmra.mrb[2].mxu0 %v6020_v39  ;;  %v6086_v50 = vld [vmem:[#allocation2 + $0x201] sm:$0xff] }
 0x692   :  { %v15150_v57 = vadd.f32 %v5503_v22, %v14862_v21  ;;  %v5505_v11 = vpop.f32.mrb[217].mxu1  ;;  %v15153_v61 = vadd.f32 %v5788_v1, %v14961_v51  ;;  %6462 = vmatprep.mubr.f32.mxu0 %v6085_v44  ;;  %v6022_v22 = vld [vmem:[#allocation2 + $0x200] sm:$0xff] }
 0x694   :  { %v9059_v40 = vpop.f32.mrb[154].mxu0 }
 0x695   :  { %v5508_v17 = vpop.f32.mrb[218].mxu1  ;;  %v15156_v41 = vadd.f32 %v9059_v40, %v14981_v5  ;;  %v5798_v45 = vpop.f32.mrb[155].mxu0  ;;  %6463 = vmatmul.mubr.f32.gmra.mrb[4].mxu0 %v6021_v7  ;;  %v6087_v5 = vld [vmem:[#allocation2 + $0x211] sm:$0xff] }
 0x696   :  { %v15159_v32 = vadd.f32 %v5508_v17, %v14870_v46  ;;  %v5510_v39 = vpop.f32.mrb[219].mxu1  ;;  %v15162_v21 = vadd.f32 %v5798_v45, %v14974_v43  ;;  %6467 = vmatprep.mubr.f32.mxu0 %v6086_v50  ;;  %v6023_v17 = vld [vmem:[#allocation2 + $0x210] sm:$0xff] }
 0x698   :  { %v9062_v51 = vpop.f32.mrb[156].mxu0 }
 0x699   :  { %v5513_v1 = vpop.f32.mrb[220].mxu1  ;;  %v15165_v44 = vadd.f32 %v9062_v51, %v14997_v15  ;;  %v5808_v11 = vpop.f32.mrb[157].mxu0  ;;  %6468 = vmatmul.mubr.f32.gmra.mrb[6].mxu0 %v6022_v22  ;;  %v6088_v15 = vld [vmem:[#allocation2 + $0x219] sm:$0xff] }
 0x69a   :  { %v15168_v40 = vadd.f32 %v5513_v1, %v14878_v53  ;;  %v5515_v7 = vpop.f32.mrb[221].mxu1  ;;  %v15171_v46 = vadd.f32 %v5808_v11, %v14989_v23  ;;  %6472 = vmatprep.mubr.f32.mxu0 %v6087_v5  ;;  %v6024_v1 = vld [vmem:[#allocation2 + $0x218] sm:$0xff] }
 0x69c   :  { %v9065_v43 = vpop.f32.mrb[158].mxu0 }
 0x69d   :  { %v5518_v45 = vpop.f32.mrb[222].mxu1  ;;  %v15174_v50 = vadd.f32 %v9065_v43, %v15013_v14  ;;  %v5818_v39 = vpop.f32.mrb[159].mxu0  ;;  %6473 = vmatmul.mubr.f32.gmra.mrb[8].mxu0 %v6023_v17  ;;  %v6089_v14 = vld [vmem:[#allocation2 + $0x229] sm:$0xff] }
 0x69e   :  { %v15177_v51 = vadd.f32 %v5518_v45, %v14886_v24  ;;  %v5520_v22 = vpop.f32.mrb[223].mxu1  ;;  %v15180_v53 = vadd.f32 %v5818_v39, %v15005_v62  ;;  %6477 = vmatprep.mubr.f32.mxu0 %v6088_v15  ;;  %v6025_v45 = vld [vmem:[#allocation2 + $0x228] sm:$0xff] }
 0x6a0   :  { %v9068_v23 = vpop.f32.mrb[160].mxu0 }
 0x6a1   :  { %v5523_v11 = vpop.f32.mrb[224].mxu1  ;;  %v15183_v5 = vadd.f32 %v9068_v23, %v15032_v36  ;;  %v5828_v7 = vpop.f32.mrb[161].mxu0  ;;  %6478 = vmatmul.mubr.f32.gmra.mrb[10].mxu0 %v6024_v1  ;;  %v6090_v36 = vld [vmem:[#allocation2 + $0x231] sm:$0xff] }
 0x6a2   :  { %v15186_v43 = vadd.f32 %v5523_v11, %v14894_v12  ;;  %v5525_v17 = vpop.f32.mrb[225].mxu1  ;;  %v15189_v24 = vadd.f32 %v5828_v7, %v15021_v20  ;;  %6482 = vmatprep.mubr.f32.mxu0 %v6089_v14  ;;  %v6026_v11 = vld [vmem:[#allocation2 + $0x230] sm:$0xff] }
 0x6a4   :  { %v9071_v62 = vpop.f32.mrb[162].mxu0 }
 0x6a5   :  { %v5528_v39 = vpop.f32.mrb[226].mxu1  ;;  %v15192_v15 = vadd.f32 %v9071_v62, %v15054_v19  ;;  %v5838_v22 = vpop.f32.mrb[163].mxu0  ;;  %6483 = vmatmul.mubr.f32.gmra.mrb[12].mxu0 %v6025_v45  ;;  %v6091_v19 = vld [vmem:[#allocation2 + $0x241] sm:$0xff] }
 0x6a6   :  { %v15195_v23 = vadd.f32 %v5528_v39, %v14902_v10  ;;  %v5530_v1 = vpop.f32.mrb[227].mxu1  ;;  %v15198_v12 = vadd.f32 %v5838_v22, %v15043_v3  ;;  %6487 = vmatprep.mubr.f32.mxu0 %v6090_v36  ;;  %v6027_v39 = vld [vmem:[#allocation2 + $0x240] sm:$0xff] }
 0x6a8   :  { %v9074_v20 = vpop.f32.mrb[164].mxu0 }
 0x6a9   :  { %v5533_v7 = vpop.f32.mrb[228].mxu1  ;;  %v15201_v14 = vadd.f32 %v9074_v20, %v15076_v48  ;;  %v5848_v17 = vpop.f32.mrb[165].mxu0  ;;  %6488 = vmatmul.mubr.f32.gmra.mrb[14].mxu0 %v6026_v11  ;;  %v6092_v48 = vld [vmem:[#allocation2 + $0x249] sm:$0xff] }
 0x6aa   :  { %v15204_v62 = vadd.f32 %v5533_v7, %v14910_v0  ;;  %v5535_v45 = vpop.f32.mrb[229].mxu1  ;;  %v15207_v10 = vadd.f32 %v5848_v17, %v15065_v54  ;;  %6492 = vmatprep.mubr.f32.mxu0 %v6091_v19  ;;  %v6028_v54 = vld [vmem:[#allocation2 + $0x248] sm:$0xff] }
 0x6ab   :  { %18360 = vst [vmem:[#allocation52_spill] sm:$0xff] %v15201_v14 }
 0x6ac   :  { %18361 = vst [vmem:[#allocation54_spill] sm:$0xff] %v15207_v10  ;;  %v9077_v3 = vpop.f32.mrb[166].mxu0  ;;  %v18409_v10 = vld [vmem:[#allocation44_spill] sm:$0xff] }
 0x6ad   :  { %v5538_v22 = vpop.f32.mrb[230].mxu1  ;;  %v15210_v36 = vadd.f32 %v9077_v3, %v15098_v9  ;;  %v5858_v1 = vpop.f32.mrb[167].mxu0  ;;  %6493 = vmatmul.mubr.f32.gmra.mrb[16].mxu0 %v6027_v39  ;;  %v6093_v9 = vld [vmem:[#allocation2 + $0x259] sm:$0xff] }
 0x6ae   :  { %v5539_v20 = vadd.f32 %v5538_v22, %v14918_v13  ;;  %v5540_v11 = vpop.f32.mrb[231].mxu1  ;;  %v15214_v0 = vadd.f32 %v5858_v1, %v15087_v27  ;;  %6497 = vmatprep.mubr.f32.mxu0 %v6092_v48  ;;  %v6029_v22 = vld [vmem:[#allocation2 + $0x258] sm:$0xff] }
 0x6af   :  { %18362 = vst [vmem:[#allocation42_spill] sm:$0xff] %v15210_v36 }
 0x6b0   :  { %18363 = vst [vmem:[#allocation47_spill] sm:$0xff] %v15214_v0  ;;  %v9080_v7 = vpop.f32.mrb[168].mxu0  ;;  %v18407_v0 = vld [vmem:[#allocation46_spill] sm:$0xff] }
 0x6b1   :  { %v5543_v17 = vpop.f32.mrb[232].mxu1  ;;  %v15217_v19 = vadd.f32 %v9080_v7, %v15122_v30  ;;  %v5868_v45 = vpop.f32.mrb[169].mxu0  ;;  %6498 = vmatmul.mubr.f32.gmra.mrb[18].mxu0 %v6028_v54  ;;  %v6094_v30 = vld [vmem:[#allocation2 + $0x261] sm:$0xff] }
 0x6b2   :  { %v15220_v3 = vadd.f32 %v5543_v17, %v14926_v28  ;;  %v5545_v39 = vpop.f32.mrb[233].mxu1  ;;  %v15223_v13 = vadd.f32 %v5868_v45, %v15109_v35  ;;  %6502 = vmatprep.mubr.f32.mxu0 %v6093_v9  ;;  %v6030_v35 = vld [vmem:[#allocation2 + $0x260] sm:$0xff] }
 0x6b3   :  { %18364 = vst [vmem:[#allocation48_spill] sm:$0xff] %v15217_v19 }
 0x6b4   :  { %18365 = vst [vmem:[#allocation17_spill] sm:$0xff] %v15223_v13  ;;  %v9083_v27 = vpop.f32.mrb[170].mxu0  ;;  %v18405_v13 = vld [vmem:[#allocation43_spill] sm:$0xff] }
 0x6b5   :  { %v5548_v1 = vpop.f32.mrb[234].mxu1  ;;  %v15226_v48 = vadd.f32 %v9083_v27, %v15141_v58  ;;  %v5878_v11 = vpop.f32.mrb[171].mxu0  ;;  %6503 = vmatmul.mubr.f32.gmra.mrb[20].mxu0 %v6029_v22  ;;  %v6095_v58 = vld [vmem:[#allocation2 + $0x271] sm:$0xff] }
 0x6b6   :  { %v5549_v7 = vadd.f32 %v5548_v1, %v14934_v47  ;;  %v5550_v54 = vpop.f32.mrb[235].mxu1  ;;  %v15230_v28 = vadd.f32 %v5878_v11, %v15132_v6  ;;  %6507 = vmatprep.mubr.f32.mxu0 %v6094_v30  ;;  %v6031_v6 = vld [vmem:[#allocation2 + $0x270] sm:$0xff] }
 0x6b7   :  { %18366 = vst [vmem:[#allocation56_spill] sm:$0xff] %v15226_v48 }
 0x6b8   :  { %18367 = vst [vmem:[#allocation23_spill] sm:$0xff] %v15230_v28  ;;  %v9086_v17 = vpop.f32.mrb[172].mxu0 }
 0x6b9   :  { %v5553_v45 = vpop.f32.mrb[236].mxu1  ;;  %v15233_v9 = vadd.f32 %v9086_v17, %v15159_v32  ;;  %v5888_v39 = vpop.f32.mrb[173].mxu0  ;;  %6508 = vmatmul.mubr.f32.gmra.mrb[22].mxu0 %v6030_v35  ;;  %v6096_v32 = vld [vmem:[#allocation2 + $0x279] sm:$0xff] }
 0x6ba   :  { %v5554_v27 = vadd.f32 %v5553_v45, %v14942_v29  ;;  %v5555_v22 = vpop.f32.mrb[237].mxu1  ;;  %v15237_v48 = vadd.f32 %v5888_v39, %v15150_v57  ;;  %6512 = vmatprep.mubr.f32.mxu0 %v6095_v58  ;;  %v6032_v57 = vld [vmem:[#allocation2 + $0x278] sm:$0xff] }
 0x6bb   :  { %18368 = vst [vmem:[#allocation6_spill] sm:$0xff] %v15233_v9 }
 0x6bc   :  { %18369 = vst [vmem:[#allocation60_spill] sm:$0xff] %v15237_v48  ;;  %v9089_v47 = vpop.f32.mrb[174].mxu0  ;;  %v18402_v48 = vld [vmem:[#allocation45_spill] sm:$0xff] }
 0x6bd   :  { %v5558_v1 = vpop.f32.mrb[238].mxu1  ;;  %v15240_v11 = vadd.f32 %v9089_v47, %v15177_v51  ;;  %v5898_v30 = vpop.f32.mrb[175].mxu0  ;;  %6513 = vmatmul.mubr.f32.gmra.mrb[24].mxu0 %v6031_v6  ;;  %v6097_v51 = vld [vmem:[#allocation2 + $0x289] sm:$0xff] }
 0x6be   :  { %v5559_v54 = vadd.f32 %v5558_v1, %v14950_v55  ;;  %v5560_v17 = vpop.f32.mrb[239].mxu1  ;;  %v15244_v35 = vadd.f32 %v5898_v30, %v15168_v40  ;;  %6517 = vmatprep.mubr.f32.mxu0 %v6096_v32  ;;  %v6033_v40 = vld [vmem:[#allocation2 + $0x288] sm:$0xff] }
 0x6bf   :  { %18370 = vst [vmem:[#allocation58_spill] sm:$0xff] %v15240_v11  ;;  %v6098_v17 = vld [vmem:[#allocation2 + $0x291] sm:$0xff] }
 0x6c0   :  { %18371 = vst [vmem:[#allocation36_spill] sm:$0xff] %v15244_v35  ;;  %v9092_v29 = vpop.f32.mrb[176].mxu0 }
 0x6c1   :  { %v5563_v45 = vpop.f32.mrb[240].mxu1  ;;  %v15247_v39 = vadd.f32 %v9092_v29, %v15195_v23  ;;  %v5908_v58 = vpop.f32.mrb[177].mxu0  ;;  %6518 = vmatmul.mubr.f32.gmra.mrb[26].mxu0 %v6032_v57 }
 0x6c2   :  { %v5564_v22 = vadd.f32 %v5563_v45, %v14958_v60  ;;  %v5565_v47 = vpop.f32.mrb[241].mxu1  ;;  %v15251_v6 = vadd.f32 %v5908_v58, %v15186_v43  ;;  %6522 = vmatprep.mubr.f32.mxu0 %v6097_v51  ;;  %v6034_v45 = vld [vmem:[#allocation2 + $0x290] sm:$0xff] }
 0x6c3   :  { %18372 = vst [vmem:[#allocation51_spill] sm:$0xff] %v15247_v39  ;;  %v6099_v47 = vld [vmem:[#allocation2 + $0x2a1] sm:$0xff] }
 0x6c4   :  { %18373 = vst [vmem:[#allocation40_spill] sm:$0xff] %v15251_v6  ;;  %v9095_v55 = vpop.f32.mrb[178].mxu0 }
 0x6c5   :  { %v5568_v1 = vpop.f32.mrb[242].mxu1  ;;  %v15253_v30 = vadd.f32 %v9095_v55, %v5539_v20  ;;  %v5918_v32 = vpop.f32.mrb[179].mxu0  ;;  %6523 = vmatmul.mubr.f32.gmra.mrb[28].mxu0 %v6033_v40 }
 0x6c6   :  { %v5569_v23 = vadd.f32 %v5568_v1, %v14965_v34  ;;  %v5570_v29 = vpop.f32.mrb[243].mxu1  ;;  %v15257_v57 = vadd.f32 %v5918_v32, %v15204_v62  ;;  %6527 = vmatprep.mubr.f32.mxu0 %v6098_v17  ;;  %v6035_v1 = vld [vmem:[#allocation2 + $0x2a0] sm:$0xff] }
 0x6c7   :  { %18374 = vst [vmem:[#allocation38_spill] sm:$0xff] %v15253_v30  ;;  %v6100_v29 = vld [vmem:[#allocation2 + $0x2a9] sm:$0xff] }
 0x6c8   :  { %18375 = vst [vmem:[#allocation39_spill] sm:$0xff] %v15257_v57  ;;  %v9098_v60 = vpop.f32.mrb[180].mxu0  ;;  %v18398_v57 = vld [vmem:[#allocation37_spill] sm:$0xff] }
 0x6c9   :  { %v5573_v43 = vpop.f32.mrb[244].mxu1  ;;  %v15259_v58 = vadd.f32 %v9098_v60, %v5549_v7  ;;  %v5928_v51 = vpop.f32.mrb[181].mxu0  ;;  %6528 = vmatmul.mubr.f32.gmra.mrb[30].mxu0 %v6034_v45 }
 0x6ca   :  { %v5574_v20 = vadd.f32 %v5573_v43, %v14971_v37  ;;  %v5575_v55 = vpop.f32.mrb[245].mxu1  ;;  %v15263_v40 = vadd.f32 %v5928_v51, %v15220_v3  ;;  %6532 = vmatprep.mubr.f32.mxu0 %v6099_v47  ;;  %v6036_v43 = vld [vmem:[#allocation2 + $0x2a8] sm:$0xff]  ;;  %v6101_v47 = vld [vmem:[#allocation2 + $0x2b9] sm:$0xff] }
 0x6cb   :  { %18376 = vst [vmem:[#allocation49_spill] sm:$0xff] %v15259_v58 }
 0x6cc   :  { %18377 = vst [vmem:[#allocation10_spill] sm:$0xff] %v15263_v40  ;;  %v9101_v34 = vpop.f32.mrb[182].mxu0  ;;  %v18397_v40 = vld [vmem:[#allocation33_spill] sm:$0xff] }
 0x6cd   :  { %v5578_v62 = vpop.f32.mrb[246].mxu1  ;;  %v15265_v32 = vadd.f32 %v9101_v34, %v5559_v54  ;;  %v5938_v17 = vpop.f32.mrb[183].mxu0  ;;  %6533 = vmatmul.mubr.f32.gmra.mrb[32].mxu0 %v6035_v1 }
 0x6ce   :  { %v5579_v7 = vadd.f32 %v5578_v62, %v14978_v38  ;;  %v5580_v60 = vpop.f32.mrb[247].mxu1  ;;  %v15268_v45 = vadd.f32 %v5938_v17, %v5554_v27  ;;  %6537 = vmatprep.mubr.f32.mxu0 %v6100_v29  ;;  %v6037_v38 = vld [vmem:[#allocation2 + $0x2b8] sm:$0xff]  ;;  %v6102_v29 = vld [vmem:[#allocation2 + $0x2c1] sm:$0xff] }
 0x6cf   :  { %18378 = vst [vmem:[#allocation28_spill] sm:$0xff] %v15265_v32 }
 0x6d0   :  { %18379 = vst [vmem:[#allocation53_spill] sm:$0xff] %v15268_v45  ;;  %v9104_v37 = vpop.f32.mrb[184].mxu0  ;;  %v18396_v45 = vld [vmem:[#allocation31_spill] sm:$0xff] }
 0x6d1   :  { %v5583_v55 = vpop.f32.mrb[248].mxu1  ;;  %v15270_v3 = vadd.f32 %v9104_v37, %v5569_v23  ;;  %v5948_v51 = vpop.f32.mrb[185].mxu0  ;;  %6538 = vmatmul.mubr.f32.gmra.mrb[34].mxu0 %v6036_v43 }
 0x6d2   :  { %v5584_v54 = vadd.f32 %v5583_v55, %v14986_v33  ;;  %v5585_v34 = vpop.f32.mrb[249].mxu1  ;;  %v15273_v32 = vadd.f32 %v5948_v51, %v5564_v22  ;;  %6542 = vmatprep.mubr.f32.mxu0 %v6101_v47  ;;  %v6038_v33 = vld [vmem:[#allocation2 + $0x2c0] sm:$0xff]  ;;  %v6103_v47 = vld [vmem:[#allocation2 + $0x2d1] sm:$0xff] }
 0x6d3   :  { %18380 = vst [vmem:[#allocation8_spill] sm:$0xff] %v15270_v3  ;;  %v18385_v34 = vld [vmem:[#allocation5_spill] sm:$0xff] }
 0x6d4   :  { %18381 = vst [vmem:[#allocation41_spill] sm:$0xff] %v15273_v32  ;;  %v9107_v1 = vpop.f32.mrb[186].mxu0 }
 0x6d5   :  { %v5588_v62 = vpop.f32.mrb[250].mxu1  ;;  %v15275_v27 = vadd.f32 %v9107_v1, %v5579_v7  ;;  %v5958_v17 = vpop.f32.mrb[187].mxu0  ;;  %6543 = vmatmul.mubr.f32.gmra.mrb[36].mxu0 %v6037_v38 }
 0x6d6   :  { %v5589_v23 = vadd.f32 %v5588_v62, %v14994_v16  ;;  %v5590_v60 = vpop.f32.mrb[251].mxu1  ;;  %v15278_v37 = vadd.f32 %v5958_v17, %v5574_v20  ;;  %6547 = vmatprep.mubr.f32.mxu0 %v6102_v29  ;;  %v6039_v16 = vld [vmem:[#allocation2 + $0x2d0] sm:$0xff]  ;;  %v6104_v17 = vld [vmem:[#allocation2 + $0x2d9] sm:$0xff] }
 0x6d7   :  { %18382 = vst [vmem:[#allocation62_spill] sm:$0xff] %v15275_v27  ;;  %v18387_v29 = vld [vmem:[#allocation29_spill] sm:$0xff] }
 0x6d8   :  { %18383 = vst [vmem:[#allocation55_spill] sm:$0xff] %v15278_v37  ;;  %v9110_v43 = vpop.f32.mrb[188].mxu0 }
 0x6d9   :  { %v5593_v55 = vpop.f32.mrb[252].mxu1  ;;  %v15280_v22 = vadd.f32 %v9110_v43, %v5589_v23  ;;  %v5968_v51 = vpop.f32.mrb[189].mxu0  ;;  %6548 = vmatmul.mubr.f32.gmra.mrb[38].mxu0 %v6038_v33 }
 0x6da   :  { %v5594_v7 = vadd.f32 %v5593_v55, %v18385_v34  ;;  %v5595_v1 = vpop.f32.mrb[253].mxu1  ;;  %v15283_v27 = vadd.f32 %v5968_v51, %v5584_v54  ;;  %6552 = vmatprep.mubr.f32.mxu0 %v6103_v47  ;;  %v6040_v55 = vld [vmem:[#allocation2 + $0x2d8] sm:$0xff]  ;;  %v6105_v51 = vld [vmem:[#allocation2 + $0x2e9] sm:$0xff] }
 0x6db   :  { %18384 = vst [vmem:[#allocation11_spill] sm:$0xff] %v15280_v22 }
 0x6dc   :  { %18386 = vst [vmem:[#allocation61_spill] sm:$0xff] %v15283_v27  ;;  %v9113_v38 = vpop.f32.mrb[190].mxu0  ;;  %v18390_v27 = vld [vmem:[#allocation3_spill] sm:$0xff] }
 0x6dd   :  { %v5598_v62 = vpop.f32.mrb[254].mxu1  ;;  %v5978_v20 = vpop.f32.mrb[191].mxu0  ;;  %6553 = vmatmul.mubr.f32.gmra.mrb[40].mxu0 %v6039_v16  ;;  %v6041_v16 = vld [vmem:[#allocation2 + $0x2e8] sm:$0xff] }
 0x6de   :  { %v5599_v60 = vadd.f32 %v5598_v62, %v18387_v29  ;;  %v5600_v37 = vpop.f32.mrb[255].mxu1  ;;  %v15286_v23 = vadd.f32 %v5978_v20, %v5594_v7  ;;  %6557 = vmatprep.mubr.f32.mxu0 %v6104_v17  ;;  %v18392_v17 = vld [vmem:[#allocation30_spill] sm:$0xff] }
 0x6e0   :  { %18388 = vst [vmem:[#allocation12_spill] sm:$0xff] %v15286_v23  ;;  %v15288_v43 = vadd.f32 %v9113_v38, %v5599_v60  ;;  %v6294_v33 = vpop.f32.mrb[192].mxu0  ;;  %v6106_v38 = vld [vmem:[#allocation2 + $0x2f1] sm:$0xff] }
 0x6e1   :  { %v9148_v34 = vpop.f32.mrb[0].mxu1  ;;  %v6296_v54 = vpop.f32.mrb[193].mxu0  ;;  %6558 = vmatmul.mubr.f32.gmra.mrb[42].mxu0 %v6040_v55  ;;  %v6042_v55 = vld [vmem:[#allocation2 + $0x2f0] sm:$0xff] }
 0x6e2   :  { %18389 = vst [vmem:[#allocation59_spill] sm:$0xff] %v15288_v43  ;;  %v6679_v47 = vpop.f32.mrb[1].mxu1  ;;  %6562 = vmatprep.mubr.f32.mxu0 %v6105_v51 }
 0x6e3   :  { %v6680_v1 = vadd.f32 %v6679_v47, %v6294_v33  ;;  %v6107_v47 = vld [vmem:[#allocation2 + $0x301] sm:$0xff] }
 0x6e4   :  { %v6299_v22 = vpop.f32.mrb[194].mxu0 }
 0x6e5   :  { %v15291_v3 = vadd.f32 %v6680_v1, %v18390_v27  ;;  %v6685_v37 = vadd.f32 %v9148_v34, %v6299_v22  ;;  %v9151_v7 = vpop.f32.mrb[2].mxu1  ;;  %v6301_v62 = vpop.f32.mrb[195].mxu0  ;;  %6563 = vmatmul.mubr.f32.gmra.mrb[44].mxu0 %v6041_v16  ;;  %v6043_v34 = vld [vmem:[#allocation2 + $0x300] sm:$0xff] }
 0x6e6   :  { %v6689_v20 = vpop.f32.mrb[3].mxu1  ;;  %6567 = vmatprep.mubr.f32.mxu0 %v6106_v38 }
 0x6e7   :  { %18391 = vst [vmem:[#allocation15_spill] sm:$0xff] %v15291_v3  ;;  %v15294_v29 = vadd.f32 %v6685_v37, %v18392_v17  ;;  %v6108_v37 = vld [vmem:[#allocation2 + $0x309] sm:$0xff] }
 0x6e8   :  { %v6304_v60 = vpop.f32.mrb[196].mxu0  ;;  %v18394_v17 = vld [vmem:[#allocation32_spill] sm:$0xff] }
 0x6e9   :  { %18393 = vst [vmem:[#allocation13_spill] sm:$0xff] %v15294_v29  ;;  %v6690_v54 = vadd.f32 %v6689_v20, %v6304_v60  ;;  %v9154_v51 = vpop.f32.mrb[4].mxu1  ;;  %v6306_v33 = vpop.f32.mrb[197].mxu0  ;;  %6568 = vmatmul.mubr.f32.gmra.mrb[46].mxu0 %v6042_v55  ;;  %v6044_v55 = vld [vmem:[#allocation2 + $0x308] sm:$0xff] }
 0x6ea   :  { %v6699_v43 = vpop.f32.mrb[5].mxu1  ;;  %6572 = vmatprep.mubr.f32.mxu0 %v6107_v47 }
 0x6eb   :  { %v15297_v27 = vadd.f32 %v6690_v54, %v15035_v18  ;;  %v6109_v18 = vld [vmem:[#allocation2 + $0x319] sm:$0xff] }
 0x6ec   :  { %v6309_v22 = vpop.f32.mrb[198].mxu0 }
 0x6ed   :  { %v6695_v1 = vadd.f32 %v9151_v7, %v6309_v22  ;;  %v9157_v16 = vpop.f32.mrb[6].mxu1  ;;  %v6311_v62 = vpop.f32.mrb[199].mxu0  ;;  %6573 = vmatmul.mubr.f32.gmra.mrb[48].mxu0 %v6043_v34  ;;  %v6045_v34 = vld [vmem:[#allocation2 + $0x318] sm:$0xff] }
 0x6ee   :  { %v6709_v38 = vpop.f32.mrb[7].mxu1  ;;  %6577 = vmatprep.mubr.f32.mxu0 %v6108_v37 }
 0x6ef   :  { %v15300_v20 = vadd.f32 %v6695_v1, %v18394_v17  ;;  %v6110_v1 = vld [vmem:[#allocation2 + $0x321] sm:$0xff] }
 0x6f0   :  { %v6314_v60 = vpop.f32.mrb[200].mxu0 }
 0x6f1   :  { %v6700_v33 = vadd.f32 %v6699_v43, %v6314_v60  ;;  %v9160_v23 = vpop.f32.mrb[8].mxu1  ;;  %v6316_v47 = vpop.f32.mrb[201].mxu0  ;;  %6578 = vmatmul.mubr.f32.gmra.mrb[50].mxu0 %v6044_v55  ;;  %v6046_v55 = vld [vmem:[#allocation2 + $0x320] sm:$0xff] }
 0x6f2   :  { %v6719_v54 = vpop.f32.mrb[9].mxu1  ;;  %6582 = vmatprep.mubr.f32.mxu0 %v6109_v18 }
 0x6f3   :  { %v15303_v7 = vadd.f32 %v6700_v33, %v15046_v8  ;;  %v6111_v8 = vld [vmem:[#allocation2 + $0x331] sm:$0xff] }
 0x6f4   :  { %v6319_v22 = vpop.f32.mrb[202].mxu0 }
 0x6f5   :  { %18395 = vst [vmem:[#allocation63_spill] sm:$0xff] %v15303_v7  ;;  %v6705_v62 = vadd.f32 %v9154_v51, %v6319_v22  ;;  %v9163_v32 = vpop.f32.mrb[10].mxu1  ;;  %v6321_v37 = vpop.f32.mrb[203].mxu0  ;;  %6583 = vmatmul.mubr.f32.gmra.mrb[52].mxu0 %v6045_v34  ;;  %v6047_v34 = vld [vmem:[#allocation2 + $0x330] sm:$0xff] }
 0x6f6   :  { %v6729_v17 = vpop.f32.mrb[11].mxu1  ;;  %6587 = vmatprep.mubr.f32.mxu0 %v6110_v1 }
 0x6f7   :  { %v15306_v43 = vadd.f32 %v6705_v62, %v18396_v45  ;;  %v6112_v45 = vld [vmem:[#allocation2 + $0x339] sm:$0xff] }
 0x6f8   :  { %v6324_v60 = vpop.f32.mrb[204].mxu0 }
 0x6f9   :  { %v6710_v47 = vadd.f32 %v6709_v38, %v6324_v60  ;;  %v9166_v58 = vpop.f32.mrb[12].mxu1  ;;  %v6326_v18 = vpop.f32.mrb[205].mxu0  ;;  %6588 = vmatmul.mubr.f32.gmra.mrb[54].mxu0 %v6046_v55  ;;  %v6113_v60 = vld [vmem:[#allocation2 + $0x349] sm:$0xff] }
 0x6fa   :  { %v6739_v33 = vpop.f32.mrb[13].mxu1  ;;  %6592 = vmatprep.mubr.f32.mxu0 %v6111_v8  ;;  %v6048_v18 = vld [vmem:[#allocation2 + $0x338] sm:$0xff] }
 0x6fb   :  { %v15309_v51 = vadd.f32 %v6710_v47, %v18397_v40  ;;  %v6114_v47 = vld [vmem:[#allocation2 + $0x351] sm:$0xff] }
 0x6fc   :  { %v6329_v22 = vpop.f32.mrb[206].mxu0 }
 0x6fd   :  { %v6715_v37 = vadd.f32 %v9157_v16, %v6329_v22  ;;  %v9169_v30 = vpop.f32.mrb[14].mxu1  ;;  %v6331_v1 = vpop.f32.mrb[207].mxu0  ;;  %6593 = vmatmul.mubr.f32.gmra.mrb[56].mxu0 %v6047_v34 }
 0x6fe   :  { %v6749_v62 = vpop.f32.mrb[15].mxu1  ;;  %6597 = vmatprep.mubr.f32.mxu0 %v6112_v45 }
 0x6ff   :  { %v15312_v38 = vadd.f32 %v6715_v37, %v18398_v57  ;;  %v18399_v37 = vld [vmem:[#allocation35_spill] sm:$0xff] }
 0x700   :  { %v6334_v55 = vpop.f32.mrb[208].mxu0 }
 0x701   :  { %v6720_v39 = vadd.f32 %v6719_v54, %v6334_v55  ;;  %v9172_v8 = vpop.f32.mrb[16].mxu1  ;;  %v6336_v6 = vpop.f32.mrb[209].mxu0  ;;  %6598 = vmatmul.mubr.f32.gmra.mrb[58].mxu0 %v6048_v18 }
 0x702   :  { %v6759_v40 = vpop.f32.mrb[17].mxu1  ;;  %6602 = vmatprep.mubr.f32.mxu0 %v6113_v60 }
 0x703   :  { %v15315_v16 = vadd.f32 %v6720_v39, %v15068_v59 }
 0x704   :  { %v6339_v22 = vpop.f32.mrb[210].mxu0 }
 0x705   :  { %v6725_v34 = vadd.f32 %v9160_v23, %v6339_v22  ;;  %v9175_v1 = vpop.f32.mrb[18].mxu1  ;;  %v6341_v45 = vpop.f32.mrb[211].mxu0  ;;  %6603 = vmatmul.mubr.f32.gmra.mrb[60].mxu0 %v15118_v2 }
 0x706   :  { %v6769_v57 = vpop.f32.mrb[19].mxu1  ;;  %6607 = vmatprep.mubr.f32.mxu0 %v6114_v47 }
 0x707   :  { %v15319_v11 = vadd.f32 %v6725_v34, %v18399_v37  ;;  %v18400_v34 = vld [vmem:[#allocation34_spill] sm:$0xff] }
 0x708   :  { %v6344_v54 = vpop.f32.mrb[212].mxu0 }
 0x709   :  { %v6730_v6 = vadd.f32 %v6729_v17, %v6344_v54  ;;  %v15321_v55 = vpop.f32.mrb[20].mxu1  ;;  %v6346_v60 = vpop.f32.mrb[213].mxu0  ;;  %6608 = vmatmul.mubr.f32.gmra.mrb[62].mxu0 %v15118_v2 }
 0x70a   :  { %v6779_v59 = vpop.f32.mrb[21].mxu1 }
 0x70b   :  { %v15325_v39 = vadd.f32 %v6730_v6, %v15079_v31 }
 0x70c   :  { %v6349_v23 = vpop.f32.mrb[214].mxu0 }
 0x70d   :  { %v6735_v18 = vadd.f32 %v9163_v32, %v6349_v23  ;;  %v15327_v22 = vpop.f32.mrb[22].mxu1  ;;  %v6351_v45 = vpop.f32.mrb[215].mxu0 }
 0x70e   :  { %v15329_v47 = vpop.f32.mrb[23].mxu1 }
 0x70f   :  { %v15332_v37 = vadd.f32 %v6735_v18, %v18400_v34 }
 0x710   :  { %v6354_v17 = vpop.f32.mrb[216].mxu0 }
 0x711   :  { %v6740_v54 = vadd.f32 %v6739_v33, %v6354_v17  ;;  %v15334_v35 = vpop.f32.mrb[24].mxu1  ;;  %v6356_v60 = vpop.f32.mrb[217].mxu0 }
 0x712   :  { %v15336_v2 = vpop.f32.mrb[25].mxu1 }
 0x713   :  { %v15339_v31 = vadd.f32 %v6740_v54, %v15090_v56 }
 0x714   :  { %v6359_v6 = vpop.f32.mrb[218].mxu0 }
 0x715   :  { %18401 = vst [vmem:[#allocation7_spill] sm:$0xff] %v15339_v31  ;;  %v6745_v32 = vadd.f32 %v9166_v58, %v6359_v6  ;;  %v15341_v23 = vpop.f32.mrb[26].mxu1  ;;  %v6361_v45 = vpop.f32.mrb[219].mxu0 }
 0x716   :  { %v15343_v9 = vpop.f32.mrb[27].mxu1 }
 0x717   :  { %v15346_v18 = vadd.f32 %v6745_v32, %v18402_v48 }
 0x718   :  { %v6364_v34 = vpop.f32.mrb[220].mxu0 }
 0x719   :  { %18403 = vst [vmem:[#allocation64_spill] sm:$0xff] %v15346_v18  ;;  %v6750_v33 = vadd.f32 %v6749_v62, %v6364_v34  ;;  %v15348_v17 = vpop.f32.mrb[28].mxu1  ;;  %v6366_v60 = vpop.f32.mrb[221].mxu0 }
 0x71a   :  { %v15350_v28 = vpop.f32.mrb[29].mxu1 }
 0x71b   :  { %v15353_v56 = vadd.f32 %v6750_v33, %v15101_v49 }
 0x71c   :  { %v6369_v54 = vpop.f32.mrb[222].mxu0 }
 0x71d   :  { %18404 = vst [vmem:[#allocation57_spill] sm:$0xff] %v15353_v56  ;;  %v6755_v58 = vadd.f32 %v9169_v30, %v6369_v54  ;;  %v6371_v6 = vpop.f32.mrb[223].mxu0  ;;  %v15355_v19 = vpop.f32.mrb[30].mxu1  ;;  %v18412_v56 = vld [vmem:[#allocation50_spill] sm:$0xff] }
 0x71e   :  { %v15357_v45 = vpop.f32.mrb[31].mxu1 }
 0x71f   :  { %v15360_v48 = vadd.f32 %v6755_v58, %v18405_v13 }
 0x720   :  { %v6374_v32 = vpop.f32.mrb[224].mxu0 }
 0x721   :  { %18406 = vst [vmem:[#allocation9_spill] sm:$0xff] %v15360_v48  ;;  %v6760_v62 = vadd.f32 %v6759_v40, %v6374_v32  ;;  %v15362_v34 = vpop.f32.mrb[32].mxu1  ;;  %v6376_v60 = vpop.f32.mrb[225].mxu0 }
 0x722   :  { %v15364_v36 = vpop.f32.mrb[33].mxu1 }
 0x723   :  { %v15367_v49 = vadd.f32 %v6760_v62, %v18407_v0 }
 0x724   :  { %v6379_v33 = vpop.f32.mrb[226].mxu0 }
 0x725   :  { %18408 = vst [vmem:[#allocation14_spill] sm:$0xff] %v15367_v49  ;;  %v6765_v30 = vadd.f32 %v9172_v8, %v6379_v33  ;;  %v15369_v54 = vpop.f32.mrb[34].mxu1  ;;  %v6381_v6 = vpop.f32.mrb[227].mxu0 }
 0x726   :  { %v15371_v14 = vpop.f32.mrb[35].mxu1 }
 0x727   :  { %v15374_v13 = vadd.f32 %v6765_v30, %v18409_v10 }
 0x728   :  { %v6384_v58 = vpop.f32.mrb[228].mxu0 }
 0x729   :  { %18410 = vst [vmem:[#allocation4_spill] sm:$0xff] %v15374_v13  ;;  %v6770_v40 = vadd.f32 %v6769_v57, %v6384_v58  ;;  %v15376_v32 = vpop.f32.mrb[36].mxu1  ;;  %v6386_v60 = vpop.f32.mrb[229].mxu0 }
 0x72a   :  { %v15378_v48 = vpop.f32.mrb[37].mxu1 }
 0x72b   :  { %v15381_v0 = vadd.f32 %v6770_v40, %v15125_v25 }
 0x72c   :  { %v6389_v62 = vpop.f32.mrb[230].mxu0 }
 0x72d   :  { %v6775_v8 = vadd.f32 %v9175_v1, %v6389_v62  ;;  %v15383_v33 = vpop.f32.mrb[38].mxu1  ;;  %v6391_v6 = vpop.f32.mrb[231].mxu0 }
 0x72e   :  { %18411 = vst [vmem:[#allocation20_spill] sm:$0xff] %v15383_v33  ;;  %v15385_v49 = vpop.f32.mrb[39].mxu1 }
 0x72f   :  { %v15388_v10 = vadd.f32 %v6775_v8, %v18412_v56 }
 0x730   :  { %v6394_v30 = vpop.f32.mrb[232].mxu0 }
 0x731   :  { %v6780_v57 = vadd.f32 %v6779_v59, %v6394_v30  ;;  %v15390_v58 = vpop.f32.mrb[40].mxu1  ;;  %v6396_v60 = vpop.f32.mrb[233].mxu0 }
 0x732   :  { %18413 = vst [vmem:[#allocation16_spill] sm:$0xff] %v15390_v58  ;;  %v15392_v13 = vpop.f32.mrb[41].mxu1 }
 0x733   :  { %v15395_v25 = vadd.f32 %v6780_v57, %v15135_v63 }
 0x734   :  { %v6399_v40 = vpop.f32.mrb[234].mxu0 }
 0x735   :  { %v6785_v1 = vadd.f32 %v15321_v55, %v6399_v40  ;;  %v15398_v62 = vpop.f32.mrb[42].mxu1  ;;  %v6401_v6 = vpop.f32.mrb[235].mxu0 }
 0x736   :  { %18414 = vst [vmem:[#allocation19_spill] sm:$0xff] %v15398_v62  ;;  %v15400_v33 = vpop.f32.mrb[43].mxu1 }
 0x737   :  { %v15403_v56 = vadd.f32 %v6785_v1, %v15128_v26 }
 0x738   :  { %v6404_v59 = vpop.f32.mrb[236].mxu0 }
 0x739   :  { %18415 = vst [vmem:[#allocation25_spill] sm:$0xff] %v15403_v56  ;;  %v6790_v8 = vadd.f32 %v15329_v47, %v6404_v59  ;;  %v15406_v30 = vpop.f32.mrb[44].mxu1  ;;  %v6406_v60 = vpop.f32.mrb[237].mxu0 }
 0x73a   :  { %18416 = vst [vmem:[#allocation21_spill] sm:$0xff] %v15406_v30  ;;  %v15408_v58 = vpop.f32.mrb[45].mxu1 }
 0x73b   :  { %v15411_v63 = vadd.f32 %v6790_v8, %v15144_v42 }
 0x73c   :  { %v6409_v55 = vpop.f32.mrb[238].mxu0 }
 0x73d   :  { %v6795_v57 = vadd.f32 %v15327_v22, %v6409_v55  ;;  %v15414_v40 = vpop.f32.mrb[46].mxu1  ;;  %v6411_v6 = vpop.f32.mrb[239].mxu0 }
 0x73e   :  { %18417 = vst [vmem:[#allocation65_spill] sm:$0xff] %v15414_v40  ;;  %v15416_v62 = vpop.f32.mrb[47].mxu1 }
 0x73f   :  { %v15419_v26 = vadd.f32 %v6795_v57, %v15138_v4 }
 0x740   :  { %v6414_v47 = vpop.f32.mrb[240].mxu0 }
 0x741   :  { %v6800_v1 = vadd.f32 %v15336_v2, %v6414_v47  ;;  %v15422_v59 = vpop.f32.mrb[48].mxu1  ;;  %v6416_v60 = vpop.f32.mrb[241].mxu0 }
 0x742   :  { %18418 = vst [vmem:[#allocation27_spill] sm:$0xff] %v15422_v59  ;;  %v15424_v30 = vpop.f32.mrb[49].mxu1 }
 0x743   :  { %v15427_v42 = vadd.f32 %v6800_v1, %v15153_v61 }
 0x744   :  { %v6419_v22 = vpop.f32.mrb[242].mxu0 }
 0x745   :  { %v6805_v8 = vadd.f32 %v15334_v35, %v6419_v22  ;;  %v15430_v55 = vpop.f32.mrb[50].mxu1  ;;  %v6421_v6 = vpop.f32.mrb[243].mxu0 }
 0x746   :  { %18419 = vst [vmem:[#allocation22_spill] sm:$0xff] %v15430_v55  ;;  %v15432_v40 = vpop.f32.mrb[51].mxu1 }
 0x747   :  { %v15435_v4 = vadd.f32 %v6805_v8, %v15147_v52 }
 0x748   :  { %v6424_v2 = vpop.f32.mrb[244].mxu0 }
 0x749   :  { %18420 = vst [vmem:[#allocation67_spill] sm:$0xff] %v15435_v4  ;;  %v6810_v57 = vadd.f32 %v15343_v9, %v6424_v2  ;;  %v15438_v47 = vpop.f32.mrb[52].mxu1  ;;  %v6426_v60 = vpop.f32.mrb[245].mxu0 }
 0x74a   :  { %18421 = vst [vmem:[#allocation18_spill] sm:$0xff] %v15438_v47  ;;  %v15440_v59 = vpop.f32.mrb[53].mxu1 }
 0x74b   :  { %v15443_v61 = vadd.f32 %v6810_v57, %v15162_v21 }
 0x74c   :  { %v6429_v35 = vpop.f32.mrb[246].mxu0 }
 0x74d   :  { %v6815_v1 = vadd.f32 %v15341_v23, %v6429_v35  ;;  %v15446_v22 = vpop.f32.mrb[54].mxu1  ;;  %v6431_v6 = vpop.f32.mrb[247].mxu0 }
 0x74e   :  { %18422 = vst [vmem:[#allocation24_spill] sm:$0xff] %v15446_v22  ;;  %v15448_v55 = vpop.f32.mrb[55].mxu1 }
 0x74f   :  { %v15451_v52 = vadd.f32 %v6815_v1, %v15156_v41  ;;  %v7062_v41 = vadd.f32 %v15294_v29, %v15291_v3 }
 0x750   :  { %v6434_v9 = vpop.f32.mrb[248].mxu0 }
 0x751   :  { %v6820_v8 = vadd.f32 %v15350_v28, %v6434_v9  ;;  %v15454_v2 = vpop.f32.mrb[56].mxu1  ;;  %v6436_v60 = vpop.f32.mrb[249].mxu0  ;;  %v7063_v9 = vadd.f32 %v7062_v41, %v15297_v27 }
 0x752   :  { %v15456_v47 = vpop.f32.mrb[57].mxu1 }
 0x753   :  { %v15459_v21 = vadd.f32 %v6820_v8, %v15171_v46 }
 0x754   :  { %v6439_v23 = vpop.f32.mrb[250].mxu0 }
 0x755   :  { %v6825_v57 = vadd.f32 %v15348_v17, %v6439_v23  ;;  %v15462_v35 = vpop.f32.mrb[58].mxu1  ;;  %v6441_v6 = vpop.f32.mrb[251].mxu0  ;;  %v7064_v23 = vadd.f32 %v7063_v9, %v15300_v20 }
 0x756   :  { %18423 = vst [vmem:[#allocation69_spill] sm:$0xff] %v15462_v35  ;;  %v15464_v22 = vpop.f32.mrb[59].mxu1 }
 0x757   :  { %v15469_v28 = vadd.f32 %v6825_v57, %v15165_v44  ;;  %v7065_v29 = vadd.f32 %v7064_v23, %v15303_v7 }
 0x758   :  { %v6444_v1 = vpop.f32.mrb[252].mxu0 }
 0x759   :  { %18424 = vst [vmem:[#allocation66_spill] sm:$0xff] %v15469_v28  ;;  %v6830_v46 = vadd.f32 %v15357_v45, %v6444_v1  ;;  %v15473_v8 = vpop.f32.mrb[60].mxu1  ;;  %v6446_v60 = vpop.f32.mrb[253].mxu0  ;;  %v7066_v45 = vadd.f32 %v7065_v29, %v15306_v43 }
 0x75a   :  { %v15475_v17 = vpop.f32.mrb[61].mxu1 }
 0x75b   :  { %v15479_v6 = vadd.f32 %v6830_v46, %v15180_v53  ;;  %v7067_v9 = vadd.f32 %v7066_v45, %v15309_v51 }
 0x75c   :  { %v6449_v35 = vpop.f32.mrb[254].mxu0 }
 0x75d   :  { %v6835_v44 = vadd.f32 %v15355_v19, %v6449_v35  ;;  %v6451_v57 = vpop.f32.mrb[255].mxu0  ;;  %v15483_v3 = vpop.f32.mrb[62].mxu1  ;;  %v7068_v23 = vadd.f32 %v7067_v9, %v15312_v38 }
 0x75e   :  { %v15485_v41 = vpop.f32.mrb[63].mxu1 }
 0x75f   :  { %v15489_v1 = vadd.f32 %v6835_v44, %v15174_v50  ;;  %v7069_v57 = vadd.f32 %v7068_v23, %v15315_v16 }
 0x760   :  { %v6454_v60 = vpop.f32.mrb[0].mxu0 }
 0x761   :  { %v6840_v53 = vadd.f32 %v15364_v36, %v6454_v60  ;;  %v6456_v46 = vpop.f32.mrb[1].mxu0  ;;  %v7070_v50 = vadd.f32 %v7069_v57, %v15319_v11 }
 0x763   :  { %v15495_v19 = vadd.f32 %v6840_v53, %v15189_v24  ;;  %v7071_v36 = vadd.f32 %v7070_v50, %v15325_v39 }
 0x764   :  { %v6459_v35 = vpop.f32.mrb[2].mxu0 }
 0x765   :  { %v6845_v7 = vadd.f32 %v15362_v34, %v6459_v35  ;;  %v6461_v29 = vpop.f32.mrb[3].mxu0  ;;  %v7072_v24 = vadd.f32 %v7071_v36, %v15332_v37  ;;  %v18427_v36 = vld [vmem:[#allocation9_spill] sm:$0xff] }
 0x766   :  { %v18426_v29 = vld [vmem:[#allocation57_spill] sm:$0xff] }
 0x767   :  { %v15501_v44 = vadd.f32 %v6845_v7, %v15183_v5  ;;  %v7073_v34 = vadd.f32 %v7072_v24, %v15339_v31  ;;  %v18429_v31 = vld [vmem:[#allocation14_spill] sm:$0xff] }
 0x768   :  { %v6464_v45 = vpop.f32.mrb[4].mxu0 }
 0x769   :  { %18425 = vst [vmem:[#allocation70_spill] sm:$0xff] %v15501_v44  ;;  %v6850_v60 = vadd.f32 %v15371_v14, %v6464_v45  ;;  %v6466_v9 = vpop.f32.mrb[5].mxu0  ;;  %v7074_v5 = vadd.f32 %v7073_v34, %v15346_v18 }
 0x76b   :  { %v15507_v53 = vadd.f32 %v6850_v60, %v15198_v12  ;;  %v7075_v14 = vadd.f32 %v7074_v5, %v18426_v29  ;;  %v18428_v60 = vld [vmem:[#allocation54_spill] sm:$0xff] }
 0x76c   :  { %v6469_v46 = vpop.f32.mrb[6].mxu0 }
 0x76d   :  { %v6855_v23 = vadd.f32 %v15369_v54, %v6469_v46  ;;  %v6471_v35 = vpop.f32.mrb[7].mxu0  ;;  %v7076_v12 = vadd.f32 %v7075_v14, %v18427_v36 }
 0x76e   :  { %v18430_v35 = vld [vmem:[#allocation4_spill] sm:$0xff] }
 0x76f   :  { %v15513_v7 = vadd.f32 %v6855_v23, %v15192_v15  ;;  %v7077_v54 = vadd.f32 %v7076_v12, %v18429_v31  ;;  %v18431_v23 = vld [vmem:[#allocation52_spill] sm:$0xff] }
 0x770   :  { %v6474_v57 = vpop.f32.mrb[8].mxu0 }
 0x771   :  { %v6860_v50 = vadd.f32 %v15378_v48, %v6474_v57  ;;  %v6476_v45 = vpop.f32.mrb[9].mxu0  ;;  %v7078_v15 = vadd.f32 %v7077_v54, %v18430_v35 }
 0x772   :  { %v18433_v45 = vld [vmem:[#allocation47_spill] sm:$0xff] }
 0x773   :  { %v15519_v9 = vadd.f32 %v6860_v50, %v18428_v60  ;;  %v7079_v48 = vadd.f32 %v7078_v15, %v15381_v0 }
 0x774   :  { %v6479_v24 = vpop.f32.mrb[10].mxu0 }
 0x775   :  { %v6865_v46 = vadd.f32 %v15376_v32, %v6479_v24  ;;  %v6481_v34 = vpop.f32.mrb[11].mxu0  ;;  %v7080_v50 = vadd.f32 %v7079_v48, %v15388_v10  ;;  %v18434_v24 = vld [vmem:[#allocation20_spill] sm:$0xff] }
 0x777   :  { %v15525_v18 = vadd.f32 %v6865_v46, %v18431_v23  ;;  %v7081_v32 = vadd.f32 %v7080_v50, %v15395_v25  ;;  %v18435_v23 = vld [vmem:[#allocation42_spill] sm:$0xff] }
 0x778   :  { %v6484_v5 = vpop.f32.mrb[12].mxu0 }
 0x779   :  { %18432 = vst [vmem:[#allocation72_spill] sm:$0xff] %v15525_v18  ;;  %v6870_v57 = vadd.f32 %v15385_v49, %v6484_v5  ;;  %v6486_v14 = vpop.f32.mrb[13].mxu0  ;;  %v7082_v46 = vadd.f32 %v7081_v32, %v15403_v56 }
 0x77a   :  { %v18436_v14 = vld [vmem:[#allocation17_spill] sm:$0xff] }
 0x77b   :  { %v15531_v60 = vadd.f32 %v6870_v57, %v18433_v45  ;;  %v7083_v49 = vadd.f32 %v7082_v46, %v15411_v63 }
 0x77c   :  { %v6489_v12 = vpop.f32.mrb[14].mxu0 }
 0x77d   :  { %v6875_v34 = vadd.f32 %v18434_v24, %v6489_v12  ;;  %v6491_v54 = vpop.f32.mrb[15].mxu0  ;;  %v7084_v57 = vadd.f32 %v7083_v49, %v15419_v26  ;;  %v18437_v24 = vld [vmem:[#allocation16_spill] sm:$0xff] }
 0x77f   :  { %v15537_v35 = vadd.f32 %v6875_v34, %v18435_v23  ;;  %v7085_v12 = vadd.f32 %v7084_v57, %v15427_v42  ;;  %v18438_v23 = vld [vmem:[#allocation48_spill] sm:$0xff] }
 0x780   :  { %v6494_v15 = vpop.f32.mrb[16].mxu0 }
 0x781   :  { %v6880_v5 = vadd.f32 %v15392_v13, %v6494_v15  ;;  %v6496_v48 = vpop.f32.mrb[17].mxu0  ;;  %v7086_v34 = vadd.f32 %v7085_v12, %v15435_v4 }
 0x782   :  { %v18440_v48 = vld [vmem:[#allocation23_spill] sm:$0xff] }
 0x783   :  { %v15543_v45 = vadd.f32 %v6880_v5, %v18436_v14  ;;  %v7087_v13 = vadd.f32 %v7086_v34, %v15443_v61 }
 0x784   :  { %v6499_v50 = vpop.f32.mrb[18].mxu0 }
 0x785   :  { %v6885_v54 = vadd.f32 %v18437_v24, %v6499_v50  ;;  %v6501_v32 = vpop.f32.mrb[19].mxu0  ;;  %v7088_v5 = vadd.f32 %v7087_v13, %v15451_v52  ;;  %v18441_v24 = vld [vmem:[#allocation19_spill] sm:$0xff] }
 0x787   :  { %v15549_v56 = vadd.f32 %v6885_v54, %v18438_v23  ;;  %v7089_v50 = vadd.f32 %v7088_v5, %v15459_v21  ;;  %v18442_v23 = vld [vmem:[#allocation56_spill] sm:$0xff] }
 0x788   :  { %v6504_v46 = vpop.f32.mrb[20].mxu0 }
 0x789   :  { %18439 = vst [vmem:[#allocation68_spill] sm:$0xff] %v15549_v56  ;;  %v6890_v15 = vadd.f32 %v15400_v33, %v6504_v46  ;;  %v6506_v49 = vpop.f32.mrb[21].mxu0  ;;  %v7090_v54 = vadd.f32 %v7089_v50, %v15469_v28 }
 0x78a   :  { %v18443_v49 = vld [vmem:[#allocation60_spill] sm:$0xff] }
 0x78b   :  { %v15555_v14 = vadd.f32 %v6890_v15, %v18440_v48  ;;  %v7091_v33 = vadd.f32 %v7090_v54, %v15479_v6 }
 0x78c   :  { %v6509_v57 = vpop.f32.mrb[22].mxu0 }
 0x78d   :  { %v6895_v32 = vadd.f32 %v18441_v24, %v6509_v57  ;;  %v6511_v12 = vpop.f32.mrb[23].mxu0  ;;  %v7092_v15 = vadd.f32 %v7091_v33, %v15489_v1  ;;  %v18444_v24 = vld [vmem:[#allocation21_spill] sm:$0xff] }
 0x78f   :  { %v15561_v4 = vadd.f32 %v6895_v32, %v18442_v23  ;;  %v7093_v57 = vadd.f32 %v7092_v15, %v15495_v19  ;;  %v18445_v23 = vld [vmem:[#allocation6_spill] sm:$0xff] }
 0x790   :  { %v6514_v34 = vpop.f32.mrb[24].mxu0 }
 0x791   :  { %v6900_v46 = vadd.f32 %v15408_v58, %v6514_v34  ;;  %v6516_v13 = vpop.f32.mrb[25].mxu0  ;;  %v7094_v32 = vadd.f32 %v7093_v57, %v15501_v44 }
 0x792   :  { %v18447_v13 = vld [vmem:[#allocation36_spill] sm:$0xff] }
 0x793   :  { %v15567_v48 = vadd.f32 %v6900_v46, %v18443_v49  ;;  %v7095_v58 = vadd.f32 %v7094_v32, %v15507_v53 }
 0x794   :  { %v6519_v5 = vpop.f32.mrb[26].mxu0 }
 0x795   :  { %v6905_v12 = vadd.f32 %v18444_v24, %v6519_v5  ;;  %v6521_v50 = vpop.f32.mrb[27].mxu0  ;;  %v7096_v46 = vadd.f32 %v7095_v58, %v15513_v7  ;;  %v18448_v24 = vld [vmem:[#allocation65_spill] sm:$0xff] }
 0x797   :  { %v15573_v28 = vadd.f32 %v6905_v12, %v18445_v23  ;;  %v7097_v5 = vadd.f32 %v7096_v46, %v15519_v9  ;;  %v18449_v23 = vld [vmem:[#allocation58_spill] sm:$0xff] }
 0x798   :  { %v6524_v54 = vpop.f32.mrb[28].mxu0 }
 0x799   :  { %18446 = vst [vmem:[#allocation26_spill] sm:$0xff] %v15573_v28  ;;  %v6910_v34 = vadd.f32 %v15416_v62, %v6524_v54  ;;  %v6526_v33 = vpop.f32.mrb[29].mxu0  ;;  %v7098_v12 = vadd.f32 %v7097_v5, %v15525_v18 }
 0x79a   :  { %v18450_v33 = vld [vmem:[#allocation40_spill] sm:$0xff] }
 0x79b   :  { %v15579_v49 = vadd.f32 %v6910_v34, %v18447_v13  ;;  %v7099_v62 = vadd.f32 %v7098_v12, %v15531_v60 }
 0x79c   :  { %v6529_v15 = vpop.f32.mrb[30].mxu0 }
 0x79d   :  { %v6915_v50 = vadd.f32 %v18448_v24, %v6529_v15  ;;  %v6531_v57 = vpop.f32.mrb[31].mxu0  ;;  %v7100_v34 = vadd.f32 %v7099_v62, %v15537_v35  ;;  %v18452_v24 = vld [vmem:[#allocation27_spill] sm:$0xff] }
 0x79f   :  { %v15585_v44 = vadd.f32 %v6915_v50, %v18449_v23  ;;  %v7101_v15 = vadd.f32 %v7100_v34, %v15543_v45  ;;  %v18453_v23 = vld [vmem:[#allocation51_spill] sm:$0xff] }
 0x7a0   :  { %v6534_v32 = vpop.f32.mrb[32].mxu0 }
 0x7a1   :  { %v6920_v54 = vadd.f32 %v15424_v30, %v6534_v32  ;;  %v6536_v58 = vpop.f32.mrb[33].mxu0  ;;  %v7102_v50 = vadd.f32 %v7101_v15, %v15549_v56 }
 0x7a2   :  { %v18455_v58 = vld [vmem:[#allocation39_spill] sm:$0xff] }
 0x7a3   :  { %v15591_v13 = vadd.f32 %v6920_v54, %v18450_v33  ;;  %v7103_v30 = vadd.f32 %v7102_v50, %v15555_v14 }
 0x7a4   :  { %v6539_v46 = vpop.f32.mrb[34].mxu0 }
 0x7a5   :  { %18451 = vst [vmem:[#allocation71_spill] sm:$0xff] %v15591_v13  ;;  %v6925_v57 = vadd.f32 %v18452_v24, %v6539_v46  ;;  %v6541_v5 = vpop.f32.mrb[35].mxu0  ;;  %v7104_v54 = vadd.f32 %v7103_v30, %v15561_v4  ;;  %v18457_v24 = vld [vmem:[#allocation22_spill] sm:$0xff] }
 0x7a7   :  { %v15597_v18 = vadd.f32 %v6925_v57, %v18453_v23  ;;  %v7105_v46 = vadd.f32 %v7104_v54, %v15567_v48  ;;  %v18458_v23 = vld [vmem:[#allocation38_spill] sm:$0xff] }
 0x7a8   :  { %v6544_v12 = vpop.f32.mrb[36].mxu0 }
 0x7a9   :  { %18454 = vst [vmem:[#allocation73_spill] sm:$0xff] %v15597_v18  ;;  %v6930_v32 = vadd.f32 %v15432_v40, %v6544_v12  ;;  %v6546_v62 = vpop.f32.mrb[37].mxu0  ;;  %v7106_v57 = vadd.f32 %v7105_v46, %v15573_v28 }
 0x7aa   :  { %v18460_v62 = vld [vmem:[#allocation10_spill] sm:$0xff] }
 0x7ab   :  { %v15603_v33 = vadd.f32 %v6930_v32, %v18455_v58  ;;  %v7107_v40 = vadd.f32 %v7106_v57, %v15579_v49 }
 0x7ac   :  { %v6549_v34 = vpop.f32.mrb[38].mxu0 }
 0x7ad   :  { %18456 = vst [vmem:[#allocation5_spill] sm:$0xff] %v15603_v33  ;;  %v6935_v5 = vadd.f32 %v18457_v24, %v6549_v34  ;;  %v6551_v15 = vpop.f32.mrb[39].mxu0  ;;  %v7108_v32 = vadd.f32 %v7107_v40, %v15585_v44  ;;  %v18462_v24 = vld [vmem:[#allocation18_spill] sm:$0xff] }
 0x7af   :  { %v15609_v56 = vadd.f32 %v6935_v5, %v18458_v23  ;;  %v7109_v34 = vadd.f32 %v7108_v32, %v15591_v13  ;;  %v18463_v23 = vld [vmem:[#allocation49_spill] sm:$0xff] }
 0x7b0   :  { %v6554_v50 = vpop.f32.mrb[40].mxu0 }
 0x7b1   :  { %18459 = vst [vmem:[#allocation29_spill] sm:$0xff] %v15609_v56  ;;  %v6940_v12 = vadd.f32 %v15440_v59, %v6554_v50  ;;  %v6556_v30 = vpop.f32.mrb[41].mxu0  ;;  %v7110_v5 = vadd.f32 %v7109_v34, %v15597_v18 }
 0x7b2   :  { %v18465_v30 = vld [vmem:[#allocation53_spill] sm:$0xff] }
 0x7b3   :  { %v15615_v58 = vadd.f32 %v6940_v12, %v18460_v62  ;;  %v7111_v59 = vadd.f32 %v7110_v5, %v15603_v33 }
 0x7b4   :  { %v6559_v54 = vpop.f32.mrb[42].mxu0 }
 0x7b5   :  { %18461 = vst [vmem:[#allocation3_spill] sm:$0xff] %v15615_v58  ;;  %v6945_v15 = vadd.f32 %v18462_v24, %v6559_v54  ;;  %v6561_v46 = vpop.f32.mrb[43].mxu0  ;;  %v7112_v12 = vadd.f32 %v7111_v59, %v15609_v56  ;;  %v18467_v24 = vld [vmem:[#allocation24_spill] sm:$0xff] }
 0x7b7   :  { %v15621_v28 = vadd.f32 %v6945_v15, %v18463_v23  ;;  %v7113_v54 = vadd.f32 %v7112_v12, %v15615_v58  ;;  %v18468_v23 = vld [vmem:[#allocation28_spill] sm:$0xff] }
 0x7b8   :  { %v6564_v57 = vpop.f32.mrb[44].mxu0 }
 0x7b9   :  { %18464 = vst [vmem:[#allocation30_spill] sm:$0xff] %v15621_v28  ;;  %v6950_v50 = vadd.f32 %v15448_v55, %v6564_v57  ;;  %v6566_v40 = vpop.f32.mrb[45].mxu0  ;;  %v7114_v15 = vadd.f32 %v7113_v54, %v15621_v28  ;;  %v18471_v28 = vld [vmem:[#allocation55_spill] sm:$0xff] }
 0x7ba   :  { %v18469_v40 = vld [vmem:[#allocation41_spill] sm:$0xff] }
 0x7bb   :  { %v15627_v62 = vadd.f32 %v6950_v50, %v18465_v30 }
 0x7bc   :  { %v6569_v32 = vpop.f32.mrb[46].mxu0 }
 0x7bd   :  { %18466 = vst [vmem:[#allocation32_spill] sm:$0xff] %v15627_v62  ;;  %v6955_v46 = vadd.f32 %v18467_v24, %v6569_v32  ;;  %v6571_v34 = vpop.f32.mrb[47].mxu0  ;;  %v7115_v5 = vadd.f32 %v7114_v15, %v15627_v62  ;;  %v18470_v32 = vld [vmem:[#allocation8_spill] sm:$0xff] }
 0x7bf   :  { %v7053_v18 = vadd.f32 %v6955_v46, %v18468_v23 }
 0x7c0   :  { %v6574_v13 = vpop.f32.mrb[48].mxu0 }
 0x7c1   :  { %v6960_v55 = vadd.f32 %v15456_v47, %v6574_v13  ;;  %v6576_v57 = vpop.f32.mrb[49].mxu0  ;;  %v7116_v59 = vadd.f32 %v7115_v5, %v7053_v18  ;;  %v18472_v13 = vld [vmem:[#allocation69_spill] sm:$0xff] }
 0x7c3   :  { %v7054_v50 = vadd.f32 %v6960_v55, %v18469_v40  ;;  %v18473_v55 = vld [vmem:[#allocation62_spill] sm:$0xff] }
 0x7c4   :  { %v6579_v30 = vpop.f32.mrb[50].mxu0 }
 0x7c5   :  { %v7117_v56 = vadd.f32 %v7116_v59, %v7054_v50  ;;  %v6965_v12 = vadd.f32 %v15454_v2, %v6579_v30  ;;  %v6581_v58 = vpop.f32.mrb[51].mxu0  ;;  %v18474_v30 = vld [vmem:[#allocation61_spill] sm:$0xff] }
 0x7c7   :  { %v7055_v24 = vadd.f32 %v6965_v12, %v18470_v32 }
 0x7c8   :  { %v6584_v34 = vpop.f32.mrb[52].mxu0 }
 0x7c9   :  { %v7118_v54 = vadd.f32 %v7117_v56, %v7055_v24  ;;  %v6970_v46 = vadd.f32 %v15464_v22, %v6584_v34  ;;  %v6586_v23 = vpop.f32.mrb[53].mxu0 }
 0x7cb   :  { %v7056_v15 = vadd.f32 %v6970_v46, %v18471_v28  ;;  %v18475_v28 = vld [vmem:[#allocation11_spill] sm:$0xff] }
 0x7cc   :  { %v6589_v62 = vpop.f32.mrb[54].mxu0 }
 0x7cd   :  { %v7119_v47 = vadd.f32 %v7118_v54, %v7056_v15  ;;  %v6975_v5 = vadd.f32 %v18472_v13, %v6589_v62  ;;  %v6591_v57 = vpop.f32.mrb[55].mxu0 }
 0x7cf   :  { %v7057_v40 = vadd.f32 %v6975_v5, %v18473_v55  ;;  %v18476_v5 = vld [vmem:[#allocation12_spill] sm:$0xff] }
 0x7d0   :  { %v6594_v59 = vpop.f32.mrb[56].mxu0 }
 0x7d1   :  { %v7120_v33 = vadd.f32 %v7119_v47, %v7057_v40  ;;  %v6980_v2 = vadd.f32 %v15475_v17, %v6594_v59  ;;  %v6596_v58 = vpop.f32.mrb[57].mxu0 }
 0x7d3   :  { %v7058_v12 = vadd.f32 %v6980_v2, %v18474_v30  ;;  %v18477_v2 = vld [vmem:[#allocation59_spill] sm:$0xff] }
 0x7d4   :  { %v6599_v56 = vpop.f32.mrb[58].mxu0 }
 0x7d5   :  { %v7121_v32 = vadd.f32 %v7120_v33, %v7058_v12  ;;  %v6985_v22 = vadd.f32 %v15473_v8, %v6599_v56  ;;  %v6601_v34 = vpop.f32.mrb[59].mxu0 }
 0x7d7   :  { %v7059_v46 = vadd.f32 %v6985_v22, %v18475_v28 }
 0x7d8   :  { %v6604_v54 = vpop.f32.mrb[60].mxu0 }
 0x7d9   :  { %v7122_v23 = vadd.f32 %v7121_v32, %v7059_v46  ;;  %v6990_v62 = vadd.f32 %v15485_v41, %v6604_v54  ;;  %v6606_v13 = vpop.f32.mrb[61].mxu0 }
 0x7db   :  { %v7060_v57 = vadd.f32 %v6990_v62, %v18476_v5 }
 0x7dc   :  { %v6609_v47 = vpop.f32.mrb[62].mxu0 }
 0x7dd   :  { %v7123_v55 = vadd.f32 %v7122_v23, %v7060_v57  ;;  %v6995_v17 = vadd.f32 %v15483_v3, %v6609_v47  ;;  %v6611_v59 = vpop.f32.mrb[63].mxu0 }
 0x7df   :  { %v7061_v58 = vadd.f32 %v6995_v17, %v18477_v2  ;;  %v18485_v17 = vld [vmem:[#allocation63_spill] sm:$0xff] }
 0x7e1   :  { %v7124_v33 = vadd.f32 %v7123_v55, %v7061_v58 }
 0x7e3   :  { %v7125_v30 = vrot.slane %v7124_v33, 4 }
 0x7e5   :  { %v7126_v8 = vadd.f32 %v7125_v30, %v7124_v33 }
 0x7e7   :  { %v7127_v56 = vrot.slane %v7126_v8, 2 }
 0x7e9   :  { %v7128_v34 = vadd.f32 %v7127_v56, %v7126_v8 }
 0x7eb   :  { %v7129_v22 = vrot.slane %v7128_v34, 1 }
 0x7ed   :  { %v7130_v28 = vadd.f32 %v7129_v22, %v7128_v34 }
 0x7ef   :  { %v15650_v32 = vmul.f32 0.001953125, %v7130_v28 }
 0x7f1   :  { %v15653_v41 = vsub.f32 %v7053_v18, %v15650_v32  ;;  %v15656_v54 = vsub.f32 %v7054_v50, %v15650_v32  ;;  %v15659_v3 = vsub.f32 %v7055_v24, %v15650_v32  ;;  %v15662_v23 = vsub.f32 %v7056_v15, %v15650_v32  ;;  %v18483_v24 = vld [vmem:[#allocation15_spill] sm:$0xff]  ;;  %v18484_v15 = vld [vmem:[#allocation13_spill] sm:$0xff] }
 0x7f2   :  { %v15665_v62 = vsub.f32 %v7057_v40, %v15650_v32  ;;  %v15668_v13 = vsub.f32 %v7058_v12, %v15650_v32  ;;  %v15671_v5 = vsub.f32 %v7059_v46, %v15650_v32  ;;  %v15674_v18 = vsub.f32 %v7060_v57, %v15650_v32 }
 0x7f3   :  { %18478 = vst [vmem:[#allocation31_spill] sm:$0xff] %v15659_v3  ;;  %18479 = vst [vmem:[#allocation33_spill] sm:$0xff] %v15662_v23  ;;  %v15677_v50 = vsub.f32 %v7061_v58, %v15650_v32  ;;  %v15681_v47 = vsub.f32 %v18483_v24, %v15650_v32  ;;  %v15685_v40 = vsub.f32 %v18484_v15, %v15650_v32 }
 0x7f4   :  { %18480 = vst [vmem:[#allocation37_spill] sm:$0xff] %v15665_v62  ;;  %18481 = vst [vmem:[#allocation35_spill] sm:$0xff] %v15668_v13  ;;  %v15689_v12 = vsub.f32 %v15297_v27, %v15650_v32  ;;  %v15697_v55 = vsub.f32 %v15300_v20, %v15650_v32  ;;  %v15701_v59 = vsub.f32 %v18485_v17, %v15650_v32 }
 0x7f5   :  { %18482 = vst [vmem:[#allocation34_spill] sm:$0xff] %v15671_v5  ;;  %v7196_v46 = vmul.f32 %v15681_v47, %v15681_v47  ;;  %v7197_v57 = vmul.f32 %v15685_v40, %v15685_v40  ;;  %v15707_v27 = vsub.f32 %v15306_v43, %v15650_v32  ;;  %v15713_v20 = vsub.f32 %v15309_v51, %v15650_v32 }
 0x7f6   :  { %v7198_v2 = vmul.f32 %v15689_v12, %v15689_v12  ;;  %v7199_v33 = vmul.f32 %v15697_v55, %v15697_v55  ;;  %v7200_v8 = vmul.f32 %v15701_v59, %v15701_v59  ;;  %v15719_v34 = vsub.f32 %v15312_v38, %v15650_v32 }
 0x7f7   :  { %v7260_v58 = vadd.f32 %v7197_v57, %v7196_v46  ;;  %v7201_v43 = vmul.f32 %v15707_v27, %v15707_v27  ;;  %v15725_v28 = vsub.f32 %v15315_v16, %v15650_v32  ;;  %v7202_v51 = vmul.f32 %v15713_v20, %v15713_v20 }
 0x7f8   :  { %v15731_v15 = vsub.f32 %v15319_v11, %v15650_v32  ;;  %v7203_v38 = vmul.f32 %v15719_v34, %v15719_v34  ;;  %v15737_v57 = vsub.f32 %v15325_v39, %v15650_v32 }
 0x7f9   :  { %v7261_v30 = vadd.f32 %v7260_v58, %v7198_v2  ;;  %v7204_v16 = vmul.f32 %v15725_v28, %v15725_v28  ;;  %v15743_v2 = vsub.f32 %v15332_v37, %v15650_v32 }
 0x7fa   :  { %v7205_v11 = vmul.f32 %v15731_v15, %v15731_v15  ;;  %v7206_v39 = vmul.f32 %v15737_v57, %v15737_v57 }
 0x7fb   :  { %v7262_v56 = vadd.f32 %v7261_v30, %v7199_v33  ;;  %v18486_v33 = vld [vmem:[#allocation7_spill] sm:$0xff]  ;;  %v7207_v37 = vmul.f32 %v15743_v2, %v15743_v2 }
 0x7fc   :  { %v15749_v30 = vsub.f32 %v18486_v33, %v15650_v32  ;;  %v18488_v33 = vld [vmem:[#allocation4_spill] sm:$0xff] }
 0x7fd   :  { %v7263_v22 = vadd.f32 %v7262_v56, %v7200_v8  ;;  %v18487_v56 = vld [vmem:[#allocation64_spill] sm:$0xff] }
 0x7ff   :  { %v7264_v24 = vadd.f32 %v7263_v22, %v7201_v43  ;;  %v15755_v43 = vsub.f32 %v18487_v56, %v15650_v32  ;;  %v15785_v56 = vsub.f32 %v15381_v0, %v15650_v32 }
 0x801   :  { %v7265_v46 = vadd.f32 %v7264_v24, %v7202_v51  ;;  %v15761_v51 = vsub.f32 %v18426_v29, %v15650_v32  ;;  %v7208_v24 = vmul.f32 %v15749_v30, %v15749_v30  ;;  %v7214_v0 = vmul.f32 %v15785_v56, %v15785_v56 }
 0x803   :  { %v7266_v17 = vadd.f32 %v7265_v46, %v7203_v38  ;;  %v15767_v46 = vsub.f32 %v18427_v36, %v15650_v32  ;;  %v7210_v29 = vmul.f32 %v15761_v51, %v15761_v51 }
 0x805   :  { %v7267_v58 = vadd.f32 %v7266_v17, %v7204_v16  ;;  %v7209_v16 = vmul.f32 %v15755_v43, %v15755_v43  ;;  %v7211_v36 = vmul.f32 %v15767_v46, %v15767_v46 }
 0x807   :  { %v7268_v8 = vadd.f32 %v7267_v58, %v7205_v11  ;;  %v15773_v11 = vsub.f32 %v18429_v31, %v15650_v32 }
 0x809   :  { %v7269_v22 = vadd.f32 %v7268_v8, %v7206_v39  ;;  %v15779_v39 = vsub.f32 %v18488_v33, %v15650_v32  ;;  %v7212_v31 = vmul.f32 %v15773_v11, %v15773_v11 }
 0x80b   :  { %v7270_v38 = vadd.f32 %v7269_v22, %v7207_v37  ;;  %v15791_v22 = vsub.f32 %v15388_v10, %v15650_v32 }
 0x80d   :  { %v7271_v17 = vadd.f32 %v7270_v38, %v7208_v24  ;;  %v7213_v24 = vmul.f32 %v15779_v39, %v15779_v39  ;;  %v7215_v10 = vmul.f32 %v15791_v22, %v15791_v22 }
 0x80f   :  { %v7272_v58 = vadd.f32 %v7271_v17, %v7209_v16  ;;  %v15797_v16 = vsub.f32 %v15395_v25, %v15650_v32 }
 0x811   :  { %v7273_v8 = vadd.f32 %v7272_v58, %v7210_v29  ;;  %v18489_v29 = vld [vmem:[#allocation25_spill] sm:$0xff]  ;;  %v7216_v25 = vmul.f32 %v15797_v16, %v15797_v16 }
 0x812   :  { %v15803_v58 = vsub.f32 %v18489_v29, %v15650_v32 }
 0x813   :  { %v7274_v37 = vadd.f32 %v7273_v8, %v7211_v36  ;;  %v15809_v36 = vsub.f32 %v15411_v63, %v15650_v32 }
 0x815   :  { %v7275_v38 = vadd.f32 %v7274_v37, %v7212_v31  ;;  %v15815_v31 = vsub.f32 %v15419_v26, %v15650_v32  ;;  %v7217_v37 = vmul.f32 %v15803_v58, %v15803_v58  ;;  %v7218_v63 = vmul.f32 %v15809_v36, %v15809_v36 }
 0x817   :  { %v7276_v17 = vadd.f32 %v7275_v38, %v7213_v24  ;;  %v15821_v38 = vsub.f32 %v15427_v42, %v15650_v32  ;;  %v7219_v26 = vmul.f32 %v15815_v31, %v15815_v31 }
 0x819   :  { %v7277_v33 = vadd.f32 %v7276_v17, %v7214_v0  ;;  %18490 = vst [vmem:[#allocation45_spill] sm:$0xff] %v15821_v38  ;;  %v18491_v17 = vld [vmem:[#allocation67_spill] sm:$0xff]  ;;  %v7220_v42 = vmul.f32 %v15821_v38, %v15821_v38 }
 0x81a   :  { %v15827_v29 = vsub.f32 %v18491_v17, %v15650_v32  ;;  %v15845_v17 = vsub.f32 %v15459_v21, %v15650_v32 }
 0x81b   :  { %v7278_v8 = vadd.f32 %v7277_v33, %v7215_v10  ;;  %v15833_v33 = vsub.f32 %v15443_v61, %v15650_v32 }
 0x81c   :  { %18492 = vst [vmem:[#allocation43_spill] sm:$0xff] %v15845_v17  ;;  %v7224_v21 = vmul.f32 %v15845_v17, %v15845_v17 }
 0x81d   :  { %v7279_v24 = vadd.f32 %v7278_v8, %v7216_v25  ;;  %v15839_v8 = vsub.f32 %v15451_v52, %v15650_v32  ;;  %v7222_v61 = vmul.f32 %v15833_v33, %v15833_v33 }
 0x81f   :  { %v7280_v0 = vadd.f32 %v7279_v24, %v7217_v37  ;;  %v7221_v37 = vmul.f32 %v15827_v29, %v15827_v29  ;;  %v7223_v52 = vmul.f32 %v15839_v8, %v15839_v8 }
 0x821   :  { %v7281_v10 = vadd.f32 %v7280_v0, %v7218_v63  ;;  %v18493_v0 = vld [vmem:[#allocation66_spill] sm:$0xff] }
 0x822   :  { %v15851_v38 = vsub.f32 %v18493_v0, %v15650_v32  ;;  %v15869_v0 = vsub.f32 %v15495_v19, %v15650_v32 }
 0x823   :  { %v7282_v25 = vadd.f32 %v7281_v10, %v7219_v26  ;;  %v15857_v10 = vsub.f32 %v15479_v6, %v15650_v32 }
 0x824   :  { %18494 = vst [vmem:[#allocation46_spill] sm:$0xff] %v15869_v0  ;;  %v7228_v19 = vmul.f32 %v15869_v0, %v15869_v0 }
 0x825   :  { %v7283_v24 = vadd.f32 %v7282_v25, %v7220_v42  ;;  %v15863_v25 = vsub.f32 %v15489_v1, %v15650_v32  ;;  %v7226_v6 = vmul.f32 %v15857_v10, %v15857_v10 }
 0x827   :  { %v7284_v63 = vadd.f32 %v7283_v24, %v7221_v37  ;;  %v7225_v37 = vmul.f32 %v15851_v38, %v15851_v38  ;;  %v7227_v1 = vmul.f32 %v15863_v25, %v15863_v25 }
 0x829   :  { %v7285_v26 = vadd.f32 %v7284_v63, %v7222_v61  ;;  %v18495_v63 = vld [vmem:[#allocation70_spill] sm:$0xff] }
 0x82a   :  { %v15875_v17 = vsub.f32 %v18495_v63, %v15650_v32  ;;  %v15893_v63 = vsub.f32 %v15519_v9, %v15650_v32 }
 0x82b   :  { %v7286_v42 = vadd.f32 %v7285_v26, %v7223_v52  ;;  %v15881_v26 = vsub.f32 %v15507_v53, %v15650_v32 }
 0x82c   :  { %18496 = vst [vmem:[#allocation44_spill] sm:$0xff] %v15893_v63  ;;  %v7232_v9 = vmul.f32 %v15893_v63, %v15893_v63 }
 0x82d   :  { %v7287_v24 = vadd.f32 %v7286_v42, %v7224_v21  ;;  %v15887_v42 = vsub.f32 %v15513_v7, %v15650_v32  ;;  %v7230_v53 = vmul.f32 %v15881_v26, %v15881_v26 }
 0x82f   :  { %v7288_v61 = vadd.f32 %v7287_v24, %v7225_v37  ;;  %v7229_v37 = vmul.f32 %v15875_v17, %v15875_v17  ;;  %v7231_v7 = vmul.f32 %v15887_v42, %v15887_v42 }
 0x831   :  { %v7289_v52 = vadd.f32 %v7288_v61, %v7226_v6  ;;  %v18497_v61 = vld [vmem:[#allocation72_spill] sm:$0xff] }
 0x832   :  { %v15899_v0 = vsub.f32 %v18497_v61, %v15650_v32  ;;  %v15917_v61 = vsub.f32 %v15543_v45, %v15650_v32 }
 0x833   :  { %v7290_v21 = vadd.f32 %v7289_v52, %v7227_v1  ;;  %v15905_v52 = vsub.f32 %v15531_v60, %v15650_v32 }
 0x834   :  { %18498 = vst [vmem:[#allocation50_spill] sm:$0xff] %v15917_v61  ;;  %v7236_v45 = vmul.f32 %v15917_v61, %v15917_v61 }
 0x835   :  { %v7291_v24 = vadd.f32 %v7290_v21, %v7228_v19  ;;  %v15911_v21 = vsub.f32 %v15537_v35, %v15650_v32  ;;  %v7234_v60 = vmul.f32 %v15905_v52, %v15905_v52 }
 0x837   :  { %v7292_v6 = vadd.f32 %v7291_v24, %v7229_v37  ;;  %v7233_v37 = vmul.f32 %v15899_v0, %v15899_v0  ;;  %v7235_v35 = vmul.f32 %v15911_v21, %v15911_v21 }
 0x839   :  { %v7293_v1 = vadd.f32 %v7292_v6, %v7230_v53  ;;  %v18499_v6 = vld [vmem:[#allocation68_spill] sm:$0xff] }
 0x83a   :  { %v15923_v63 = vsub.f32 %v18499_v6, %v15650_v32  ;;  %v15941_v6 = vsub.f32 %v15567_v48, %v15650_v32 }
 0x83b   :  { %v7294_v19 = vadd.f32 %v7293_v1, %v7231_v7  ;;  %v15929_v1 = vsub.f32 %v15555_v14, %v15650_v32 }
 0x83c   :  { %18501 = vst [vmem:[#allocation9_spill] sm:$0xff] %v15941_v6  ;;  %v7240_v48 = vmul.f32 %v15941_v6, %v15941_v6 }
 0x83d   :  { %v7295_v24 = vadd.f32 %v7294_v19, %v7232_v9  ;;  %v15935_v19 = vsub.f32 %v15561_v4, %v15650_v32  ;;  %v7238_v14 = vmul.f32 %v15929_v1, %v15929_v1 }
 0x83f   :  { %v7296_v53 = vadd.f32 %v7295_v24, %v7233_v37  ;;  %18500 = vst [vmem:[#allocation57_spill] sm:$0xff] %v15935_v19  ;;  %v7237_v37 = vmul.f32 %v15923_v63, %v15923_v63  ;;  %v7239_v4 = vmul.f32 %v15935_v19, %v15935_v19 }
 0x841   :  { %v7297_v7 = vadd.f32 %v7296_v53, %v7234_v60  ;;  %v18502_v53 = vld [vmem:[#allocation26_spill] sm:$0xff] }
 0x842   :  { %v15947_v61 = vsub.f32 %v18502_v53, %v15650_v32  ;;  %v18506_v53 = vld [vmem:[#allocation71_spill] sm:$0xff] }
 0x843   :  { %v7298_v9 = vadd.f32 %v7297_v7, %v7235_v35  ;;  %v15953_v7 = vsub.f32 %v15579_v49, %v15650_v32  ;;  %v15965_v19 = vsub.f32 %v18506_v53, %v15650_v32  ;;  %v18511_v53 = vld [vmem:[#allocation29_spill] sm:$0xff] }
 0x844   :  { %18503 = vst [vmem:[#allocation54_spill] sm:$0xff] %v15947_v61 }
 0x845   :  { %v7299_v24 = vadd.f32 %v7298_v9, %v7236_v45  ;;  %18504 = vst [vmem:[#allocation14_spill] sm:$0xff] %v15953_v7  ;;  %v15959_v9 = vsub.f32 %v15585_v44, %v15650_v32  ;;  %18507 = vst [vmem:[#allocation47_spill] sm:$0xff] %v15965_v19  ;;  %v7242_v49 = vmul.f32 %v15953_v7, %v15953_v7 }
 0x846   :  { %v15983_v7 = vsub.f32 %v18511_v53, %v15650_v32  ;;  %v18515_v53 = vld [vmem:[#allocation32_spill] sm:$0xff] }
 0x847   :  { %v7300_v60 = vadd.f32 %v7299_v24, %v7237_v37  ;;  %18505 = vst [vmem:[#allocation52_spill] sm:$0xff] %v15959_v9  ;;  %v7241_v37 = vmul.f32 %v15947_v61, %v15947_v61  ;;  %v7243_v44 = vmul.f32 %v15959_v9, %v15959_v9 }
 0x848   :  { %18512 = vst [vmem:[#allocation42_spill] sm:$0xff] %v15983_v7 }
 0x849   :  { %v7301_v35 = vadd.f32 %v7300_v60, %v7238_v14  ;;  %v18508_v60 = vld [vmem:[#allocation73_spill] sm:$0xff] }
 0x84a   :  { %v15971_v6 = vsub.f32 %v18508_v60, %v15650_v32  ;;  %v18513_v60 = vld [vmem:[#allocation3_spill] sm:$0xff] }
 0x84b   :  { %v7302_v45 = vadd.f32 %v7301_v35, %v7239_v4  ;;  %v18510_v35 = vld [vmem:[#allocation5_spill] sm:$0xff]  ;;  %v15989_v9 = vsub.f32 %v18513_v60, %v15650_v32 }
 0x84c   :  { %18509 = vst [vmem:[#allocation20_spill] sm:$0xff] %v15971_v6  ;;  %v15977_v61 = vsub.f32 %v18510_v35, %v15650_v32  ;;  %v18514_v35 = vld [vmem:[#allocation30_spill] sm:$0xff] }
 0x84d   :  { %v7303_v24 = vadd.f32 %v7302_v45, %v7240_v48  ;;  %v7244_v48 = vmul.f32 %v15965_v19, %v15965_v19  ;;  %v15995_v19 = vsub.f32 %v18514_v35, %v15650_v32 }
 0x84f   :  { %v7304_v14 = vadd.f32 %v7303_v24, %v7241_v37  ;;  %v7245_v37 = vmul.f32 %v15971_v6, %v15971_v6  ;;  %v16001_v6 = vsub.f32 %v18515_v53, %v15650_v32  ;;  %v7249_v60 = vmul.f32 %v15995_v19, %v15995_v19 }
 0x850   :  { %v7252_v32 = vmul.f32 %v15656_v54, %v15656_v54  ;;  %v7253_v53 = vmul.f32 %v15659_v3, %v15659_v3 }
 0x851   :  { %v7305_v4 = vadd.f32 %v7304_v14, %v7242_v49  ;;  %v7246_v49 = vmul.f32 %v15977_v61, %v15977_v61 }
 0x853   :  { %v7306_v45 = vadd.f32 %v7305_v4, %v7243_v44  ;;  %v7247_v44 = vmul.f32 %v15983_v7, %v15983_v7  ;;  %v7251_v7 = vmul.f32 %v15653_v41, %v15653_v41 }
 0x855   :  { %v7307_v24 = vadd.f32 %v7306_v45, %v7244_v48  ;;  %v7248_v48 = vmul.f32 %v15989_v9, %v15989_v9 }
 0x857   :  { %v7308_v14 = vadd.f32 %v7307_v24, %v7245_v37  ;;  %v7250_v24 = vmul.f32 %v16001_v6, %v16001_v6 }
 0x859   :  { %v7309_v4 = vadd.f32 %v7308_v14, %v7246_v49 }
 0x85b   :  { %v7310_v45 = vadd.f32 %v7309_v4, %v7247_v44  ;;  %v7254_v4 = vmul.f32 %v15662_v23, %v15662_v23 }
 0x85d   :  { %v7311_v37 = vadd.f32 %v7310_v45, %v7248_v48  ;;  %v7255_v45 = vmul.f32 %v15665_v62, %v15665_v62 }
 0x85f   :  { %v7312_v35 = vadd.f32 %v7311_v37, %v7249_v60  ;;  %v7256_v37 = vmul.f32 %v15668_v13, %v15668_v13 }
 0x861   :  { %v7313_v49 = vadd.f32 %v7312_v35, %v7250_v24  ;;  %v7257_v35 = vmul.f32 %v15671_v5, %v15671_v5 }
 0x863   :  { %v7314_v14 = vadd.f32 %v7313_v49, %v7251_v7  ;;  %v7258_v49 = vmul.f32 %v15674_v18, %v15674_v18 }
 0x865   :  { %v7315_v44 = vadd.f32 %v7314_v14, %v7252_v32  ;;  %v7259_v14 = vmul.f32 %v15677_v50, %v15677_v50 }
 0x867   :  { %v7316_v48 = vadd.f32 %v7315_v44, %v7253_v53 }
 0x869   :  { %v7317_v60 = vadd.f32 %v7316_v48, %v7254_v4 }
 0x86b   :  { %v7318_v24 = vadd.f32 %v7317_v60, %v7255_v45 }
 0x86d   :  { %v7319_v7 = vadd.f32 %v7318_v24, %v7256_v37 }
 0x86f   :  { %v7320_v32 = vadd.f32 %v7319_v7, %v7257_v35  ;;  %v18517_v35 = vld [vmem:[#allocation43_spill] sm:$0xff] }
 0x871   :  { %v7321_v53 = vadd.f32 %v7320_v32, %v7258_v49  ;;  %v18518_v49 = vld [vmem:[#allocation46_spill] sm:$0xff] }
 0x873   :  { %v7322_v44 = vadd.f32 %v7321_v53, %v7259_v14  ;;  %v18519_v14 = vld [vmem:[#allocation44_spill] sm:$0xff] }
 0x875   :  { %v7323_v23 = vrot.slane %v7322_v44, 4 }
 0x877   :  { %v7324_v62 = vadd.f32 %v7323_v23, %v7322_v44  ;;  %v18520_v44 = vld [vmem:[#allocation50_spill] sm:$0xff] }
 0x879   :  { %v7325_v4 = vrot.slane %v7324_v62, 2 }
 0x87b   :  { %v7326_v48 = vadd.f32 %v7325_v4, %v7324_v62 }
 0x87d   :  { %v7327_v3 = vrot.slane %v7326_v48, 1 }
 0x87f   :  { %v7328_v13 = vadd.f32 %v7327_v3, %v7326_v48  ;;  %v18521_v48 = vld [vmem:[#allocation57_spill] sm:$0xff] }
 0x881   :  { %v7329_v45 = vmul.f32 0.001953125, %v7328_v13 }
 0x883   :  { %v7330_v60 = vadd.f32 1e-05, %v7329_v45  ;;  %v18522_v45 = vld [vmem:[#allocation9_spill] sm:$0xff] }
 0x885   :  { %9726 = vrsqrt.f32 %v7330_v60  ;;  %v18523_v60 = vld [vmem:[#allocation54_spill] sm:$0xff] }
 0x88f   :  { %v16027_v5 = vpop.eup %9726 }
 0x890   :  { %v16031_v37 = vmul.f32 %v16027_v5, %v15681_v47  ;;  %v16035_v24 = vmul.f32 %v16027_v5, %v15685_v40  ;;  %v16039_v23 = vmul.f32 %v16027_v5, %v15689_v12  ;;  %v16043_v3 = vmul.f32 %v16027_v5, %v15697_v55 }
 0x891   :  { %v16047_v62 = vmul.f32 %v16027_v5, %v15701_v59  ;;  %v16051_v13 = vmul.f32 %v16027_v5, %v15707_v27  ;;  %v16055_v47 = vmul.f32 %v16027_v5, %v15713_v20  ;;  %v16059_v40 = vmul.f32 %v16027_v5, %v15719_v34 }
 0x892   :  { %v16063_v12 = vmul.f32 %v16027_v5, %v15725_v28  ;;  %v16067_v55 = vmul.f32 %v16027_v5, %v15731_v15  ;;  %v16071_v59 = vmul.f32 %v16027_v5, %v15737_v57  ;;  %v16075_v27 = vmul.f32 %v16027_v5, %v15743_v2 }
 0x893   :  { %v16079_v20 = vmul.f32 %v16027_v5, %v15749_v30  ;;  %v16083_v34 = vmul.f32 %v16027_v5, %v15755_v43  ;;  %v16087_v28 = vmul.f32 %v16027_v5, %v15761_v51  ;;  %v16091_v15 = vmul.f32 %v16027_v5, %v15767_v46 }
 0x894   :  { %v16095_v57 = vmul.f32 %v16027_v5, %v15773_v11  ;;  %v16099_v2 = vmul.f32 %v16027_v5, %v15779_v39  ;;  %v16103_v30 = vmul.f32 %v16027_v5, %v15785_v56  ;;  %v16107_v43 = vmul.f32 %v16027_v5, %v15791_v22  ;;  %v18516_v56 = vld [vmem:[#allocation45_spill] sm:$0xff] }
 0x895   :  { %v16111_v51 = vmul.f32 %v16027_v5, %v15797_v16  ;;  %v16115_v46 = vmul.f32 %v16027_v5, %v15803_v58  ;;  %v16119_v11 = vmul.f32 %v16027_v5, %v15809_v36  ;;  %v16123_v39 = vmul.f32 %v16027_v5, %v15815_v31 }
 0x896   :  { %v16127_v22 = vmul.f32 %v16027_v5, %v18516_v56  ;;  %v16131_v16 = vmul.f32 %v16027_v5, %v15827_v29  ;;  %v16135_v58 = vmul.f32 %v16027_v5, %v15833_v33  ;;  %v16139_v36 = vmul.f32 %v16027_v5, %v15839_v8 }
 0x897   :  { %v16143_v31 = vmul.f32 %v16027_v5, %v18517_v35  ;;  %v16147_v7 = vmul.f32 %v16027_v5, %v15851_v38  ;;  %v16151_v29 = vmul.f32 %v16027_v5, %v15857_v10  ;;  %v16155_v33 = vmul.f32 %v16027_v5, %v15863_v25  ;;  %v18525_v35 = vld [vmem:[#allocation14_spill] sm:$0xff] }
 0x898   :  { %v16159_v8 = vmul.f32 %v16027_v5, %v18518_v49  ;;  %v16163_v32 = vmul.f32 %v16027_v5, %v15875_v17  ;;  %v16167_v38 = vmul.f32 %v16027_v5, %v15881_v26  ;;  %v16171_v10 = vmul.f32 %v16027_v5, %v15887_v42  ;;  %v18526_v49 = vld [vmem:[#allocation52_spill] sm:$0xff] }
 0x899   :  { %v16175_v25 = vmul.f32 %v16027_v5, %v18519_v14  ;;  %v16179_v53 = vmul.f32 %v16027_v5, %v15899_v0  ;;  %v16183_v17 = vmul.f32 %v16027_v5, %v15905_v52  ;;  %v16187_v26 = vmul.f32 %v16027_v5, %v15911_v21  ;;  %v18527_v14 = vld [vmem:[#allocation47_spill] sm:$0xff] }
 0x89a   :  { %v16191_v42 = vmul.f32 %v16027_v5, %v18520_v44  ;;  %v16195_v4 = vmul.f32 %v16027_v5, %v15923_v63  ;;  %v16199_v0 = vmul.f32 %v16027_v5, %v15929_v1  ;;  %v16203_v52 = vmul.f32 %v16027_v5, %v18521_v48  ;;  %v18528_v48 = vld [vmem:[#allocation20_spill] sm:$0xff] }
 0x89b   :  { %v16207_v21 = vmul.f32 %v16027_v5, %v18522_v45  ;;  %v16211_v56 = vmul.f32 %v16027_v5, %v18523_v60  ;;  %v16215_v63 = vmul.f32 %v16027_v5, %v18525_v35  ;;  %v16219_v1 = vmul.f32 %v16027_v5, %v18526_v49 }
 0x89c   :  { %v16223_v44 = vmul.f32 %v16027_v5, %v18527_v14  ;;  %v16227_v45 = vmul.f32 %v16027_v5, %v18528_v48  ;;  %v16231_v60 = vmul.f32 %v16027_v5, %v15977_v61  ;;  %v16239_v49 = vmul.f32 %v16027_v5, %v15989_v9 }
 0x89d   :  { %18524 = vst [vmem:[#allocation17_spill] sm:$0xff] %v16211_v56  ;;  %v18530_v56 = vld [vmem:[#allocation42_spill] sm:$0xff]  ;;  %v16243_v14 = vmul.f32 %v16027_v5, %v15995_v19  ;;  %v16247_v48 = vmul.f32 %v16027_v5, %v16001_v6  ;;  %v16251_v61 = vmul.f32 %v16027_v5, %v15653_v41  ;;  %v16260_v9 = vmul.f32 %v16027_v5, %v15656_v54 }
 0x89e   :  { %18529 = vst [vmem:[#allocation16_spill] sm:$0xff] %v16231_v60  ;;  %v16235_v35 = vmul.f32 %v16027_v5, %v18530_v56  ;;  %18532 = vst [vmem:[#allocation23_spill] sm:$0xff] %v16239_v49  ;;  %v16256_v56 = vld [vmem:[%s17516_s5] ss:$0 sm:$0xff]  ;;  %v18540_v60 = vld [vmem:[#allocation34_spill] sm:$0xff] }
 0x89f   :  { %18533 = vst [vmem:[#allocation19_spill] sm:$0xff] %v16243_v14  ;;  %18534 = vst [vmem:[#allocation56_spill] sm:$0xff] %v16247_v48  ;;  %v18536_v49 = vld [vmem:[#allocation31_spill] sm:$0xff]  ;;  %v18537_v14 = vld [vmem:[#allocation33_spill] sm:$0xff]  ;;  %v16280_v54 = vmul.f32 %v16027_v5, %v18540_v60  ;;  %v16300_v60 = vmul.f32 %v16256_v56, %v16039_v23  ;;  %v16324_v23 = vmul.f32 %v16256_v56, %v16063_v12 }
 0x8a0   :  { %18531 = vst [vmem:[#allocation48_spill] sm:$0xff] %v16235_v35  ;;  %18535 = vst [vmem:[#allocation60_spill] sm:$0xff] %v16251_v61  ;;  %v16264_v19 = vmul.f32 %v16027_v5, %v18536_v49  ;;  %v16268_v6 = vmul.f32 %v16027_v5, %v18537_v14  ;;  %v18538_v48 = vld [vmem:[#allocation37_spill] sm:$0xff]  ;;  %v18539_v61 = vld [vmem:[#allocation35_spill] sm:$0xff]  ;;  %v16284_v49 = vmul.f32 %v16027_v5, %v15674_v18 }
 0x8a1   :  { %v16272_v41 = vmul.f32 %v16027_v5, %v18538_v48  ;;  %v16276_v35 = vmul.f32 %v16027_v5, %v18539_v61  ;;  %v16288_v14 = vmul.f32 %v16027_v5, %v15677_v50  ;;  %v16292_v48 = vmul.f32 %v16256_v56, %v16031_v37 }
 0x8a2   :  { %v16296_v61 = vmul.f32 %v16256_v56, %v16035_v24  ;;  %v16304_v18 = vmul.f32 %v16256_v56, %v16043_v3  ;;  %v16308_v5 = vmul.f32 %v16256_v56, %v16047_v62  ;;  %v16312_v50 = vmul.f32 %v16256_v56, %v16051_v13 }
 0x8a3   :  { %v16316_v37 = vmul.f32 %v16256_v56, %v16055_v47  ;;  %v16320_v24 = vmul.f32 %v16256_v56, %v16059_v40  ;;  %v16328_v3 = vmul.f32 %v16256_v56, %v16067_v55  ;;  %v16332_v62 = vmul.f32 %v16256_v56, %v16071_v59 }
 0x8a4   :  { %v16336_v13 = vmul.f32 %v16256_v56, %v16075_v27  ;;  %v16340_v47 = vmul.f32 %v16256_v56, %v16079_v20  ;;  %v16344_v40 = vmul.f32 %v16256_v56, %v16083_v34  ;;  %v16348_v12 = vmul.f32 %v16256_v56, %v16087_v28 }
 0x8a5   :  { %v16352_v55 = vmul.f32 %v16256_v56, %v16091_v15  ;;  %v16356_v59 = vmul.f32 %v16256_v56, %v16095_v57  ;;  %v16360_v27 = vmul.f32 %v16256_v56, %v16099_v2  ;;  %v16364_v20 = vmul.f32 %v16256_v56, %v16103_v30 }
 0x8a6   :  { %v16368_v34 = vmul.f32 %v16256_v56, %v16107_v43  ;;  %v16372_v28 = vmul.f32 %v16256_v56, %v16111_v51  ;;  %v16376_v15 = vmul.f32 %v16256_v56, %v16115_v46  ;;  %v16380_v57 = vmul.f32 %v16256_v56, %v16119_v11 }
 0x8a7   :  { %v16384_v2 = vmul.f32 %v16256_v56, %v16123_v39  ;;  %v16388_v30 = vmul.f32 %v16256_v56, %v16127_v22  ;;  %v16392_v43 = vmul.f32 %v16256_v56, %v16131_v16  ;;  %v16396_v51 = vmul.f32 %v16256_v56, %v16135_v58 }
 0x8a8   :  { %v16400_v46 = vmul.f32 %v16256_v56, %v16139_v36  ;;  %v16404_v11 = vmul.f32 %v16256_v56, %v16143_v31  ;;  %v16408_v39 = vmul.f32 %v16256_v56, %v16147_v7  ;;  %v16412_v22 = vmul.f32 %v16256_v56, %v16151_v29 }
 0x8a9   :  { %v16416_v16 = vmul.f32 %v16256_v56, %v16155_v33  ;;  %v16420_v58 = vmul.f32 %v16256_v56, %v16159_v8  ;;  %v16424_v36 = vmul.f32 %v16256_v56, %v16163_v32  ;;  %v16428_v31 = vmul.f32 %v16256_v56, %v16167_v38 }
 0x8aa   :  { %v16432_v7 = vmul.f32 %v16256_v56, %v16171_v10  ;;  %v16436_v29 = vmul.f32 %v16256_v56, %v16175_v25  ;;  %v16440_v33 = vmul.f32 %v16256_v56, %v16179_v53  ;;  %v16444_v8 = vmul.f32 %v16256_v56, %v16183_v17 }
 0x8ab   :  { %v16448_v32 = vmul.f32 %v16256_v56, %v16187_v26  ;;  %v16452_v38 = vmul.f32 %v16256_v56, %v16191_v42  ;;  %v16456_v10 = vmul.f32 %v16256_v56, %v16195_v4  ;;  %v16460_v25 = vmul.f32 %v16256_v56, %v16199_v0  ;;  %v18542_v26 = vld [vmem:[#allocation17_spill] sm:$0xff] }
 0x8ac   :  { %v16464_v53 = vmul.f32 %v16256_v56, %v16203_v52  ;;  %v16468_v17 = vmul.f32 %v16256_v56, %v16207_v21  ;;  %v16472_v42 = vmul.f32 %v16256_v56, %v18542_v26  ;;  %v16476_v4 = vmul.f32 %v16256_v56, %v16215_v63 }
 0x8ad   :  { %v16480_v0 = vmul.f32 %v16256_v56, %v16219_v1  ;;  %v16484_v52 = vmul.f32 %v16256_v56, %v16223_v44  ;;  %v16488_v21 = vmul.f32 %v16256_v56, %v16227_v45 }
 0x8ae   :  { %18541 = vst [vmem:[#allocation21_spill] sm:$0xff] %v16468_v17  ;;  %18543 = vst [vmem:[#allocation6_spill] sm:$0xff] %v16472_v42  ;;  %v18548_v17 = vld [vmem:[#allocation16_spill] sm:$0xff] }
 0x8af   :  { %18544 = vst [vmem:[#allocation36_spill] sm:$0xff] %v16476_v4  ;;  %18545 = vst [vmem:[#allocation65_spill] sm:$0xff] %v16480_v0  ;;  %v16492_v26 = vmul.f32 %v16256_v56, %v18548_v17  ;;  %v18549_v42 = vld [vmem:[#allocation48_spill] sm:$0xff]  ;;  %v18550_v4 = vld [vmem:[#allocation23_spill] sm:$0xff] }
 0x8b0   :  { %18546 = vst [vmem:[#allocation58_spill] sm:$0xff] %v16484_v52  ;;  %18547 = vst [vmem:[#allocation40_spill] sm:$0xff] %v16488_v21  ;;  %v16496_v63 = vmul.f32 %v16256_v56, %v18549_v42  ;;  %v16500_v1 = vmul.f32 %v16256_v56, %v18550_v4  ;;  %v18551_v0 = vld [vmem:[#allocation19_spill] sm:$0xff]  ;;  %v18552_v52 = vld [vmem:[#allocation56_spill] sm:$0xff]  ;;  %v16521_v4 = vmul.f32 %v16256_v56, %v16260_v9 }
 0x8b1   :  { %v16504_v44 = vmul.f32 %v16256_v56, %v18551_v0  ;;  %v16508_v45 = vmul.f32 %v16256_v56, %v18552_v52  ;;  %v18553_v21 = vld [vmem:[#allocation60_spill] sm:$0xff]  ;;  %v16517_v42 = vld [vmem:[%s17517_s6] ss:$0 sm:$0xff]  ;;  %v16525_v0 = vmul.f32 %v16256_v56, %v16264_v19  ;;  %v16529_v52 = vmul.f32 %v16256_v56, %v16268_v6 }
 0x8b2   :  { %v16512_v17 = vmul.f32 %v16256_v56, %v18553_v21  ;;  %v16533_v21 = vmul.f32 %v16256_v56, %v16272_v41  ;;  %v16541_v9 = vmul.f32 %v16256_v56, %v16280_v54  ;;  %v16545_v19 = vmul.f32 %v16256_v56, %v16284_v49 }
 0x8b3   :  { %v16549_v6 = vmul.f32 %v16256_v56, %v16288_v14  ;;  %v16553_v41 = vadd.f32 %v16517_v42, %v16292_v48  ;;  %v16561_v54 = vadd.f32 %v16517_v42, %v16300_v60  ;;  %v16565_v49 = vadd.f32 %v16517_v42, %v16304_v18 }
 0x8b4   :  { %18554 = vst [vmem:[#allocation27_spill] sm:$0xff] %v16512_v17  ;;  %v16537_v17 = vmul.f32 %v16256_v56, %v16276_v35  ;;  %v16557_v35 = vadd.f32 %v16517_v42, %v16296_v61  ;;  %v16569_v56 = vadd.f32 %v16517_v42, %v16308_v5  ;;  %v16573_v14 = vadd.f32 %v16517_v42, %v16312_v50 }
 0x8b5   :  { %v16577_v48 = vadd.f32 %v16517_v42, %v16316_v37  ;;  %v16581_v61 = vadd.f32 %v16517_v42, %v16320_v24  ;;  %v16585_v60 = vadd.f32 %v16517_v42, %v16324_v23  ;;  %v16589_v18 = vadd.f32 %v16517_v42, %v16328_v3 }
 0x8b6   :  { %v16593_v5 = vadd.f32 %v16517_v42, %v16332_v62  ;;  %v16597_v50 = vadd.f32 %v16517_v42, %v16336_v13  ;;  %v16601_v37 = vadd.f32 %v16517_v42, %v16340_v47  ;;  %v16605_v24 = vadd.f32 %v16517_v42, %v16344_v40 }
 0x8b7   :  { %v16609_v23 = vadd.f32 %v16517_v42, %v16348_v12  ;;  %v16613_v3 = vadd.f32 %v16517_v42, %v16352_v55  ;;  %v16617_v62 = vadd.f32 %v16517_v42, %v16356_v59  ;;  %v16621_v13 = vadd.f32 %v16517_v42, %v16360_v27 }
 0x8b8   :  { %v16625_v47 = vadd.f32 %v16517_v42, %v16364_v20  ;;  %v16629_v40 = vadd.f32 %v16517_v42, %v16368_v34  ;;  %v16633_v12 = vadd.f32 %v16517_v42, %v16372_v28  ;;  %v16637_v55 = vadd.f32 %v16517_v42, %v16376_v15 }
 0x8b9   :  { %v16641_v59 = vadd.f32 %v16517_v42, %v16380_v57  ;;  %v16645_v27 = vadd.f32 %v16517_v42, %v16384_v2  ;;  %v16649_v20 = vadd.f32 %v16517_v42, %v16388_v30  ;;  %v16653_v34 = vadd.f32 %v16517_v42, %v16392_v43 }
 0x8ba   :  { %v16657_v28 = vadd.f32 %v16517_v42, %v16396_v51  ;;  %v16661_v15 = vadd.f32 %v16517_v42, %v16400_v46  ;;  %v16665_v57 = vadd.f32 %v16517_v42, %v16404_v11  ;;  %v16669_v2 = vadd.f32 %v16517_v42, %v16408_v39 }
 0x8bb   :  { %v16673_v30 = vadd.f32 %v16517_v42, %v16412_v22  ;;  %v16677_v43 = vadd.f32 %v16517_v42, %v16416_v16  ;;  %v16681_v51 = vadd.f32 %v16517_v42, %v16420_v58  ;;  %v16685_v46 = vadd.f32 %v16517_v42, %v16424_v36 }
 0x8bc   :  { %v16689_v11 = vadd.f32 %v16517_v42, %v16428_v31  ;;  %v16693_v39 = vadd.f32 %v16517_v42, %v16432_v7  ;;  %v16697_v22 = vadd.f32 %v16517_v42, %v16436_v29  ;;  %v16701_v16 = vadd.f32 %v16517_v42, %v16440_v33 }
 0x8bd   :  { %v16705_v58 = vadd.f32 %v16517_v42, %v16444_v8  ;;  %v16709_v36 = vadd.f32 %v16517_v42, %v16448_v32  ;;  %v16713_v31 = vadd.f32 %v16517_v42, %v16452_v38  ;;  %v16717_v7 = vadd.f32 %v16517_v42, %v16456_v10  ;;  %v18565_v8 = vld [vmem:[#allocation21_spill] sm:$0xff] }
 0x8be   :  { %18555 = vst [vmem:[#allocation51_spill] sm:$0xff] %v16689_v11  ;;  %18556 = vst [vmem:[#allocation39_spill] sm:$0xff] %v16693_v39  ;;  %v16721_v29 = vadd.f32 %v16517_v42, %v16460_v25  ;;  %v16725_v33 = vadd.f32 %v16517_v42, %v16464_v53  ;;  %v16729_v32 = vadd.f32 %v16517_v42, %v18565_v8  ;;  %v7538_v53 = vld [vmem:[%s17512_s0] sm:$0xff]  ;;  %v7539_v8 = vld [vmem:[%s17512_s0 + $0x8] sm:$0xff] }
 0x8bf   :  { %18557 = vst [vmem:[#allocation22_spill] sm:$0xff] %v16697_v22  ;;  %18558 = vst [vmem:[#allocation38_spill] sm:$0xff] %v16701_v16  ;;  %v7562_v39 = vld [vmem:[%s17512_s0 + $0xc0] sm:$0xff]  ;;  %v7563_v11 = vld [vmem:[%s17512_s0 + $0xc8] sm:$0xff] }
 0x8c0   :  { %18559 = vst [vmem:[#allocation10_spill] sm:$0xff] %v16705_v58  ;;  %18560 = vst [vmem:[#allocation18_spill] sm:$0xff] %v16709_v36  ;;  %v18567_v36 = vld [vmem:[#allocation6_spill] sm:$0xff]  ;;  %v7546_v58 = vld [vmem:[%s17512_s0 + $0x40] sm:$0xff] }
 0x8c1   :  { %18561 = vst [vmem:[#allocation49_spill] sm:$0xff] %v16713_v31  ;;  %18562 = vst [vmem:[#allocation53_spill] sm:$0xff] %v16717_v7  ;;  %v16733_v38 = vadd.f32 %v16517_v42, %v18567_v36  ;;  %v18569_v31 = vld [vmem:[#allocation36_spill] sm:$0xff]  ;;  %v18571_v7 = vld [vmem:[#allocation65_spill] sm:$0xff] }
 0x8c2   :  { %18563 = vst [vmem:[#allocation24_spill] sm:$0xff] %v16721_v29  ;;  %18564 = vst [vmem:[#allocation28_spill] sm:$0xff] %v16725_v33  ;;  %v16737_v10 = vadd.f32 %v16517_v42, %v18569_v31  ;;  %v16741_v25 = vadd.f32 %v16517_v42, %v18571_v7  ;;  %v7540_v36 = vld [vmem:[%s17512_s0 + $0x10] sm:$0xff]  ;;  %v7541_v31 = vld [vmem:[%s17512_s0 + $0x18] sm:$0xff]  ;;  %v16769_v33 = vadd.f32 %v16517_v42, %v16496_v63 }
 0x8c3   :  { %18566 = vst [vmem:[#allocation41_spill] sm:$0xff] %v16729_v32  ;;  %18568 = vst [vmem:[#allocation8_spill] sm:$0xff] %v16733_v38  ;;  %v16765_v32 = vadd.f32 %v16517_v42, %v16492_v26  ;;  %v7542_v29 = vld [vmem:[%s17512_s0 + $0x20] sm:$0xff]  ;;  %v7545_v26 = vld [vmem:[%s17512_s0 + $0x38] sm:$0xff]  ;;  %v16785_v63 = vadd.f32 %v16517_v42, %v16500_v1  ;;  %v16886_v16 = vadd.f32 %v7540_v36, %v16561_v54 }
 0x8c4   :  { %18570 = vst [vmem:[#allocation55_spill] sm:$0xff] %v16737_v10  ;;  %18572 = vst [vmem:[#allocation69_spill] sm:$0xff] %v16741_v25  ;;  %v18573_v10 = vld [vmem:[#allocation58_spill] sm:$0xff]  ;;  %v18575_v25 = vld [vmem:[#allocation40_spill] sm:$0xff]  ;;  %v16889_v22 = vadd.f32 %v7541_v31, %v16565_v49  ;;  %v16904_v54 = vadd.f32 %v7542_v29, %v16569_v56 }
 0x8c5   :  { %v16757_v7 = vadd.f32 %v16517_v42, %v18573_v10  ;;  %v16761_v38 = vadd.f32 %v16517_v42, %v18575_v25  ;;  %18577 = vst [vmem:[#allocation11_spill] sm:$0xff] %v16765_v32  ;;  %18578 = vst [vmem:[#allocation12_spill] sm:$0xff] %v16769_v33  ;;  %v7543_v10 = vld [vmem:[%s17512_s0 + $0x28] sm:$0xff]  ;;  %v7544_v25 = vld [vmem:[%s17512_s0 + $0x30] sm:$0xff]  ;;  %v16789_v33 = vadd.f32 %v16517_v42, %v16504_v44 }
 0x8c6   :  { %18579 = vst [vmem:[#allocation59_spill] sm:$0xff] %v16785_v63  ;;  %v16793_v32 = vadd.f32 %v16517_v42, %v16508_v45  ;;  %v7547_v1 = vld [vmem:[%s17512_s0 + $0x48] sm:$0xff]  ;;  %v7548_v44 = vld [vmem:[%s17512_s0 + $0x50] sm:$0xff]  ;;  %v7549_v45 = vld [vmem:[%s17512_s0 + $0x58] sm:$0xff]  ;;  %v16907_v49 = vadd.f32 %v7543_v10, %v16573_v14 }
 0x8c7   :  { %18574 = vst [vmem:[#allocation62_spill] sm:$0xff] %v16757_v7  ;;  %18576 = vst [vmem:[#allocation61_spill] sm:$0xff] %v16761_v38  ;;  %v18582_v38 = vld [vmem:[#allocation27_spill] sm:$0xff]  ;;  %v7567_v31 = vld [vmem:[%s17512_s0 + $0xe8] sm:$0xff]  ;;  %v16934_v29 = vadd.f32 %v7548_v44, %v16593_v5  ;;  %v16937_v10 = vadd.f32 %v7549_v45, %v16597_v50 }
 0x8c8   :  { %18580 = vst [vmem:[#allocation15_spill] sm:$0xff] %v16789_v33  ;;  %18581 = vst [vmem:[#allocation13_spill] sm:$0xff] %v16793_v32  ;;  %v16797_v7 = vadd.f32 %v16517_v42, %v18582_v38  ;;  %v16813_v38 = vadd.f32 %v16517_v42, %v16521_v4  ;;  %v16821_v32 = vadd.f32 %v16517_v42, %v16529_v52  ;;  %v7550_v63 = vld [vmem:[%s17512_s0 + $0x60] sm:$0xff]  ;;  %v7551_v4 = vld [vmem:[%s17512_s0 + $0x68] sm:$0xff] }
 0x8c9   :  { %v16825_v33 = vadd.f32 %v16517_v42, %v16533_v21  ;;  %v7553_v52 = vld [vmem:[%s17512_s0 + $0x78] sm:$0xff]  ;;  %v16841_v21 = vadd.f32 %v16517_v42, %v16537_v17  ;;  %v7555_v17 = vld [vmem:[%s17512_s0 + $0x88] sm:$0xff]  ;;  %v7566_v36 = vld [vmem:[%s17512_s0 + $0xe0] sm:$0xff]  ;;  %v16952_v5 = vadd.f32 %v7550_v63, %v16601_v37  ;;  %v16955_v50 = vadd.f32 %v7551_v4, %v16605_v24 }
 0x8ca   :  { %18583 = vst [vmem:[#allocation63_spill] sm:$0xff] %v16797_v7  ;;  %18584 = vst [vmem:[#allocation7_spill] sm:$0xff] %v16813_v38  ;;  %v16817_v7 = vadd.f32 %v16517_v42, %v16525_v0  ;;  %v7552_v0 = vld [vmem:[%s17512_s0 + $0x70] sm:$0xff]  ;;  %v7554_v38 = vld [vmem:[%s17512_s0 + $0x80] sm:$0xff] }
 0x8cb   :  { %18586 = vst [vmem:[#allocation4_spill] sm:$0xff] %v16821_v32  ;;  %18587 = vst [vmem:[#allocation25_spill] sm:$0xff] %v16825_v33  ;;  %v16845_v33 = vadd.f32 %v16517_v42, %v16541_v9  ;;  %v16849_v32 = vadd.f32 %v16517_v42, %v16545_v19  ;;  %v7556_v9 = vld [vmem:[%s17512_s0 + $0x90] sm:$0xff]  ;;  %v7557_v19 = vld [vmem:[%s17512_s0 + $0x98] sm:$0xff] }
 0x8cc   :  { %18585 = vst [vmem:[#allocation64_spill] sm:$0xff] %v16817_v7  ;;  %18588 = vst [vmem:[#allocation67_spill] sm:$0xff] %v16841_v21  ;;  %v16853_v7 = vadd.f32 %v16517_v42, %v16549_v6  ;;  %v7558_v42 = vld [vmem:[%s17512_s0 + $0xa0] sm:$0xff]  ;;  %v7559_v6 = vld [vmem:[%s17512_s0 + $0xa8] sm:$0xff]  ;;  %v16883_v21 = vadd.f32 %v7539_v8, %v16557_v35  ;;  %v16913_v8 = vadd.f32 %v7545_v26, %v16581_v61 }
 0x8cd   :  { %18589 = vst [vmem:[#allocation66_spill] sm:$0xff] %v16845_v33  ;;  %18590 = vst [vmem:[#allocation70_spill] sm:$0xff] %v16849_v32  ;;  %v7561_v32 = vld [vmem:[%s17512_s0 + $0xb8] sm:$0xff]  ;;  %v16880_v33 = vadd.f32 %v7538_v53, %v16553_v41  ;;  %v7564_v41 = vld [vmem:[%s17512_s0 + $0xd0] sm:$0xff]  ;;  %v16910_v53 = vadd.f32 %v7544_v25, %v16577_v48  ;;  %v16928_v48 = vadd.f32 %v7546_v58, %v16585_v60 }
 0x8ce   :  { %18591 = vst [vmem:[#allocation72_spill] sm:$0xff] %v16853_v7  ;;  %v7560_v7 = vld [vmem:[%s17512_s0 + $0xb0] sm:$0xff]  ;;  %v7565_v35 = vld [vmem:[%s17512_s0 + $0xd8] sm:$0xff]  ;;  %v16931_v61 = vadd.f32 %v7547_v1, %v16589_v18  ;;  %v7570_v25 = vld [vmem:[%s17512_s0 + $0x100] sm:$0xff]  ;;  %v16958_v58 = vadd.f32 %v7552_v0, %v16609_v23  ;;  %v16961_v1 = vadd.f32 %v7553_v52, %v16613_v3  ;;  %v16976_v23 = vadd.f32 %v7554_v38, %v16617_v62 }
 0x8cf   :  { %v7568_v56 = vld [vmem:[%s17512_s0 + $0xf0] sm:$0xff]  ;;  %v7569_v14 = vld [vmem:[%s17512_s0 + $0xf8] sm:$0xff]  ;;  %v7571_v26 = vld [vmem:[%s17512_s0 + $0x108] sm:$0xff]  ;;  %v16979_v3 = vadd.f32 %v7555_v17, %v16621_v13  ;;  %v16982_v63 = vadd.f32 %v7556_v9, %v16625_v47  ;;  %v16985_v4 = vadd.f32 %v7557_v19, %v16629_v40  ;;  %v16997_v13 = vadd.f32 %v7558_v42, %v16633_v12 }
 0x8d0   :  { %v7572_v60 = vld [vmem:[%s17512_s0 + $0x110] sm:$0xff]  ;;  %v7573_v18 = vld [vmem:[%s17512_s0 + $0x118] sm:$0xff]  ;;  %v7574_v44 = vld [vmem:[%s17512_s0 + $0x120] sm:$0xff]  ;;  %v17000_v47 = vadd.f32 %v7559_v6, %v16637_v55  ;;  %v17003_v40 = vadd.f32 %v7560_v7, %v16641_v59  ;;  %v17006_v38 = vadd.f32 %v7561_v32, %v16645_v27  ;;  %v17018_v55 = vadd.f32 %v7562_v39, %v16649_v20 }
 0x8d1   :  { %v7575_v45 = vld [vmem:[%s17512_s0 + $0x128] sm:$0xff]  ;;  %v7576_v37 = vld [vmem:[%s17512_s0 + $0x130] sm:$0xff]  ;;  %v7577_v24 = vld [vmem:[%s17512_s0 + $0x138] sm:$0xff]  ;;  %v17021_v59 = vadd.f32 %v7563_v11, %v16653_v34  ;;  %v17024_v27 = vadd.f32 %v7564_v41, %v16657_v28  ;;  %v17027_v32 = vadd.f32 %v7565_v35, %v16661_v15  ;;  %v17039_v34 = vadd.f32 %v7566_v36, %v16665_v57 }
 0x8d2   :  { %v7578_v0 = vld [vmem:[%s17512_s0 + $0x140] sm:$0xff]  ;;  %v7579_v52 = vld [vmem:[%s17512_s0 + $0x148] sm:$0xff]  ;;  %v7580_v62 = vld [vmem:[%s17512_s0 + $0x150] sm:$0xff]  ;;  %v17042_v28 = vadd.f32 %v7567_v31, %v16669_v2  ;;  %v17045_v15 = vadd.f32 %v7568_v56, %v16673_v30  ;;  %v17048_v11 = vadd.f32 %v7569_v14, %v16677_v43  ;;  %v17060_v2 = vadd.f32 %v7570_v25, %v16681_v51 }
 0x8d3   :  { %v7581_v17 = vld [vmem:[%s17512_s0 + $0x158] sm:$0xff]  ;;  %v7582_v9 = vld [vmem:[%s17512_s0 + $0x160] sm:$0xff]  ;;  %v7583_v12 = vld [vmem:[%s17512_s0 + $0x168] sm:$0xff]  ;;  %v17063_v30 = vadd.f32 %v7571_v26, %v16685_v46 }
 0x8d4   :  { %v7584_v7 = vld [vmem:[%s17512_s0 + $0x170] sm:$0xff]  ;;  %v7585_v19 = vld [vmem:[%s17512_s0 + $0x178] sm:$0xff]  ;;  %v7586_v20 = vld [vmem:[%s17512_s0 + $0x180] sm:$0xff] }
 0x8d5   :  { %v7587_v39 = vld [vmem:[%s17512_s0 + $0x188] sm:$0xff]  ;;  %v7588_v42 = vld [vmem:[%s17512_s0 + $0x190] sm:$0xff]  ;;  %v7589_v57 = vld [vmem:[%s17512_s0 + $0x198] sm:$0xff] }
 0x8d6   :  { %v18592_v43 = vld [vmem:[#allocation51_spill] sm:$0xff]  ;;  %v7591_v31 = vld [vmem:[%s17512_s0 + $0x1a8] sm:$0xff]  ;;  %v7592_v51 = vld [vmem:[%s17512_s0 + $0x1b0] sm:$0xff] }
 0x8d7   :  { %v17066_v6 = vadd.f32 %v7572_v60, %v18592_v43  ;;  %v18594_v41 = vld [vmem:[#allocation39_spill] sm:$0xff]  ;;  %v18596_v46 = vld [vmem:[#allocation22_spill] sm:$0xff] }
 0x8d8   :  { %v17069_v35 = vadd.f32 %v7573_v18, %v18594_v41  ;;  %v7590_v36 = vld [vmem:[%s17512_s0 + $0x1a0] sm:$0xff]  ;;  %v17081_v56 = vadd.f32 %v7574_v44, %v18596_v46  ;;  %v18598_v14 = vld [vmem:[#allocation38_spill] sm:$0xff]  ;;  %v7595_v44 = vld [vmem:[%s17512_s0 + $0x1c8] sm:$0xff] }
 0x8d9   :  { %18593 = vst [vmem:[#allocation68_spill] sm:$0xff] %v17066_v6  ;;  %v17084_v25 = vadd.f32 %v7575_v45, %v18598_v14  ;;  %v18600_v26 = vld [vmem:[#allocation10_spill] sm:$0xff]  ;;  %v18604_v45 = vld [vmem:[#allocation49_spill] sm:$0xff] }
 0x8da   :  { %18595 = vst [vmem:[#allocation26_spill] sm:$0xff] %v17069_v35  ;;  %18597 = vst [vmem:[#allocation71_spill] sm:$0xff] %v17081_v56  ;;  %v17087_v60 = vadd.f32 %v7576_v37, %v18600_v26  ;;  %v18602_v18 = vld [vmem:[#allocation18_spill] sm:$0xff]  ;;  %v7594_v35 = vld [vmem:[%s17512_s0 + $0x1c0] sm:$0xff]  ;;  %v17102_v46 = vadd.f32 %v7578_v0, %v18604_v45 }
 0x8db   :  { %18599 = vst [vmem:[#allocation73_spill] sm:$0xff] %v17084_v25  ;;  %v17090_v43 = vadd.f32 %v7577_v24, %v18602_v18  ;;  %v7593_v41 = vld [vmem:[%s17512_s0 + $0x1b8] sm:$0xff]  ;;  %v18606_v37 = vld [vmem:[#allocation53_spill] sm:$0xff]  ;;  %v18608_v24 = vld [vmem:[#allocation24_spill] sm:$0xff] }
 0x8dc   :  { %18601 = vst [vmem:[#allocation5_spill] sm:$0xff] %v17087_v60  ;;  %18605 = vst [vmem:[#allocation3_spill] sm:$0xff] %v17102_v46  ;;  %v17105_v14 = vadd.f32 %v7579_v52, %v18606_v37  ;;  %v17108_v26 = vadd.f32 %v7580_v62, %v18608_v24  ;;  %v18610_v18 = vld [vmem:[#allocation28_spill] sm:$0xff]  ;;  %v7596_v60 = vld [vmem:[%s17512_s0 + $0x1d0] sm:$0xff] }
 0x8dd   :  { %18603 = vst [vmem:[#allocation29_spill] sm:$0xff] %v17090_v43  ;;  %v17111_v43 = vadd.f32 %v7581_v17, %v18610_v18  ;;  %v7597_v25 = vld [vmem:[%s17512_s0 + $0x1d8] sm:$0xff]  ;;  %v7598_v0 = vld [vmem:[%s17512_s0 + $0x1e0] sm:$0xff]  ;;  %v18612_v52 = vld [vmem:[#allocation41_spill] sm:$0xff] }
 0x8de   :  { %18607 = vst [vmem:[#allocation30_spill] sm:$0xff] %v17105_v14  ;;  %18609 = vst [vmem:[#allocation32_spill] sm:$0xff] %v17108_v26  ;;  %v17123_v45 = vadd.f32 %v7582_v9, %v18612_v52  ;;  %v18614_v62 = vld [vmem:[#allocation8_spill] sm:$0xff]  ;;  %v18616_v17 = vld [vmem:[#allocation55_spill] sm:$0xff] }
 0x8df   :  { %18611 = vst [vmem:[#allocation45_spill] sm:$0xff] %v17111_v43  ;;  %v17126_v37 = vadd.f32 %v7583_v12, %v18614_v62  ;;  %v17129_v24 = vadd.f32 %v7584_v7, %v18616_v17  ;;  %v18618_v18 = vld [vmem:[#allocation69_spill] sm:$0xff]  ;;  %v7599_v26 = vld [vmem:[%s17512_s0 + $0x1e8] sm:$0xff]  ;;  %v7601_v9 = vld [vmem:[%s17512_s0 + $0x1f8] sm:$0xff] }
 0x8e0   :  { %18613 = vst [vmem:[#allocation43_spill] sm:$0xff] %v17123_v45  ;;  %v17132_v43 = vadd.f32 %v7585_v19, %v18618_v18  ;;  %v7600_v14 = vld [vmem:[%s17512_s0 + $0x1f0] sm:$0xff]  ;;  %v18620_v12 = vld [vmem:[#allocation62_spill] sm:$0xff]  ;;  %v18622_v19 = vld [vmem:[#allocation11_spill] sm:$0xff] }
 0x8e1   :  { %18615 = vst [vmem:[#allocation46_spill] sm:$0xff] %v17126_v37  ;;  %18617 = vst [vmem:[#allocation44_spill] sm:$0xff] %v17129_v24  ;;  %v17144_v52 = vadd.f32 %v7586_v20, %v18620_v12  ;;  %v18621_v7 = vld [vmem:[#allocation61_spill] sm:$0xff]  ;;  %v17150_v17 = vadd.f32 %v7588_v42, %v18622_v19  ;;  %v18623_v18 = vld [vmem:[#allocation12_spill] sm:$0xff] }
 0x8e2   :  { %18619 = vst [vmem:[#allocation50_spill] sm:$0xff] %v17132_v43  ;;  %v17147_v62 = vadd.f32 %v7587_v39, %v18621_v7  ;;  %v17153_v43 = vadd.f32 %v7589_v57, %v18623_v18  ;;  %v18624_v24 = vld [vmem:[#allocation59_spill] sm:$0xff]  ;;  %v18626_v56 = vld [vmem:[#allocation13_spill] sm:$0xff]  ;;  %v18629_v42 = vld [vmem:[#allocation64_spill] sm:$0xff] }
 0x8e3   :  { %v17156_v37 = vadd.f32 %v7590_v36, %v18624_v24  ;;  %v18625_v45 = vld [vmem:[#allocation15_spill] sm:$0xff]  ;;  %v17162_v6 = vadd.f32 %v7592_v51, %v18626_v56  ;;  %v17171_v19 = vadd.f32 %v7595_v44, %v18629_v42  ;;  %v18630_v57 = vld [vmem:[#allocation4_spill] sm:$0xff]  ;;  %v18631_v36 = vld [vmem:[#allocation25_spill] sm:$0xff]  ;;  %v7666_v44 = vmax.f32 %v16880_v33, 0.0 }
 0x8e4   :  { %v17159_v46 = vadd.f32 %v7591_v31, %v18625_v45  ;;  %v18627_v20 = vld [vmem:[#allocation63_spill] sm:$0xff]  ;;  %v17174_v18 = vadd.f32 %v7596_v60, %v18630_v57  ;;  %v17177_v24 = vadd.f32 %v7597_v25, %v18631_v36  ;;  %v18633_v51 = vld [vmem:[#allocation66_spill] sm:$0xff]  ;;  %v7667_v60 = vmax.f32 %v16883_v21, 0.0 }
 0x8e5   :  { %v17165_v12 = vadd.f32 %v7593_v41, %v18627_v20  ;;  %v18628_v39 = vld [vmem:[#allocation7_spill] sm:$0xff]  ;;  %v17183_v56 = vadd.f32 %v7599_v26, %v18633_v51  ;;  %v18634_v41 = vld [vmem:[#allocation70_spill] sm:$0xff]  ;;  %v7668_v42 = vmax.f32 %v16886_v16, 0.0  ;;  %v7669_v25 = vmax.f32 %v16889_v22, 0.0  ;;  %7730 = vst.msk [vmem:[%s17518_s7] sm:$0xff] %vm199_vm0, %v7666_v44 }
 0x8e6   :  { %v17168_v7 = vadd.f32 %v7594_v35, %v18628_v39  ;;  %v18632_v31 = vld [vmem:[#allocation67_spill] sm:$0xff]  ;;  %v17186_v20 = vadd.f32 %v7600_v14, %v18634_v41  ;;  %v18635_v35 = vld [vmem:[#allocation72_spill] sm:$0xff]  ;;  %v7671_v57 = vmax.f32 %v16907_v49, 0.0  ;;  %v7672_v26 = vmax.f32 %v16910_v53, 0.0  ;;  %7731 = vst.msk [vmem:[%s17518_s7 + $0x8] sm:$0xff] %vm199_vm0, %v7667_v60  ;;  %v18643_v44 = vld [vmem:[#allocation30_spill] sm:$0xff] }
 0x8e7   :  { %v17180_v45 = vadd.f32 %v7598_v0, %v18632_v31  ;;  %v17189_v39 = vadd.f32 %v7601_v9, %v18635_v35  ;;  %v7670_v0 = vmax.f32 %v16904_v54, 0.0  ;;  %v7673_v14 = vmax.f32 %v16913_v8, 0.0  ;;  %7732 = vst.msk [vmem:[%s17518_s7 + $0x10] sm:$0xff] %vm199_vm0, %v7668_v42  ;;  %7733 = vst.msk [vmem:[%s17518_s7 + $0x18] sm:$0xff] %vm199_vm0, %v7669_v25  ;;  %v18641_v31 = vld [vmem:[#allocation29_spill] sm:$0xff]  ;;  %v18642_v41 = vld [vmem:[#allocation3_spill] sm:$0xff] }
 0x8e8   :  { %v7674_v36 = vmax.f32 %v16928_v48, 0.0  ;;  %v7675_v9 = vmax.f32 %v16931_v61, 0.0  ;;  %v7676_v33 = vmax.f32 %v16934_v29, 0.0  ;;  %v7677_v21 = vmax.f32 %v16937_v10, 0.0  ;;  %7735 = vst.msk [vmem:[%s17518_s7 + $0x28] sm:$0xff] %vm199_vm0, %v7671_v57  ;;  %7736 = vst.msk [vmem:[%s17518_s7 + $0x30] sm:$0xff] %vm199_vm0, %v7672_v26 }
 0x8e9   :  { %v7678_v22 = vmax.f32 %v16952_v5, 0.0  ;;  %v7679_v16 = vmax.f32 %v16955_v50, 0.0  ;;  %v7680_v54 = vmax.f32 %v16958_v58, 0.0  ;;  %v7681_v49 = vmax.f32 %v16961_v1, 0.0  ;;  %7734 = vst.msk [vmem:[%s17518_s7 + $0x20] sm:$0xff] %vm199_vm0, %v7670_v0  ;;  %7737 = vst.msk [vmem:[%s17518_s7 + $0x38] sm:$0xff] %vm199_vm0, %v7673_v14 }
 0x8ea   :  { %v7682_v53 = vmax.f32 %v16976_v23, 0.0  ;;  %v7683_v8 = vmax.f32 %v16979_v3, 0.0  ;;  %v7684_v48 = vmax.f32 %v16982_v63, 0.0  ;;  %v7685_v61 = vmax.f32 %v16985_v4, 0.0  ;;  %7738 = vst.msk [vmem:[%s17518_s7 + $0x40] sm:$0xff] %vm199_vm0, %v7674_v36  ;;  %7739 = vst.msk [vmem:[%s17518_s7 + $0x48] sm:$0xff] %vm199_vm0, %v7675_v9 }
 0x8eb   :  { %7740 = vst.msk [vmem:[%s17518_s7 + $0x50] sm:$0xff] %vm199_vm0, %v7676_v33  ;;  %7741 = vst.msk [vmem:[%s17518_s7 + $0x58] sm:$0xff] %vm199_vm0, %v7677_v21  ;;  %v7686_v29 = vmax.f32 %v16997_v13, 0.0  ;;  %v7687_v10 = vmax.f32 %v17000_v47, 0.0  ;;  %v7688_v5 = vmax.f32 %v17003_v40, 0.0  ;;  %v7689_v50 = vmax.f32 %v17006_v38, 0.0 }
 0x8ec   :  { %7742 = vst.msk [vmem:[%s17518_s7 + $0x60] sm:$0xff] %vm199_vm0, %v7678_v22  ;;  %7743 = vst.msk [vmem:[%s17518_s7 + $0x68] sm:$0xff] %vm199_vm0, %v7679_v16  ;;  %v7690_v58 = vmax.f32 %v17018_v55, 0.0  ;;  %v7691_v1 = vmax.f32 %v17021_v59, 0.0  ;;  %v7692_v23 = vmax.f32 %v17024_v27, 0.0  ;;  %v7693_v3 = vmax.f32 %v17027_v32, 0.0 }
 0x8ed   :  { %7744 = vst.msk [vmem:[%s17518_s7 + $0x70] sm:$0xff] %vm199_vm0, %v7680_v54  ;;  %7745 = vst.msk [vmem:[%s17518_s7 + $0x78] sm:$0xff] %vm199_vm0, %v7681_v49  ;;  %v7694_v63 = vmax.f32 %v17039_v34, 0.0  ;;  %v7695_v4 = vmax.f32 %v17042_v28, 0.0  ;;  %v7696_v13 = vmax.f32 %v17045_v15, 0.0  ;;  %v7697_v47 = vmax.f32 %v17048_v11, 0.0 }
 0x8ee   :  { %7746 = vst.msk [vmem:[%s17518_s7 + $0x80] sm:$0xff] %vm199_vm0, %v7682_v53  ;;  %7747 = vst.msk [vmem:[%s17518_s7 + $0x88] sm:$0xff] %vm199_vm0, %v7683_v8  ;;  %v7698_v40 = vmax.f32 %v17060_v2, 0.0  ;;  %v7699_v38 = vmax.f32 %v17063_v30, 0.0  ;;  %v18636_v55 = vld [vmem:[#allocation68_spill] sm:$0xff]  ;;  %v18637_v27 = vld [vmem:[#allocation26_spill] sm:$0xff] }
 0x8ef   :  { %7748 = vst.msk [vmem:[%s17518_s7 + $0x90] sm:$0xff] %vm199_vm0, %v7684_v48  ;;  %7749 = vst.msk [vmem:[%s17518_s7 + $0x98] sm:$0xff] %vm199_vm0, %v7685_v61  ;;  %v7700_v59 = vmax.f32 %v18636_v55, 0.0  ;;  %v7701_v32 = vmax.f32 %v18637_v27, 0.0  ;;  %v18638_v34 = vld [vmem:[#allocation71_spill] sm:$0xff]  ;;  %v18639_v15 = vld [vmem:[#allocation73_spill] sm:$0xff] }
 0x8f0   :  { %7750 = vst.msk [vmem:[%s17518_s7 + $0xa0] sm:$0xff] %vm199_vm0, %v7686_v29  ;;  %7751 = vst.msk [vmem:[%s17518_s7 + $0xa8] sm:$0xff] %vm199_vm0, %v7687_v10  ;;  %v7702_v28 = vmax.f32 %v18638_v34, 0.0  ;;  %v7703_v11 = vmax.f32 %v18639_v15, 0.0  ;;  %v18640_v2 = vld [vmem:[#allocation5_spill] sm:$0xff]  ;;  %v7705_v51 = vmax.f32 %v18641_v31, 0.0 }
 0x8f1   :  { %7752 = vst.msk [vmem:[%s17518_s7 + $0xb0] sm:$0xff] %vm199_vm0, %v7688_v5  ;;  %7753 = vst.msk [vmem:[%s17518_s7 + $0xb8] sm:$0xff] %vm199_vm0, %v7689_v50  ;;  %v7704_v30 = vmax.f32 %v18640_v2, 0.0  ;;  %v7706_v35 = vmax.f32 %v18642_v41, 0.0  ;;  %v7707_v60 = vmax.f32 %v18643_v44, 0.0  ;;  %v18644_v42 = vld [vmem:[#allocation32_spill] sm:$0xff] }
 0x8f2   :  { %7754 = vst.msk [vmem:[%s17518_s7 + $0xc0] sm:$0xff] %vm199_vm0, %v7690_v58  ;;  %7755 = vst.msk [vmem:[%s17518_s7 + $0xc8] sm:$0xff] %vm199_vm0, %v7691_v1  ;;  %v7708_v25 = vmax.f32 %v18644_v42, 0.0  ;;  %v18645_v0 = vld [vmem:[#allocation45_spill] sm:$0xff]  ;;  %v18646_v26 = vld [vmem:[#allocation43_spill] sm:$0xff]  ;;  %v7714_v54 = vmax.f32 %v17144_v52, 0.0 }
 0x8f3   :  { %7756 = vst.msk [vmem:[%s17518_s7 + $0xd0] sm:$0xff] %vm199_vm0, %v7692_v23  ;;  %7757 = vst.msk [vmem:[%s17518_s7 + $0xd8] sm:$0xff] %vm199_vm0, %v7693_v3  ;;  %v7709_v57 = vmax.f32 %v18645_v0, 0.0  ;;  %v7710_v14 = vmax.f32 %v18646_v26, 0.0  ;;  %v18647_v36 = vld [vmem:[#allocation46_spill] sm:$0xff]  ;;  %v18648_v33 = vld [vmem:[#allocation44_spill] sm:$0xff] }
 0x8f4   :  { %7758 = vst.msk [vmem:[%s17518_s7 + $0xe0] sm:$0xff] %vm199_vm0, %v7694_v63  ;;  %7759 = vst.msk [vmem:[%s17518_s7 + $0xe8] sm:$0xff] %vm199_vm0, %v7695_v4  ;;  %v7711_v9 = vmax.f32 %v18647_v36, 0.0  ;;  %v7712_v21 = vmax.f32 %v18648_v33, 0.0  ;;  %v18649_v22 = vld [vmem:[#allocation50_spill] sm:$0xff]  ;;  %v7715_v49 = vmax.f32 %v17147_v62, 0.0 }
 0x8f5   :  { %7760 = vst.msk [vmem:[%s17518_s7 + $0xf0] sm:$0xff] %vm199_vm0, %v7696_v13  ;;  %7761 = vst.msk [vmem:[%s17518_s7 + $0xf8] sm:$0xff] %vm199_vm0, %v7697_v47  ;;  %v7713_v16 = vmax.f32 %v18649_v22, 0.0  ;;  %v7716_v53 = vmax.f32 %v17150_v17, 0.0  ;;  %v7717_v8 = vmax.f32 %v17153_v43, 0.0  ;;  %v7718_v43 = vmax.f32 %v17156_v37, 0.0 }
 0x8f6   :  { %7762 = vst.msk [vmem:[%s17518_s7 + $0x100] sm:$0xff] %vm199_vm0, %v7698_v40  ;;  %7763 = vst.msk [vmem:[%s17518_s7 + $0x108] sm:$0xff] %vm199_vm0, %v7699_v38  ;;  %v7719_v52 = vmax.f32 %v17159_v46, 0.0  ;;  %v7720_v62 = vmax.f32 %v17162_v6, 0.0  ;;  %v7721_v17 = vmax.f32 %v17165_v12, 0.0  ;;  %v7722_v6 = vmax.f32 %v17168_v7, 0.0 }
 0x8f7   :  { %7764 = vst.msk [vmem:[%s17518_s7 + $0x110] sm:$0xff] %vm199_vm0, %v7700_v59  ;;  %7765 = vst.msk [vmem:[%s17518_s7 + $0x118] sm:$0xff] %vm199_vm0, %v7701_v32  ;;  %v7723_v46 = vmax.f32 %v17171_v19, 0.0  ;;  %v7724_v37 = vmax.f32 %v17174_v18, 0.0  ;;  %v7725_v12 = vmax.f32 %v17177_v24, 0.0  ;;  %v7726_v7 = vmax.f32 %v17180_v45, 0.0 }
 0x8f8   :  { %7766 = vst.msk [vmem:[%s17518_s7 + $0x120] sm:$0xff] %vm199_vm0, %v7702_v28  ;;  %7767 = vst.msk [vmem:[%s17518_s7 + $0x128] sm:$0xff] %vm199_vm0, %v7703_v11  ;;  %v7727_v19 = vmax.f32 %v17183_v56, 0.0  ;;  %v7728_v18 = vmax.f32 %v17186_v20, 0.0  ;;  %v7729_v24 = vmax.f32 %v17189_v39, 0.0 }
 0x8f9   :  { %7768 = vst.msk [vmem:[%s17518_s7 + $0x130] sm:$0xff] %vm199_vm0, %v7704_v30  ;;  %7769 = vst.msk [vmem:[%s17518_s7 + $0x138] sm:$0xff] %vm199_vm0, %v7705_v51 }
 0x8fa   :  { %7770 = vst.msk [vmem:[%s17518_s7 + $0x140] sm:$0xff] %vm199_vm0, %v7706_v35  ;;  %7771 = vst.msk [vmem:[%s17518_s7 + $0x148] sm:$0xff] %vm199_vm0, %v7707_v60 }
 0x8fb   :  { %7772 = vst.msk [vmem:[%s17518_s7 + $0x150] sm:$0xff] %vm199_vm0, %v7708_v25  ;;  %7773 = vst.msk [vmem:[%s17518_s7 + $0x158] sm:$0xff] %vm199_vm0, %v7709_v57 }
 0x8fc   :  { %7774 = vst.msk [vmem:[%s17518_s7 + $0x160] sm:$0xff] %vm199_vm0, %v7710_v14  ;;  %7775 = vst.msk [vmem:[%s17518_s7 + $0x168] sm:$0xff] %vm199_vm0, %v7711_v9 }
 0x8fd   :  { %7776 = vst.msk [vmem:[%s17518_s7 + $0x170] sm:$0xff] %vm199_vm0, %v7712_v21  ;;  %7777 = vst.msk [vmem:[%s17518_s7 + $0x178] sm:$0xff] %vm199_vm0, %v7713_v16 }
 0x8fe   :  { %7778 = vst.msk [vmem:[%s17518_s7 + $0x180] sm:$0xff] %vm199_vm0, %v7714_v54  ;;  %7779 = vst.msk [vmem:[%s17518_s7 + $0x188] sm:$0xff] %vm199_vm0, %v7715_v49 }
 0x8ff   :  { %7780 = vst.msk [vmem:[%s17518_s7 + $0x190] sm:$0xff] %vm199_vm0, %v7716_v53  ;;  %7781 = vst.msk [vmem:[%s17518_s7 + $0x198] sm:$0xff] %vm199_vm0, %v7717_v8 }
 0x900   :  { %7782 = vst.msk [vmem:[%s17518_s7 + $0x1a0] sm:$0xff] %vm199_vm0, %v7718_v43  ;;  %7783 = vst.msk [vmem:[%s17518_s7 + $0x1a8] sm:$0xff] %vm199_vm0, %v7719_v52 }
 0x901   :  { %7784 = vst.msk [vmem:[%s17518_s7 + $0x1b0] sm:$0xff] %vm199_vm0, %v7720_v62  ;;  %7785 = vst.msk [vmem:[%s17518_s7 + $0x1b8] sm:$0xff] %vm199_vm0, %v7721_v17 }
 0x902   :  { %7786 = vst.msk [vmem:[%s17518_s7 + $0x1c0] sm:$0xff] %vm199_vm0, %v7722_v6  ;;  %7787 = vst.msk [vmem:[%s17518_s7 + $0x1c8] sm:$0xff] %vm199_vm0, %v7723_v46 }
 0x903   :  { %7788 = vst.msk [vmem:[%s17518_s7 + $0x1d0] sm:$0xff] %vm199_vm0, %v7724_v37  ;;  %7789 = vst.msk [vmem:[%s17518_s7 + $0x1d8] sm:$0xff] %vm199_vm0, %v7725_v12 }
 0x904   :  { %7790 = vst.msk [vmem:[%s17518_s7 + $0x1e0] sm:$0xff] %vm199_vm0, %v7726_v7  ;;  %7791 = vst.msk [vmem:[%s17518_s7 + $0x1e8] sm:$0xff] %vm199_vm0, %v7727_v19 }
 0x905   :  { %7792 = vst.msk [vmem:[%s17518_s7 + $0x1f0] sm:$0xff] %vm199_vm0, %v7728_v18  ;;  %7793 = vst.msk [vmem:[%s17518_s7 + $0x1f8] sm:$0xff] %vm199_vm0, %v7729_v24 }

</bundles_post_ra>
